<compile_context>
chip_gen: v7x
topology: tpu7x:2x2x1
jax: 0.10.0
libtpu: 0.0.40
codegen_flags: <defaults>
</compile_context>

<pallas_src>
import functools

import jax
import jax.numpy as jnp
from jax.experimental import pallas as pl
from jax.experimental.pallas import tpu as pltpu

MATMUL_DTYPE = jnp.bfloat16          # MXU operand dtype; accumulation is f32


# ---------------------------------------------------------------------------
# In-kernel helpers (pure jnp on loaded values)
# ---------------------------------------------------------------------------
def _softmax_last(x):
    m = jnp.max(x, axis=-1, keepdims=True)
    e = jnp.exp(x - m)
    # reciprocal goes to the EUP slot -> effectively free vs. a VALU divide
    return e * pl.reciprocal(jnp.sum(e, axis=-1, keepdims=True), approx=True)


def _fused_qkv(x, W_qkv, b_qkv, m_col):
    """(relu(x) @ W_qkv + b) * mask, as one lane-dense matmul.

    x     : [BT, N, D] f32
    W_qkv : [D, 3*O]  bf16 (query-role columns pre-scaled by 1/sqrt(hd))
    b_qkv : [1, 3*O]  f32
    m_col : [BT, N, 1] f32
    returns [BT, N, 3*O] f32
    """
    BT, N, D = x.shape
    x2 = jnp.maximum(x, 0.0).astype(MATMUL_DTYPE).reshape(BT * N, D)
    t = jnp.dot(x2, W_qkv, preferred_element_type=jnp.float32) + b_qkv
    return t.reshape(BT, N, W_qkv.shape[-1]) * m_col


def _mh_attention(q_role, k_role, v_role, key_bias, num_head):
    """Multi-head attention over 8-lane head views of the fused projection.

    q_role : [BT, N, O] f32 (1/sqrt(hd) already folded into the weights)
    k_role : [BT, M, O] f32 (masked key rows are zero)
    v_role : [BT, M, O] f32
    key_bias: [BT, 1, M] f32 additive key-mask bias (0 / -1e9)
    returns : [BT, N, O] f32 — heads concatenated along lanes (torch.cat order)
    """
    O = q_role.shape[-1]
    hd = O // num_head
    outs = []
    for h in range(num_head):                       # static unroll over heads
        lo = h * hd
        qh = q_role[:, :, lo:lo + hd].astype(MATMUL_DTYPE)
        kh = k_role[:, :, lo:lo + hd].astype(MATMUL_DTYPE)
        vh = v_role[:, :, lo:lo + hd].astype(MATMUL_DTYPE)
        s = jnp.einsum('bnd,bmd->bnm', qh, kh,
                       preferred_element_type=jnp.float32)    # [BT, N, M]
        s = s + key_bias                            # additive mask bias
        p = _softmax_last(s)
        outs.append(jnp.einsum('bnm,bmd->bnd', p.astype(MATMUL_DTYPE), vh,
                               preferred_element_type=jnp.float32))
    return jnp.concatenate(outs, axis=-1)           # [BT, N, O]


def _inter_stage(v, q, vm_col, qm_col, v_bias, q_bias, pr, num_head):
    (Wv_qkv, bv_qkv, Wq_qkv, bq_qkv,
     Wvo_x, Wvo_u, bvo, Wqo_x, Wqo_u, bqo) = pr
    BT, No, Dv = v.shape
    _, Nq, Dq = q.shape
    O = Wv_qkv.shape[-1] // 3

    v_trans = _fused_qkv(v, Wv_qkv, bv_qkv, vm_col)   # [BT, No, 3O]
    q_trans = _fused_qkv(q, Wq_qkv, bq_qkv, qm_col)   # [BT, Nq, 3O]

    v_k, v_q_, v_v = v_trans[..., :O], v_trans[..., O:2 * O], v_trans[..., 2 * O:]
    q_k, q_q_, q_v = q_trans[..., :O], q_trans[..., O:2 * O], q_trans[..., 2 * O:]

    upd_v = _mh_attention(v_q_, q_k, q_v, q_bias, num_head)   # v attends over q
    upd_q = _mh_attention(q_q_, v_k, v_v, v_bias, num_head)   # q attends over v

    # cat(v, upd) @ Wvo == v @ Wvo_x + upd @ Wvo_u  (split-weight, lane-dense)
    v_new = (jnp.dot(v.reshape(BT * No, Dv).astype(MATMUL_DTYPE), Wvo_x,
                     preferred_element_type=jnp.float32)
             + jnp.dot(upd_v.reshape(BT * No, O).astype(MATMUL_DTYPE), Wvo_u,
                       preferred_element_type=jnp.float32)
             + bvo).reshape(BT, No, O)
    q_new = (jnp.dot(q.reshape(BT * Nq, Dq).astype(MATMUL_DTYPE), Wqo_x,
                     preferred_element_type=jnp.float32)
             + jnp.dot(upd_q.reshape(BT * Nq, O).astype(MATMUL_DTYPE), Wqo_u,
                       preferred_element_type=jnp.float32)
             + bqo).reshape(BT, Nq, O)
    return v_new, q_new


def _intra_stage(v, q, vm_col, qm_col, v_bias, q_bias, pr, num_head):
    (Wg_v4q, bg_v4q, Wg_q4v, bg_q4v,
     Wv_qkv, bv_qkv, Wq_qkv, bq_qkv,
     Wvo, bvo, Wqo, bqo) = pr
    BT, No, Dv = v.shape
    _, Nq, Dq = q.shape
    O = Wv_qkv.shape[-1] // 3

    # masked means -> conditioning gates
    # (jnp.maximum guard avoids NaN for an all-masked row; reference would NaN)
    v_cnt = jnp.maximum(jnp.sum(vm_col, axis=1, keepdims=True), 1.0)   # [BT,1,1]
    q_cnt = jnp.maximum(jnp.sum(qm_col, axis=1, keepdims=True), 1.0)
    v_mean = jnp.sum(v * vm_col, axis=1, keepdims=True) / v_cnt        # [BT,1,Dv]
    q_mean = jnp.sum(q * qm_col, axis=1, keepdims=True) / q_cnt        # [BT,1,Dq]

    v4q_gate = jax.nn.sigmoid(
        jnp.dot(jnp.maximum(v_mean, 0.0).reshape(BT, Dv).astype(MATMUL_DTYPE),
                Wg_v4q, preferred_element_type=jnp.float32)
        + bg_v4q).reshape(BT, 1, O)
    q4v_gate = jax.nn.sigmoid(
        jnp.dot(jnp.maximum(q_mean, 0.0).reshape(BT, Dq).astype(MATMUL_DTYPE),
                Wg_q4v, preferred_element_type=jnp.float32)
        + bg_q4v).reshape(BT, 1, O)

    v_trans = _fused_qkv(v, Wv_qkv, bv_qkv, vm_col)
    q_trans = _fused_qkv(q, Wq_qkv, bq_qkv, qm_col)

    v_k, v_q_, v_v = v_trans[..., :O], v_trans[..., O:2 * O], v_trans[..., 2 * O:]
    q_k, q_q_, q_v = q_trans[..., :O], q_trans[..., O:2 * O], q_trans[..., 2 * O:]

    new_vq = (1.0 + q4v_gate) * v_q_
    new_vk = (1.0 + q4v_gate) * v_k
    new_qq = (1.0 + v4q_gate) * q_q_
    new_qk = (1.0 + v4q_gate) * q_k

    upd_v = _mh_attention(new_vq, new_vk, v_v, v_bias, num_head)
    upd_q = _mh_attention(new_qq, new_qk, q_v, q_bias, num_head)

    # (v + upd) @ Wvo : one lane-dense matmul, no duplicated head-view weights
    v_new = (jnp.dot((v + upd_v).reshape(BT * No, O).astype(MATMUL_DTYPE), Wvo,
                     preferred_element_type=jnp.float32) + bvo).reshape(BT, No, O)
    q_new = (jnp.dot((q + upd_q).reshape(BT * Nq, O).astype(MATMUL_DTYPE), Wqo,
                     preferred_element_type=jnp.float32) + bqo).reshape(BT, Nq, O)
    return v_new, q_new


def _multi_block_kernel(*refs, stage_specs, num_head, n_data, n_groups):
    data_refs = refs[:n_data]
    group_refs = refs[n_data:n_data + n_groups]
    ov_ref, oq_ref = refs[n_data + n_groups:]

    v_ref, q_ref, vmc_ref, qmc_ref, vb_ref, qb_ref = data_refs
    v = v_ref[...]            # [BT, No, Dv] f32
    q = q_ref[...]            # [BT, Nq, Dq] f32
    vm_col = vmc_ref[...]     # [BT, No, 1]
    qm_col = qmc_ref[...]     # [BT, Nq, 1]
    v_bias = vb_ref[...]      # [BT, 1, No]  additive key-mask bias
    q_bias = qb_ref[...]      # [BT, 1, Nq]

    # statically unrolled: whole MultiBlock in one kernel, v/q stay resident
    for kind, slots in stage_specs:
        pr = [group_refs[g][i] for (g, i) in slots]   # static leading-axis loads
        if kind == "inter":
            v, q = _inter_stage(v, q, vm_col, qm_col, v_bias, q_bias, pr, num_head)
        else:
            v, q = _intra_stage(v, q, vm_col, qm_col, v_bias, q_bias, pr, num_head)

    # TODO(synk): O=32 < 128 lanes -> masked partial stores; lane-dense
    # automatically at production sizes (O >= 128).
    ov_ref[...] = v.astype(ov_ref.dtype)
    oq_ref[...] = q.astype(oq_ref.dtype)


# ---------------------------------------------------------------------------
# Host-side parameter preprocessing (layout plumbing, done once)
# ---------------------------------------------------------------------------
def _fold_q_scale(W, O, scale):
    """Fold 1/sqrt(head_dim) into the query-role columns of a fused [.,3O] mat."""
    return jnp.concatenate([W[:, :O], W[:, O:2 * O] / scale, W[:, 2 * O:]], axis=1)


def _prep_inter_params(p, num_head, dtype):
    O = p["bvo"].shape[-1]
    hd = O // num_head
    scale = float(hd) ** 0.5
    Dv = p["Wv"].shape[0]
    Dq = p["Wq"].shape[0]
    return [
        _fold_q_scale(p["Wv"], O, scale).astype(dtype),   # Wv_qkv [Dv, 3O]
        _fold_q_scale(p["bv"], O, scale),                 # bv_qkv [1, 3O] f32
        _fold_q_scale(p["Wq"], O, scale).astype(dtype),   # Wq_qkv [Dq, 3O]
        _fold_q_scale(p["bq"], O, scale),
        p["Wvo"][:Dv, :].astype(dtype),                   # Wvo_x [Dv, O]
        p["Wvo"][Dv:, :].astype(dtype),                   # Wvo_u [O, O]
        p["bvo"],
        p["Wqo"][:Dq, :].astype(dtype),                   # Wqo_x [Dq, O]
        p["Wqo"][Dq:, :].astype(dtype),                   # Wqo_u [O, O]
        p["bqo"],
    ]


def _prep_intra_params(p, num_head, dtype):
    O = p["bvo"].shape[-1]
    hd = O // num_head
    scale = float(hd) ** 0.5
    return [
        p["Wg_v4q"].astype(dtype), p["bg_v4q"],
        p["Wg_q4v"].astype(dtype), p["bg_q4v"],
        _fold_q_scale(p["Wv"], O, scale).astype(dtype),
        _fold_q_scale(p["bv"], O, scale),
        _fold_q_scale(p["Wq"], O, scale).astype(dtype),
        _fold_q_scale(p["bq"], O, scale),
        p["Wvo"].astype(dtype), p["bvo"],                 # single copy (no head view)
        p["Wqo"].astype(dtype), p["bqo"],
    ]


# ---------------------------------------------------------------------------
# Fused MultiBlock forward: ONE pallas_call for the whole block stack
# ---------------------------------------------------------------------------
def multi_block_forward(v, q, v_mask, q_mask, params, num_block, num_head,
                        matmul_dtype=MATMUL_DTYPE, batch_tile=None):
    del num_block  # stage structure comes from `params`
    B, No, Dv = v.shape
    _, Nq, Dq = q.shape
    O = params[0][1]["bvo"].shape[-1]

    if batch_tile is None:
        # Fold batch rows into the matmul M-dim, but keep >= 2 grid steps so
        # both v7x TensorCores get work (dimension_semantics="parallel").
        batch_tile = max(1, B // 2)
        while B % batch_tile:
            batch_tile -= 1
    BT = batch_tile
    assert B % BT == 0
    n_steps = B // BT

    v_mask = v_mask.astype(jnp.float32)
    q_mask = q_mask.astype(jnp.float32)
    vm_col = v_mask[:, :, None]                       # [B, No, 1]
    qm_col = q_mask[:, :, None]                       # [B, Nq, 1]
    v_bias = ((v_mask - 1.0) * 1e9)[:, None, :]       # [B, 1, No] additive mask
    q_bias = ((q_mask - 1.0) * 1e9)[:, None, :]       # [B, 1, Nq]

    # Per-stage parameter lists, then stack same-(shape,dtype) params across
    # stages into a few arrays with a leading slot axis (fewer DMA descriptors,
    # weights DMA'd once via constant index_maps).
    group_keys, group_lists, stage_specs = [], {}, []
    for kind, p in params:
        if kind == "inter":
            plist = _prep_inter_params(p, num_head, matmul_dtype)
        else:
            plist = _prep_intra_params(p, num_head, matmul_dtype)
        slots = []
        for arr in plist:
            key = (tuple(arr.shape), jnp.dtype(arr.dtype).name)
            if key not in group_lists:
                group_lists[key] = []
                group_keys.append(key)
            g = group_keys.index(key)
            slots.append((g, len(group_lists[key])))
            group_lists[key].append(arr)
        stage_specs.append((kind, tuple(slots)))
    stacked = [jnp.stack(group_lists[k], axis=0) for k in group_keys]

    def batch3(n, d):
        return pl.BlockSpec((BT, n, d), lambda i: (i, 0, 0))

    def full_spec(arr):
        return pl.BlockSpec(arr.shape, lambda i, _nd=arr.ndim: (0,) * _nd)

    data_inputs = [v, q, vm_col, qm_col, v_bias, q_bias]
    data_specs = [batch3(No, Dv), batch3(Nq, Dq),
                  batch3(No, 1), batch3(Nq, 1),
                  batch3(1, No), batch3(1, Nq)]
    param_specs = [full_spec(a) for a in stacked]     # constant index_map

    kernel = functools.partial(
        _multi_block_kernel, stage_specs=tuple(stage_specs),
        num_head=num_head, n_data=len(data_inputs), n_groups=len(stacked))

    out_v, out_q = pl.pallas_call(
        kernel,
        out_shape=(jax.ShapeDtypeStruct((B, No, O), jnp.float32),
                   jax.ShapeDtypeStruct((B, Nq, O), jnp.float32)),
        grid_spec=pltpu.PrefetchScalarGridSpec(
            num_scalar_prefetch=0,
            grid=(n_steps,),
            in_specs=data_specs + param_specs,
            out_specs=(batch3(No, O), batch3(Nq, O)),
        ),
        compiler_params=pltpu.CompilerParams(
            dimension_semantics=("parallel",),
            vmem_limit_bytes=64 * 1024 * 1024),
    )(*data_inputs, *stacked)
    return out_v, out_q


# ---------------------------------------------------------------------------
# Pure-JAX reference (mirrors the PyTorch module, x @ W + b convention)
# ---------------------------------------------------------------------------
def _ref_inter(v, q, v_mask, q_mask, p, H):
    O = p["bvo"].shape[-1]
    hd = O // H
    relu = lambda x: jnp.maximum(x, 0.0)
    v_trans = (relu(v) @ p["Wv"] + p["bv"]) * v_mask[:, :, None]
    q_trans = (relu(q) @ p["Wq"] + p["bq"]) * q_mask[:, :, None]
    v_k, v_q, v_v = v_trans[..., :O], v_trans[..., O:2 * O], v_trans[..., 2 * O:]
    q_k, q_q, q_v = q_trans[..., :O], q_trans[..., O:2 * O], q_trans[..., 2 * O:]
    v_upds, q_upds = [], []
    for i in range(H):
        sl = slice(i * hd, (i + 1) * hd)
        q2v = jnp.einsum('bnd,bmd->bnm', v_q[..., sl], q_k[..., sl])
        q2v = jnp.where(q_mask[:, None, :] == 0, -1e9, q2v) / hd ** 0.5
        v2q = jnp.einsum('bnd,bmd->bnm', q_q[..., sl], v_k[..., sl])
        v2q = jnp.where(v_mask[:, None, :] == 0, -1e9, v2q) / hd ** 0.5
        v_upds.append(jax.nn.softmax(q2v, axis=-1) @ q_v[..., sl])
        q_upds.append(jax.nn.softmax(v2q, axis=-1) @ v_v[..., sl])
    v_update = jnp.concatenate(v_upds, axis=-1)
    q_update = jnp.concatenate(q_upds, axis=-1)
    new_v = jnp.concatenate([v, v_update], axis=-1) @ p["Wvo"] + p["bvo"]
    new_q = jnp.concatenate([q, q_update], axis=-1) @ p["Wqo"] + p["bqo"]
    return new_v, new_q


def _ref_intra(v, q, v_mask, q_mask, p, H):
    O = p["bvo"].shape[-1]
    hd = O // H
    relu = lambda x: jnp.maximum(x, 0.0)
    v_mean = (v * v_mask[:, :, None]).sum(1) / v_mask.sum(1)[:, None]
    q_mean = (q * q_mask[:, :, None]).sum(1) / q_mask.sum(1)[:, None]
    v4q_gate = jax.nn.sigmoid(relu(v_mean) @ p["Wg_v4q"] + p["bg_v4q"])[:, None, :]
    q4v_gate = jax.nn.sigmoid(relu(q_mean) @ p["Wg_q4v"] + p["bg_q4v"])[:, None, :]
    v_trans = (relu(v) @ p["Wv"] + p["bv"]) * v_mask[:, :, None]
    q_trans = (relu(q) @ p["Wq"] + p["bq"]) * q_mask[:, :, None]
    v_k, v_q, v_v = v_trans[..., :O], v_trans[..., O:2 * O], v_trans[..., 2 * O:]
    q_k, q_q, q_v = q_trans[..., :O], q_trans[..., O:2 * O], q_trans[..., 2 * O:]
    new_vq, new_vk = (1 + q4v_gate) * v_q, (1 + q4v_gate) * v_k
    new_qq, new_qk = (1 + v4q_gate) * q_q, (1 + v4q_gate) * q_k
    v_upds, q_upds = [], []
    for i in range(H):
        sl = slice(i * hd, (i + 1) * hd)
        v2v = jnp.einsum('bnd,bmd->bnm', new_vq[..., sl], new_vk[..., sl])
        v2v = jnp.where(v_mask[:, None, :] == 0, -1e9, v2v) / hd ** 0.5
        q2q = jnp.einsum('bnd,bmd->bnm', new_qq[..., sl], new_qk[..., sl])
        q2q = jnp.where(q_mask[:, None, :] == 0, -1e9, q2q) / hd ** 0.5
        v_upds.append(jax.nn.softmax(v2v, axis=-1) @ v_v[..., sl])
        q_upds.append(jax.nn.softmax(q2q, axis=-1) @ q_v[..., sl])
    v_update = jnp.concatenate(v_upds, axis=-1)
    q_update = jnp.concatenate(q_upds, axis=-1)
    new_v = (v + v_update) @ p["Wvo"] + p["bvo"]
    new_q = (q + q_update) @ p["Wqo"] + p["bqo"]
    return new_v, new_q


def multi_block_reference(v, q, v_mask, q_mask, params, num_head):
    for kind, p in params:
        if kind == "inter":
            v, q = _ref_inter(v, q, v_mask, q_mask, p, num_head)
        else:
            v, q = _ref_intra(v, q, v_mask, q_mask, p, num_head)
    return v, q


# ---------------------------------------------------------------------------
# Parameter initialization (deterministic, synthetic)
# ---------------------------------------------------------------------------
def _init_linear(key, d_in, d_out):
    kw, kb = jax.random.split(key)
    W = jax.random.normal(kw, (d_in, d_out), jnp.float32) * 0.05
    b = jax.random.normal(kb, (1, d_out), jnp.float32) * 0.05
    return W, b


def init_inter_params(key, v_size, q_size, output_size):
    ks = jax.random.split(key, 4)
    Wv, bv = _init_linear(ks[0], v_size, output_size * 3)
    Wq, bq = _init_linear(ks[1], q_size, output_size * 3)
    # rows [0:v_size] of Wvo act on v, rows [v_size:] on v_update (cat order (v, upd))
    Wvo, bvo = _init_linear(ks[2], v_size + output_size, output_size)
    Wqo, bqo = _init_linear(ks[3], q_size + output_size, output_size)
    return dict(Wv=Wv, bv=bv, Wq=Wq, bq=bq, Wvo=Wvo, bvo=bvo, Wqo=Wqo, bqo=bqo)


def init_intra_params(key, v_size, q_size, output_size):
    ks = jax.random.split(key, 6)
    Wg_v4q, bg_v4q = _init_linear(ks[0], v_size, output_size)
    Wg_q4v, bg_q4v = _init_linear(ks[1], q_size, output_size)
    Wv, bv = _init_linear(ks[2], v_size, output_size * 3)
    Wq, bq = _init_linear(ks[3], q_size, output_size * 3)
    Wvo, bvo = _init_linear(ks[4], output_size, output_size)
    Wqo, bqo = _init_linear(ks[5], output_size, output_size)
    return dict(Wg_v4q=Wg_v4q, bg_v4q=bg_v4q, Wg_q4v=Wg_q4v, bg_q4v=bg_q4v,
                Wv=Wv, bv=bv, Wq=Wq, bq=bq, Wvo=Wvo, bvo=bvo, Wqo=Wqo, bqo=bqo)


def init_multi_block_params(key, num_block, v_size, q_size, output_size):
    params = []
    keys = jax.random.split(key, 2 * num_block)
    params.append(("inter", init_inter_params(keys[0], v_size, q_size, output_size)))
    params.append(("intra", init_intra_params(keys[1], output_size, output_size, output_size)))
    for i in range(num_block - 1):
        params.append(("inter", init_inter_params(keys[2 + 2 * i],
                                                  output_size, output_size, output_size)))
        params.append(("intra", init_intra_params(keys[3 + 2 * i],
                                                  output_size, output_size, output_size)))
    return params


if __name__ == "__main__":
    # Small shapes consistent with the module's forward contract.
    batch, num_obj, max_len = 2, 16, 8
    v_size, q_size, output_size = 48, 40, 32
    num_head, num_block = 4, 2

    key = jax.random.PRNGKey(0)
    kv, kq, kp = jax.random.split(key, 3)

    v = jax.random.normal(kv, (batch, num_obj, v_size), jnp.float32)
    q = jax.random.normal(kq, (batch, max_len, q_size), jnp.float32)

    v_mask = jnp.ones((batch, num_obj), jnp.float32).at[1, num_obj - 3:].set(0.0)
    q_mask = jnp.ones((batch, max_len), jnp.float32).at[1, max_len - 2:].set(0.0)

    params = init_multi_block_params(kp, num_block, v_size, q_size, output_size)

    out_v, out_q = multi_block_forward(v, q, v_mask, q_mask, params,
                                       num_block, num_head)
    jax.block_until_ready((out_v, out_q))

    assert out_v.shape == (batch, num_obj, output_size)
    assert out_q.shape == (batch, max_len, output_size)
    assert bool(jnp.all(jnp.isfinite(out_v))) and bool(jnp.all(jnp.isfinite(out_q)))

    # Loose-tolerance check vs. a pure-JAX reference (bf16 MXU operands +
    # approx reciprocal softmax give ~1e-2-scale deviations from f32).
    ref_v, ref_q = multi_block_reference(v, q, v_mask, q_mask, params, num_head)
    assert bool(jnp.allclose(out_v, ref_v, atol=5e-2, rtol=5e-2))
    assert bool(jnp.allclose(out_q, ref_q, atol=5e-2, rtol=5e-2))

    print("KERNEL_OK")
</pallas_src>

<mosaic_0001>
module attributes {stable_mosaic.version = 11 : i64} {
  func.func @_multi_block_kernel(%arg0: i32, %arg1: memref<1x16x48xf32, #tpu.memory_space<vmem>>, %arg2: memref<1x8x40xf32, #tpu.memory_space<vmem>>, %arg3: memref<1x16x1xf32, #tpu.memory_space<vmem>>, %arg4: memref<1x8x1xf32, #tpu.memory_space<vmem>>, %arg5: memref<1x1x16xf32, #tpu.memory_space<vmem>>, %arg6: memref<1x1x8xf32, #tpu.memory_space<vmem>>, %arg7: memref<1x48x96xbf16, #tpu.memory_space<vmem>>, %arg8: memref<8x1x96xf32, #tpu.memory_space<vmem>>, %arg9: memref<1x40x96xbf16, #tpu.memory_space<vmem>>, %arg10: memref<1x48x32xbf16, #tpu.memory_space<vmem>>, %arg11: memref<14x32x32xbf16, #tpu.memory_space<vmem>>, %arg12: memref<12x1x32xf32, #tpu.memory_space<vmem>>, %arg13: memref<1x40x32xbf16, #tpu.memory_space<vmem>>, %arg14: memref<6x32x96xbf16, #tpu.memory_space<vmem>>, %arg15: memref<1x16x32xf32, #tpu.memory_space<vmem>>, %arg16: memref<1x8x32xf32, #tpu.memory_space<vmem>>) attributes {dimension_semantics = [#tpu.dimension_semantics<parallel>], iteration_bounds = array<i64: 2>, scalar_prefetch = 0 : i64, scratch_operands = 0 : i64, tpu.core_type = #tpu.core_type<tc>, window_params = [{transform_indices = @transform_0, window_bounds = array<i64: 1, 16, 48>}, {transform_indices = @transform_1, window_bounds = array<i64: 1, 8, 40>}, {transform_indices = @transform_2, window_bounds = array<i64: 1, 16, 1>}, {transform_indices = @transform_3, window_bounds = array<i64: 1, 8, 1>}, {transform_indices = @transform_4, window_bounds = array<i64: 1, 1, 16>}, {transform_indices = @transform_5, window_bounds = array<i64: 1, 1, 8>}, {pipeline_mode = #tpu.pipeline_mode<synchronous>, transform_indices = @transform_6, window_bounds = array<i64: 1, 48, 96>}, {pipeline_mode = #tpu.pipeline_mode<synchronous>, transform_indices = @transform_7, window_bounds = array<i64: 8, 1, 96>}, {pipeline_mode = #tpu.pipeline_mode<synchronous>, transform_indices = @transform_8, window_bounds = array<i64: 1, 40, 96>}, {pipeline_mode = #tpu.pipeline_mode<synchronous>, transform_indices = @transform_9, window_bounds = array<i64: 1, 48, 32>}, {pipeline_mode = #tpu.pipeline_mode<synchronous>, transform_indices = @transform_10, window_bounds = array<i64: 14, 32, 32>}, {pipeline_mode = #tpu.pipeline_mode<synchronous>, transform_indices = @transform_11, window_bounds = array<i64: 12, 1, 32>}, {pipeline_mode = #tpu.pipeline_mode<synchronous>, transform_indices = @transform_12, window_bounds = array<i64: 1, 40, 32>}, {pipeline_mode = #tpu.pipeline_mode<synchronous>, transform_indices = @transform_13, window_bounds = array<i64: 6, 32, 96>}, {transform_indices = @transform_14, window_bounds = array<i64: 1, 16, 32>}, {transform_indices = @transform_15, window_bounds = array<i64: 1, 8, 32>}]} {
    %c0 = arith.constant 0 : index
    %c0_0 = arith.constant 0 : index
    %c0_1 = arith.constant 0 : index
    %0 = vector.load %arg1[%c0, %c0_0, %c0_1] : memref<1x16x48xf32, #tpu.memory_space<vmem>>, vector<1x16x48xf32>
    %c0_2 = arith.constant 0 : index
    %c0_3 = arith.constant 0 : index
    %c0_4 = arith.constant 0 : index
    %1 = vector.load %arg2[%c0_2, %c0_3, %c0_4] : memref<1x8x40xf32, #tpu.memory_space<vmem>>, vector<1x8x40xf32>
    %c0_5 = arith.constant 0 : index
    %c0_6 = arith.constant 0 : index
    %c0_7 = arith.constant 0 : index
    %2 = vector.load %arg3[%c0_5, %c0_6, %c0_7] : memref<1x16x1xf32, #tpu.memory_space<vmem>>, vector<1x16x1xf32>
    %c0_8 = arith.constant 0 : index
    %c0_9 = arith.constant 0 : index
    %c0_10 = arith.constant 0 : index
    %3 = vector.load %arg4[%c0_8, %c0_9, %c0_10] : memref<1x8x1xf32, #tpu.memory_space<vmem>>, vector<1x8x1xf32>
    %c0_11 = arith.constant 0 : index
    %c0_12 = arith.constant 0 : index
    %c0_13 = arith.constant 0 : index
    %4 = vector.load %arg5[%c0_11, %c0_12, %c0_13] : memref<1x1x16xf32, #tpu.memory_space<vmem>>, vector<1x1x16xf32>
    %c0_14 = arith.constant 0 : index
    %c0_15 = arith.constant 0 : index
    %c0_16 = arith.constant 0 : index
    %5 = vector.load %arg6[%c0_14, %c0_15, %c0_16] : memref<1x1x8xf32, #tpu.memory_space<vmem>>, vector<1x1x8xf32>
    %c0_17 = arith.constant 0 : index
    %c0_18 = arith.constant 0 : index
    %c0_19 = arith.constant 0 : index
    %6 = vector.load %arg7[%c0_17, %c0_18, %c0_19] : memref<1x48x96xbf16, #tpu.memory_space<vmem>>, vector<1x48x96xbf16>
    %7 = vector.shape_cast %6 : vector<1x48x96xbf16> to vector<48x96xbf16>
    %c0_20 = arith.constant 0 : index
    %c0_21 = arith.constant 0 : index
    %c0_22 = arith.constant 0 : index
    %8 = vector.load %arg8[%c0_20, %c0_21, %c0_22] : memref<8x1x96xf32, #tpu.memory_space<vmem>>, vector<1x1x96xf32>
    %9 = vector.shape_cast %8 : vector<1x1x96xf32> to vector<1x96xf32>
    %c0_23 = arith.constant 0 : index
    %c0_24 = arith.constant 0 : index
    %c0_25 = arith.constant 0 : index
    %10 = vector.load %arg9[%c0_23, %c0_24, %c0_25] : memref<1x40x96xbf16, #tpu.memory_space<vmem>>, vector<1x40x96xbf16>
    %11 = vector.shape_cast %10 : vector<1x40x96xbf16> to vector<40x96xbf16>
    %c1 = arith.constant 1 : index
    %c0_26 = arith.constant 0 : index
    %c0_27 = arith.constant 0 : index
    %12 = vector.load %arg8[%c1, %c0_26, %c0_27] : memref<8x1x96xf32, #tpu.memory_space<vmem>>, vector<1x1x96xf32>
    %13 = vector.shape_cast %12 : vector<1x1x96xf32> to vector<1x96xf32>
    %c0_28 = arith.constant 0 : index
    %c0_29 = arith.constant 0 : index
    %c0_30 = arith.constant 0 : index
    %14 = vector.load %arg10[%c0_28, %c0_29, %c0_30] : memref<1x48x32xbf16, #tpu.memory_space<vmem>>, vector<1x48x32xbf16>
    %15 = vector.shape_cast %14 : vector<1x48x32xbf16> to vector<48x32xbf16>
    %c0_31 = arith.constant 0 : index
    %c0_32 = arith.constant 0 : index
    %c0_33 = arith.constant 0 : index
    %16 = vector.load %arg11[%c0_31, %c0_32, %c0_33] : memref<14x32x32xbf16, #tpu.memory_space<vmem>>, vector<1x32x32xbf16>
    %17 = vector.shape_cast %16 : vector<1x32x32xbf16> to vector<32x32xbf16>
    %c0_34 = arith.constant 0 : index
    %c0_35 = arith.constant 0 : index
    %c0_36 = arith.constant 0 : index
    %18 = vector.load %arg12[%c0_34, %c0_35, %c0_36] : memref<12x1x32xf32, #tpu.memory_space<vmem>>, vector<1x1x32xf32>
    %19 = vector.shape_cast %18 : vector<1x1x32xf32> to vector<1x32xf32>
    %c0_37 = arith.constant 0 : index
    %c0_38 = arith.constant 0 : index
    %c0_39 = arith.constant 0 : index
    %20 = vector.load %arg13[%c0_37, %c0_38, %c0_39] : memref<1x40x32xbf16, #tpu.memory_space<vmem>>, vector<1x40x32xbf16>
    %21 = vector.shape_cast %20 : vector<1x40x32xbf16> to vector<40x32xbf16>
    %c1_40 = arith.constant 1 : index
    %c0_41 = arith.constant 0 : index
    %c0_42 = arith.constant 0 : index
    %22 = vector.load %arg11[%c1_40, %c0_41, %c0_42] : memref<14x32x32xbf16, #tpu.memory_space<vmem>>, vector<1x32x32xbf16>
    %23 = vector.shape_cast %22 : vector<1x32x32xbf16> to vector<32x32xbf16>
    %c1_43 = arith.constant 1 : index
    %c0_44 = arith.constant 0 : index
    %c0_45 = arith.constant 0 : index
    %24 = vector.load %arg12[%c1_43, %c0_44, %c0_45] : memref<12x1x32xf32, #tpu.memory_space<vmem>>, vector<1x1x32xf32>
    %25 = vector.shape_cast %24 : vector<1x1x32xf32> to vector<1x32xf32>
    %cst = arith.constant 0.000000e+00 : f32
    %26 = vector.broadcast %cst : f32 to vector<1x16x48xf32>
    %27 = arith.maximumf %0, %26 : vector<1x16x48xf32>
    %28 = arith.truncf %27 : vector<1x16x48xf32> to vector<1x16x48xbf16>
    %29 = vector.shape_cast %28 : vector<1x16x48xbf16> to vector<16x48xbf16>
    %cst_46 = arith.constant dense<0.000000e+00> : vector<16x96xf32>
    %30 = tpu.matmul %29, %7, %cst_46 {dimension_numbers = #tpu.dot_dimension_numbers<[1], [0], [0], [1], [0, 0, 1, 1], [], []>} : vector<16x48xbf16>, vector<48x96xbf16>, vector<16x96xf32> -> vector<16x96xf32>
    %31 = vector.broadcast %9 : vector<1x96xf32> to vector<16x96xf32>
    %32 = arith.addf %30, %31 : vector<16x96xf32>
    %33 = vector.shape_cast %32 : vector<16x96xf32> to vector<1x16x96xf32>
    %34 = vector.broadcast %2 : vector<1x16x1xf32> to vector<1x16x96xf32>
    %35 = arith.mulf %33, %34 : vector<1x16x96xf32>
    %cst_47 = arith.constant 0.000000e+00 : f32
    %36 = vector.broadcast %cst_47 : f32 to vector<1x8x40xf32>
    %37 = arith.maximumf %1, %36 : vector<1x8x40xf32>
    %38 = arith.truncf %37 : vector<1x8x40xf32> to vector<1x8x40xbf16>
    %39 = vector.shape_cast %38 : vector<1x8x40xbf16> to vector<8x40xbf16>
    %cst_48 = arith.constant dense<0.000000e+00> : vector<8x96xf32>
    %40 = tpu.matmul %39, %11, %cst_48 {dimension_numbers = #tpu.dot_dimension_numbers<[1], [0], [0], [1], [0, 0, 1, 1], [], []>} : vector<8x40xbf16>, vector<40x96xbf16>, vector<8x96xf32> -> vector<8x96xf32>
    %41 = vector.broadcast %13 : vector<1x96xf32> to vector<8x96xf32>
    %42 = arith.addf %40, %41 : vector<8x96xf32>
    %43 = vector.shape_cast %42 : vector<8x96xf32> to vector<1x8x96xf32>
    %44 = vector.broadcast %3 : vector<1x8x1xf32> to vector<1x8x96xf32>
    %45 = arith.mulf %43, %44 : vector<1x8x96xf32>
    %46 = vector.extract_strided_slice %35 {offsets = [0, 0, 0], sizes = [1, 16, 32], strides = [1, 1, 1]} : vector<1x16x96xf32> to vector<1x16x32xf32>
    %47 = vector.extract_strided_slice %35 {offsets = [0, 0, 32], sizes = [1, 16, 32], strides = [1, 1, 1]} : vector<1x16x96xf32> to vector<1x16x32xf32>
    %48 = vector.extract_strided_slice %35 {offsets = [0, 0, 64], sizes = [1, 16, 32], strides = [1, 1, 1]} : vector<1x16x96xf32> to vector<1x16x32xf32>
    %49 = vector.extract_strided_slice %45 {offsets = [0, 0, 0], sizes = [1, 8, 32], strides = [1, 1, 1]} : vector<1x8x96xf32> to vector<1x8x32xf32>
    %50 = vector.extract_strided_slice %45 {offsets = [0, 0, 32], sizes = [1, 8, 32], strides = [1, 1, 1]} : vector<1x8x96xf32> to vector<1x8x32xf32>
    %51 = vector.extract_strided_slice %45 {offsets = [0, 0, 64], sizes = [1, 8, 32], strides = [1, 1, 1]} : vector<1x8x96xf32> to vector<1x8x32xf32>
    %52 = vector.extract_strided_slice %47 {offsets = [0, 0, 0], sizes = [1, 16, 8], strides = [1, 1, 1]} : vector<1x16x32xf32> to vector<1x16x8xf32>
    %53 = arith.truncf %52 : vector<1x16x8xf32> to vector<1x16x8xbf16>
    %54 = vector.extract_strided_slice %49 {offsets = [0, 0, 0], sizes = [1, 8, 8], strides = [1, 1, 1]} : vector<1x8x32xf32> to vector<1x8x8xf32>
    %55 = arith.truncf %54 : vector<1x8x8xf32> to vector<1x8x8xbf16>
    %56 = vector.extract_strided_slice %51 {offsets = [0, 0, 0], sizes = [1, 8, 8], strides = [1, 1, 1]} : vector<1x8x32xf32> to vector<1x8x8xf32>
    %57 = arith.truncf %56 : vector<1x8x8xf32> to vector<1x8x8xbf16>
    "tpu.trace_start"() <{level = 10 : i32, message = "bnd,bmd->bnm"}> : () -> ()
    %cst_49 = arith.constant dense<0.000000e+00> : vector<1x16x8xf32>
    %58 = tpu.matmul %53, %55, %cst_49 {dimension_numbers = #tpu.dot_dimension_numbers<[2], [2], [1], [1], [0, 0, 0, 1, 1, 1], [0], [0]>} : vector<1x16x8xbf16>, vector<1x8x8xbf16>, vector<1x16x8xf32> -> vector<1x16x8xf32>
    "tpu.trace_stop"() : () -> ()
    %59 = vector.broadcast %5 : vector<1x1x8xf32> to vector<1x16x8xf32>
    %60 = arith.addf %58, %59 : vector<1x16x8xf32>
    %cst_50 = arith.constant dense<0xFF800000> : vector<1x16xf32>
    %61 = vector.multi_reduction <maximumf>, %60, %cst_50 [2] : vector<1x16x8xf32> to vector<1x16xf32>
    %62 = vector.shape_cast %61 : vector<1x16xf32> to vector<1x16x1xf32>
    %63 = vector.broadcast %62 : vector<1x16x1xf32> to vector<1x16x8xf32>
    %64 = arith.subf %60, %63 : vector<1x16x8xf32>
    %65 = math.exp %64 : vector<1x16x8xf32>
    %cst_51 = arith.constant dense<0.000000e+00> : vector<1x16xf32>
    %66 = vector.multi_reduction <add>, %65, %cst_51 [2] : vector<1x16x8xf32> to vector<1x16xf32>
    %67 = vector.shape_cast %66 : vector<1x16xf32> to vector<1x16x1xf32>
    %68 = tpu.reciprocal %67 {approx = true} : vector<1x16x1xf32> -> vector<1x16x1xf32>
    %69 = vector.broadcast %68 : vector<1x16x1xf32> to vector<1x16x8xf32>
    %70 = arith.mulf %65, %69 : vector<1x16x8xf32>
    %71 = arith.truncf %70 : vector<1x16x8xf32> to vector<1x16x8xbf16>
    "tpu.trace_start"() <{level = 10 : i32, message = "bnm,bmd->bnd"}> : () -> ()
    %cst_52 = arith.constant dense<0.000000e+00> : vector<1x16x8xf32>
    %72 = tpu.matmul %71, %57, %cst_52 {dimension_numbers = #tpu.dot_dimension_numbers<[2], [1], [1], [2], [0, 0, 0, 1, 1, 2], [0], [0]>} : vector<1x16x8xbf16>, vector<1x8x8xbf16>, vector<1x16x8xf32> -> vector<1x16x8xf32>
    "tpu.trace_stop"() : () -> ()
    %73 = vector.extract_strided_slice %47 {offsets = [0, 0, 8], sizes = [1, 16, 8], strides = [1, 1, 1]} : vector<1x16x32xf32> to vector<1x16x8xf32>
    %74 = arith.truncf %73 : vector<1x16x8xf32> to vector<1x16x8xbf16>
    %75 = vector.extract_strided_slice %49 {offsets = [0, 0, 8], sizes = [1, 8, 8], strides = [1, 1, 1]} : vector<1x8x32xf32> to vector<1x8x8xf32>
    %76 = arith.truncf %75 : vector<1x8x8xf32> to vector<1x8x8xbf16>
    %77 = vector.extract_strided_slice %51 {offsets = [0, 0, 8], sizes = [1, 8, 8], strides = [1, 1, 1]} : vector<1x8x32xf32> to vector<1x8x8xf32>
    %78 = arith.truncf %77 : vector<1x8x8xf32> to vector<1x8x8xbf16>
    "tpu.trace_start"() <{level = 10 : i32, message = "bnd,bmd->bnm"}> : () -> ()
    %cst_53 = arith.constant dense<0.000000e+00> : vector<1x16x8xf32>
    %79 = tpu.matmul %74, %76, %cst_53 {dimension_numbers = #tpu.dot_dimension_numbers<[2], [2], [1], [1], [0, 0, 0, 1, 1, 1], [0], [0]>} : vector<1x16x8xbf16>, vector<1x8x8xbf16>, vector<1x16x8xf32> -> vector<1x16x8xf32>
    "tpu.trace_stop"() : () -> ()
    %80 = vector.broadcast %5 : vector<1x1x8xf32> to vector<1x16x8xf32>
    %81 = arith.addf %79, %80 : vector<1x16x8xf32>
    %cst_54 = arith.constant dense<0xFF800000> : vector<1x16xf32>
    %82 = vector.multi_reduction <maximumf>, %81, %cst_54 [2] : vector<1x16x8xf32> to vector<1x16xf32>
    %83 = vector.shape_cast %82 : vector<1x16xf32> to vector<1x16x1xf32>
    %84 = vector.broadcast %83 : vector<1x16x1xf32> to vector<1x16x8xf32>
    %85 = arith.subf %81, %84 : vector<1x16x8xf32>
    %86 = math.exp %85 : vector<1x16x8xf32>
    %cst_55 = arith.constant dense<0.000000e+00> : vector<1x16xf32>
    %87 = vector.multi_reduction <add>, %86, %cst_55 [2] : vector<1x16x8xf32> to vector<1x16xf32>
    %88 = vector.shape_cast %87 : vector<1x16xf32> to vector<1x16x1xf32>
    %89 = tpu.reciprocal %88 {approx = true} : vector<1x16x1xf32> -> vector<1x16x1xf32>
    %90 = vector.broadcast %89 : vector<1x16x1xf32> to vector<1x16x8xf32>
    %91 = arith.mulf %86, %90 : vector<1x16x8xf32>
    %92 = arith.truncf %91 : vector<1x16x8xf32> to vector<1x16x8xbf16>
    "tpu.trace_start"() <{level = 10 : i32, message = "bnm,bmd->bnd"}> : () -> ()
    %cst_56 = arith.constant dense<0.000000e+00> : vector<1x16x8xf32>
    %93 = tpu.matmul %92, %78, %cst_56 {dimension_numbers = #tpu.dot_dimension_numbers<[2], [1], [1], [2], [0, 0, 0, 1, 1, 2], [0], [0]>} : vector<1x16x8xbf16>, vector<1x8x8xbf16>, vector<1x16x8xf32> -> vector<1x16x8xf32>
    "tpu.trace_stop"() : () -> ()
    %94 = vector.extract_strided_slice %47 {offsets = [0, 0, 16], sizes = [1, 16, 8], strides = [1, 1, 1]} : vector<1x16x32xf32> to vector<1x16x8xf32>
    %95 = arith.truncf %94 : vector<1x16x8xf32> to vector<1x16x8xbf16>
    %96 = vector.extract_strided_slice %49 {offsets = [0, 0, 16], sizes = [1, 8, 8], strides = [1, 1, 1]} : vector<1x8x32xf32> to vector<1x8x8xf32>
    %97 = arith.truncf %96 : vector<1x8x8xf32> to vector<1x8x8xbf16>
    %98 = vector.extract_strided_slice %51 {offsets = [0, 0, 16], sizes = [1, 8, 8], strides = [1, 1, 1]} : vector<1x8x32xf32> to vector<1x8x8xf32>
    %99 = arith.truncf %98 : vector<1x8x8xf32> to vector<1x8x8xbf16>
    "tpu.trace_start"() <{level = 10 : i32, message = "bnd,bmd->bnm"}> : () -> ()
    %cst_57 = arith.constant dense<0.000000e+00> : vector<1x16x8xf32>
    %100 = tpu.matmul %95, %97, %cst_57 {dimension_numbers = #tpu.dot_dimension_numbers<[2], [2], [1], [1], [0, 0, 0, 1, 1, 1], [0], [0]>} : vector<1x16x8xbf16>, vector<1x8x8xbf16>, vector<1x16x8xf32> -> vector<1x16x8xf32>
    "tpu.trace_stop"() : () -> ()
    %101 = vector.broadcast %5 : vector<1x1x8xf32> to vector<1x16x8xf32>
    %102 = arith.addf %100, %101 : vector<1x16x8xf32>
    %cst_58 = arith.constant dense<0xFF800000> : vector<1x16xf32>
    %103 = vector.multi_reduction <maximumf>, %102, %cst_58 [2] : vector<1x16x8xf32> to vector<1x16xf32>
    %104 = vector.shape_cast %103 : vector<1x16xf32> to vector<1x16x1xf32>
    %105 = vector.broadcast %104 : vector<1x16x1xf32> to vector<1x16x8xf32>
    %106 = arith.subf %102, %105 : vector<1x16x8xf32>
    %107 = math.exp %106 : vector<1x16x8xf32>
    %cst_59 = arith.constant dense<0.000000e+00> : vector<1x16xf32>
    %108 = vector.multi_reduction <add>, %107, %cst_59 [2] : vector<1x16x8xf32> to vector<1x16xf32>
    %109 = vector.shape_cast %108 : vector<1x16xf32> to vector<1x16x1xf32>
    %110 = tpu.reciprocal %109 {approx = true} : vector<1x16x1xf32> -> vector<1x16x1xf32>
    %111 = vector.broadcast %110 : vector<1x16x1xf32> to vector<1x16x8xf32>
    %112 = arith.mulf %107, %111 : vector<1x16x8xf32>
    %113 = arith.truncf %112 : vector<1x16x8xf32> to vector<1x16x8xbf16>
    "tpu.trace_start"() <{level = 10 : i32, message = "bnm,bmd->bnd"}> : () -> ()
    %cst_60 = arith.constant dense<0.000000e+00> : vector<1x16x8xf32>
    %114 = tpu.matmul %113, %99, %cst_60 {dimension_numbers = #tpu.dot_dimension_numbers<[2], [1], [1], [2], [0, 0, 0, 1, 1, 2], [0], [0]>} : vector<1x16x8xbf16>, vector<1x8x8xbf16>, vector<1x16x8xf32> -> vector<1x16x8xf32>
    "tpu.trace_stop"() : () -> ()
    %115 = vector.extract_strided_slice %47 {offsets = [0, 0, 24], sizes = [1, 16, 8], strides = [1, 1, 1]} : vector<1x16x32xf32> to vector<1x16x8xf32>
    %116 = arith.truncf %115 : vector<1x16x8xf32> to vector<1x16x8xbf16>
    %117 = vector.extract_strided_slice %49 {offsets = [0, 0, 24], sizes = [1, 8, 8], strides = [1, 1, 1]} : vector<1x8x32xf32> to vector<1x8x8xf32>
    %118 = arith.truncf %117 : vector<1x8x8xf32> to vector<1x8x8xbf16>
    %119 = vector.extract_strided_slice %51 {offsets = [0, 0, 24], sizes = [1, 8, 8], strides = [1, 1, 1]} : vector<1x8x32xf32> to vector<1x8x8xf32>
    %120 = arith.truncf %119 : vector<1x8x8xf32> to vector<1x8x8xbf16>
    "tpu.trace_start"() <{level = 10 : i32, message = "bnd,bmd->bnm"}> : () -> ()
    %cst_61 = arith.constant dense<0.000000e+00> : vector<1x16x8xf32>
    %121 = tpu.matmul %116, %118, %cst_61 {dimension_numbers = #tpu.dot_dimension_numbers<[2], [2], [1], [1], [0, 0, 0, 1, 1, 1], [0], [0]>} : vector<1x16x8xbf16>, vector<1x8x8xbf16>, vector<1x16x8xf32> -> vector<1x16x8xf32>
    "tpu.trace_stop"() : () -> ()
    %122 = vector.broadcast %5 : vector<1x1x8xf32> to vector<1x16x8xf32>
    %123 = arith.addf %121, %122 : vector<1x16x8xf32>
    %cst_62 = arith.constant dense<0xFF800000> : vector<1x16xf32>
    %124 = vector.multi_reduction <maximumf>, %123, %cst_62 [2] : vector<1x16x8xf32> to vector<1x16xf32>
    %125 = vector.shape_cast %124 : vector<1x16xf32> to vector<1x16x1xf32>
    %126 = vector.broadcast %125 : vector<1x16x1xf32> to vector<1x16x8xf32>
    %127 = arith.subf %123, %126 : vector<1x16x8xf32>
    %128 = math.exp %127 : vector<1x16x8xf32>
    %cst_63 = arith.constant dense<0.000000e+00> : vector<1x16xf32>
    %129 = vector.multi_reduction <add>, %128, %cst_63 [2] : vector<1x16x8xf32> to vector<1x16xf32>
    %130 = vector.shape_cast %129 : vector<1x16xf32> to vector<1x16x1xf32>
    %131 = tpu.reciprocal %130 {approx = true} : vector<1x16x1xf32> -> vector<1x16x1xf32>
    %132 = vector.broadcast %131 : vector<1x16x1xf32> to vector<1x16x8xf32>
    %133 = arith.mulf %128, %132 : vector<1x16x8xf32>
    %134 = arith.truncf %133 : vector<1x16x8xf32> to vector<1x16x8xbf16>
    "tpu.trace_start"() <{level = 10 : i32, message = "bnm,bmd->bnd"}> : () -> ()
    %cst_64 = arith.constant dense<0.000000e+00> : vector<1x16x8xf32>
    %135 = tpu.matmul %134, %120, %cst_64 {dimension_numbers = #tpu.dot_dimension_numbers<[2], [1], [1], [2], [0, 0, 0, 1, 1, 2], [0], [0]>} : vector<1x16x8xbf16>, vector<1x8x8xbf16>, vector<1x16x8xf32> -> vector<1x16x8xf32>
    "tpu.trace_stop"() : () -> ()
    %136 = tpu.concatenate %72, %93, %114, %135 in 2 : vector<1x16x8xf32>, vector<1x16x8xf32>, vector<1x16x8xf32>, vector<1x16x8xf32> -> vector<1x16x32xf32>
    %137 = vector.extract_strided_slice %50 {offsets = [0, 0, 0], sizes = [1, 8, 8], strides = [1, 1, 1]} : vector<1x8x32xf32> to vector<1x8x8xf32>
    %138 = arith.truncf %137 : vector<1x8x8xf32> to vector<1x8x8xbf16>
    %139 = vector.extract_strided_slice %46 {offsets = [0, 0, 0], sizes = [1, 16, 8], strides = [1, 1, 1]} : vector<1x16x32xf32> to vector<1x16x8xf32>
    %140 = arith.truncf %139 : vector<1x16x8xf32> to vector<1x16x8xbf16>
    %141 = vector.extract_strided_slice %48 {offsets = [0, 0, 0], sizes = [1, 16, 8], strides = [1, 1, 1]} : vector<1x16x32xf32> to vector<1x16x8xf32>
    %142 = arith.truncf %141 : vector<1x16x8xf32> to vector<1x16x8xbf16>
    "tpu.trace_start"() <{level = 10 : i32, message = "bnd,bmd->bnm"}> : () -> ()
    %cst_65 = arith.constant dense<0.000000e+00> : vector<1x8x16xf32>
    %143 = tpu.matmul %138, %140, %cst_65 {dimension_numbers = #tpu.dot_dimension_numbers<[2], [2], [1], [1], [0, 0, 0, 1, 1, 1], [0], [0]>} : vector<1x8x8xbf16>, vector<1x16x8xbf16>, vector<1x8x16xf32> -> vector<1x8x16xf32>
    "tpu.trace_stop"() : () -> ()
    %144 = vector.broadcast %4 : vector<1x1x16xf32> to vector<1x8x16xf32>
    %145 = arith.addf %143, %144 : vector<1x8x16xf32>
    %cst_66 = arith.constant dense<0xFF800000> : vector<1x8xf32>
    %146 = vector.multi_reduction <maximumf>, %145, %cst_66 [2] : vector<1x8x16xf32> to vector<1x8xf32>
    %147 = vector.shape_cast %146 : vector<1x8xf32> to vector<1x8x1xf32>
    %148 = vector.broadcast %147 : vector<1x8x1xf32> to vector<1x8x16xf32>
    %149 = arith.subf %145, %148 : vector<1x8x16xf32>
    %150 = math.exp %149 : vector<1x8x16xf32>
    %cst_67 = arith.constant dense<0.000000e+00> : vector<1x8xf32>
    %151 = vector.multi_reduction <add>, %150, %cst_67 [2] : vector<1x8x16xf32> to vector<1x8xf32>
    %152 = vector.shape_cast %151 : vector<1x8xf32> to vector<1x8x1xf32>
    %153 = tpu.reciprocal %152 {approx = true} : vector<1x8x1xf32> -> vector<1x8x1xf32>
    %154 = vector.broadcast %153 : vector<1x8x1xf32> to vector<1x8x16xf32>
    %155 = arith.mulf %150, %154 : vector<1x8x16xf32>
    %156 = arith.truncf %155 : vector<1x8x16xf32> to vector<1x8x16xbf16>
    "tpu.trace_start"() <{level = 10 : i32, message = "bnm,bmd->bnd"}> : () -> ()
    %cst_68 = arith.constant dense<0.000000e+00> : vector<1x8x8xf32>
    %157 = tpu.matmul %156, %142, %cst_68 {dimension_numbers = #tpu.dot_dimension_numbers<[2], [1], [1], [2], [0, 0, 0, 1, 1, 2], [0], [0]>} : vector<1x8x16xbf16>, vector<1x16x8xbf16>, vector<1x8x8xf32> -> vector<1x8x8xf32>
    "tpu.trace_stop"() : () -> ()
    %158 = vector.extract_strided_slice %50 {offsets = [0, 0, 8], sizes = [1, 8, 8], strides = [1, 1, 1]} : vector<1x8x32xf32> to vector<1x8x8xf32>
    %159 = arith.truncf %158 : vector<1x8x8xf32> to vector<1x8x8xbf16>
    %160 = vector.extract_strided_slice %46 {offsets = [0, 0, 8], sizes = [1, 16, 8], strides = [1, 1, 1]} : vector<1x16x32xf32> to vector<1x16x8xf32>
    %161 = arith.truncf %160 : vector<1x16x8xf32> to vector<1x16x8xbf16>
    %162 = vector.extract_strided_slice %48 {offsets = [0, 0, 8], sizes = [1, 16, 8], strides = [1, 1, 1]} : vector<1x16x32xf32> to vector<1x16x8xf32>
    %163 = arith.truncf %162 : vector<1x16x8xf32> to vector<1x16x8xbf16>
    "tpu.trace_start"() <{level = 10 : i32, message = "bnd,bmd->bnm"}> : () -> ()
    %cst_69 = arith.constant dense<0.000000e+00> : vector<1x8x16xf32>
    %164 = tpu.matmul %159, %161, %cst_69 {dimension_numbers = #tpu.dot_dimension_numbers<[2], [2], [1], [1], [0, 0, 0, 1, 1, 1], [0], [0]>} : vector<1x8x8xbf16>, vector<1x16x8xbf16>, vector<1x8x16xf32> -> vector<1x8x16xf32>
    "tpu.trace_stop"() : () -> ()
    %165 = vector.broadcast %4 : vector<1x1x16xf32> to vector<1x8x16xf32>
    %166 = arith.addf %164, %165 : vector<1x8x16xf32>
    %cst_70 = arith.constant dense<0xFF800000> : vector<1x8xf32>
    %167 = vector.multi_reduction <maximumf>, %166, %cst_70 [2] : vector<1x8x16xf32> to vector<1x8xf32>
    %168 = vector.shape_cast %167 : vector<1x8xf32> to vector<1x8x1xf32>
    %169 = vector.broadcast %168 : vector<1x8x1xf32> to vector<1x8x16xf32>
    %170 = arith.subf %166, %169 : vector<1x8x16xf32>
    %171 = math.exp %170 : vector<1x8x16xf32>
    %cst_71 = arith.constant dense<0.000000e+00> : vector<1x8xf32>
    %172 = vector.multi_reduction <add>, %171, %cst_71 [2] : vector<1x8x16xf32> to vector<1x8xf32>
    %173 = vector.shape_cast %172 : vector<1x8xf32> to vector<1x8x1xf32>
    %174 = tpu.reciprocal %173 {approx = true} : vector<1x8x1xf32> -> vector<1x8x1xf32>
    %175 = vector.broadcast %174 : vector<1x8x1xf32> to vector<1x8x16xf32>
    %176 = arith.mulf %171, %175 : vector<1x8x16xf32>
    %177 = arith.truncf %176 : vector<1x8x16xf32> to vector<1x8x16xbf16>
    "tpu.trace_start"() <{level = 10 : i32, message = "bnm,bmd->bnd"}> : () -> ()
    %cst_72 = arith.constant dense<0.000000e+00> : vector<1x8x8xf32>
    %178 = tpu.matmul %177, %163, %cst_72 {dimension_numbers = #tpu.dot_dimension_numbers<[2], [1], [1], [2], [0, 0, 0, 1, 1, 2], [0], [0]>} : vector<1x8x16xbf16>, vector<1x16x8xbf16>, vector<1x8x8xf32> -> vector<1x8x8xf32>
    "tpu.trace_stop"() : () -> ()
    %179 = vector.extract_strided_slice %50 {offsets = [0, 0, 16], sizes = [1, 8, 8], strides = [1, 1, 1]} : vector<1x8x32xf32> to vector<1x8x8xf32>
    %180 = arith.truncf %179 : vector<1x8x8xf32> to vector<1x8x8xbf16>
    %181 = vector.extract_strided_slice %46 {offsets = [0, 0, 16], sizes = [1, 16, 8], strides = [1, 1, 1]} : vector<1x16x32xf32> to vector<1x16x8xf32>
    %182 = arith.truncf %181 : vector<1x16x8xf32> to vector<1x16x8xbf16>
    %183 = vector.extract_strided_slice %48 {offsets = [0, 0, 16], sizes = [1, 16, 8], strides = [1, 1, 1]} : vector<1x16x32xf32> to vector<1x16x8xf32>
    %184 = arith.truncf %183 : vector<1x16x8xf32> to vector<1x16x8xbf16>
    "tpu.trace_start"() <{level = 10 : i32, message = "bnd,bmd->bnm"}> : () -> ()
    %cst_73 = arith.constant dense<0.000000e+00> : vector<1x8x16xf32>
    %185 = tpu.matmul %180, %182, %cst_73 {dimension_numbers = #tpu.dot_dimension_numbers<[2], [2], [1], [1], [0, 0, 0, 1, 1, 1], [0], [0]>} : vector<1x8x8xbf16>, vector<1x16x8xbf16>, vector<1x8x16xf32> -> vector<1x8x16xf32>
    "tpu.trace_stop"() : () -> ()
    %186 = vector.broadcast %4 : vector<1x1x16xf32> to vector<1x8x16xf32>
    %187 = arith.addf %185, %186 : vector<1x8x16xf32>
    %cst_74 = arith.constant dense<0xFF800000> : vector<1x8xf32>
    %188 = vector.multi_reduction <maximumf>, %187, %cst_74 [2] : vector<1x8x16xf32> to vector<1x8xf32>
    %189 = vector.shape_cast %188 : vector<1x8xf32> to vector<1x8x1xf32>
    %190 = vector.broadcast %189 : vector<1x8x1xf32> to vector<1x8x16xf32>
    %191 = arith.subf %187, %190 : vector<1x8x16xf32>
    %192 = math.exp %191 : vector<1x8x16xf32>
    %cst_75 = arith.constant dense<0.000000e+00> : vector<1x8xf32>
    %193 = vector.multi_reduction <add>, %192, %cst_75 [2] : vector<1x8x16xf32> to vector<1x8xf32>
    %194 = vector.shape_cast %193 : vector<1x8xf32> to vector<1x8x1xf32>
    %195 = tpu.reciprocal %194 {approx = true} : vector<1x8x1xf32> -> vector<1x8x1xf32>
    %196 = vector.broadcast %195 : vector<1x8x1xf32> to vector<1x8x16xf32>
    %197 = arith.mulf %192, %196 : vector<1x8x16xf32>
    %198 = arith.truncf %197 : vector<1x8x16xf32> to vector<1x8x16xbf16>
    "tpu.trace_start"() <{level = 10 : i32, message = "bnm,bmd->bnd"}> : () -> ()
    %cst_76 = arith.constant dense<0.000000e+00> : vector<1x8x8xf32>
    %199 = tpu.matmul %198, %184, %cst_76 {dimension_numbers = #tpu.dot_dimension_numbers<[2], [1], [1], [2], [0, 0, 0, 1, 1, 2], [0], [0]>} : vector<1x8x16xbf16>, vector<1x16x8xbf16>, vector<1x8x8xf32> -> vector<1x8x8xf32>
    "tpu.trace_stop"() : () -> ()
    %200 = vector.extract_strided_slice %50 {offsets = [0, 0, 24], sizes = [1, 8, 8], strides = [1, 1, 1]} : vector<1x8x32xf32> to vector<1x8x8xf32>
    %201 = arith.truncf %200 : vector<1x8x8xf32> to vector<1x8x8xbf16>
    %202 = vector.extract_strided_slice %46 {offsets = [0, 0, 24], sizes = [1, 16, 8], strides = [1, 1, 1]} : vector<1x16x32xf32> to vector<1x16x8xf32>
    %203 = arith.truncf %202 : vector<1x16x8xf32> to vector<1x16x8xbf16>
    %204 = vector.extract_strided_slice %48 {offsets = [0, 0, 24], sizes = [1, 16, 8], strides = [1, 1, 1]} : vector<1x16x32xf32> to vector<1x16x8xf32>
    %205 = arith.truncf %204 : vector<1x16x8xf32> to vector<1x16x8xbf16>
    "tpu.trace_start"() <{level = 10 : i32, message = "bnd,bmd->bnm"}> : () -> ()
    %cst_77 = arith.constant dense<0.000000e+00> : vector<1x8x16xf32>
    %206 = tpu.matmul %201, %203, %cst_77 {dimension_numbers = #tpu.dot_dimension_numbers<[2], [2], [1], [1], [0, 0, 0, 1, 1, 1], [0], [0]>} : vector<1x8x8xbf16>, vector<1x16x8xbf16>, vector<1x8x16xf32> -> vector<1x8x16xf32>
    "tpu.trace_stop"() : () -> ()
    %207 = vector.broadcast %4 : vector<1x1x16xf32> to vector<1x8x16xf32>
    %208 = arith.addf %206, %207 : vector<1x8x16xf32>
    %cst_78 = arith.constant dense<0xFF800000> : vector<1x8xf32>
    %209 = vector.multi_reduction <maximumf>, %208, %cst_78 [2] : vector<1x8x16xf32> to vector<1x8xf32>
    %210 = vector.shape_cast %209 : vector<1x8xf32> to vector<1x8x1xf32>
    %211 = vector.broadcast %210 : vector<1x8x1xf32> to vector<1x8x16xf32>
    %212 = arith.subf %208, %211 : vector<1x8x16xf32>
    %213 = math.exp %212 : vector<1x8x16xf32>
    %cst_79 = arith.constant dense<0.000000e+00> : vector<1x8xf32>
    %214 = vector.multi_reduction <add>, %213, %cst_79 [2] : vector<1x8x16xf32> to vector<1x8xf32>
    %215 = vector.shape_cast %214 : vector<1x8xf32> to vector<1x8x1xf32>
    %216 = tpu.reciprocal %215 {approx = true} : vector<1x8x1xf32> -> vector<1x8x1xf32>
    %217 = vector.broadcast %216 : vector<1x8x1xf32> to vector<1x8x16xf32>
    %218 = arith.mulf %213, %217 : vector<1x8x16xf32>
    %219 = arith.truncf %218 : vector<1x8x16xf32> to vector<1x8x16xbf16>
    "tpu.trace_start"() <{level = 10 : i32, message = "bnm,bmd->bnd"}> : () -> ()
    %cst_80 = arith.constant dense<0.000000e+00> : vector<1x8x8xf32>
    %220 = tpu.matmul %219, %205, %cst_80 {dimension_numbers = #tpu.dot_dimension_numbers<[2], [1], [1], [2], [0, 0, 0, 1, 1, 2], [0], [0]>} : vector<1x8x16xbf16>, vector<1x16x8xbf16>, vector<1x8x8xf32> -> vector<1x8x8xf32>
    "tpu.trace_stop"() : () -> ()
    %221 = tpu.concatenate %157, %178, %199, %220 in 2 : vector<1x8x8xf32>, vector<1x8x8xf32>, vector<1x8x8xf32>, vector<1x8x8xf32> -> vector<1x8x32xf32>
    %222 = vector.shape_cast %0 : vector<1x16x48xf32> to vector<16x48xf32>
    %223 = arith.truncf %222 : vector<16x48xf32> to vector<16x48xbf16>
    %cst_81 = arith.constant dense<0.000000e+00> : vector<16x32xf32>
    %224 = tpu.matmul %223, %15, %cst_81 {dimension_numbers = #tpu.dot_dimension_numbers<[1], [0], [0], [1], [0, 0, 1, 1], [], []>} : vector<16x48xbf16>, vector<48x32xbf16>, vector<16x32xf32> -> vector<16x32xf32>
    %225 = vector.shape_cast %136 : vector<1x16x32xf32> to vector<16x32xf32>
    %226 = arith.truncf %225 : vector<16x32xf32> to vector<16x32xbf16>
    %cst_82 = arith.constant dense<0.000000e+00> : vector<16x32xf32>
    %227 = tpu.matmul %226, %17, %cst_82 {dimension_numbers = #tpu.dot_dimension_numbers<[1], [0], [0], [1], [0, 0, 1, 1], [], []>} : vector<16x32xbf16>, vector<32x32xbf16>, vector<16x32xf32> -> vector<16x32xf32>
    %228 = arith.addf %224, %227 : vector<16x32xf32>
    %229 = vector.broadcast %19 : vector<1x32xf32> to vector<16x32xf32>
    %230 = arith.addf %228, %229 : vector<16x32xf32>
    %231 = vector.shape_cast %230 : vector<16x32xf32> to vector<1x16x32xf32>
    %232 = vector.shape_cast %1 : vector<1x8x40xf32> to vector<8x40xf32>
    %233 = arith.truncf %232 : vector<8x40xf32> to vector<8x40xbf16>
    %cst_83 = arith.constant dense<0.000000e+00> : vector<8x32xf32>
    %234 = tpu.matmul %233, %21, %cst_83 {dimension_numbers = #tpu.dot_dimension_numbers<[1], [0], [0], [1], [0, 0, 1, 1], [], []>} : vector<8x40xbf16>, vector<40x32xbf16>, vector<8x32xf32> -> vector<8x32xf32>
    %235 = vector.shape_cast %221 : vector<1x8x32xf32> to vector<8x32xf32>
    %236 = arith.truncf %235 : vector<8x32xf32> to vector<8x32xbf16>
    %cst_84 = arith.constant dense<0.000000e+00> : vector<8x32xf32>
    %237 = tpu.matmul %236, %23, %cst_84 {dimension_numbers = #tpu.dot_dimension_numbers<[1], [0], [0], [1], [0, 0, 1, 1], [], []>} : vector<8x32xbf16>, vector<32x32xbf16>, vector<8x32xf32> -> vector<8x32xf32>
    %238 = arith.addf %234, %237 : vector<8x32xf32>
    %239 = vector.broadcast %25 : vector<1x32xf32> to vector<8x32xf32>
    %240 = arith.addf %238, %239 : vector<8x32xf32>
    %241 = vector.shape_cast %240 : vector<8x32xf32> to vector<1x8x32xf32>
    %c2 = arith.constant 2 : index
    %c0_85 = arith.constant 0 : index
    %c0_86 = arith.constant 0 : index
    %242 = vector.load %arg11[%c2, %c0_85, %c0_86] : memref<14x32x32xbf16, #tpu.memory_space<vmem>>, vector<1x32x32xbf16>
    %243 = vector.shape_cast %242 : vector<1x32x32xbf16> to vector<32x32xbf16>
    %c2_87 = arith.constant 2 : index
    %c0_88 = arith.constant 0 : index
    %c0_89 = arith.constant 0 : index
    %244 = vector.load %arg12[%c2_87, %c0_88, %c0_89] : memref<12x1x32xf32, #tpu.memory_space<vmem>>, vector<1x1x32xf32>
    %245 = vector.shape_cast %244 : vector<1x1x32xf32> to vector<1x32xf32>
    %c3 = arith.constant 3 : index
    %c0_90 = arith.constant 0 : index
    %c0_91 = arith.constant 0 : index
    %246 = vector.load %arg11[%c3, %c0_90, %c0_91] : memref<14x32x32xbf16, #tpu.memory_space<vmem>>, vector<1x32x32xbf16>
    %247 = vector.shape_cast %246 : vector<1x32x32xbf16> to vector<32x32xbf16>
    %c3_92 = arith.constant 3 : index
    %c0_93 = arith.constant 0 : index
    %c0_94 = arith.constant 0 : index
    %248 = vector.load %arg12[%c3_92, %c0_93, %c0_94] : memref<12x1x32xf32, #tpu.memory_space<vmem>>, vector<1x1x32xf32>
    %249 = vector.shape_cast %248 : vector<1x1x32xf32> to vector<1x32xf32>
    %c0_95 = arith.constant 0 : index
    %c0_96 = arith.constant 0 : index
    %c0_97 = arith.constant 0 : index
    %250 = vector.load %arg14[%c0_95, %c0_96, %c0_97] : memref<6x32x96xbf16, #tpu.memory_space<vmem>>, vector<1x32x96xbf16>
    %251 = vector.shape_cast %250 : vector<1x32x96xbf16> to vector<32x96xbf16>
    %c2_98 = arith.constant 2 : index
    %c0_99 = arith.constant 0 : index
    %c0_100 = arith.constant 0 : index
    %252 = vector.load %arg8[%c2_98, %c0_99, %c0_100] : memref<8x1x96xf32, #tpu.memory_space<vmem>>, vector<1x1x96xf32>
    %253 = vector.shape_cast %252 : vector<1x1x96xf32> to vector<1x96xf32>
    %c1_101 = arith.constant 1 : index
    %c0_102 = arith.constant 0 : index
    %c0_103 = arith.constant 0 : index
    %254 = vector.load %arg14[%c1_101, %c0_102, %c0_103] : memref<6x32x96xbf16, #tpu.memory_space<vmem>>, vector<1x32x96xbf16>
    %255 = vector.shape_cast %254 : vector<1x32x96xbf16> to vector<32x96xbf16>
    %c3_104 = arith.constant 3 : index
    %c0_105 = arith.constant 0 : index
    %c0_106 = arith.constant 0 : index
    %256 = vector.load %arg8[%c3_104, %c0_105, %c0_106] : memref<8x1x96xf32, #tpu.memory_space<vmem>>, vector<1x1x96xf32>
    %257 = vector.shape_cast %256 : vector<1x1x96xf32> to vector<1x96xf32>
    %c4 = arith.constant 4 : index
    %c0_107 = arith.constant 0 : index
    %c0_108 = arith.constant 0 : index
    %258 = vector.load %arg11[%c4, %c0_107, %c0_108] : memref<14x32x32xbf16, #tpu.memory_space<vmem>>, vector<1x32x32xbf16>
    %259 = vector.shape_cast %258 : vector<1x32x32xbf16> to vector<32x32xbf16>
    %c4_109 = arith.constant 4 : index
    %c0_110 = arith.constant 0 : index
    %c0_111 = arith.constant 0 : index
    %260 = vector.load %arg12[%c4_109, %c0_110, %c0_111] : memref<12x1x32xf32, #tpu.memory_space<vmem>>, vector<1x1x32xf32>
    %261 = vector.shape_cast %260 : vector<1x1x32xf32> to vector<1x32xf32>
    %c5 = arith.constant 5 : index
    %c0_112 = arith.constant 0 : index
    %c0_113 = arith.constant 0 : index
    %262 = vector.load %arg11[%c5, %c0_112, %c0_113] : memref<14x32x32xbf16, #tpu.memory_space<vmem>>, vector<1x32x32xbf16>
    %263 = vector.shape_cast %262 : vector<1x32x32xbf16> to vector<32x32xbf16>
    %c5_114 = arith.constant 5 : index
    %c0_115 = arith.constant 0 : index
    %c0_116 = arith.constant 0 : index
    %264 = vector.load %arg12[%c5_114, %c0_115, %c0_116] : memref<12x1x32xf32, #tpu.memory_space<vmem>>, vector<1x1x32xf32>
    %265 = vector.shape_cast %264 : vector<1x1x32xf32> to vector<1x32xf32>
    %cst_117 = arith.constant dense<0.000000e+00> : vector<1x1xf32>
    %266 = vector.multi_reduction <add>, %2, %cst_117 [1] : vector<1x16x1xf32> to vector<1x1xf32>
    %267 = vector.shape_cast %266 : vector<1x1xf32> to vector<1x1x1xf32>
    %cst_118 = arith.constant 1.000000e+00 : f32
    %268 = vector.broadcast %cst_118 : f32 to vector<1x1x1xf32>
    %269 = arith.maximumf %267, %268 : vector<1x1x1xf32>
    %cst_119 = arith.constant dense<0.000000e+00> : vector<1x1xf32>
    %270 = vector.multi_reduction <add>, %3, %cst_119 [1] : vector<1x8x1xf32> to vector<1x1xf32>
    %271 = vector.shape_cast %270 : vector<1x1xf32> to vector<1x1x1xf32>
    %cst_120 = arith.constant 1.000000e+00 : f32
    %272 = vector.broadcast %cst_120 : f32 to vector<1x1x1xf32>
    %273 = arith.maximumf %271, %272 : vector<1x1x1xf32>
    %274 = vector.broadcast %2 : vector<1x16x1xf32> to vector<1x16x32xf32>
    %275 = arith.mulf %231, %274 : vector<1x16x32xf32>
    %cst_121 = arith.constant dense<0.000000e+00> : vector<1x32xf32>
    %276 = vector.multi_reduction <add>, %275, %cst_121 [1] : vector<1x16x32xf32> to vector<1x32xf32>
    %277 = vector.shape_cast %276 : vector<1x32xf32> to vector<1x1x32xf32>
    %278 = vector.broadcast %269 : vector<1x1x1xf32> to vector<1x1x32xf32>
    %279 = arith.divf %277, %278 : vector<1x1x32xf32>
    %280 = vector.broadcast %3 : vector<1x8x1xf32> to vector<1x8x32xf32>
    %281 = arith.mulf %241, %280 : vector<1x8x32xf32>
    %cst_122 = arith.constant dense<0.000000e+00> : vector<1x32xf32>
    %282 = vector.multi_reduction <add>, %281, %cst_122 [1] : vector<1x8x32xf32> to vector<1x32xf32>
    %283 = vector.shape_cast %282 : vector<1x32xf32> to vector<1x1x32xf32>
    %284 = vector.broadcast %273 : vector<1x1x1xf32> to vector<1x1x32xf32>
    %285 = arith.divf %283, %284 : vector<1x1x32xf32>
    %cst_123 = arith.constant 0.000000e+00 : f32
    %286 = vector.broadcast %cst_123 : f32 to vector<1x1x32xf32>
    %287 = arith.maximumf %279, %286 : vector<1x1x32xf32>
    %288 = vector.shape_cast %287 : vector<1x1x32xf32> to vector<1x32xf32>
    %289 = arith.truncf %288 : vector<1x32xf32> to vector<1x32xbf16>
    %cst_124 = arith.constant dense<0.000000e+00> : vector<1x32xf32>
    %290 = tpu.matmul %289, %243, %cst_124 {dimension_numbers = #tpu.dot_dimension_numbers<[1], [0], [0], [1], [0, 0, 1, 1], [], []>} : vector<1x32xbf16>, vector<32x32xbf16>, vector<1x32xf32> -> vector<1x32xf32>
    %291 = arith.addf %290, %245 : vector<1x32xf32>
    %292 = arith.negf %291 : vector<1x32xf32>
    %293 = math.exp %292 : vector<1x32xf32>
    %cst_125 = arith.constant 1.000000e+00 : f32
    %294 = vector.broadcast %cst_125 : f32 to vector<1x32xf32>
    %295 = arith.addf %294, %293 : vector<1x32xf32>
    %296 = arith.divf %294, %295 : vector<1x32xf32>
    %297 = vector.shape_cast %296 : vector<1x32xf32> to vector<1x1x32xf32>
    %cst_126 = arith.constant 0.000000e+00 : f32
    %298 = vector.broadcast %cst_126 : f32 to vector<1x1x32xf32>
    %299 = arith.maximumf %285, %298 : vector<1x1x32xf32>
    %300 = vector.shape_cast %299 : vector<1x1x32xf32> to vector<1x32xf32>
    %301 = arith.truncf %300 : vector<1x32xf32> to vector<1x32xbf16>
    %cst_127 = arith.constant dense<0.000000e+00> : vector<1x32xf32>
    %302 = tpu.matmul %301, %247, %cst_127 {dimension_numbers = #tpu.dot_dimension_numbers<[1], [0], [0], [1], [0, 0, 1, 1], [], []>} : vector<1x32xbf16>, vector<32x32xbf16>, vector<1x32xf32> -> vector<1x32xf32>
    %303 = arith.addf %302, %249 : vector<1x32xf32>
    %304 = arith.negf %303 : vector<1x32xf32>
    %305 = math.exp %304 : vector<1x32xf32>
    %cst_128 = arith.constant 1.000000e+00 : f32
    %306 = vector.broadcast %cst_128 : f32 to vector<1x32xf32>
    %307 = arith.addf %306, %305 : vector<1x32xf32>
    %308 = arith.divf %306, %307 : vector<1x32xf32>
    %309 = vector.shape_cast %308 : vector<1x32xf32> to vector<1x1x32xf32>
    %cst_129 = arith.constant 0.000000e+00 : f32
    %310 = vector.broadcast %cst_129 : f32 to vector<1x16x32xf32>
    %311 = arith.maximumf %231, %310 : vector<1x16x32xf32>
    %312 = arith.truncf %311 : vector<1x16x32xf32> to vector<1x16x32xbf16>
    %313 = vector.shape_cast %312 : vector<1x16x32xbf16> to vector<16x32xbf16>
    %cst_130 = arith.constant dense<0.000000e+00> : vector<16x96xf32>
    %314 = tpu.matmul %313, %251, %cst_130 {dimension_numbers = #tpu.dot_dimension_numbers<[1], [0], [0], [1], [0, 0, 1, 1], [], []>} : vector<16x32xbf16>, vector<32x96xbf16>, vector<16x96xf32> -> vector<16x96xf32>
    %315 = vector.broadcast %253 : vector<1x96xf32> to vector<16x96xf32>
    %316 = arith.addf %314, %315 : vector<16x96xf32>
    %317 = vector.shape_cast %316 : vector<16x96xf32> to vector<1x16x96xf32>
    %318 = vector.broadcast %2 : vector<1x16x1xf32> to vector<1x16x96xf32>
    %319 = arith.mulf %317, %318 : vector<1x16x96xf32>
    %cst_131 = arith.constant 0.000000e+00 : f32
    %320 = vector.broadcast %cst_131 : f32 to vector<1x8x32xf32>
    %321 = arith.maximumf %241, %320 : vector<1x8x32xf32>
    %322 = arith.truncf %321 : vector<1x8x32xf32> to vector<1x8x32xbf16>
    %323 = vector.shape_cast %322 : vector<1x8x32xbf16> to vector<8x32xbf16>
    %cst_132 = arith.constant dense<0.000000e+00> : vector<8x96xf32>
    %324 = tpu.matmul %323, %255, %cst_132 {dimension_numbers = #tpu.dot_dimension_numbers<[1], [0], [0], [1], [0, 0, 1, 1], [], []>} : vector<8x32xbf16>, vector<32x96xbf16>, vector<8x96xf32> -> vector<8x96xf32>
    %325 = vector.broadcast %257 : vector<1x96xf32> to vector<8x96xf32>
    %326 = arith.addf %324, %325 : vector<8x96xf32>
    %327 = vector.shape_cast %326 : vector<8x96xf32> to vector<1x8x96xf32>
    %328 = vector.broadcast %3 : vector<1x8x1xf32> to vector<1x8x96xf32>
    %329 = arith.mulf %327, %328 : vector<1x8x96xf32>
    %330 = vector.extract_strided_slice %319 {offsets = [0, 0, 0], sizes = [1, 16, 32], strides = [1, 1, 1]} : vector<1x16x96xf32> to vector<1x16x32xf32>
    %331 = vector.extract_strided_slice %319 {offsets = [0, 0, 32], sizes = [1, 16, 32], strides = [1, 1, 1]} : vector<1x16x96xf32> to vector<1x16x32xf32>
    %332 = vector.extract_strided_slice %319 {offsets = [0, 0, 64], sizes = [1, 16, 32], strides = [1, 1, 1]} : vector<1x16x96xf32> to vector<1x16x32xf32>
    %333 = vector.extract_strided_slice %329 {offsets = [0, 0, 0], sizes = [1, 8, 32], strides = [1, 1, 1]} : vector<1x8x96xf32> to vector<1x8x32xf32>
    %334 = vector.extract_strided_slice %329 {offsets = [0, 0, 32], sizes = [1, 8, 32], strides = [1, 1, 1]} : vector<1x8x96xf32> to vector<1x8x32xf32>
    %335 = vector.extract_strided_slice %329 {offsets = [0, 0, 64], sizes = [1, 8, 32], strides = [1, 1, 1]} : vector<1x8x96xf32> to vector<1x8x32xf32>
    %cst_133 = arith.constant 1.000000e+00 : f32
    %336 = vector.broadcast %cst_133 : f32 to vector<1x1x32xf32>
    %337 = arith.addf %336, %309 : vector<1x1x32xf32>
    %338 = vector.broadcast %337 : vector<1x1x32xf32> to vector<1x16x32xf32>
    %339 = arith.mulf %338, %331 : vector<1x16x32xf32>
    %cst_134 = arith.constant 1.000000e+00 : f32
    %340 = vector.broadcast %cst_134 : f32 to vector<1x1x32xf32>
    %341 = arith.addf %340, %309 : vector<1x1x32xf32>
    %342 = vector.broadcast %341 : vector<1x1x32xf32> to vector<1x16x32xf32>
    %343 = arith.mulf %342, %330 : vector<1x16x32xf32>
    %cst_135 = arith.constant 1.000000e+00 : f32
    %344 = vector.broadcast %cst_135 : f32 to vector<1x1x32xf32>
    %345 = arith.addf %344, %297 : vector<1x1x32xf32>
    %346 = vector.broadcast %345 : vector<1x1x32xf32> to vector<1x8x32xf32>
    %347 = arith.mulf %346, %334 : vector<1x8x32xf32>
    %cst_136 = arith.constant 1.000000e+00 : f32
    %348 = vector.broadcast %cst_136 : f32 to vector<1x1x32xf32>
    %349 = arith.addf %348, %297 : vector<1x1x32xf32>
    %350 = vector.broadcast %349 : vector<1x1x32xf32> to vector<1x8x32xf32>
    %351 = arith.mulf %350, %333 : vector<1x8x32xf32>
    %352 = vector.extract_strided_slice %339 {offsets = [0, 0, 0], sizes = [1, 16, 8], strides = [1, 1, 1]} : vector<1x16x32xf32> to vector<1x16x8xf32>
    %353 = arith.truncf %352 : vector<1x16x8xf32> to vector<1x16x8xbf16>
    %354 = vector.extract_strided_slice %343 {offsets = [0, 0, 0], sizes = [1, 16, 8], strides = [1, 1, 1]} : vector<1x16x32xf32> to vector<1x16x8xf32>
    %355 = arith.truncf %354 : vector<1x16x8xf32> to vector<1x16x8xbf16>
    %356 = vector.extract_strided_slice %332 {offsets = [0, 0, 0], sizes = [1, 16, 8], strides = [1, 1, 1]} : vector<1x16x32xf32> to vector<1x16x8xf32>
    %357 = arith.truncf %356 : vector<1x16x8xf32> to vector<1x16x8xbf16>
    "tpu.trace_start"() <{level = 10 : i32, message = "bnd,bmd->bnm"}> : () -> ()
    %cst_137 = arith.constant dense<0.000000e+00> : vector<1x16x16xf32>
    %358 = tpu.matmul %353, %355, %cst_137 {dimension_numbers = #tpu.dot_dimension_numbers<[2], [2], [1], [1], [0, 0, 0, 1, 1, 1], [0], [0]>} : vector<1x16x8xbf16>, vector<1x16x8xbf16>, vector<1x16x16xf32> -> vector<1x16x16xf32>
    "tpu.trace_stop"() : () -> ()
    %359 = vector.broadcast %4 : vector<1x1x16xf32> to vector<1x16x16xf32>
    %360 = arith.addf %358, %359 : vector<1x16x16xf32>
    %cst_138 = arith.constant dense<0xFF800000> : vector<1x16xf32>
    %361 = vector.multi_reduction <maximumf>, %360, %cst_138 [2] : vector<1x16x16xf32> to vector<1x16xf32>
    %362 = vector.shape_cast %361 : vector<1x16xf32> to vector<1x16x1xf32>
    %363 = vector.broadcast %362 : vector<1x16x1xf32> to vector<1x16x16xf32>
    %364 = arith.subf %360, %363 : vector<1x16x16xf32>
    %365 = math.exp %364 : vector<1x16x16xf32>
    %cst_139 = arith.constant dense<0.000000e+00> : vector<1x16xf32>
    %366 = vector.multi_reduction <add>, %365, %cst_139 [2] : vector<1x16x16xf32> to vector<1x16xf32>
    %367 = vector.shape_cast %366 : vector<1x16xf32> to vector<1x16x1xf32>
    %368 = tpu.reciprocal %367 {approx = true} : vector<1x16x1xf32> -> vector<1x16x1xf32>
    %369 = vector.broadcast %368 : vector<1x16x1xf32> to vector<1x16x16xf32>
    %370 = arith.mulf %365, %369 : vector<1x16x16xf32>
    %371 = arith.truncf %370 : vector<1x16x16xf32> to vector<1x16x16xbf16>
    "tpu.trace_start"() <{level = 10 : i32, message = "bnm,bmd->bnd"}> : () -> ()
    %cst_140 = arith.constant dense<0.000000e+00> : vector<1x16x8xf32>
    %372 = tpu.matmul %371, %357, %cst_140 {dimension_numbers = #tpu.dot_dimension_numbers<[2], [1], [1], [2], [0, 0, 0, 1, 1, 2], [0], [0]>} : vector<1x16x16xbf16>, vector<1x16x8xbf16>, vector<1x16x8xf32> -> vector<1x16x8xf32>
    "tpu.trace_stop"() : () -> ()
    %373 = vector.extract_strided_slice %339 {offsets = [0, 0, 8], sizes = [1, 16, 8], strides = [1, 1, 1]} : vector<1x16x32xf32> to vector<1x16x8xf32>
    %374 = arith.truncf %373 : vector<1x16x8xf32> to vector<1x16x8xbf16>
    %375 = vector.extract_strided_slice %343 {offsets = [0, 0, 8], sizes = [1, 16, 8], strides = [1, 1, 1]} : vector<1x16x32xf32> to vector<1x16x8xf32>
    %376 = arith.truncf %375 : vector<1x16x8xf32> to vector<1x16x8xbf16>
    %377 = vector.extract_strided_slice %332 {offsets = [0, 0, 8], sizes = [1, 16, 8], strides = [1, 1, 1]} : vector<1x16x32xf32> to vector<1x16x8xf32>
    %378 = arith.truncf %377 : vector<1x16x8xf32> to vector<1x16x8xbf16>
    "tpu.trace_start"() <{level = 10 : i32, message = "bnd,bmd->bnm"}> : () -> ()
    %cst_141 = arith.constant dense<0.000000e+00> : vector<1x16x16xf32>
    %379 = tpu.matmul %374, %376, %cst_141 {dimension_numbers = #tpu.dot_dimension_numbers<[2], [2], [1], [1], [0, 0, 0, 1, 1, 1], [0], [0]>} : vector<1x16x8xbf16>, vector<1x16x8xbf16>, vector<1x16x16xf32> -> vector<1x16x16xf32>
    "tpu.trace_stop"() : () -> ()
    %380 = vector.broadcast %4 : vector<1x1x16xf32> to vector<1x16x16xf32>
    %381 = arith.addf %379, %380 : vector<1x16x16xf32>
    %cst_142 = arith.constant dense<0xFF800000> : vector<1x16xf32>
    %382 = vector.multi_reduction <maximumf>, %381, %cst_142 [2] : vector<1x16x16xf32> to vector<1x16xf32>
    %383 = vector.shape_cast %382 : vector<1x16xf32> to vector<1x16x1xf32>
    %384 = vector.broadcast %383 : vector<1x16x1xf32> to vector<1x16x16xf32>
    %385 = arith.subf %381, %384 : vector<1x16x16xf32>
    %386 = math.exp %385 : vector<1x16x16xf32>
    %cst_143 = arith.constant dense<0.000000e+00> : vector<1x16xf32>
    %387 = vector.multi_reduction <add>, %386, %cst_143 [2] : vector<1x16x16xf32> to vector<1x16xf32>
    %388 = vector.shape_cast %387 : vector<1x16xf32> to vector<1x16x1xf32>
    %389 = tpu.reciprocal %388 {approx = true} : vector<1x16x1xf32> -> vector<1x16x1xf32>
    %390 = vector.broadcast %389 : vector<1x16x1xf32> to vector<1x16x16xf32>
    %391 = arith.mulf %386, %390 : vector<1x16x16xf32>
    %392 = arith.truncf %391 : vector<1x16x16xf32> to vector<1x16x16xbf16>
    "tpu.trace_start"() <{level = 10 : i32, message = "bnm,bmd->bnd"}> : () -> ()
    %cst_144 = arith.constant dense<0.000000e+00> : vector<1x16x8xf32>
    %393 = tpu.matmul %392, %378, %cst_144 {dimension_numbers = #tpu.dot_dimension_numbers<[2], [1], [1], [2], [0, 0, 0, 1, 1, 2], [0], [0]>} : vector<1x16x16xbf16>, vector<1x16x8xbf16>, vector<1x16x8xf32> -> vector<1x16x8xf32>
    "tpu.trace_stop"() : () -> ()
    %394 = vector.extract_strided_slice %339 {offsets = [0, 0, 16], sizes = [1, 16, 8], strides = [1, 1, 1]} : vector<1x16x32xf32> to vector<1x16x8xf32>
    %395 = arith.truncf %394 : vector<1x16x8xf32> to vector<1x16x8xbf16>
    %396 = vector.extract_strided_slice %343 {offsets = [0, 0, 16], sizes = [1, 16, 8], strides = [1, 1, 1]} : vector<1x16x32xf32> to vector<1x16x8xf32>
    %397 = arith.truncf %396 : vector<1x16x8xf32> to vector<1x16x8xbf16>
    %398 = vector.extract_strided_slice %332 {offsets = [0, 0, 16], sizes = [1, 16, 8], strides = [1, 1, 1]} : vector<1x16x32xf32> to vector<1x16x8xf32>
    %399 = arith.truncf %398 : vector<1x16x8xf32> to vector<1x16x8xbf16>
    "tpu.trace_start"() <{level = 10 : i32, message = "bnd,bmd->bnm"}> : () -> ()
    %cst_145 = arith.constant dense<0.000000e+00> : vector<1x16x16xf32>
    %400 = tpu.matmul %395, %397, %cst_145 {dimension_numbers = #tpu.dot_dimension_numbers<[2], [2], [1], [1], [0, 0, 0, 1, 1, 1], [0], [0]>} : vector<1x16x8xbf16>, vector<1x16x8xbf16>, vector<1x16x16xf32> -> vector<1x16x16xf32>
    "tpu.trace_stop"() : () -> ()
    %401 = vector.broadcast %4 : vector<1x1x16xf32> to vector<1x16x16xf32>
    %402 = arith.addf %400, %401 : vector<1x16x16xf32>
    %cst_146 = arith.constant dense<0xFF800000> : vector<1x16xf32>
    %403 = vector.multi_reduction <maximumf>, %402, %cst_146 [2] : vector<1x16x16xf32> to vector<1x16xf32>
    %404 = vector.shape_cast %403 : vector<1x16xf32> to vector<1x16x1xf32>
    %405 = vector.broadcast %404 : vector<1x16x1xf32> to vector<1x16x16xf32>
    %406 = arith.subf %402, %405 : vector<1x16x16xf32>
    %407 = math.exp %406 : vector<1x16x16xf32>
    %cst_147 = arith.constant dense<0.000000e+00> : vector<1x16xf32>
    %408 = vector.multi_reduction <add>, %407, %cst_147 [2] : vector<1x16x16xf32> to vector<1x16xf32>
    %409 = vector.shape_cast %408 : vector<1x16xf32> to vector<1x16x1xf32>
    %410 = tpu.reciprocal %409 {approx = true} : vector<1x16x1xf32> -> vector<1x16x1xf32>
    %411 = vector.broadcast %410 : vector<1x16x1xf32> to vector<1x16x16xf32>
    %412 = arith.mulf %407, %411 : vector<1x16x16xf32>
    %413 = arith.truncf %412 : vector<1x16x16xf32> to vector<1x16x16xbf16>
    "tpu.trace_start"() <{level = 10 : i32, message = "bnm,bmd->bnd"}> : () -> ()
    %cst_148 = arith.constant dense<0.000000e+00> : vector<1x16x8xf32>
    %414 = tpu.matmul %413, %399, %cst_148 {dimension_numbers = #tpu.dot_dimension_numbers<[2], [1], [1], [2], [0, 0, 0, 1, 1, 2], [0], [0]>} : vector<1x16x16xbf16>, vector<1x16x8xbf16>, vector<1x16x8xf32> -> vector<1x16x8xf32>
    "tpu.trace_stop"() : () -> ()
    %415 = vector.extract_strided_slice %339 {offsets = [0, 0, 24], sizes = [1, 16, 8], strides = [1, 1, 1]} : vector<1x16x32xf32> to vector<1x16x8xf32>
    %416 = arith.truncf %415 : vector<1x16x8xf32> to vector<1x16x8xbf16>
    %417 = vector.extract_strided_slice %343 {offsets = [0, 0, 24], sizes = [1, 16, 8], strides = [1, 1, 1]} : vector<1x16x32xf32> to vector<1x16x8xf32>
    %418 = arith.truncf %417 : vector<1x16x8xf32> to vector<1x16x8xbf16>
    %419 = vector.extract_strided_slice %332 {offsets = [0, 0, 24], sizes = [1, 16, 8], strides = [1, 1, 1]} : vector<1x16x32xf32> to vector<1x16x8xf32>
    %420 = arith.truncf %419 : vector<1x16x8xf32> to vector<1x16x8xbf16>
    "tpu.trace_start"() <{level = 10 : i32, message = "bnd,bmd->bnm"}> : () -> ()
    %cst_149 = arith.constant dense<0.000000e+00> : vector<1x16x16xf32>
    %421 = tpu.matmul %416, %418, %cst_149 {dimension_numbers = #tpu.dot_dimension_numbers<[2], [2], [1], [1], [0, 0, 0, 1, 1, 1], [0], [0]>} : vector<1x16x8xbf16>, vector<1x16x8xbf16>, vector<1x16x16xf32> -> vector<1x16x16xf32>
    "tpu.trace_stop"() : () -> ()
    %422 = vector.broadcast %4 : vector<1x1x16xf32> to vector<1x16x16xf32>
    %423 = arith.addf %421, %422 : vector<1x16x16xf32>
    %cst_150 = arith.constant dense<0xFF800000> : vector<1x16xf32>
    %424 = vector.multi_reduction <maximumf>, %423, %cst_150 [2] : vector<1x16x16xf32> to vector<1x16xf32>
    %425 = vector.shape_cast %424 : vector<1x16xf32> to vector<1x16x1xf32>
    %426 = vector.broadcast %425 : vector<1x16x1xf32> to vector<1x16x16xf32>
    %427 = arith.subf %423, %426 : vector<1x16x16xf32>
    %428 = math.exp %427 : vector<1x16x16xf32>
    %cst_151 = arith.constant dense<0.000000e+00> : vector<1x16xf32>
    %429 = vector.multi_reduction <add>, %428, %cst_151 [2] : vector<1x16x16xf32> to vector<1x16xf32>
    %430 = vector.shape_cast %429 : vector<1x16xf32> to vector<1x16x1xf32>
    %431 = tpu.reciprocal %430 {approx = true} : vector<1x16x1xf32> -> vector<1x16x1xf32>
    %432 = vector.broadcast %431 : vector<1x16x1xf32> to vector<1x16x16xf32>
    %433 = arith.mulf %428, %432 : vector<1x16x16xf32>
    %434 = arith.truncf %433 : vector<1x16x16xf32> to vector<1x16x16xbf16>
    "tpu.trace_start"() <{level = 10 : i32, message = "bnm,bmd->bnd"}> : () -> ()
    %cst_152 = arith.constant dense<0.000000e+00> : vector<1x16x8xf32>
    %435 = tpu.matmul %434, %420, %cst_152 {dimension_numbers = #tpu.dot_dimension_numbers<[2], [1], [1], [2], [0, 0, 0, 1, 1, 2], [0], [0]>} : vector<1x16x16xbf16>, vector<1x16x8xbf16>, vector<1x16x8xf32> -> vector<1x16x8xf32>
    "tpu.trace_stop"() : () -> ()
    %436 = tpu.concatenate %372, %393, %414, %435 in 2 : vector<1x16x8xf32>, vector<1x16x8xf32>, vector<1x16x8xf32>, vector<1x16x8xf32> -> vector<1x16x32xf32>
    %437 = vector.extract_strided_slice %347 {offsets = [0, 0, 0], sizes = [1, 8, 8], strides = [1, 1, 1]} : vector<1x8x32xf32> to vector<1x8x8xf32>
    %438 = arith.truncf %437 : vector<1x8x8xf32> to vector<1x8x8xbf16>
    %439 = vector.extract_strided_slice %351 {offsets = [0, 0, 0], sizes = [1, 8, 8], strides = [1, 1, 1]} : vector<1x8x32xf32> to vector<1x8x8xf32>
    %440 = arith.truncf %439 : vector<1x8x8xf32> to vector<1x8x8xbf16>
    %441 = vector.extract_strided_slice %335 {offsets = [0, 0, 0], sizes = [1, 8, 8], strides = [1, 1, 1]} : vector<1x8x32xf32> to vector<1x8x8xf32>
    %442 = arith.truncf %441 : vector<1x8x8xf32> to vector<1x8x8xbf16>
    "tpu.trace_start"() <{level = 10 : i32, message = "bnd,bmd->bnm"}> : () -> ()
    %cst_153 = arith.constant dense<0.000000e+00> : vector<1x8x8xf32>
    %443 = tpu.matmul %438, %440, %cst_153 {dimension_numbers = #tpu.dot_dimension_numbers<[2], [2], [1], [1], [0, 0, 0, 1, 1, 1], [0], [0]>} : vector<1x8x8xbf16>, vector<1x8x8xbf16>, vector<1x8x8xf32> -> vector<1x8x8xf32>
    "tpu.trace_stop"() : () -> ()
    %444 = vector.broadcast %5 : vector<1x1x8xf32> to vector<1x8x8xf32>
    %445 = arith.addf %443, %444 : vector<1x8x8xf32>
    %cst_154 = arith.constant dense<0xFF800000> : vector<1x8xf32>
    %446 = vector.multi_reduction <maximumf>, %445, %cst_154 [2] : vector<1x8x8xf32> to vector<1x8xf32>
    %447 = vector.shape_cast %446 : vector<1x8xf32> to vector<1x8x1xf32>
    %448 = vector.broadcast %447 : vector<1x8x1xf32> to vector<1x8x8xf32>
    %449 = arith.subf %445, %448 : vector<1x8x8xf32>
    %450 = math.exp %449 : vector<1x8x8xf32>
    %cst_155 = arith.constant dense<0.000000e+00> : vector<1x8xf32>
    %451 = vector.multi_reduction <add>, %450, %cst_155 [2] : vector<1x8x8xf32> to vector<1x8xf32>
    %452 = vector.shape_cast %451 : vector<1x8xf32> to vector<1x8x1xf32>
    %453 = tpu.reciprocal %452 {approx = true} : vector<1x8x1xf32> -> vector<1x8x1xf32>
    %454 = vector.broadcast %453 : vector<1x8x1xf32> to vector<1x8x8xf32>
    %455 = arith.mulf %450, %454 : vector<1x8x8xf32>
    %456 = arith.truncf %455 : vector<1x8x8xf32> to vector<1x8x8xbf16>
    "tpu.trace_start"() <{level = 10 : i32, message = "bnm,bmd->bnd"}> : () -> ()
    %cst_156 = arith.constant dense<0.000000e+00> : vector<1x8x8xf32>
    %457 = tpu.matmul %456, %442, %cst_156 {dimension_numbers = #tpu.dot_dimension_numbers<[2], [1], [1], [2], [0, 0, 0, 1, 1, 2], [0], [0]>} : vector<1x8x8xbf16>, vector<1x8x8xbf16>, vector<1x8x8xf32> -> vector<1x8x8xf32>
    "tpu.trace_stop"() : () -> ()
    %458 = vector.extract_strided_slice %347 {offsets = [0, 0, 8], sizes = [1, 8, 8], strides = [1, 1, 1]} : vector<1x8x32xf32> to vector<1x8x8xf32>
    %459 = arith.truncf %458 : vector<1x8x8xf32> to vector<1x8x8xbf16>
    %460 = vector.extract_strided_slice %351 {offsets = [0, 0, 8], sizes = [1, 8, 8], strides = [1, 1, 1]} : vector<1x8x32xf32> to vector<1x8x8xf32>
    %461 = arith.truncf %460 : vector<1x8x8xf32> to vector<1x8x8xbf16>
    %462 = vector.extract_strided_slice %335 {offsets = [0, 0, 8], sizes = [1, 8, 8], strides = [1, 1, 1]} : vector<1x8x32xf32> to vector<1x8x8xf32>
    %463 = arith.truncf %462 : vector<1x8x8xf32> to vector<1x8x8xbf16>
    "tpu.trace_start"() <{level = 10 : i32, message = "bnd,bmd->bnm"}> : () -> ()
    %cst_157 = arith.constant dense<0.000000e+00> : vector<1x8x8xf32>
    %464 = tpu.matmul %459, %461, %cst_157 {dimension_numbers = #tpu.dot_dimension_numbers<[2], [2], [1], [1], [0, 0, 0, 1, 1, 1], [0], [0]>} : vector<1x8x8xbf16>, vector<1x8x8xbf16>, vector<1x8x8xf32> -> vector<1x8x8xf32>
    "tpu.trace_stop"() : () -> ()
    %465 = vector.broadcast %5 : vector<1x1x8xf32> to vector<1x8x8xf32>
    %466 = arith.addf %464, %465 : vector<1x8x8xf32>
    %cst_158 = arith.constant dense<0xFF800000> : vector<1x8xf32>
    %467 = vector.multi_reduction <maximumf>, %466, %cst_158 [2] : vector<1x8x8xf32> to vector<1x8xf32>
    %468 = vector.shape_cast %467 : vector<1x8xf32> to vector<1x8x1xf32>
    %469 = vector.broadcast %468 : vector<1x8x1xf32> to vector<1x8x8xf32>
    %470 = arith.subf %466, %469 : vector<1x8x8xf32>
    %471 = math.exp %470 : vector<1x8x8xf32>
    %cst_159 = arith.constant dense<0.000000e+00> : vector<1x8xf32>
    %472 = vector.multi_reduction <add>, %471, %cst_159 [2] : vector<1x8x8xf32> to vector<1x8xf32>
    %473 = vector.shape_cast %472 : vector<1x8xf32> to vector<1x8x1xf32>
    %474 = tpu.reciprocal %473 {approx = true} : vector<1x8x1xf32> -> vector<1x8x1xf32>
    %475 = vector.broadcast %474 : vector<1x8x1xf32> to vector<1x8x8xf32>
    %476 = arith.mulf %471, %475 : vector<1x8x8xf32>
    %477 = arith.truncf %476 : vector<1x8x8xf32> to vector<1x8x8xbf16>
    "tpu.trace_start"() <{level = 10 : i32, message = "bnm,bmd->bnd"}> : () -> ()
    %cst_160 = arith.constant dense<0.000000e+00> : vector<1x8x8xf32>
    %478 = tpu.matmul %477, %463, %cst_160 {dimension_numbers = #tpu.dot_dimension_numbers<[2], [1], [1], [2], [0, 0, 0, 1, 1, 2], [0], [0]>} : vector<1x8x8xbf16>, vector<1x8x8xbf16>, vector<1x8x8xf32> -> vector<1x8x8xf32>
    "tpu.trace_stop"() : () -> ()
    %479 = vector.extract_strided_slice %347 {offsets = [0, 0, 16], sizes = [1, 8, 8], strides = [1, 1, 1]} : vector<1x8x32xf32> to vector<1x8x8xf32>
    %480 = arith.truncf %479 : vector<1x8x8xf32> to vector<1x8x8xbf16>
    %481 = vector.extract_strided_slice %351 {offsets = [0, 0, 16], sizes = [1, 8, 8], strides = [1, 1, 1]} : vector<1x8x32xf32> to vector<1x8x8xf32>
    %482 = arith.truncf %481 : vector<1x8x8xf32> to vector<1x8x8xbf16>
    %483 = vector.extract_strided_slice %335 {offsets = [0, 0, 16], sizes = [1, 8, 8], strides = [1, 1, 1]} : vector<1x8x32xf32> to vector<1x8x8xf32>
    %484 = arith.truncf %483 : vector<1x8x8xf32> to vector<1x8x8xbf16>
    "tpu.trace_start"() <{level = 10 : i32, message = "bnd,bmd->bnm"}> : () -> ()
    %cst_161 = arith.constant dense<0.000000e+00> : vector<1x8x8xf32>
    %485 = tpu.matmul %480, %482, %cst_161 {dimension_numbers = #tpu.dot_dimension_numbers<[2], [2], [1], [1], [0, 0, 0, 1, 1, 1], [0], [0]>} : vector<1x8x8xbf16>, vector<1x8x8xbf16>, vector<1x8x8xf32> -> vector<1x8x8xf32>
    "tpu.trace_stop"() : () -> ()
    %486 = vector.broadcast %5 : vector<1x1x8xf32> to vector<1x8x8xf32>
    %487 = arith.addf %485, %486 : vector<1x8x8xf32>
    %cst_162 = arith.constant dense<0xFF800000> : vector<1x8xf32>
    %488 = vector.multi_reduction <maximumf>, %487, %cst_162 [2] : vector<1x8x8xf32> to vector<1x8xf32>
    %489 = vector.shape_cast %488 : vector<1x8xf32> to vector<1x8x1xf32>
    %490 = vector.broadcast %489 : vector<1x8x1xf32> to vector<1x8x8xf32>
    %491 = arith.subf %487, %490 : vector<1x8x8xf32>
    %492 = math.exp %491 : vector<1x8x8xf32>
    %cst_163 = arith.constant dense<0.000000e+00> : vector<1x8xf32>
    %493 = vector.multi_reduction <add>, %492, %cst_163 [2] : vector<1x8x8xf32> to vector<1x8xf32>
    %494 = vector.shape_cast %493 : vector<1x8xf32> to vector<1x8x1xf32>
    %495 = tpu.reciprocal %494 {approx = true} : vector<1x8x1xf32> -> vector<1x8x1xf32>
    %496 = vector.broadcast %495 : vector<1x8x1xf32> to vector<1x8x8xf32>
    %497 = arith.mulf %492, %496 : vector<1x8x8xf32>
    %498 = arith.truncf %497 : vector<1x8x8xf32> to vector<1x8x8xbf16>
    "tpu.trace_start"() <{level = 10 : i32, message = "bnm,bmd->bnd"}> : () -> ()
    %cst_164 = arith.constant dense<0.000000e+00> : vector<1x8x8xf32>
    %499 = tpu.matmul %498, %484, %cst_164 {dimension_numbers = #tpu.dot_dimension_numbers<[2], [1], [1], [2], [0, 0, 0, 1, 1, 2], [0], [0]>} : vector<1x8x8xbf16>, vector<1x8x8xbf16>, vector<1x8x8xf32> -> vector<1x8x8xf32>
    "tpu.trace_stop"() : () -> ()
    %500 = vector.extract_strided_slice %347 {offsets = [0, 0, 24], sizes = [1, 8, 8], strides = [1, 1, 1]} : vector<1x8x32xf32> to vector<1x8x8xf32>
    %501 = arith.truncf %500 : vector<1x8x8xf32> to vector<1x8x8xbf16>
    %502 = vector.extract_strided_slice %351 {offsets = [0, 0, 24], sizes = [1, 8, 8], strides = [1, 1, 1]} : vector<1x8x32xf32> to vector<1x8x8xf32>
    %503 = arith.truncf %502 : vector<1x8x8xf32> to vector<1x8x8xbf16>
    %504 = vector.extract_strided_slice %335 {offsets = [0, 0, 24], sizes = [1, 8, 8], strides = [1, 1, 1]} : vector<1x8x32xf32> to vector<1x8x8xf32>
    %505 = arith.truncf %504 : vector<1x8x8xf32> to vector<1x8x8xbf16>
    "tpu.trace_start"() <{level = 10 : i32, message = "bnd,bmd->bnm"}> : () -> ()
    %cst_165 = arith.constant dense<0.000000e+00> : vector<1x8x8xf32>
    %506 = tpu.matmul %501, %503, %cst_165 {dimension_numbers = #tpu.dot_dimension_numbers<[2], [2], [1], [1], [0, 0, 0, 1, 1, 1], [0], [0]>} : vector<1x8x8xbf16>, vector<1x8x8xbf16>, vector<1x8x8xf32> -> vector<1x8x8xf32>
    "tpu.trace_stop"() : () -> ()
    %507 = vector.broadcast %5 : vector<1x1x8xf32> to vector<1x8x8xf32>
    %508 = arith.addf %506, %507 : vector<1x8x8xf32>
    %cst_166 = arith.constant dense<0xFF800000> : vector<1x8xf32>
    %509 = vector.multi_reduction <maximumf>, %508, %cst_166 [2] : vector<1x8x8xf32> to vector<1x8xf32>
    %510 = vector.shape_cast %509 : vector<1x8xf32> to vector<1x8x1xf32>
    %511 = vector.broadcast %510 : vector<1x8x1xf32> to vector<1x8x8xf32>
    %512 = arith.subf %508, %511 : vector<1x8x8xf32>
    %513 = math.exp %512 : vector<1x8x8xf32>
    %cst_167 = arith.constant dense<0.000000e+00> : vector<1x8xf32>
    %514 = vector.multi_reduction <add>, %513, %cst_167 [2] : vector<1x8x8xf32> to vector<1x8xf32>
    %515 = vector.shape_cast %514 : vector<1x8xf32> to vector<1x8x1xf32>
    %516 = tpu.reciprocal %515 {approx = true} : vector<1x8x1xf32> -> vector<1x8x1xf32>
    %517 = vector.broadcast %516 : vector<1x8x1xf32> to vector<1x8x8xf32>
    %518 = arith.mulf %513, %517 : vector<1x8x8xf32>
    %519 = arith.truncf %518 : vector<1x8x8xf32> to vector<1x8x8xbf16>
    "tpu.trace_start"() <{level = 10 : i32, message = "bnm,bmd->bnd"}> : () -> ()
    %cst_168 = arith.constant dense<0.000000e+00> : vector<1x8x8xf32>
    %520 = tpu.matmul %519, %505, %cst_168 {dimension_numbers = #tpu.dot_dimension_numbers<[2], [1], [1], [2], [0, 0, 0, 1, 1, 2], [0], [0]>} : vector<1x8x8xbf16>, vector<1x8x8xbf16>, vector<1x8x8xf32> -> vector<1x8x8xf32>
    "tpu.trace_stop"() : () -> ()
    %521 = tpu.concatenate %457, %478, %499, %520 in 2 : vector<1x8x8xf32>, vector<1x8x8xf32>, vector<1x8x8xf32>, vector<1x8x8xf32> -> vector<1x8x32xf32>
    %522 = arith.addf %231, %436 : vector<1x16x32xf32>
    %523 = vector.shape_cast %522 : vector<1x16x32xf32> to vector<16x32xf32>
    %524 = arith.truncf %523 : vector<16x32xf32> to vector<16x32xbf16>
    %cst_169 = arith.constant dense<0.000000e+00> : vector<16x32xf32>
    %525 = tpu.matmul %524, %259, %cst_169 {dimension_numbers = #tpu.dot_dimension_numbers<[1], [0], [0], [1], [0, 0, 1, 1], [], []>} : vector<16x32xbf16>, vector<32x32xbf16>, vector<16x32xf32> -> vector<16x32xf32>
    %526 = vector.broadcast %261 : vector<1x32xf32> to vector<16x32xf32>
    %527 = arith.addf %525, %526 : vector<16x32xf32>
    %528 = vector.shape_cast %527 : vector<16x32xf32> to vector<1x16x32xf32>
    %529 = arith.addf %241, %521 : vector<1x8x32xf32>
    %530 = vector.shape_cast %529 : vector<1x8x32xf32> to vector<8x32xf32>
    %531 = arith.truncf %530 : vector<8x32xf32> to vector<8x32xbf16>
    %cst_170 = arith.constant dense<0.000000e+00> : vector<8x32xf32>
    %532 = tpu.matmul %531, %263, %cst_170 {dimension_numbers = #tpu.dot_dimension_numbers<[1], [0], [0], [1], [0, 0, 1, 1], [], []>} : vector<8x32xbf16>, vector<32x32xbf16>, vector<8x32xf32> -> vector<8x32xf32>
    %533 = vector.broadcast %265 : vector<1x32xf32> to vector<8x32xf32>
    %534 = arith.addf %532, %533 : vector<8x32xf32>
    %535 = vector.shape_cast %534 : vector<8x32xf32> to vector<1x8x32xf32>
    %c2_171 = arith.constant 2 : index
    %c0_172 = arith.constant 0 : index
    %c0_173 = arith.constant 0 : index
    %536 = vector.load %arg14[%c2_171, %c0_172, %c0_173] : memref<6x32x96xbf16, #tpu.memory_space<vmem>>, vector<1x32x96xbf16>
    %537 = vector.shape_cast %536 : vector<1x32x96xbf16> to vector<32x96xbf16>
    %c4_174 = arith.constant 4 : index
    %c0_175 = arith.constant 0 : index
    %c0_176 = arith.constant 0 : index
    %538 = vector.load %arg8[%c4_174, %c0_175, %c0_176] : memref<8x1x96xf32, #tpu.memory_space<vmem>>, vector<1x1x96xf32>
    %539 = vector.shape_cast %538 : vector<1x1x96xf32> to vector<1x96xf32>
    %c3_177 = arith.constant 3 : index
    %c0_178 = arith.constant 0 : index
    %c0_179 = arith.constant 0 : index
    %540 = vector.load %arg14[%c3_177, %c0_178, %c0_179] : memref<6x32x96xbf16, #tpu.memory_space<vmem>>, vector<1x32x96xbf16>
    %541 = vector.shape_cast %540 : vector<1x32x96xbf16> to vector<32x96xbf16>
    %c5_180 = arith.constant 5 : index
    %c0_181 = arith.constant 0 : index
    %c0_182 = arith.constant 0 : index
    %542 = vector.load %arg8[%c5_180, %c0_181, %c0_182] : memref<8x1x96xf32, #tpu.memory_space<vmem>>, vector<1x1x96xf32>
    %543 = vector.shape_cast %542 : vector<1x1x96xf32> to vector<1x96xf32>
    %c6 = arith.constant 6 : index
    %c0_183 = arith.constant 0 : index
    %c0_184 = arith.constant 0 : index
    %544 = vector.load %arg11[%c6, %c0_183, %c0_184] : memref<14x32x32xbf16, #tpu.memory_space<vmem>>, vector<1x32x32xbf16>
    %545 = vector.shape_cast %544 : vector<1x32x32xbf16> to vector<32x32xbf16>
    %c7 = arith.constant 7 : index
    %c0_185 = arith.constant 0 : index
    %c0_186 = arith.constant 0 : index
    %546 = vector.load %arg11[%c7, %c0_185, %c0_186] : memref<14x32x32xbf16, #tpu.memory_space<vmem>>, vector<1x32x32xbf16>
    %547 = vector.shape_cast %546 : vector<1x32x32xbf16> to vector<32x32xbf16>
    %c6_187 = arith.constant 6 : index
    %c0_188 = arith.constant 0 : index
    %c0_189 = arith.constant 0 : index
    %548 = vector.load %arg12[%c6_187, %c0_188, %c0_189] : memref<12x1x32xf32, #tpu.memory_space<vmem>>, vector<1x1x32xf32>
    %549 = vector.shape_cast %548 : vector<1x1x32xf32> to vector<1x32xf32>
    %c8 = arith.constant 8 : index
    %c0_190 = arith.constant 0 : index
    %c0_191 = arith.constant 0 : index
    %550 = vector.load %arg11[%c8, %c0_190, %c0_191] : memref<14x32x32xbf16, #tpu.memory_space<vmem>>, vector<1x32x32xbf16>
    %551 = vector.shape_cast %550 : vector<1x32x32xbf16> to vector<32x32xbf16>
    %c9 = arith.constant 9 : index
    %c0_192 = arith.constant 0 : index
    %c0_193 = arith.constant 0 : index
    %552 = vector.load %arg11[%c9, %c0_192, %c0_193] : memref<14x32x32xbf16, #tpu.memory_space<vmem>>, vector<1x32x32xbf16>
    %553 = vector.shape_cast %552 : vector<1x32x32xbf16> to vector<32x32xbf16>
    %c7_194 = arith.constant 7 : index
    %c0_195 = arith.constant 0 : index
    %c0_196 = arith.constant 0 : index
    %554 = vector.load %arg12[%c7_194, %c0_195, %c0_196] : memref<12x1x32xf32, #tpu.memory_space<vmem>>, vector<1x1x32xf32>
    %555 = vector.shape_cast %554 : vector<1x1x32xf32> to vector<1x32xf32>
    %cst_197 = arith.constant 0.000000e+00 : f32
    %556 = vector.broadcast %cst_197 : f32 to vector<1x16x32xf32>
    %557 = arith.maximumf %528, %556 : vector<1x16x32xf32>
    %558 = arith.truncf %557 : vector<1x16x32xf32> to vector<1x16x32xbf16>
    %559 = vector.shape_cast %558 : vector<1x16x32xbf16> to vector<16x32xbf16>
    %cst_198 = arith.constant dense<0.000000e+00> : vector<16x96xf32>
    %560 = tpu.matmul %559, %537, %cst_198 {dimension_numbers = #tpu.dot_dimension_numbers<[1], [0], [0], [1], [0, 0, 1, 1], [], []>} : vector<16x32xbf16>, vector<32x96xbf16>, vector<16x96xf32> -> vector<16x96xf32>
    %561 = vector.broadcast %539 : vector<1x96xf32> to vector<16x96xf32>
    %562 = arith.addf %560, %561 : vector<16x96xf32>
    %563 = vector.shape_cast %562 : vector<16x96xf32> to vector<1x16x96xf32>
    %564 = vector.broadcast %2 : vector<1x16x1xf32> to vector<1x16x96xf32>
    %565 = arith.mulf %563, %564 : vector<1x16x96xf32>
    %cst_199 = arith.constant 0.000000e+00 : f32
    %566 = vector.broadcast %cst_199 : f32 to vector<1x8x32xf32>
    %567 = arith.maximumf %535, %566 : vector<1x8x32xf32>
    %568 = arith.truncf %567 : vector<1x8x32xf32> to vector<1x8x32xbf16>
    %569 = vector.shape_cast %568 : vector<1x8x32xbf16> to vector<8x32xbf16>
    %cst_200 = arith.constant dense<0.000000e+00> : vector<8x96xf32>
    %570 = tpu.matmul %569, %541, %cst_200 {dimension_numbers = #tpu.dot_dimension_numbers<[1], [0], [0], [1], [0, 0, 1, 1], [], []>} : vector<8x32xbf16>, vector<32x96xbf16>, vector<8x96xf32> -> vector<8x96xf32>
    %571 = vector.broadcast %543 : vector<1x96xf32> to vector<8x96xf32>
    %572 = arith.addf %570, %571 : vector<8x96xf32>
    %573 = vector.shape_cast %572 : vector<8x96xf32> to vector<1x8x96xf32>
    %574 = vector.broadcast %3 : vector<1x8x1xf32> to vector<1x8x96xf32>
    %575 = arith.mulf %573, %574 : vector<1x8x96xf32>
    %576 = vector.extract_strided_slice %565 {offsets = [0, 0, 0], sizes = [1, 16, 32], strides = [1, 1, 1]} : vector<1x16x96xf32> to vector<1x16x32xf32>
    %577 = vector.extract_strided_slice %565 {offsets = [0, 0, 32], sizes = [1, 16, 32], strides = [1, 1, 1]} : vector<1x16x96xf32> to vector<1x16x32xf32>
    %578 = vector.extract_strided_slice %565 {offsets = [0, 0, 64], sizes = [1, 16, 32], strides = [1, 1, 1]} : vector<1x16x96xf32> to vector<1x16x32xf32>
    %579 = vector.extract_strided_slice %575 {offsets = [0, 0, 0], sizes = [1, 8, 32], strides = [1, 1, 1]} : vector<1x8x96xf32> to vector<1x8x32xf32>
    %580 = vector.extract_strided_slice %575 {offsets = [0, 0, 32], sizes = [1, 8, 32], strides = [1, 1, 1]} : vector<1x8x96xf32> to vector<1x8x32xf32>
    %581 = vector.extract_strided_slice %575 {offsets = [0, 0, 64], sizes = [1, 8, 32], strides = [1, 1, 1]} : vector<1x8x96xf32> to vector<1x8x32xf32>
    %582 = vector.extract_strided_slice %577 {offsets = [0, 0, 0], sizes = [1, 16, 8], strides = [1, 1, 1]} : vector<1x16x32xf32> to vector<1x16x8xf32>
    %583 = arith.truncf %582 : vector<1x16x8xf32> to vector<1x16x8xbf16>
    %584 = vector.extract_strided_slice %579 {offsets = [0, 0, 0], sizes = [1, 8, 8], strides = [1, 1, 1]} : vector<1x8x32xf32> to vector<1x8x8xf32>
    %585 = arith.truncf %584 : vector<1x8x8xf32> to vector<1x8x8xbf16>
    %586 = vector.extract_strided_slice %581 {offsets = [0, 0, 0], sizes = [1, 8, 8], strides = [1, 1, 1]} : vector<1x8x32xf32> to vector<1x8x8xf32>
    %587 = arith.truncf %586 : vector<1x8x8xf32> to vector<1x8x8xbf16>
    "tpu.trace_start"() <{level = 10 : i32, message = "bnd,bmd->bnm"}> : () -> ()
    %cst_201 = arith.constant dense<0.000000e+00> : vector<1x16x8xf32>
    %588 = tpu.matmul %583, %585, %cst_201 {dimension_numbers = #tpu.dot_dimension_numbers<[2], [2], [1], [1], [0, 0, 0, 1, 1, 1], [0], [0]>} : vector<1x16x8xbf16>, vector<1x8x8xbf16>, vector<1x16x8xf32> -> vector<1x16x8xf32>
    "tpu.trace_stop"() : () -> ()
    %589 = vector.broadcast %5 : vector<1x1x8xf32> to vector<1x16x8xf32>
    %590 = arith.addf %588, %589 : vector<1x16x8xf32>
    %cst_202 = arith.constant dense<0xFF800000> : vector<1x16xf32>
    %591 = vector.multi_reduction <maximumf>, %590, %cst_202 [2] : vector<1x16x8xf32> to vector<1x16xf32>
    %592 = vector.shape_cast %591 : vector<1x16xf32> to vector<1x16x1xf32>
    %593 = vector.broadcast %592 : vector<1x16x1xf32> to vector<1x16x8xf32>
    %594 = arith.subf %590, %593 : vector<1x16x8xf32>
    %595 = math.exp %594 : vector<1x16x8xf32>
    %cst_203 = arith.constant dense<0.000000e+00> : vector<1x16xf32>
    %596 = vector.multi_reduction <add>, %595, %cst_203 [2] : vector<1x16x8xf32> to vector<1x16xf32>
    %597 = vector.shape_cast %596 : vector<1x16xf32> to vector<1x16x1xf32>
    %598 = tpu.reciprocal %597 {approx = true} : vector<1x16x1xf32> -> vector<1x16x1xf32>
    %599 = vector.broadcast %598 : vector<1x16x1xf32> to vector<1x16x8xf32>
    %600 = arith.mulf %595, %599 : vector<1x16x8xf32>
    %601 = arith.truncf %600 : vector<1x16x8xf32> to vector<1x16x8xbf16>
    "tpu.trace_start"() <{level = 10 : i32, message = "bnm,bmd->bnd"}> : () -> ()
    %cst_204 = arith.constant dense<0.000000e+00> : vector<1x16x8xf32>
    %602 = tpu.matmul %601, %587, %cst_204 {dimension_numbers = #tpu.dot_dimension_numbers<[2], [1], [1], [2], [0, 0, 0, 1, 1, 2], [0], [0]>} : vector<1x16x8xbf16>, vector<1x8x8xbf16>, vector<1x16x8xf32> -> vector<1x16x8xf32>
    "tpu.trace_stop"() : () -> ()
    %603 = vector.extract_strided_slice %577 {offsets = [0, 0, 8], sizes = [1, 16, 8], strides = [1, 1, 1]} : vector<1x16x32xf32> to vector<1x16x8xf32>
    %604 = arith.truncf %603 : vector<1x16x8xf32> to vector<1x16x8xbf16>
    %605 = vector.extract_strided_slice %579 {offsets = [0, 0, 8], sizes = [1, 8, 8], strides = [1, 1, 1]} : vector<1x8x32xf32> to vector<1x8x8xf32>
    %606 = arith.truncf %605 : vector<1x8x8xf32> to vector<1x8x8xbf16>
    %607 = vector.extract_strided_slice %581 {offsets = [0, 0, 8], sizes = [1, 8, 8], strides = [1, 1, 1]} : vector<1x8x32xf32> to vector<1x8x8xf32>
    %608 = arith.truncf %607 : vector<1x8x8xf32> to vector<1x8x8xbf16>
    "tpu.trace_start"() <{level = 10 : i32, message = "bnd,bmd->bnm"}> : () -> ()
    %cst_205 = arith.constant dense<0.000000e+00> : vector<1x16x8xf32>
    %609 = tpu.matmul %604, %606, %cst_205 {dimension_numbers = #tpu.dot_dimension_numbers<[2], [2], [1], [1], [0, 0, 0, 1, 1, 1], [0], [0]>} : vector<1x16x8xbf16>, vector<1x8x8xbf16>, vector<1x16x8xf32> -> vector<1x16x8xf32>
    "tpu.trace_stop"() : () -> ()
    %610 = vector.broadcast %5 : vector<1x1x8xf32> to vector<1x16x8xf32>
    %611 = arith.addf %609, %610 : vector<1x16x8xf32>
    %cst_206 = arith.constant dense<0xFF800000> : vector<1x16xf32>
    %612 = vector.multi_reduction <maximumf>, %611, %cst_206 [2] : vector<1x16x8xf32> to vector<1x16xf32>
    %613 = vector.shape_cast %612 : vector<1x16xf32> to vector<1x16x1xf32>
    %614 = vector.broadcast %613 : vector<1x16x1xf32> to vector<1x16x8xf32>
    %615 = arith.subf %611, %614 : vector<1x16x8xf32>
    %616 = math.exp %615 : vector<1x16x8xf32>
    %cst_207 = arith.constant dense<0.000000e+00> : vector<1x16xf32>
    %617 = vector.multi_reduction <add>, %616, %cst_207 [2] : vector<1x16x8xf32> to vector<1x16xf32>
    %618 = vector.shape_cast %617 : vector<1x16xf32> to vector<1x16x1xf32>
    %619 = tpu.reciprocal %618 {approx = true} : vector<1x16x1xf32> -> vector<1x16x1xf32>
    %620 = vector.broadcast %619 : vector<1x16x1xf32> to vector<1x16x8xf32>
    %621 = arith.mulf %616, %620 : vector<1x16x8xf32>
    %622 = arith.truncf %621 : vector<1x16x8xf32> to vector<1x16x8xbf16>
    "tpu.trace_start"() <{level = 10 : i32, message = "bnm,bmd->bnd"}> : () -> ()
    %cst_208 = arith.constant dense<0.000000e+00> : vector<1x16x8xf32>
    %623 = tpu.matmul %622, %608, %cst_208 {dimension_numbers = #tpu.dot_dimension_numbers<[2], [1], [1], [2], [0, 0, 0, 1, 1, 2], [0], [0]>} : vector<1x16x8xbf16>, vector<1x8x8xbf16>, vector<1x16x8xf32> -> vector<1x16x8xf32>
    "tpu.trace_stop"() : () -> ()
    %624 = vector.extract_strided_slice %577 {offsets = [0, 0, 16], sizes = [1, 16, 8], strides = [1, 1, 1]} : vector<1x16x32xf32> to vector<1x16x8xf32>
    %625 = arith.truncf %624 : vector<1x16x8xf32> to vector<1x16x8xbf16>
    %626 = vector.extract_strided_slice %579 {offsets = [0, 0, 16], sizes = [1, 8, 8], strides = [1, 1, 1]} : vector<1x8x32xf32> to vector<1x8x8xf32>
    %627 = arith.truncf %626 : vector<1x8x8xf32> to vector<1x8x8xbf16>
    %628 = vector.extract_strided_slice %581 {offsets = [0, 0, 16], sizes = [1, 8, 8], strides = [1, 1, 1]} : vector<1x8x32xf32> to vector<1x8x8xf32>
    %629 = arith.truncf %628 : vector<1x8x8xf32> to vector<1x8x8xbf16>
    "tpu.trace_start"() <{level = 10 : i32, message = "bnd,bmd->bnm"}> : () -> ()
    %cst_209 = arith.constant dense<0.000000e+00> : vector<1x16x8xf32>
    %630 = tpu.matmul %625, %627, %cst_209 {dimension_numbers = #tpu.dot_dimension_numbers<[2], [2], [1], [1], [0, 0, 0, 1, 1, 1], [0], [0]>} : vector<1x16x8xbf16>, vector<1x8x8xbf16>, vector<1x16x8xf32> -> vector<1x16x8xf32>
    "tpu.trace_stop"() : () -> ()
    %631 = vector.broadcast %5 : vector<1x1x8xf32> to vector<1x16x8xf32>
    %632 = arith.addf %630, %631 : vector<1x16x8xf32>
    %cst_210 = arith.constant dense<0xFF800000> : vector<1x16xf32>
    %633 = vector.multi_reduction <maximumf>, %632, %cst_210 [2] : vector<1x16x8xf32> to vector<1x16xf32>
    %634 = vector.shape_cast %633 : vector<1x16xf32> to vector<1x16x1xf32>
    %635 = vector.broadcast %634 : vector<1x16x1xf32> to vector<1x16x8xf32>
    %636 = arith.subf %632, %635 : vector<1x16x8xf32>
    %637 = math.exp %636 : vector<1x16x8xf32>
    %cst_211 = arith.constant dense<0.000000e+00> : vector<1x16xf32>
    %638 = vector.multi_reduction <add>, %637, %cst_211 [2] : vector<1x16x8xf32> to vector<1x16xf32>
    %639 = vector.shape_cast %638 : vector<1x16xf32> to vector<1x16x1xf32>
    %640 = tpu.reciprocal %639 {approx = true} : vector<1x16x1xf32> -> vector<1x16x1xf32>
    %641 = vector.broadcast %640 : vector<1x16x1xf32> to vector<1x16x8xf32>
    %642 = arith.mulf %637, %641 : vector<1x16x8xf32>
    %643 = arith.truncf %642 : vector<1x16x8xf32> to vector<1x16x8xbf16>
    "tpu.trace_start"() <{level = 10 : i32, message = "bnm,bmd->bnd"}> : () -> ()
    %cst_212 = arith.constant dense<0.000000e+00> : vector<1x16x8xf32>
    %644 = tpu.matmul %643, %629, %cst_212 {dimension_numbers = #tpu.dot_dimension_numbers<[2], [1], [1], [2], [0, 0, 0, 1, 1, 2], [0], [0]>} : vector<1x16x8xbf16>, vector<1x8x8xbf16>, vector<1x16x8xf32> -> vector<1x16x8xf32>
    "tpu.trace_stop"() : () -> ()
    %645 = vector.extract_strided_slice %577 {offsets = [0, 0, 24], sizes = [1, 16, 8], strides = [1, 1, 1]} : vector<1x16x32xf32> to vector<1x16x8xf32>
    %646 = arith.truncf %645 : vector<1x16x8xf32> to vector<1x16x8xbf16>
    %647 = vector.extract_strided_slice %579 {offsets = [0, 0, 24], sizes = [1, 8, 8], strides = [1, 1, 1]} : vector<1x8x32xf32> to vector<1x8x8xf32>
    %648 = arith.truncf %647 : vector<1x8x8xf32> to vector<1x8x8xbf16>
    %649 = vector.extract_strided_slice %581 {offsets = [0, 0, 24], sizes = [1, 8, 8], strides = [1, 1, 1]} : vector<1x8x32xf32> to vector<1x8x8xf32>
    %650 = arith.truncf %649 : vector<1x8x8xf32> to vector<1x8x8xbf16>
    "tpu.trace_start"() <{level = 10 : i32, message = "bnd,bmd->bnm"}> : () -> ()
    %cst_213 = arith.constant dense<0.000000e+00> : vector<1x16x8xf32>
    %651 = tpu.matmul %646, %648, %cst_213 {dimension_numbers = #tpu.dot_dimension_numbers<[2], [2], [1], [1], [0, 0, 0, 1, 1, 1], [0], [0]>} : vector<1x16x8xbf16>, vector<1x8x8xbf16>, vector<1x16x8xf32> -> vector<1x16x8xf32>
    "tpu.trace_stop"() : () -> ()
    %652 = vector.broadcast %5 : vector<1x1x8xf32> to vector<1x16x8xf32>
    %653 = arith.addf %651, %652 : vector<1x16x8xf32>
    %cst_214 = arith.constant dense<0xFF800000> : vector<1x16xf32>
    %654 = vector.multi_reduction <maximumf>, %653, %cst_214 [2] : vector<1x16x8xf32> to vector<1x16xf32>
    %655 = vector.shape_cast %654 : vector<1x16xf32> to vector<1x16x1xf32>
    %656 = vector.broadcast %655 : vector<1x16x1xf32> to vector<1x16x8xf32>
    %657 = arith.subf %653, %656 : vector<1x16x8xf32>
    %658 = math.exp %657 : vector<1x16x8xf32>
    %cst_215 = arith.constant dense<0.000000e+00> : vector<1x16xf32>
    %659 = vector.multi_reduction <add>, %658, %cst_215 [2] : vector<1x16x8xf32> to vector<1x16xf32>
    %660 = vector.shape_cast %659 : vector<1x16xf32> to vector<1x16x1xf32>
    %661 = tpu.reciprocal %660 {approx = true} : vector<1x16x1xf32> -> vector<1x16x1xf32>
    %662 = vector.broadcast %661 : vector<1x16x1xf32> to vector<1x16x8xf32>
    %663 = arith.mulf %658, %662 : vector<1x16x8xf32>
    %664 = arith.truncf %663 : vector<1x16x8xf32> to vector<1x16x8xbf16>
    "tpu.trace_start"() <{level = 10 : i32, message = "bnm,bmd->bnd"}> : () -> ()
    %cst_216 = arith.constant dense<0.000000e+00> : vector<1x16x8xf32>
    %665 = tpu.matmul %664, %650, %cst_216 {dimension_numbers = #tpu.dot_dimension_numbers<[2], [1], [1], [2], [0, 0, 0, 1, 1, 2], [0], [0]>} : vector<1x16x8xbf16>, vector<1x8x8xbf16>, vector<1x16x8xf32> -> vector<1x16x8xf32>
    "tpu.trace_stop"() : () -> ()
    %666 = tpu.concatenate %602, %623, %644, %665 in 2 : vector<1x16x8xf32>, vector<1x16x8xf32>, vector<1x16x8xf32>, vector<1x16x8xf32> -> vector<1x16x32xf32>
    %667 = vector.extract_strided_slice %580 {offsets = [0, 0, 0], sizes = [1, 8, 8], strides = [1, 1, 1]} : vector<1x8x32xf32> to vector<1x8x8xf32>
    %668 = arith.truncf %667 : vector<1x8x8xf32> to vector<1x8x8xbf16>
    %669 = vector.extract_strided_slice %576 {offsets = [0, 0, 0], sizes = [1, 16, 8], strides = [1, 1, 1]} : vector<1x16x32xf32> to vector<1x16x8xf32>
    %670 = arith.truncf %669 : vector<1x16x8xf32> to vector<1x16x8xbf16>
    %671 = vector.extract_strided_slice %578 {offsets = [0, 0, 0], sizes = [1, 16, 8], strides = [1, 1, 1]} : vector<1x16x32xf32> to vector<1x16x8xf32>
    %672 = arith.truncf %671 : vector<1x16x8xf32> to vector<1x16x8xbf16>
    "tpu.trace_start"() <{level = 10 : i32, message = "bnd,bmd->bnm"}> : () -> ()
    %cst_217 = arith.constant dense<0.000000e+00> : vector<1x8x16xf32>
    %673 = tpu.matmul %668, %670, %cst_217 {dimension_numbers = #tpu.dot_dimension_numbers<[2], [2], [1], [1], [0, 0, 0, 1, 1, 1], [0], [0]>} : vector<1x8x8xbf16>, vector<1x16x8xbf16>, vector<1x8x16xf32> -> vector<1x8x16xf32>
    "tpu.trace_stop"() : () -> ()
    %674 = vector.broadcast %4 : vector<1x1x16xf32> to vector<1x8x16xf32>
    %675 = arith.addf %673, %674 : vector<1x8x16xf32>
    %cst_218 = arith.constant dense<0xFF800000> : vector<1x8xf32>
    %676 = vector.multi_reduction <maximumf>, %675, %cst_218 [2] : vector<1x8x16xf32> to vector<1x8xf32>
    %677 = vector.shape_cast %676 : vector<1x8xf32> to vector<1x8x1xf32>
    %678 = vector.broadcast %677 : vector<1x8x1xf32> to vector<1x8x16xf32>
    %679 = arith.subf %675, %678 : vector<1x8x16xf32>
    %680 = math.exp %679 : vector<1x8x16xf32>
    %cst_219 = arith.constant dense<0.000000e+00> : vector<1x8xf32>
    %681 = vector.multi_reduction <add>, %680, %cst_219 [2] : vector<1x8x16xf32> to vector<1x8xf32>
    %682 = vector.shape_cast %681 : vector<1x8xf32> to vector<1x8x1xf32>
    %683 = tpu.reciprocal %682 {approx = true} : vector<1x8x1xf32> -> vector<1x8x1xf32>
    %684 = vector.broadcast %683 : vector<1x8x1xf32> to vector<1x8x16xf32>
    %685 = arith.mulf %680, %684 : vector<1x8x16xf32>
    %686 = arith.truncf %685 : vector<1x8x16xf32> to vector<1x8x16xbf16>
    "tpu.trace_start"() <{level = 10 : i32, message = "bnm,bmd->bnd"}> : () -> ()
    %cst_220 = arith.constant dense<0.000000e+00> : vector<1x8x8xf32>
    %687 = tpu.matmul %686, %672, %cst_220 {dimension_numbers = #tpu.dot_dimension_numbers<[2], [1], [1], [2], [0, 0, 0, 1, 1, 2], [0], [0]>} : vector<1x8x16xbf16>, vector<1x16x8xbf16>, vector<1x8x8xf32> -> vector<1x8x8xf32>
    "tpu.trace_stop"() : () -> ()
    %688 = vector.extract_strided_slice %580 {offsets = [0, 0, 8], sizes = [1, 8, 8], strides = [1, 1, 1]} : vector<1x8x32xf32> to vector<1x8x8xf32>
    %689 = arith.truncf %688 : vector<1x8x8xf32> to vector<1x8x8xbf16>
    %690 = vector.extract_strided_slice %576 {offsets = [0, 0, 8], sizes = [1, 16, 8], strides = [1, 1, 1]} : vector<1x16x32xf32> to vector<1x16x8xf32>
    %691 = arith.truncf %690 : vector<1x16x8xf32> to vector<1x16x8xbf16>
    %692 = vector.extract_strided_slice %578 {offsets = [0, 0, 8], sizes = [1, 16, 8], strides = [1, 1, 1]} : vector<1x16x32xf32> to vector<1x16x8xf32>
    %693 = arith.truncf %692 : vector<1x16x8xf32> to vector<1x16x8xbf16>
    "tpu.trace_start"() <{level = 10 : i32, message = "bnd,bmd->bnm"}> : () -> ()
    %cst_221 = arith.constant dense<0.000000e+00> : vector<1x8x16xf32>
    %694 = tpu.matmul %689, %691, %cst_221 {dimension_numbers = #tpu.dot_dimension_numbers<[2], [2], [1], [1], [0, 0, 0, 1, 1, 1], [0], [0]>} : vector<1x8x8xbf16>, vector<1x16x8xbf16>, vector<1x8x16xf32> -> vector<1x8x16xf32>
    "tpu.trace_stop"() : () -> ()
    %695 = vector.broadcast %4 : vector<1x1x16xf32> to vector<1x8x16xf32>
    %696 = arith.addf %694, %695 : vector<1x8x16xf32>
    %cst_222 = arith.constant dense<0xFF800000> : vector<1x8xf32>
    %697 = vector.multi_reduction <maximumf>, %696, %cst_222 [2] : vector<1x8x16xf32> to vector<1x8xf32>
    %698 = vector.shape_cast %697 : vector<1x8xf32> to vector<1x8x1xf32>
    %699 = vector.broadcast %698 : vector<1x8x1xf32> to vector<1x8x16xf32>
    %700 = arith.subf %696, %699 : vector<1x8x16xf32>
    %701 = math.exp %700 : vector<1x8x16xf32>
    %cst_223 = arith.constant dense<0.000000e+00> : vector<1x8xf32>
    %702 = vector.multi_reduction <add>, %701, %cst_223 [2] : vector<1x8x16xf32> to vector<1x8xf32>
    %703 = vector.shape_cast %702 : vector<1x8xf32> to vector<1x8x1xf32>
    %704 = tpu.reciprocal %703 {approx = true} : vector<1x8x1xf32> -> vector<1x8x1xf32>
    %705 = vector.broadcast %704 : vector<1x8x1xf32> to vector<1x8x16xf32>
    %706 = arith.mulf %701, %705 : vector<1x8x16xf32>
    %707 = arith.truncf %706 : vector<1x8x16xf32> to vector<1x8x16xbf16>
    "tpu.trace_start"() <{level = 10 : i32, message = "bnm,bmd->bnd"}> : () -> ()
    %cst_224 = arith.constant dense<0.000000e+00> : vector<1x8x8xf32>
    %708 = tpu.matmul %707, %693, %cst_224 {dimension_numbers = #tpu.dot_dimension_numbers<[2], [1], [1], [2], [0, 0, 0, 1, 1, 2], [0], [0]>} : vector<1x8x16xbf16>, vector<1x16x8xbf16>, vector<1x8x8xf32> -> vector<1x8x8xf32>
    "tpu.trace_stop"() : () -> ()
    %709 = vector.extract_strided_slice %580 {offsets = [0, 0, 16], sizes = [1, 8, 8], strides = [1, 1, 1]} : vector<1x8x32xf32> to vector<1x8x8xf32>
    %710 = arith.truncf %709 : vector<1x8x8xf32> to vector<1x8x8xbf16>
    %711 = vector.extract_strided_slice %576 {offsets = [0, 0, 16], sizes = [1, 16, 8], strides = [1, 1, 1]} : vector<1x16x32xf32> to vector<1x16x8xf32>
    %712 = arith.truncf %711 : vector<1x16x8xf32> to vector<1x16x8xbf16>
    %713 = vector.extract_strided_slice %578 {offsets = [0, 0, 16], sizes = [1, 16, 8], strides = [1, 1, 1]} : vector<1x16x32xf32> to vector<1x16x8xf32>
    %714 = arith.truncf %713 : vector<1x16x8xf32> to vector<1x16x8xbf16>
    "tpu.trace_start"() <{level = 10 : i32, message = "bnd,bmd->bnm"}> : () -> ()
    %cst_225 = arith.constant dense<0.000000e+00> : vector<1x8x16xf32>
    %715 = tpu.matmul %710, %712, %cst_225 {dimension_numbers = #tpu.dot_dimension_numbers<[2], [2], [1], [1], [0, 0, 0, 1, 1, 1], [0], [0]>} : vector<1x8x8xbf16>, vector<1x16x8xbf16>, vector<1x8x16xf32> -> vector<1x8x16xf32>
    "tpu.trace_stop"() : () -> ()
    %716 = vector.broadcast %4 : vector<1x1x16xf32> to vector<1x8x16xf32>
    %717 = arith.addf %715, %716 : vector<1x8x16xf32>
    %cst_226 = arith.constant dense<0xFF800000> : vector<1x8xf32>
    %718 = vector.multi_reduction <maximumf>, %717, %cst_226 [2] : vector<1x8x16xf32> to vector<1x8xf32>
    %719 = vector.shape_cast %718 : vector<1x8xf32> to vector<1x8x1xf32>
    %720 = vector.broadcast %719 : vector<1x8x1xf32> to vector<1x8x16xf32>
    %721 = arith.subf %717, %720 : vector<1x8x16xf32>
    %722 = math.exp %721 : vector<1x8x16xf32>
    %cst_227 = arith.constant dense<0.000000e+00> : vector<1x8xf32>
    %723 = vector.multi_reduction <add>, %722, %cst_227 [2] : vector<1x8x16xf32> to vector<1x8xf32>
    %724 = vector.shape_cast %723 : vector<1x8xf32> to vector<1x8x1xf32>
    %725 = tpu.reciprocal %724 {approx = true} : vector<1x8x1xf32> -> vector<1x8x1xf32>
    %726 = vector.broadcast %725 : vector<1x8x1xf32> to vector<1x8x16xf32>
    %727 = arith.mulf %722, %726 : vector<1x8x16xf32>
    %728 = arith.truncf %727 : vector<1x8x16xf32> to vector<1x8x16xbf16>
    "tpu.trace_start"() <{level = 10 : i32, message = "bnm,bmd->bnd"}> : () -> ()
    %cst_228 = arith.constant dense<0.000000e+00> : vector<1x8x8xf32>
    %729 = tpu.matmul %728, %714, %cst_228 {dimension_numbers = #tpu.dot_dimension_numbers<[2], [1], [1], [2], [0, 0, 0, 1, 1, 2], [0], [0]>} : vector<1x8x16xbf16>, vector<1x16x8xbf16>, vector<1x8x8xf32> -> vector<1x8x8xf32>
    "tpu.trace_stop"() : () -> ()
    %730 = vector.extract_strided_slice %580 {offsets = [0, 0, 24], sizes = [1, 8, 8], strides = [1, 1, 1]} : vector<1x8x32xf32> to vector<1x8x8xf32>
    %731 = arith.truncf %730 : vector<1x8x8xf32> to vector<1x8x8xbf16>
    %732 = vector.extract_strided_slice %576 {offsets = [0, 0, 24], sizes = [1, 16, 8], strides = [1, 1, 1]} : vector<1x16x32xf32> to vector<1x16x8xf32>
    %733 = arith.truncf %732 : vector<1x16x8xf32> to vector<1x16x8xbf16>
    %734 = vector.extract_strided_slice %578 {offsets = [0, 0, 24], sizes = [1, 16, 8], strides = [1, 1, 1]} : vector<1x16x32xf32> to vector<1x16x8xf32>
    %735 = arith.truncf %734 : vector<1x16x8xf32> to vector<1x16x8xbf16>
    "tpu.trace_start"() <{level = 10 : i32, message = "bnd,bmd->bnm"}> : () -> ()
    %cst_229 = arith.constant dense<0.000000e+00> : vector<1x8x16xf32>
    %736 = tpu.matmul %731, %733, %cst_229 {dimension_numbers = #tpu.dot_dimension_numbers<[2], [2], [1], [1], [0, 0, 0, 1, 1, 1], [0], [0]>} : vector<1x8x8xbf16>, vector<1x16x8xbf16>, vector<1x8x16xf32> -> vector<1x8x16xf32>
    "tpu.trace_stop"() : () -> ()
    %737 = vector.broadcast %4 : vector<1x1x16xf32> to vector<1x8x16xf32>
    %738 = arith.addf %736, %737 : vector<1x8x16xf32>
    %cst_230 = arith.constant dense<0xFF800000> : vector<1x8xf32>
    %739 = vector.multi_reduction <maximumf>, %738, %cst_230 [2] : vector<1x8x16xf32> to vector<1x8xf32>
    %740 = vector.shape_cast %739 : vector<1x8xf32> to vector<1x8x1xf32>
    %741 = vector.broadcast %740 : vector<1x8x1xf32> to vector<1x8x16xf32>
    %742 = arith.subf %738, %741 : vector<1x8x16xf32>
    %743 = math.exp %742 : vector<1x8x16xf32>
    %cst_231 = arith.constant dense<0.000000e+00> : vector<1x8xf32>
    %744 = vector.multi_reduction <add>, %743, %cst_231 [2] : vector<1x8x16xf32> to vector<1x8xf32>
    %745 = vector.shape_cast %744 : vector<1x8xf32> to vector<1x8x1xf32>
    %746 = tpu.reciprocal %745 {approx = true} : vector<1x8x1xf32> -> vector<1x8x1xf32>
    %747 = vector.broadcast %746 : vector<1x8x1xf32> to vector<1x8x16xf32>
    %748 = arith.mulf %743, %747 : vector<1x8x16xf32>
    %749 = arith.truncf %748 : vector<1x8x16xf32> to vector<1x8x16xbf16>
    "tpu.trace_start"() <{level = 10 : i32, message = "bnm,bmd->bnd"}> : () -> ()
    %cst_232 = arith.constant dense<0.000000e+00> : vector<1x8x8xf32>
    %750 = tpu.matmul %749, %735, %cst_232 {dimension_numbers = #tpu.dot_dimension_numbers<[2], [1], [1], [2], [0, 0, 0, 1, 1, 2], [0], [0]>} : vector<1x8x16xbf16>, vector<1x16x8xbf16>, vector<1x8x8xf32> -> vector<1x8x8xf32>
    "tpu.trace_stop"() : () -> ()
    %751 = tpu.concatenate %687, %708, %729, %750 in 2 : vector<1x8x8xf32>, vector<1x8x8xf32>, vector<1x8x8xf32>, vector<1x8x8xf32> -> vector<1x8x32xf32>
    %752 = vector.shape_cast %528 : vector<1x16x32xf32> to vector<16x32xf32>
    %753 = arith.truncf %752 : vector<16x32xf32> to vector<16x32xbf16>
    %cst_233 = arith.constant dense<0.000000e+00> : vector<16x32xf32>
    %754 = tpu.matmul %753, %545, %cst_233 {dimension_numbers = #tpu.dot_dimension_numbers<[1], [0], [0], [1], [0, 0, 1, 1], [], []>} : vector<16x32xbf16>, vector<32x32xbf16>, vector<16x32xf32> -> vector<16x32xf32>
    %755 = vector.shape_cast %666 : vector<1x16x32xf32> to vector<16x32xf32>
    %756 = arith.truncf %755 : vector<16x32xf32> to vector<16x32xbf16>
    %cst_234 = arith.constant dense<0.000000e+00> : vector<16x32xf32>
    %757 = tpu.matmul %756, %547, %cst_234 {dimension_numbers = #tpu.dot_dimension_numbers<[1], [0], [0], [1], [0, 0, 1, 1], [], []>} : vector<16x32xbf16>, vector<32x32xbf16>, vector<16x32xf32> -> vector<16x32xf32>
    %758 = arith.addf %754, %757 : vector<16x32xf32>
    %759 = vector.broadcast %549 : vector<1x32xf32> to vector<16x32xf32>
    %760 = arith.addf %758, %759 : vector<16x32xf32>
    %761 = vector.shape_cast %760 : vector<16x32xf32> to vector<1x16x32xf32>
    %762 = vector.shape_cast %535 : vector<1x8x32xf32> to vector<8x32xf32>
    %763 = arith.truncf %762 : vector<8x32xf32> to vector<8x32xbf16>
    %cst_235 = arith.constant dense<0.000000e+00> : vector<8x32xf32>
    %764 = tpu.matmul %763, %551, %cst_235 {dimension_numbers = #tpu.dot_dimension_numbers<[1], [0], [0], [1], [0, 0, 1, 1], [], []>} : vector<8x32xbf16>, vector<32x32xbf16>, vector<8x32xf32> -> vector<8x32xf32>
    %765 = vector.shape_cast %751 : vector<1x8x32xf32> to vector<8x32xf32>
    %766 = arith.truncf %765 : vector<8x32xf32> to vector<8x32xbf16>
    %cst_236 = arith.constant dense<0.000000e+00> : vector<8x32xf32>
    %767 = tpu.matmul %766, %553, %cst_236 {dimension_numbers = #tpu.dot_dimension_numbers<[1], [0], [0], [1], [0, 0, 1, 1], [], []>} : vector<8x32xbf16>, vector<32x32xbf16>, vector<8x32xf32> -> vector<8x32xf32>
    %768 = arith.addf %764, %767 : vector<8x32xf32>
    %769 = vector.broadcast %555 : vector<1x32xf32> to vector<8x32xf32>
    %770 = arith.addf %768, %769 : vector<8x32xf32>
    %771 = vector.shape_cast %770 : vector<8x32xf32> to vector<1x8x32xf32>
    %c10 = arith.constant 10 : index
    %c0_237 = arith.constant 0 : index
    %c0_238 = arith.constant 0 : index
    %772 = vector.load %arg11[%c10, %c0_237, %c0_238] : memref<14x32x32xbf16, #tpu.memory_space<vmem>>, vector<1x32x32xbf16>
    %773 = vector.shape_cast %772 : vector<1x32x32xbf16> to vector<32x32xbf16>
    %c8_239 = arith.constant 8 : index
    %c0_240 = arith.constant 0 : index
    %c0_241 = arith.constant 0 : index
    %774 = vector.load %arg12[%c8_239, %c0_240, %c0_241] : memref<12x1x32xf32, #tpu.memory_space<vmem>>, vector<1x1x32xf32>
    %775 = vector.shape_cast %774 : vector<1x1x32xf32> to vector<1x32xf32>
    %c11 = arith.constant 11 : index
    %c0_242 = arith.constant 0 : index
    %c0_243 = arith.constant 0 : index
    %776 = vector.load %arg11[%c11, %c0_242, %c0_243] : memref<14x32x32xbf16, #tpu.memory_space<vmem>>, vector<1x32x32xbf16>
    %777 = vector.shape_cast %776 : vector<1x32x32xbf16> to vector<32x32xbf16>
    %c9_244 = arith.constant 9 : index
    %c0_245 = arith.constant 0 : index
    %c0_246 = arith.constant 0 : index
    %778 = vector.load %arg12[%c9_244, %c0_245, %c0_246] : memref<12x1x32xf32, #tpu.memory_space<vmem>>, vector<1x1x32xf32>
    %779 = vector.shape_cast %778 : vector<1x1x32xf32> to vector<1x32xf32>
    %c4_247 = arith.constant 4 : index
    %c0_248 = arith.constant 0 : index
    %c0_249 = arith.constant 0 : index
    %780 = vector.load %arg14[%c4_247, %c0_248, %c0_249] : memref<6x32x96xbf16, #tpu.memory_space<vmem>>, vector<1x32x96xbf16>
    %781 = vector.shape_cast %780 : vector<1x32x96xbf16> to vector<32x96xbf16>
    %c6_250 = arith.constant 6 : index
    %c0_251 = arith.constant 0 : index
    %c0_252 = arith.constant 0 : index
    %782 = vector.load %arg8[%c6_250, %c0_251, %c0_252] : memref<8x1x96xf32, #tpu.memory_space<vmem>>, vector<1x1x96xf32>
    %783 = vector.shape_cast %782 : vector<1x1x96xf32> to vector<1x96xf32>
    %c5_253 = arith.constant 5 : index
    %c0_254 = arith.constant 0 : index
    %c0_255 = arith.constant 0 : index
    %784 = vector.load %arg14[%c5_253, %c0_254, %c0_255] : memref<6x32x96xbf16, #tpu.memory_space<vmem>>, vector<1x32x96xbf16>
    %785 = vector.shape_cast %784 : vector<1x32x96xbf16> to vector<32x96xbf16>
    %c7_256 = arith.constant 7 : index
    %c0_257 = arith.constant 0 : index
    %c0_258 = arith.constant 0 : index
    %786 = vector.load %arg8[%c7_256, %c0_257, %c0_258] : memref<8x1x96xf32, #tpu.memory_space<vmem>>, vector<1x1x96xf32>
    %787 = vector.shape_cast %786 : vector<1x1x96xf32> to vector<1x96xf32>
    %c12 = arith.constant 12 : index
    %c0_259 = arith.constant 0 : index
    %c0_260 = arith.constant 0 : index
    %788 = vector.load %arg11[%c12, %c0_259, %c0_260] : memref<14x32x32xbf16, #tpu.memory_space<vmem>>, vector<1x32x32xbf16>
    %789 = vector.shape_cast %788 : vector<1x32x32xbf16> to vector<32x32xbf16>
    %c10_261 = arith.constant 10 : index
    %c0_262 = arith.constant 0 : index
    %c0_263 = arith.constant 0 : index
    %790 = vector.load %arg12[%c10_261, %c0_262, %c0_263] : memref<12x1x32xf32, #tpu.memory_space<vmem>>, vector<1x1x32xf32>
    %791 = vector.shape_cast %790 : vector<1x1x32xf32> to vector<1x32xf32>
    %c13 = arith.constant 13 : index
    %c0_264 = arith.constant 0 : index
    %c0_265 = arith.constant 0 : index
    %792 = vector.load %arg11[%c13, %c0_264, %c0_265] : memref<14x32x32xbf16, #tpu.memory_space<vmem>>, vector<1x32x32xbf16>
    %793 = vector.shape_cast %792 : vector<1x32x32xbf16> to vector<32x32xbf16>
    %c11_266 = arith.constant 11 : index
    %c0_267 = arith.constant 0 : index
    %c0_268 = arith.constant 0 : index
    %794 = vector.load %arg12[%c11_266, %c0_267, %c0_268] : memref<12x1x32xf32, #tpu.memory_space<vmem>>, vector<1x1x32xf32>
    %795 = vector.shape_cast %794 : vector<1x1x32xf32> to vector<1x32xf32>
    %cst_269 = arith.constant dense<0.000000e+00> : vector<1x1xf32>
    %796 = vector.multi_reduction <add>, %2, %cst_269 [1] : vector<1x16x1xf32> to vector<1x1xf32>
    %797 = vector.shape_cast %796 : vector<1x1xf32> to vector<1x1x1xf32>
    %cst_270 = arith.constant 1.000000e+00 : f32
    %798 = vector.broadcast %cst_270 : f32 to vector<1x1x1xf32>
    %799 = arith.maximumf %797, %798 : vector<1x1x1xf32>
    %cst_271 = arith.constant dense<0.000000e+00> : vector<1x1xf32>
    %800 = vector.multi_reduction <add>, %3, %cst_271 [1] : vector<1x8x1xf32> to vector<1x1xf32>
    %801 = vector.shape_cast %800 : vector<1x1xf32> to vector<1x1x1xf32>
    %cst_272 = arith.constant 1.000000e+00 : f32
    %802 = vector.broadcast %cst_272 : f32 to vector<1x1x1xf32>
    %803 = arith.maximumf %801, %802 : vector<1x1x1xf32>
    %804 = vector.broadcast %2 : vector<1x16x1xf32> to vector<1x16x32xf32>
    %805 = arith.mulf %761, %804 : vector<1x16x32xf32>
    %cst_273 = arith.constant dense<0.000000e+00> : vector<1x32xf32>
    %806 = vector.multi_reduction <add>, %805, %cst_273 [1] : vector<1x16x32xf32> to vector<1x32xf32>
    %807 = vector.shape_cast %806 : vector<1x32xf32> to vector<1x1x32xf32>
    %808 = vector.broadcast %799 : vector<1x1x1xf32> to vector<1x1x32xf32>
    %809 = arith.divf %807, %808 : vector<1x1x32xf32>
    %810 = vector.broadcast %3 : vector<1x8x1xf32> to vector<1x8x32xf32>
    %811 = arith.mulf %771, %810 : vector<1x8x32xf32>
    %cst_274 = arith.constant dense<0.000000e+00> : vector<1x32xf32>
    %812 = vector.multi_reduction <add>, %811, %cst_274 [1] : vector<1x8x32xf32> to vector<1x32xf32>
    %813 = vector.shape_cast %812 : vector<1x32xf32> to vector<1x1x32xf32>
    %814 = vector.broadcast %803 : vector<1x1x1xf32> to vector<1x1x32xf32>
    %815 = arith.divf %813, %814 : vector<1x1x32xf32>
    %cst_275 = arith.constant 0.000000e+00 : f32
    %816 = vector.broadcast %cst_275 : f32 to vector<1x1x32xf32>
    %817 = arith.maximumf %809, %816 : vector<1x1x32xf32>
    %818 = vector.shape_cast %817 : vector<1x1x32xf32> to vector<1x32xf32>
    %819 = arith.truncf %818 : vector<1x32xf32> to vector<1x32xbf16>
    %cst_276 = arith.constant dense<0.000000e+00> : vector<1x32xf32>
    %820 = tpu.matmul %819, %773, %cst_276 {dimension_numbers = #tpu.dot_dimension_numbers<[1], [0], [0], [1], [0, 0, 1, 1], [], []>} : vector<1x32xbf16>, vector<32x32xbf16>, vector<1x32xf32> -> vector<1x32xf32>
    %821 = arith.addf %820, %775 : vector<1x32xf32>
    %822 = arith.negf %821 : vector<1x32xf32>
    %823 = math.exp %822 : vector<1x32xf32>
    %cst_277 = arith.constant 1.000000e+00 : f32
    %824 = vector.broadcast %cst_277 : f32 to vector<1x32xf32>
    %825 = arith.addf %824, %823 : vector<1x32xf32>
    %826 = arith.divf %824, %825 : vector<1x32xf32>
    %827 = vector.shape_cast %826 : vector<1x32xf32> to vector<1x1x32xf32>
    %cst_278 = arith.constant 0.000000e+00 : f32
    %828 = vector.broadcast %cst_278 : f32 to vector<1x1x32xf32>
    %829 = arith.maximumf %815, %828 : vector<1x1x32xf32>
    %830 = vector.shape_cast %829 : vector<1x1x32xf32> to vector<1x32xf32>
    %831 = arith.truncf %830 : vector<1x32xf32> to vector<1x32xbf16>
    %cst_279 = arith.constant dense<0.000000e+00> : vector<1x32xf32>
    %832 = tpu.matmul %831, %777, %cst_279 {dimension_numbers = #tpu.dot_dimension_numbers<[1], [0], [0], [1], [0, 0, 1, 1], [], []>} : vector<1x32xbf16>, vector<32x32xbf16>, vector<1x32xf32> -> vector<1x32xf32>
    %833 = arith.addf %832, %779 : vector<1x32xf32>
    %834 = arith.negf %833 : vector<1x32xf32>
    %835 = math.exp %834 : vector<1x32xf32>
    %cst_280 = arith.constant 1.000000e+00 : f32
    %836 = vector.broadcast %cst_280 : f32 to vector<1x32xf32>
    %837 = arith.addf %836, %835 : vector<1x32xf32>
    %838 = arith.divf %836, %837 : vector<1x32xf32>
    %839 = vector.shape_cast %838 : vector<1x32xf32> to vector<1x1x32xf32>
    %cst_281 = arith.constant 0.000000e+00 : f32
    %840 = vector.broadcast %cst_281 : f32 to vector<1x16x32xf32>
    %841 = arith.maximumf %761, %840 : vector<1x16x32xf32>
    %842 = arith.truncf %841 : vector<1x16x32xf32> to vector<1x16x32xbf16>
    %843 = vector.shape_cast %842 : vector<1x16x32xbf16> to vector<16x32xbf16>
    %cst_282 = arith.constant dense<0.000000e+00> : vector<16x96xf32>
    %844 = tpu.matmul %843, %781, %cst_282 {dimension_numbers = #tpu.dot_dimension_numbers<[1], [0], [0], [1], [0, 0, 1, 1], [], []>} : vector<16x32xbf16>, vector<32x96xbf16>, vector<16x96xf32> -> vector<16x96xf32>
    %845 = vector.broadcast %783 : vector<1x96xf32> to vector<16x96xf32>
    %846 = arith.addf %844, %845 : vector<16x96xf32>
    %847 = vector.shape_cast %846 : vector<16x96xf32> to vector<1x16x96xf32>
    %848 = vector.broadcast %2 : vector<1x16x1xf32> to vector<1x16x96xf32>
    %849 = arith.mulf %847, %848 : vector<1x16x96xf32>
    %cst_283 = arith.constant 0.000000e+00 : f32
    %850 = vector.broadcast %cst_283 : f32 to vector<1x8x32xf32>
    %851 = arith.maximumf %771, %850 : vector<1x8x32xf32>
    %852 = arith.truncf %851 : vector<1x8x32xf32> to vector<1x8x32xbf16>
    %853 = vector.shape_cast %852 : vector<1x8x32xbf16> to vector<8x32xbf16>
    %cst_284 = arith.constant dense<0.000000e+00> : vector<8x96xf32>
    %854 = tpu.matmul %853, %785, %cst_284 {dimension_numbers = #tpu.dot_dimension_numbers<[1], [0], [0], [1], [0, 0, 1, 1], [], []>} : vector<8x32xbf16>, vector<32x96xbf16>, vector<8x96xf32> -> vector<8x96xf32>
    %855 = vector.broadcast %787 : vector<1x96xf32> to vector<8x96xf32>
    %856 = arith.addf %854, %855 : vector<8x96xf32>
    %857 = vector.shape_cast %856 : vector<8x96xf32> to vector<1x8x96xf32>
    %858 = vector.broadcast %3 : vector<1x8x1xf32> to vector<1x8x96xf32>
    %859 = arith.mulf %857, %858 : vector<1x8x96xf32>
    %860 = vector.extract_strided_slice %849 {offsets = [0, 0, 0], sizes = [1, 16, 32], strides = [1, 1, 1]} : vector<1x16x96xf32> to vector<1x16x32xf32>
    %861 = vector.extract_strided_slice %849 {offsets = [0, 0, 32], sizes = [1, 16, 32], strides = [1, 1, 1]} : vector<1x16x96xf32> to vector<1x16x32xf32>
    %862 = vector.extract_strided_slice %849 {offsets = [0, 0, 64], sizes = [1, 16, 32], strides = [1, 1, 1]} : vector<1x16x96xf32> to vector<1x16x32xf32>
    %863 = vector.extract_strided_slice %859 {offsets = [0, 0, 0], sizes = [1, 8, 32], strides = [1, 1, 1]} : vector<1x8x96xf32> to vector<1x8x32xf32>
    %864 = vector.extract_strided_slice %859 {offsets = [0, 0, 32], sizes = [1, 8, 32], strides = [1, 1, 1]} : vector<1x8x96xf32> to vector<1x8x32xf32>
    %865 = vector.extract_strided_slice %859 {offsets = [0, 0, 64], sizes = [1, 8, 32], strides = [1, 1, 1]} : vector<1x8x96xf32> to vector<1x8x32xf32>
    %cst_285 = arith.constant 1.000000e+00 : f32
    %866 = vector.broadcast %cst_285 : f32 to vector<1x1x32xf32>
    %867 = arith.addf %866, %839 : vector<1x1x32xf32>
    %868 = vector.broadcast %867 : vector<1x1x32xf32> to vector<1x16x32xf32>
    %869 = arith.mulf %868, %861 : vector<1x16x32xf32>
    %cst_286 = arith.constant 1.000000e+00 : f32
    %870 = vector.broadcast %cst_286 : f32 to vector<1x1x32xf32>
    %871 = arith.addf %870, %839 : vector<1x1x32xf32>
    %872 = vector.broadcast %871 : vector<1x1x32xf32> to vector<1x16x32xf32>
    %873 = arith.mulf %872, %860 : vector<1x16x32xf32>
    %cst_287 = arith.constant 1.000000e+00 : f32
    %874 = vector.broadcast %cst_287 : f32 to vector<1x1x32xf32>
    %875 = arith.addf %874, %827 : vector<1x1x32xf32>
    %876 = vector.broadcast %875 : vector<1x1x32xf32> to vector<1x8x32xf32>
    %877 = arith.mulf %876, %864 : vector<1x8x32xf32>
    %cst_288 = arith.constant 1.000000e+00 : f32
    %878 = vector.broadcast %cst_288 : f32 to vector<1x1x32xf32>
    %879 = arith.addf %878, %827 : vector<1x1x32xf32>
    %880 = vector.broadcast %879 : vector<1x1x32xf32> to vector<1x8x32xf32>
    %881 = arith.mulf %880, %863 : vector<1x8x32xf32>
    %882 = vector.extract_strided_slice %869 {offsets = [0, 0, 0], sizes = [1, 16, 8], strides = [1, 1, 1]} : vector<1x16x32xf32> to vector<1x16x8xf32>
    %883 = arith.truncf %882 : vector<1x16x8xf32> to vector<1x16x8xbf16>
    %884 = vector.extract_strided_slice %873 {offsets = [0, 0, 0], sizes = [1, 16, 8], strides = [1, 1, 1]} : vector<1x16x32xf32> to vector<1x16x8xf32>
    %885 = arith.truncf %884 : vector<1x16x8xf32> to vector<1x16x8xbf16>
    %886 = vector.extract_strided_slice %862 {offsets = [0, 0, 0], sizes = [1, 16, 8], strides = [1, 1, 1]} : vector<1x16x32xf32> to vector<1x16x8xf32>
    %887 = arith.truncf %886 : vector<1x16x8xf32> to vector<1x16x8xbf16>
    "tpu.trace_start"() <{level = 10 : i32, message = "bnd,bmd->bnm"}> : () -> ()
    %cst_289 = arith.constant dense<0.000000e+00> : vector<1x16x16xf32>
    %888 = tpu.matmul %883, %885, %cst_289 {dimension_numbers = #tpu.dot_dimension_numbers<[2], [2], [1], [1], [0, 0, 0, 1, 1, 1], [0], [0]>} : vector<1x16x8xbf16>, vector<1x16x8xbf16>, vector<1x16x16xf32> -> vector<1x16x16xf32>
    "tpu.trace_stop"() : () -> ()
    %889 = vector.broadcast %4 : vector<1x1x16xf32> to vector<1x16x16xf32>
    %890 = arith.addf %888, %889 : vector<1x16x16xf32>
    %cst_290 = arith.constant dense<0xFF800000> : vector<1x16xf32>
    %891 = vector.multi_reduction <maximumf>, %890, %cst_290 [2] : vector<1x16x16xf32> to vector<1x16xf32>
    %892 = vector.shape_cast %891 : vector<1x16xf32> to vector<1x16x1xf32>
    %893 = vector.broadcast %892 : vector<1x16x1xf32> to vector<1x16x16xf32>
    %894 = arith.subf %890, %893 : vector<1x16x16xf32>
    %895 = math.exp %894 : vector<1x16x16xf32>
    %cst_291 = arith.constant dense<0.000000e+00> : vector<1x16xf32>
    %896 = vector.multi_reduction <add>, %895, %cst_291 [2] : vector<1x16x16xf32> to vector<1x16xf32>
    %897 = vector.shape_cast %896 : vector<1x16xf32> to vector<1x16x1xf32>
    %898 = tpu.reciprocal %897 {approx = true} : vector<1x16x1xf32> -> vector<1x16x1xf32>
    %899 = vector.broadcast %898 : vector<1x16x1xf32> to vector<1x16x16xf32>
    %900 = arith.mulf %895, %899 : vector<1x16x16xf32>
    %901 = arith.truncf %900 : vector<1x16x16xf32> to vector<1x16x16xbf16>
    "tpu.trace_start"() <{level = 10 : i32, message = "bnm,bmd->bnd"}> : () -> ()
    %cst_292 = arith.constant dense<0.000000e+00> : vector<1x16x8xf32>
    %902 = tpu.matmul %901, %887, %cst_292 {dimension_numbers = #tpu.dot_dimension_numbers<[2], [1], [1], [2], [0, 0, 0, 1, 1, 2], [0], [0]>} : vector<1x16x16xbf16>, vector<1x16x8xbf16>, vector<1x16x8xf32> -> vector<1x16x8xf32>
    "tpu.trace_stop"() : () -> ()
    %903 = vector.extract_strided_slice %869 {offsets = [0, 0, 8], sizes = [1, 16, 8], strides = [1, 1, 1]} : vector<1x16x32xf32> to vector<1x16x8xf32>
    %904 = arith.truncf %903 : vector<1x16x8xf32> to vector<1x16x8xbf16>
    %905 = vector.extract_strided_slice %873 {offsets = [0, 0, 8], sizes = [1, 16, 8], strides = [1, 1, 1]} : vector<1x16x32xf32> to vector<1x16x8xf32>
    %906 = arith.truncf %905 : vector<1x16x8xf32> to vector<1x16x8xbf16>
    %907 = vector.extract_strided_slice %862 {offsets = [0, 0, 8], sizes = [1, 16, 8], strides = [1, 1, 1]} : vector<1x16x32xf32> to vector<1x16x8xf32>
    %908 = arith.truncf %907 : vector<1x16x8xf32> to vector<1x16x8xbf16>
    "tpu.trace_start"() <{level = 10 : i32, message = "bnd,bmd->bnm"}> : () -> ()
    %cst_293 = arith.constant dense<0.000000e+00> : vector<1x16x16xf32>
    %909 = tpu.matmul %904, %906, %cst_293 {dimension_numbers = #tpu.dot_dimension_numbers<[2], [2], [1], [1], [0, 0, 0, 1, 1, 1], [0], [0]>} : vector<1x16x8xbf16>, vector<1x16x8xbf16>, vector<1x16x16xf32> -> vector<1x16x16xf32>
    "tpu.trace_stop"() : () -> ()
    %910 = vector.broadcast %4 : vector<1x1x16xf32> to vector<1x16x16xf32>
    %911 = arith.addf %909, %910 : vector<1x16x16xf32>
    %cst_294 = arith.constant dense<0xFF800000> : vector<1x16xf32>
    %912 = vector.multi_reduction <maximumf>, %911, %cst_294 [2] : vector<1x16x16xf32> to vector<1x16xf32>
    %913 = vector.shape_cast %912 : vector<1x16xf32> to vector<1x16x1xf32>
    %914 = vector.broadcast %913 : vector<1x16x1xf32> to vector<1x16x16xf32>
    %915 = arith.subf %911, %914 : vector<1x16x16xf32>
    %916 = math.exp %915 : vector<1x16x16xf32>
    %cst_295 = arith.constant dense<0.000000e+00> : vector<1x16xf32>
    %917 = vector.multi_reduction <add>, %916, %cst_295 [2] : vector<1x16x16xf32> to vector<1x16xf32>
    %918 = vector.shape_cast %917 : vector<1x16xf32> to vector<1x16x1xf32>
    %919 = tpu.reciprocal %918 {approx = true} : vector<1x16x1xf32> -> vector<1x16x1xf32>
    %920 = vector.broadcast %919 : vector<1x16x1xf32> to vector<1x16x16xf32>
    %921 = arith.mulf %916, %920 : vector<1x16x16xf32>
    %922 = arith.truncf %921 : vector<1x16x16xf32> to vector<1x16x16xbf16>
    "tpu.trace_start"() <{level = 10 : i32, message = "bnm,bmd->bnd"}> : () -> ()
    %cst_296 = arith.constant dense<0.000000e+00> : vector<1x16x8xf32>
    %923 = tpu.matmul %922, %908, %cst_296 {dimension_numbers = #tpu.dot_dimension_numbers<[2], [1], [1], [2], [0, 0, 0, 1, 1, 2], [0], [0]>} : vector<1x16x16xbf16>, vector<1x16x8xbf16>, vector<1x16x8xf32> -> vector<1x16x8xf32>
    "tpu.trace_stop"() : () -> ()
    %924 = vector.extract_strided_slice %869 {offsets = [0, 0, 16], sizes = [1, 16, 8], strides = [1, 1, 1]} : vector<1x16x32xf32> to vector<1x16x8xf32>
    %925 = arith.truncf %924 : vector<1x16x8xf32> to vector<1x16x8xbf16>
    %926 = vector.extract_strided_slice %873 {offsets = [0, 0, 16], sizes = [1, 16, 8], strides = [1, 1, 1]} : vector<1x16x32xf32> to vector<1x16x8xf32>
    %927 = arith.truncf %926 : vector<1x16x8xf32> to vector<1x16x8xbf16>
    %928 = vector.extract_strided_slice %862 {offsets = [0, 0, 16], sizes = [1, 16, 8], strides = [1, 1, 1]} : vector<1x16x32xf32> to vector<1x16x8xf32>
    %929 = arith.truncf %928 : vector<1x16x8xf32> to vector<1x16x8xbf16>
    "tpu.trace_start"() <{level = 10 : i32, message = "bnd,bmd->bnm"}> : () -> ()
    %cst_297 = arith.constant dense<0.000000e+00> : vector<1x16x16xf32>
    %930 = tpu.matmul %925, %927, %cst_297 {dimension_numbers = #tpu.dot_dimension_numbers<[2], [2], [1], [1], [0, 0, 0, 1, 1, 1], [0], [0]>} : vector<1x16x8xbf16>, vector<1x16x8xbf16>, vector<1x16x16xf32> -> vector<1x16x16xf32>
    "tpu.trace_stop"() : () -> ()
    %931 = vector.broadcast %4 : vector<1x1x16xf32> to vector<1x16x16xf32>
    %932 = arith.addf %930, %931 : vector<1x16x16xf32>
    %cst_298 = arith.constant dense<0xFF800000> : vector<1x16xf32>
    %933 = vector.multi_reduction <maximumf>, %932, %cst_298 [2] : vector<1x16x16xf32> to vector<1x16xf32>
    %934 = vector.shape_cast %933 : vector<1x16xf32> to vector<1x16x1xf32>
    %935 = vector.broadcast %934 : vector<1x16x1xf32> to vector<1x16x16xf32>
    %936 = arith.subf %932, %935 : vector<1x16x16xf32>
    %937 = math.exp %936 : vector<1x16x16xf32>
    %cst_299 = arith.constant dense<0.000000e+00> : vector<1x16xf32>
    %938 = vector.multi_reduction <add>, %937, %cst_299 [2] : vector<1x16x16xf32> to vector<1x16xf32>
    %939 = vector.shape_cast %938 : vector<1x16xf32> to vector<1x16x1xf32>
    %940 = tpu.reciprocal %939 {approx = true} : vector<1x16x1xf32> -> vector<1x16x1xf32>
    %941 = vector.broadcast %940 : vector<1x16x1xf32> to vector<1x16x16xf32>
    %942 = arith.mulf %937, %941 : vector<1x16x16xf32>
    %943 = arith.truncf %942 : vector<1x16x16xf32> to vector<1x16x16xbf16>
    "tpu.trace_start"() <{level = 10 : i32, message = "bnm,bmd->bnd"}> : () -> ()
    %cst_300 = arith.constant dense<0.000000e+00> : vector<1x16x8xf32>
    %944 = tpu.matmul %943, %929, %cst_300 {dimension_numbers = #tpu.dot_dimension_numbers<[2], [1], [1], [2], [0, 0, 0, 1, 1, 2], [0], [0]>} : vector<1x16x16xbf16>, vector<1x16x8xbf16>, vector<1x16x8xf32> -> vector<1x16x8xf32>
    "tpu.trace_stop"() : () -> ()
    %945 = vector.extract_strided_slice %869 {offsets = [0, 0, 24], sizes = [1, 16, 8], strides = [1, 1, 1]} : vector<1x16x32xf32> to vector<1x16x8xf32>
    %946 = arith.truncf %945 : vector<1x16x8xf32> to vector<1x16x8xbf16>
    %947 = vector.extract_strided_slice %873 {offsets = [0, 0, 24], sizes = [1, 16, 8], strides = [1, 1, 1]} : vector<1x16x32xf32> to vector<1x16x8xf32>
    %948 = arith.truncf %947 : vector<1x16x8xf32> to vector<1x16x8xbf16>
    %949 = vector.extract_strided_slice %862 {offsets = [0, 0, 24], sizes = [1, 16, 8], strides = [1, 1, 1]} : vector<1x16x32xf32> to vector<1x16x8xf32>
    %950 = arith.truncf %949 : vector<1x16x8xf32> to vector<1x16x8xbf16>
    "tpu.trace_start"() <{level = 10 : i32, message = "bnd,bmd->bnm"}> : () -> ()
    %cst_301 = arith.constant dense<0.000000e+00> : vector<1x16x16xf32>
    %951 = tpu.matmul %946, %948, %cst_301 {dimension_numbers = #tpu.dot_dimension_numbers<[2], [2], [1], [1], [0, 0, 0, 1, 1, 1], [0], [0]>} : vector<1x16x8xbf16>, vector<1x16x8xbf16>, vector<1x16x16xf32> -> vector<1x16x16xf32>
    "tpu.trace_stop"() : () -> ()
    %952 = vector.broadcast %4 : vector<1x1x16xf32> to vector<1x16x16xf32>
    %953 = arith.addf %951, %952 : vector<1x16x16xf32>
    %cst_302 = arith.constant dense<0xFF800000> : vector<1x16xf32>
    %954 = vector.multi_reduction <maximumf>, %953, %cst_302 [2] : vector<1x16x16xf32> to vector<1x16xf32>
    %955 = vector.shape_cast %954 : vector<1x16xf32> to vector<1x16x1xf32>
    %956 = vector.broadcast %955 : vector<1x16x1xf32> to vector<1x16x16xf32>
    %957 = arith.subf %953, %956 : vector<1x16x16xf32>
    %958 = math.exp %957 : vector<1x16x16xf32>
    %cst_303 = arith.constant dense<0.000000e+00> : vector<1x16xf32>
    %959 = vector.multi_reduction <add>, %958, %cst_303 [2] : vector<1x16x16xf32> to vector<1x16xf32>
    %960 = vector.shape_cast %959 : vector<1x16xf32> to vector<1x16x1xf32>
    %961 = tpu.reciprocal %960 {approx = true} : vector<1x16x1xf32> -> vector<1x16x1xf32>
    %962 = vector.broadcast %961 : vector<1x16x1xf32> to vector<1x16x16xf32>
    %963 = arith.mulf %958, %962 : vector<1x16x16xf32>
    %964 = arith.truncf %963 : vector<1x16x16xf32> to vector<1x16x16xbf16>
    "tpu.trace_start"() <{level = 10 : i32, message = "bnm,bmd->bnd"}> : () -> ()
    %cst_304 = arith.constant dense<0.000000e+00> : vector<1x16x8xf32>
    %965 = tpu.matmul %964, %950, %cst_304 {dimension_numbers = #tpu.dot_dimension_numbers<[2], [1], [1], [2], [0, 0, 0, 1, 1, 2], [0], [0]>} : vector<1x16x16xbf16>, vector<1x16x8xbf16>, vector<1x16x8xf32> -> vector<1x16x8xf32>
    "tpu.trace_stop"() : () -> ()
    %966 = tpu.concatenate %902, %923, %944, %965 in 2 : vector<1x16x8xf32>, vector<1x16x8xf32>, vector<1x16x8xf32>, vector<1x16x8xf32> -> vector<1x16x32xf32>
    %967 = vector.extract_strided_slice %877 {offsets = [0, 0, 0], sizes = [1, 8, 8], strides = [1, 1, 1]} : vector<1x8x32xf32> to vector<1x8x8xf32>
    %968 = arith.truncf %967 : vector<1x8x8xf32> to vector<1x8x8xbf16>
    %969 = vector.extract_strided_slice %881 {offsets = [0, 0, 0], sizes = [1, 8, 8], strides = [1, 1, 1]} : vector<1x8x32xf32> to vector<1x8x8xf32>
    %970 = arith.truncf %969 : vector<1x8x8xf32> to vector<1x8x8xbf16>
    %971 = vector.extract_strided_slice %865 {offsets = [0, 0, 0], sizes = [1, 8, 8], strides = [1, 1, 1]} : vector<1x8x32xf32> to vector<1x8x8xf32>
    %972 = arith.truncf %971 : vector<1x8x8xf32> to vector<1x8x8xbf16>
    "tpu.trace_start"() <{level = 10 : i32, message = "bnd,bmd->bnm"}> : () -> ()
    %cst_305 = arith.constant dense<0.000000e+00> : vector<1x8x8xf32>
    %973 = tpu.matmul %968, %970, %cst_305 {dimension_numbers = #tpu.dot_dimension_numbers<[2], [2], [1], [1], [0, 0, 0, 1, 1, 1], [0], [0]>} : vector<1x8x8xbf16>, vector<1x8x8xbf16>, vector<1x8x8xf32> -> vector<1x8x8xf32>
    "tpu.trace_stop"() : () -> ()
    %974 = vector.broadcast %5 : vector<1x1x8xf32> to vector<1x8x8xf32>
    %975 = arith.addf %973, %974 : vector<1x8x8xf32>
    %cst_306 = arith.constant dense<0xFF800000> : vector<1x8xf32>
    %976 = vector.multi_reduction <maximumf>, %975, %cst_306 [2] : vector<1x8x8xf32> to vector<1x8xf32>
    %977 = vector.shape_cast %976 : vector<1x8xf32> to vector<1x8x1xf32>
    %978 = vector.broadcast %977 : vector<1x8x1xf32> to vector<1x8x8xf32>
    %979 = arith.subf %975, %978 : vector<1x8x8xf32>
    %980 = math.exp %979 : vector<1x8x8xf32>
    %cst_307 = arith.constant dense<0.000000e+00> : vector<1x8xf32>
    %981 = vector.multi_reduction <add>, %980, %cst_307 [2] : vector<1x8x8xf32> to vector<1x8xf32>
    %982 = vector.shape_cast %981 : vector<1x8xf32> to vector<1x8x1xf32>
    %983 = tpu.reciprocal %982 {approx = true} : vector<1x8x1xf32> -> vector<1x8x1xf32>
    %984 = vector.broadcast %983 : vector<1x8x1xf32> to vector<1x8x8xf32>
    %985 = arith.mulf %980, %984 : vector<1x8x8xf32>
    %986 = arith.truncf %985 : vector<1x8x8xf32> to vector<1x8x8xbf16>
    "tpu.trace_start"() <{level = 10 : i32, message = "bnm,bmd->bnd"}> : () -> ()
    %cst_308 = arith.constant dense<0.000000e+00> : vector<1x8x8xf32>
    %987 = tpu.matmul %986, %972, %cst_308 {dimension_numbers = #tpu.dot_dimension_numbers<[2], [1], [1], [2], [0, 0, 0, 1, 1, 2], [0], [0]>} : vector<1x8x8xbf16>, vector<1x8x8xbf16>, vector<1x8x8xf32> -> vector<1x8x8xf32>
    "tpu.trace_stop"() : () -> ()
    %988 = vector.extract_strided_slice %877 {offsets = [0, 0, 8], sizes = [1, 8, 8], strides = [1, 1, 1]} : vector<1x8x32xf32> to vector<1x8x8xf32>
    %989 = arith.truncf %988 : vector<1x8x8xf32> to vector<1x8x8xbf16>
    %990 = vector.extract_strided_slice %881 {offsets = [0, 0, 8], sizes = [1, 8, 8], strides = [1, 1, 1]} : vector<1x8x32xf32> to vector<1x8x8xf32>
    %991 = arith.truncf %990 : vector<1x8x8xf32> to vector<1x8x8xbf16>
    %992 = vector.extract_strided_slice %865 {offsets = [0, 0, 8], sizes = [1, 8, 8], strides = [1, 1, 1]} : vector<1x8x32xf32> to vector<1x8x8xf32>
    %993 = arith.truncf %992 : vector<1x8x8xf32> to vector<1x8x8xbf16>
    "tpu.trace_start"() <{level = 10 : i32, message = "bnd,bmd->bnm"}> : () -> ()
    %cst_309 = arith.constant dense<0.000000e+00> : vector<1x8x8xf32>
    %994 = tpu.matmul %989, %991, %cst_309 {dimension_numbers = #tpu.dot_dimension_numbers<[2], [2], [1], [1], [0, 0, 0, 1, 1, 1], [0], [0]>} : vector<1x8x8xbf16>, vector<1x8x8xbf16>, vector<1x8x8xf32> -> vector<1x8x8xf32>
    "tpu.trace_stop"() : () -> ()
    %995 = vector.broadcast %5 : vector<1x1x8xf32> to vector<1x8x8xf32>
    %996 = arith.addf %994, %995 : vector<1x8x8xf32>
    %cst_310 = arith.constant dense<0xFF800000> : vector<1x8xf32>
    %997 = vector.multi_reduction <maximumf>, %996, %cst_310 [2] : vector<1x8x8xf32> to vector<1x8xf32>
    %998 = vector.shape_cast %997 : vector<1x8xf32> to vector<1x8x1xf32>
    %999 = vector.broadcast %998 : vector<1x8x1xf32> to vector<1x8x8xf32>
    %1000 = arith.subf %996, %999 : vector<1x8x8xf32>
    %1001 = math.exp %1000 : vector<1x8x8xf32>
    %cst_311 = arith.constant dense<0.000000e+00> : vector<1x8xf32>
    %1002 = vector.multi_reduction <add>, %1001, %cst_311 [2] : vector<1x8x8xf32> to vector<1x8xf32>
    %1003 = vector.shape_cast %1002 : vector<1x8xf32> to vector<1x8x1xf32>
    %1004 = tpu.reciprocal %1003 {approx = true} : vector<1x8x1xf32> -> vector<1x8x1xf32>
    %1005 = vector.broadcast %1004 : vector<1x8x1xf32> to vector<1x8x8xf32>
    %1006 = arith.mulf %1001, %1005 : vector<1x8x8xf32>
    %1007 = arith.truncf %1006 : vector<1x8x8xf32> to vector<1x8x8xbf16>
    "tpu.trace_start"() <{level = 10 : i32, message = "bnm,bmd->bnd"}> : () -> ()
    %cst_312 = arith.constant dense<0.000000e+00> : vector<1x8x8xf32>
    %1008 = tpu.matmul %1007, %993, %cst_312 {dimension_numbers = #tpu.dot_dimension_numbers<[2], [1], [1], [2], [0, 0, 0, 1, 1, 2], [0], [0]>} : vector<1x8x8xbf16>, vector<1x8x8xbf16>, vector<1x8x8xf32> -> vector<1x8x8xf32>
    "tpu.trace_stop"() : () -> ()
    %1009 = vector.extract_strided_slice %877 {offsets = [0, 0, 16], sizes = [1, 8, 8], strides = [1, 1, 1]} : vector<1x8x32xf32> to vector<1x8x8xf32>
    %1010 = arith.truncf %1009 : vector<1x8x8xf32> to vector<1x8x8xbf16>
    %1011 = vector.extract_strided_slice %881 {offsets = [0, 0, 16], sizes = [1, 8, 8], strides = [1, 1, 1]} : vector<1x8x32xf32> to vector<1x8x8xf32>
    %1012 = arith.truncf %1011 : vector<1x8x8xf32> to vector<1x8x8xbf16>
    %1013 = vector.extract_strided_slice %865 {offsets = [0, 0, 16], sizes = [1, 8, 8], strides = [1, 1, 1]} : vector<1x8x32xf32> to vector<1x8x8xf32>
    %1014 = arith.truncf %1013 : vector<1x8x8xf32> to vector<1x8x8xbf16>
    "tpu.trace_start"() <{level = 10 : i32, message = "bnd,bmd->bnm"}> : () -> ()
    %cst_313 = arith.constant dense<0.000000e+00> : vector<1x8x8xf32>
    %1015 = tpu.matmul %1010, %1012, %cst_313 {dimension_numbers = #tpu.dot_dimension_numbers<[2], [2], [1], [1], [0, 0, 0, 1, 1, 1], [0], [0]>} : vector<1x8x8xbf16>, vector<1x8x8xbf16>, vector<1x8x8xf32> -> vector<1x8x8xf32>
    "tpu.trace_stop"() : () -> ()
    %1016 = vector.broadcast %5 : vector<1x1x8xf32> to vector<1x8x8xf32>
    %1017 = arith.addf %1015, %1016 : vector<1x8x8xf32>
    %cst_314 = arith.constant dense<0xFF800000> : vector<1x8xf32>
    %1018 = vector.multi_reduction <maximumf>, %1017, %cst_314 [2] : vector<1x8x8xf32> to vector<1x8xf32>
    %1019 = vector.shape_cast %1018 : vector<1x8xf32> to vector<1x8x1xf32>
    %1020 = vector.broadcast %1019 : vector<1x8x1xf32> to vector<1x8x8xf32>
    %1021 = arith.subf %1017, %1020 : vector<1x8x8xf32>
    %1022 = math.exp %1021 : vector<1x8x8xf32>
    %cst_315 = arith.constant dense<0.000000e+00> : vector<1x8xf32>
    %1023 = vector.multi_reduction <add>, %1022, %cst_315 [2] : vector<1x8x8xf32> to vector<1x8xf32>
    %1024 = vector.shape_cast %1023 : vector<1x8xf32> to vector<1x8x1xf32>
    %1025 = tpu.reciprocal %1024 {approx = true} : vector<1x8x1xf32> -> vector<1x8x1xf32>
    %1026 = vector.broadcast %1025 : vector<1x8x1xf32> to vector<1x8x8xf32>
    %1027 = arith.mulf %1022, %1026 : vector<1x8x8xf32>
    %1028 = arith.truncf %1027 : vector<1x8x8xf32> to vector<1x8x8xbf16>
    "tpu.trace_start"() <{level = 10 : i32, message = "bnm,bmd->bnd"}> : () -> ()
    %cst_316 = arith.constant dense<0.000000e+00> : vector<1x8x8xf32>
    %1029 = tpu.matmul %1028, %1014, %cst_316 {dimension_numbers = #tpu.dot_dimension_numbers<[2], [1], [1], [2], [0, 0, 0, 1, 1, 2], [0], [0]>} : vector<1x8x8xbf16>, vector<1x8x8xbf16>, vector<1x8x8xf32> -> vector<1x8x8xf32>
    "tpu.trace_stop"() : () -> ()
    %1030 = vector.extract_strided_slice %877 {offsets = [0, 0, 24], sizes = [1, 8, 8], strides = [1, 1, 1]} : vector<1x8x32xf32> to vector<1x8x8xf32>
    %1031 = arith.truncf %1030 : vector<1x8x8xf32> to vector<1x8x8xbf16>
    %1032 = vector.extract_strided_slice %881 {offsets = [0, 0, 24], sizes = [1, 8, 8], strides = [1, 1, 1]} : vector<1x8x32xf32> to vector<1x8x8xf32>
    %1033 = arith.truncf %1032 : vector<1x8x8xf32> to vector<1x8x8xbf16>
    %1034 = vector.extract_strided_slice %865 {offsets = [0, 0, 24], sizes = [1, 8, 8], strides = [1, 1, 1]} : vector<1x8x32xf32> to vector<1x8x8xf32>
    %1035 = arith.truncf %1034 : vector<1x8x8xf32> to vector<1x8x8xbf16>
    "tpu.trace_start"() <{level = 10 : i32, message = "bnd,bmd->bnm"}> : () -> ()
    %cst_317 = arith.constant dense<0.000000e+00> : vector<1x8x8xf32>
    %1036 = tpu.matmul %1031, %1033, %cst_317 {dimension_numbers = #tpu.dot_dimension_numbers<[2], [2], [1], [1], [0, 0, 0, 1, 1, 1], [0], [0]>} : vector<1x8x8xbf16>, vector<1x8x8xbf16>, vector<1x8x8xf32> -> vector<1x8x8xf32>
    "tpu.trace_stop"() : () -> ()
    %1037 = vector.broadcast %5 : vector<1x1x8xf32> to vector<1x8x8xf32>
    %1038 = arith.addf %1036, %1037 : vector<1x8x8xf32>
    %cst_318 = arith.constant dense<0xFF800000> : vector<1x8xf32>
    %1039 = vector.multi_reduction <maximumf>, %1038, %cst_318 [2] : vector<1x8x8xf32> to vector<1x8xf32>
    %1040 = vector.shape_cast %1039 : vector<1x8xf32> to vector<1x8x1xf32>
    %1041 = vector.broadcast %1040 : vector<1x8x1xf32> to vector<1x8x8xf32>
    %1042 = arith.subf %1038, %1041 : vector<1x8x8xf32>
    %1043 = math.exp %1042 : vector<1x8x8xf32>
    %cst_319 = arith.constant dense<0.000000e+00> : vector<1x8xf32>
    %1044 = vector.multi_reduction <add>, %1043, %cst_319 [2] : vector<1x8x8xf32> to vector<1x8xf32>
    %1045 = vector.shape_cast %1044 : vector<1x8xf32> to vector<1x8x1xf32>
    %1046 = tpu.reciprocal %1045 {approx = true} : vector<1x8x1xf32> -> vector<1x8x1xf32>
    %1047 = vector.broadcast %1046 : vector<1x8x1xf32> to vector<1x8x8xf32>
    %1048 = arith.mulf %1043, %1047 : vector<1x8x8xf32>
    %1049 = arith.truncf %1048 : vector<1x8x8xf32> to vector<1x8x8xbf16>
    "tpu.trace_start"() <{level = 10 : i32, message = "bnm,bmd->bnd"}> : () -> ()
    %cst_320 = arith.constant dense<0.000000e+00> : vector<1x8x8xf32>
    %1050 = tpu.matmul %1049, %1035, %cst_320 {dimension_numbers = #tpu.dot_dimension_numbers<[2], [1], [1], [2], [0, 0, 0, 1, 1, 2], [0], [0]>} : vector<1x8x8xbf16>, vector<1x8x8xbf16>, vector<1x8x8xf32> -> vector<1x8x8xf32>
    "tpu.trace_stop"() : () -> ()
    %1051 = tpu.concatenate %987, %1008, %1029, %1050 in 2 : vector<1x8x8xf32>, vector<1x8x8xf32>, vector<1x8x8xf32>, vector<1x8x8xf32> -> vector<1x8x32xf32>
    %1052 = arith.addf %761, %966 : vector<1x16x32xf32>
    %1053 = vector.shape_cast %1052 : vector<1x16x32xf32> to vector<16x32xf32>
    %1054 = arith.truncf %1053 : vector<16x32xf32> to vector<16x32xbf16>
    %cst_321 = arith.constant dense<0.000000e+00> : vector<16x32xf32>
    %1055 = tpu.matmul %1054, %789, %cst_321 {dimension_numbers = #tpu.dot_dimension_numbers<[1], [0], [0], [1], [0, 0, 1, 1], [], []>} : vector<16x32xbf16>, vector<32x32xbf16>, vector<16x32xf32> -> vector<16x32xf32>
    %1056 = vector.broadcast %791 : vector<1x32xf32> to vector<16x32xf32>
    %1057 = arith.addf %1055, %1056 : vector<16x32xf32>
    %1058 = vector.shape_cast %1057 : vector<16x32xf32> to vector<1x16x32xf32>
    %1059 = arith.addf %771, %1051 : vector<1x8x32xf32>
    %1060 = vector.shape_cast %1059 : vector<1x8x32xf32> to vector<8x32xf32>
    %1061 = arith.truncf %1060 : vector<8x32xf32> to vector<8x32xbf16>
    %cst_322 = arith.constant dense<0.000000e+00> : vector<8x32xf32>
    %1062 = tpu.matmul %1061, %793, %cst_322 {dimension_numbers = #tpu.dot_dimension_numbers<[1], [0], [0], [1], [0, 0, 1, 1], [], []>} : vector<8x32xbf16>, vector<32x32xbf16>, vector<8x32xf32> -> vector<8x32xf32>
    %1063 = vector.broadcast %795 : vector<1x32xf32> to vector<8x32xf32>
    %1064 = arith.addf %1062, %1063 : vector<8x32xf32>
    %1065 = vector.shape_cast %1064 : vector<8x32xf32> to vector<1x8x32xf32>
    %c0_323 = arith.constant 0 : index
    %c0_324 = arith.constant 0 : index
    %c0_325 = arith.constant 0 : index
    %1066 = vector.load %arg15[%c0_323, %c0_324, %c0_325] : memref<1x16x32xf32, #tpu.memory_space<vmem>>, vector<1x16x32xf32>
    tpu.vector_store %arg15[%c0_323, %c0_324, %c0_325], %1058 {strides = array<i32>} : memref<1x16x32xf32, #tpu.memory_space<vmem>>, vector<1x16x32xf32>,
    %c0_326 = arith.constant 0 : index
    %c0_327 = arith.constant 0 : index
    %c0_328 = arith.constant 0 : index
    %1067 = vector.load %arg16[%c0_326, %c0_327, %c0_328] : memref<1x8x32xf32, #tpu.memory_space<vmem>>, vector<1x8x32xf32>
    tpu.vector_store %arg16[%c0_326, %c0_327, %c0_328], %1065 {strides = array<i32>} : memref<1x8x32xf32, #tpu.memory_space<vmem>>, vector<1x8x32xf32>,
    return
  }
  func.func @transform_0(%arg0: i32) -> (i32, i32, i32) {
    %c0_i32 = arith.constant 0 : i32
    %c0_i32_0 = arith.constant 0 : i32
    %c0_i32_1 = arith.constant 0 : i32
    return %arg0, %c0_i32, %c0_i32_0 : i32, i32, i32
  }
  func.func @transform_1(%arg0: i32) -> (i32, i32, i32) {
    %c0_i32 = arith.constant 0 : i32
    %c0_i32_0 = arith.constant 0 : i32
    %c0_i32_1 = arith.constant 0 : i32
    return %arg0, %c0_i32, %c0_i32_0 : i32, i32, i32
  }
  func.func @transform_2(%arg0: i32) -> (i32, i32, i32) {
    %c0_i32 = arith.constant 0 : i32
    %c0_i32_0 = arith.constant 0 : i32
    %c0_i32_1 = arith.constant 0 : i32
    return %arg0, %c0_i32, %c0_i32_0 : i32, i32, i32
  }
  func.func @transform_3(%arg0: i32) -> (i32, i32, i32) {
    %c0_i32 = arith.constant 0 : i32
    %c0_i32_0 = arith.constant 0 : i32
    %c0_i32_1 = arith.constant 0 : i32
    return %arg0, %c0_i32, %c0_i32_0 : i32, i32, i32
  }
  func.func @transform_4(%arg0: i32) -> (i32, i32, i32) {
    %c0_i32 = arith.constant 0 : i32
    %c0_i32_0 = arith.constant 0 : i32
    %c0_i32_1 = arith.constant 0 : i32
    return %arg0, %c0_i32, %c0_i32_0 : i32, i32, i32
  }
  func.func @transform_5(%arg0: i32) -> (i32, i32, i32) {
    %c0_i32 = arith.constant 0 : i32
    %c0_i32_0 = arith.constant 0 : i32
    %c0_i32_1 = arith.constant 0 : i32
    return %arg0, %c0_i32, %c0_i32_0 : i32, i32, i32
  }
  func.func @transform_6(%arg0: i32) -> (i32, i32, i32) {
    %c0_i32 = arith.constant 0 : i32
    %c0_i32_0 = arith.constant 0 : i32
    %c0_i32_1 = arith.constant 0 : i32
    %c0_i32_2 = arith.constant 0 : i32
    return %c0_i32, %c0_i32_0, %c0_i32_1 : i32, i32, i32
  }
  func.func @transform_7(%arg0: i32) -> (i32, i32, i32) {
    %c0_i32 = arith.constant 0 : i32
    %c0_i32_0 = arith.constant 0 : i32
    %c0_i32_1 = arith.constant 0 : i32
    %c0_i32_2 = arith.constant 0 : i32
    return %c0_i32, %c0_i32_0, %c0_i32_1 : i32, i32, i32
  }
  func.func @transform_8(%arg0: i32) -> (i32, i32, i32) {
    %c0_i32 = arith.constant 0 : i32
    %c0_i32_0 = arith.constant 0 : i32
    %c0_i32_1 = arith.constant 0 : i32
    %c0_i32_2 = arith.constant 0 : i32
    return %c0_i32, %c0_i32_0, %c0_i32_1 : i32, i32, i32
  }
  func.func @transform_9(%arg0: i32) -> (i32, i32, i32) {
    %c0_i32 = arith.constant 0 : i32
    %c0_i32_0 = arith.constant 0 : i32
    %c0_i32_1 = arith.constant 0 : i32
    %c0_i32_2 = arith.constant 0 : i32
    return %c0_i32, %c0_i32_0, %c0_i32_1 : i32, i32, i32
  }
  func.func @transform_10(%arg0: i32) -> (i32, i32, i32) {
    %c0_i32 = arith.constant 0 : i32
    %c0_i32_0 = arith.constant 0 : i32
    %c0_i32_1 = arith.constant 0 : i32
    %c0_i32_2 = arith.constant 0 : i32
    return %c0_i32, %c0_i32_0, %c0_i32_1 : i32, i32, i32
  }
  func.func @transform_11(%arg0: i32) -> (i32, i32, i32) {
    %c0_i32 = arith.constant 0 : i32
    %c0_i32_0 = arith.constant 0 : i32
    %c0_i32_1 = arith.constant 0 : i32
    %c0_i32_2 = arith.constant 0 : i32
    return %c0_i32, %c0_i32_0, %c0_i32_1 : i32, i32, i32
  }
  func.func @transform_12(%arg0: i32) -> (i32, i32, i32) {
    %c0_i32 = arith.constant 0 : i32
    %c0_i32_0 = arith.constant 0 : i32
    %c0_i32_1 = arith.constant 0 : i32
    %c0_i32_2 = arith.constant 0 : i32
    return %c0_i32, %c0_i32_0, %c0_i32_1 : i32, i32, i32
  }
  func.func @transform_13(%arg0: i32) -> (i32, i32, i32) {
    %c0_i32 = arith.constant 0 : i32
    %c0_i32_0 = arith.constant 0 : i32
    %c0_i32_1 = arith.constant 0 : i32
    %c0_i32_2 = arith.constant 0 : i32
    return %c0_i32, %c0_i32_0, %c0_i32_1 : i32, i32, i32
  }
  func.func @transform_14(%arg0: i32) -> (i32, i32, i32) {
    %c0_i32 = arith.constant 0 : i32
    %c0_i32_0 = arith.constant 0 : i32
    %c0_i32_1 = arith.constant 0 : i32
    return %arg0, %c0_i32, %c0_i32_0 : i32, i32, i32
  }
  func.func @transform_15(%arg0: i32) -> (i32, i32, i32) {
    %c0_i32 = arith.constant 0 : i32
    %c0_i32_0 = arith.constant 0 : i32
    %c0_i32_1 = arith.constant 0 : i32
    return %arg0, %c0_i32, %c0_i32_0 : i32, i32, i32
  }
}

</mosaic_0001>

<bundles_post_ra>
// kernel: tpu_custom_call.1
= control target key start
LH: loop header
LB: loop body
LE: loop exit
PB: predicated region body
PF: predicated region fallthrough
CT: control target
= control target key end

     0   :  { %s10959_s0 = inlined_call_operand.hbm [shape: f32[2,16,48], index: 0, kind: input, shape index: {}]   ;;  %s10960_s1 = inlined_call_operand.hbm [shape: f32[2,8,40], index: 1, kind: input, shape index: {}]   ;;  %s10961_s2 = inlined_call_operand.hbm [shape: f32[2,16,1], index: 2, kind: input, shape index: {}]   ;;  %s10962_s3 = inlined_call_operand.hbm [shape: f32[2,8,1], index: 3, kind: input, shape index: {}]   ;;  %s10963_s4 = inlined_call_operand.hbm [shape: f32[2,1,16], index: 4, kind: input, shape index: {}]   ;;  %s10964_s5 = inlined_call_operand.hbm [shape: f32[2,1,8], index: 5, kind: input, shape index: {}]   ;;  %s10965_s6 = inlined_call_operand.hbm [shape: bf16[1,48,96], index: 6, kind: input, shape index: {}]   ;;  %s10966_s7 = inlined_call_operand.hbm [shape: f32[8,1,96], index: 7, kind: input, shape index: {}]   ;;  %s10967_s8 = inlined_call_operand.hbm [shape: bf16[1,40,96], index: 8, kind: input, shape index: {}]   ;;  %s10968_s9 = inlined_call_operand.hbm [shape: bf16[1,48,32], index: 9, kind: input, shape index: {}]   ;;  %s10969_s10 = inlined_call_operand.hbm [shape: bf16[14,32,32], index: 10, kind: input, shape index: {}]   ;;  %s10970_s11 = inlined_call_operand.hbm [shape: f32[12,1,32], index: 11, kind: input, shape index: {}]   ;;  %s10971_s12 = inlined_call_operand.hbm [shape: bf16[1,40,32], index: 12, kind: input, shape index: {}]   ;;  %s10972_s13 = inlined_call_operand.hbm [shape: bf16[6,32,96], index: 13, kind: input, shape index: {}]   ;;  %s10973_s14 = inlined_call_operand.hbm [shape: f32[2,16,32], index: 14, kind: output, shape index: {0}]   ;;  %s10974_s15 = inlined_call_operand.hbm [shape: f32[2,8,32], index: 15, kind: output, shape index: {1}]  }
   0x1   :  { %11016 = sst [smem:[#allocation44_spill]] %s10959_s0 }
   0x2   :  { %11017 = sst [smem:[#allocation45_spill]] %s10960_s1 }
   0x3   :  { %11018 = sst [smem:[#allocation46_spill]] %s10961_s2 }
   0x4   :  { %11019 = sst [smem:[#allocation47_spill]] %s10962_s3 }
   0x5   :  { %11020 = sst [smem:[#allocation48_spill]] %s10963_s4 }
   0x6   :  { %11021 = sst [smem:[#allocation49_spill]] %s10964_s5 }
   0x7   :  { %11022 = sst [smem:[#allocation50_spill]] %s10965_s6 }
   0x8   :  { %11023 = sst [smem:[#allocation51_spill]] %s10966_s7 }
   0x9   :  { %11024 = sst [smem:[#allocation52_spill]] %s10968_s9 }
   0xa   :  { %11025 = sst [smem:[#allocation53_spill]] %s10970_s11 }
   0xb   :  { %11026 = sst [smem:[#allocation54_spill]] %s10973_s14 }
   0xc   :  { %11027 = sst [smem:[#allocation55_spill]] %s10974_s15 }
   0xd   :  { %21 = vsyncpa [#allocation3], 0 }
   0xe   :  { %23 = vsyncpa [#allocation3 + $0x1], 0 }
   0xf   :  { %24 = vsyncpa [#allocation6], 0 }
  0x10   :  { %26 = vsyncpa [#allocation6 + $0x1], 0 }
  0x11   :  { %27 = vsyncpa [#allocation9], 0 }
  0x12   :  { %29 = vsyncpa [#allocation9 + $0x1], 0 }
  0x13   :  { %30 = vsyncpa [#allocation12], 0 }
  0x14   :  { %32 = vsyncpa [#allocation12 + $0x1], 0 }
  0x15   :  { %33 = vsyncpa [#allocation15], 0 }
  0x16   :  { %34 = vsyncpa [#allocation18], 0 }
  0x17   :  { %35 = vsyncpa [#allocation21], 0 }
  0x18   :  { %36 = vsyncpa [#allocation24], 0 }
  0x19   :  { %37 = vsyncpa [#allocation4], 0 }
  0x1a   :  { %39 = vsyncpa [#allocation4 + $0x1], 0 }
  0x1b   :  { %40 = vsyncpa [#allocation27], 0 }
  0x1c   :  { %42 = vsyncpa [#allocation27 + $0x1], 0  ;;  %s9025_s18 = smov 0   ;;  %s9027_s19 = smov 0  }
  0x1d   :  { %s9029_s20 = smov 0   ;;  %s9031_s21 = smov 0  }
  0x1e LB: > { %11028 = sst [smem:[#allocation39_spill]] %s8899_s20  ;;  %s8905_s22 = smov [#allocation13]   ;;  %s8903_s21 = sphi %s9031_s21, %s11093_s21   ;;  %s8899_s20 = sphi %s9029_s20, %s11095_s20   ;;  %s8895_s19 = sphi %s9027_s19, %s11097_s19   ;;  %s8891_s18 = sphi %s9025_s18, %s11096_s18  }
  0x1f   : > { %s441_s23 = sshll.u32 %s8905_s22, 4  ;;  %s9046_s24 = sadd.s32 4294967295, %s8903_s21   ;;  %s9051_s23 = int_to_ptr.vmem [resolvable:$true] %s441_s23 }
  0x20   : > { %p6888_p0 = scmp.ge.s32.totalorder %s8903_s21, 1  ;;  %p10984_p1 = scmp.eq.s32.totalorder %s9046_s24, 0 }
  0x21   : > { %p429_p2 = scmp.lt.s32.totalorder %s8903_s21, 3  ;;  %s8906_s26 = smov [#allocation14]  }
  0x22   : > { %s454_s27 = sshll.u32 %s8906_s26, 4  ;;  %s8907_s29 = smov [#allocation17]   ;;  %s9066_s27 = int_to_ptr.vmem [resolvable:$true] %s454_s27 }
  0x23   : > { %p9053_p3 = pnand %p6888_p0, %p429_p2  ;;  %s9068_s30 = sshll.u32 %s8907_s29, 4  ;;  %s481_s30 = int_to_ptr.vmem [resolvable:$true] %s9068_s30 }
  0x24   : > { %s11032_s6 = sld [smem:[#allocation50_spill]] }
  0x25   : > { %s11029_s25 = scalar_select %p9053_p3, 1, 0 }
  0x26   : > { %p7933_p5 = pneg %p9053_p3 }
  0x27   : > { %11030 = sst [smem:[#allocation40_spill]] %s11029_s25 }
  0x28   : > { %p9062_p6 = pnand %p7933_p5, %p10984_p1 }
  0x2a   : > { %s11031_s28 = scalar_select %p9062_p6, 1, 0 }
  0x2b   : > { %s8369_s22 = scalar_lea.hbm %s11032_s6, 384  ;;  %p9078_p8 = pneg %p9062_p6 }
  0x2c   : > { %p8370_p7 = scmp.ne.s32.totalorder %s11032_s6, %s8369_s22  ;;  %p8376_p11 = scmp.lt.u32.totalorder %s8369_s22, %s11032_s6 }
  0x2d   : > { %s11033_s26 = scalar_select %p9078_p8, 1, 0 }
  0x2e   : > { %p8372_p9 = pnand %p9078_p8, %p8370_p7 }
  0x30   : > { %p8373_p10 = pneg %p8372_p9 }
  0x32   : > { %p8378_p12 = pnand %p8376_p11, %p8373_p10 }
  0x34   : > { %8381 = shalt.err (!%p8378_p12)
}
  0x35   : > { %s8382_s14 = scalar_lea.vmem %s9051_s23, 384  ;;  %p8390_p5 = scmp.lt.s32.totalorder %s9051_s23, %s9051_s23 }
  0x36   : > { %p8383_p13 = scmp.ne.s32.totalorder %s9051_s23, %s8382_s14  ;;  %p8391_p4 = scmp.lt.s32.totalorder %s8382_s14, %s8382_s14 }
  0x38   : > { %p8385_p0 = pnand %p8383_p13, %p9078_p8  ;;  %p8392_p7 = por %p8391_p4, %p8390_p5 }
  0x3a   : > { %p8386_p2 = pneg %p8385_p0 }
  0x3c   : > { %p8393_p9 = pnand %p8392_p7, %p8386_p2 }
  0x3e   : > { %8396 = shalt.err (!%p8393_p9)
}
  0x3f   : > { %s10982_s15 = smov 64   ;;  %s10988_s25 = smov 4  }
  0x40   : > { %7936 = dma.hbm_to_vmem [thread:$0]  (!%p9062_p6), %s11032_s6, 384, %s9051_s23, [#allocation12], %s10982_s15, %s10982_s15, %s10988_s25  }
  0x41   : > { %s11034_s7 = sld [smem:[#allocation51_spill]] }
  0x47   : > { %s8397_s14 = scalar_lea.hbm %s11034_s7, 128 }
  0x48   : > { %p8398_p4 = scmp.ne.s32.totalorder %s11034_s7, %s8397_s14  ;;  %p8404_p12 = scmp.lt.u32.totalorder %s8397_s14, %s11034_s7 }
  0x4a   : > { %p8400_p10 = pnand %p8398_p4, %p9078_p8 }
  0x4c   : > { %p8401_p11 = pneg %p8400_p10 }
  0x4e   : > { %p8406_p13 = pnand %p8404_p12, %p8401_p11 }
  0x50   : > { %8409 = shalt.err (!%p8406_p13)
}
  0x51   : > { %s8410_s23 = scalar_lea.vmem %s9066_s27, 128  ;;  %p8418_p7 = scmp.lt.s32.totalorder %s9066_s27, %s9066_s27 }
  0x52   : > { %p8411_p0 = scmp.ne.s32.totalorder %s9066_s27, %s8410_s23  ;;  %p8419_p9 = scmp.lt.s32.totalorder %s8410_s23, %s8410_s23 }
  0x54   : > { %p8413_p2 = pnand %p8411_p0, %p9078_p8  ;;  %p8420_p4 = por %p8419_p9, %p8418_p7 }
  0x56   : > { %p8414_p5 = pneg %p8413_p2 }
  0x58   : > { %p8421_p10 = pnand %p8420_p4, %p8414_p5 }
  0x5a   : > { %8424 = shalt.err (!%p8421_p10)
}
  0x5b   : > { %s10986_s4 = smov 16   ;;  %s10987_s0 = smov 1  }
  0x5c   : > { %7939 = dma.hbm_to_vmem [thread:$0]  (!%p9062_p6), %s11034_s7, 128, %s9066_s27, [#allocation15], %s10986_s4, %s10986_s4, %s10987_s0  }
  0x5d   : > { %s11035_s9 = sld [smem:[#allocation52_spill]] }
  0x63   : > { %s8425_s22 = scalar_lea.hbm %s11035_s9, 384 }
  0x64   : > { %p8426_p11 = scmp.ne.s32.totalorder %s11035_s9, %s8425_s22  ;;  %p8432_p0 = scmp.lt.u32.totalorder %s8425_s22, %s11035_s9 }
  0x66   : > { %p8428_p12 = pnand %p8426_p11, %p9078_p8 }
  0x68   : > { %p8429_p13 = pneg %p8428_p12 }
  0x6a   : > { %p8434_p2 = pnand %p8432_p0, %p8429_p13 }
  0x6c   : > { %8437 = shalt.err (!%p8434_p2)
}
  0x6d   : > { %s8438_s2 = scalar_lea.vmem %s481_s30, 384  ;;  %p8446_p4 = scmp.lt.s32.totalorder %s481_s30, %s481_s30 }
  0x6e   : > { %p8439_p5 = scmp.ne.s32.totalorder %s481_s30, %s8438_s2  ;;  %p8447_p10 = scmp.lt.s32.totalorder %s8438_s2, %s8438_s2 }
  0x70   : > { %p8441_p7 = pnand %p8439_p5, %p9078_p8  ;;  %p8448_p1 = por %p8447_p10, %p8446_p4 }
  0x72   : > { %p8442_p9 = pneg %p8441_p7 }
  0x74   : > { %p8449_p3 = pnand %p8448_p1, %p8442_p9 }
  0x76   : > { %8452 = shalt.err (!%p8449_p3)
}
  0x77   : > { %s11036_s27 = smov 64   ;;  %s8912_s16 = smov [#allocation20]  }
  0x78   : > { %7945 = dma.hbm_to_vmem [thread:$0]  (!%p9062_p6), %s11035_s9, 384, %s481_s30, [#allocation18], %s11036_s27, %s11036_s27, %s10988_s25  }
  0x79   : > { %s506_s17 = sshll.u32 %s8912_s16, 4  ;;  %s11037_s11 = sld [smem:[#allocation53_spill]]  ;;  %s507_s17 = int_to_ptr.vmem [resolvable:$true] %s506_s17 }
  0x7f   : > { %s8453_s14 = scalar_lea.hbm %s11037_s11, 192 }
  0x80   : > { %p8454_p1 = scmp.ne.s32.totalorder %s11037_s11, %s8453_s14  ;;  %p8460_p12 = scmp.lt.u32.totalorder %s8453_s14, %s11037_s11 }
  0x82   : > { %p8456_p3 = pnand %p8454_p1, %p9078_p8 }
  0x84   : > { %p8457_p11 = pneg %p8456_p3 }
  0x86   : > { %p8462_p13 = pnand %p8460_p12, %p8457_p11 }
  0x88   : > { %8465 = shalt.err (!%p8462_p13)
}
  0x89   : > { %s8466_s30 = scalar_lea.vmem %s507_s17, 192  ;;  %p8474_p7 = scmp.lt.s32.totalorder %s507_s17, %s507_s17 }
  0x8a   : > { %p8467_p0 = scmp.ne.s32.totalorder %s507_s17, %s8466_s30  ;;  %p8475_p9 = scmp.lt.s32.totalorder %s8466_s30, %s8466_s30 }
  0x8c   : > { %p8469_p2 = pnand %p8467_p0, %p9078_p8  ;;  %p8476_p4 = por %p8475_p9, %p8474_p7 }
  0x8e   : > { %p8470_p5 = pneg %p8469_p2 }
  0x90   : > { %p8477_p10 = pnand %p8476_p4, %p8470_p5 }
  0x92   : > { %8480 = shalt.err (!%p8477_p10)
}
  0x93   : > { %s11038_s15 = smov 1   ;;  %s11039_s5 = smov 16  }
  0x94   : > { %7951 = dma.hbm_to_vmem [thread:$0]  (!%p9062_p6), %s11037_s11, 192, %s507_s17, [#allocation21], %s11039_s5, %s11039_s5, %s11038_s15  }
  0x95   : > { %s6887_s16 = sadd.s32 4294967294, %s8903_s21   ;;  %s9173_s22 = sadd.s32 1, %s8903_s21  }
  0x96   : > { %11040 = sst [smem:[#allocation41_spill]] %s9173_s22  ;;  %s52_s29 = ssub.s32 %s8903_s21, %s9173_s22 }
  0x97   : > { %s55_s14 = sadd.s32 1, %s8899_s20  ;;  %p53_p1 = scmp.eq.s32.totalorder %s52_s29, 0 }
  0x98   : > { %p62_p3 = scmp.ne.s32.totalorder %s8899_s20, %s8895_s19  ;;  %p63_p11 = scmp.eq.s32.totalorder %s8903_s21, 0 }
  0x99   : > { %p68_p12 = scmp.ne.s32.totalorder %s8895_s19, %s8891_s18  ;;  %p11042_p0 = scmp.eq.s32.totalorder %s9046_s24, 0 }
  0x9a   : > { %s9184_s23 = scalar_select %p53_p1, %s8899_s20, %s55_s14  }
  0x9b   : > { %p64_p13 = por %p63_p11, %p62_p3  ;;  %p9188_p2 = por %p11042_p0, %p68_p12 }
  0x9c   : > { %11041 = sst [smem:[#allocation42_spill]] %s9184_s23  ;;  %p390_p5 = scmp.eq.s32.totalorder %s9046_s24, 1 }
  0x9d   : > { %s11043_s2 = scalar_select %p9188_p2, 1, 0 }
  0x9e   : > { %p396_p7 = scmp.eq.s32.totalorder %s6887_s16, 1  ;;  %p7992_p9 = scmp.lt.s32.totalorder %s8903_s21, 2 }
  0x9f   : > { %s9195_s17 = sand.u32 1, %s8899_s20   ;;  %p9197_p4 = por %p390_p5, %p62_p3 }
  0xa0   : > { %p9201_p10 = por %p396_p7, %p68_p12  ;;  %p9205_p1 = pnand %p7992_p9, %p64_p13 }
  0xa1   : > { %s11044_s30 = scalar_select %p9197_p4, 1, 0 }
  0xa2   : > { %s11045_s15 = scalar_select %p9201_p10, 1, 0 }
  0xa3   : > { %s11047_s5 = scalar_select %p9205_p1, 1, 0 }
  0xa4   : > { %11046 = sst [smem:[#allocation43_spill]] %s11045_s15  ;;  %s9210_s4 = sand.u32 1, %s8903_s21  }
  0xa5   : > { %s10990_s0 = sshll.u32 %s9195_s17, 3  ;;  %s10991_s16 = sshll.u32 %s8903_s21, 7 }
  0xa6   : > { %s571_s29 = scalar_lea.vmem [#allocation5], %s10990_s0  ;;  %s11048_s1 = sld [smem:[#allocation45_spill]] }
  0xa7   : > { %s578_s14 = sshll.u32 %s571_s29, 4  ;;  %p9230_p11 = pneg %p9205_p1  ;;  %s9223_s14 = int_to_ptr.vmem [resolvable:$true] %s578_s14 }
  0xa9   : > { %s11049_s23 = scalar_select %p9230_p11, 1, 0 }
  0xac   : > { %s9221_s7 = scalar_lea.hbm %s11048_s1, %s10991_s16  ;;  %s8486_s29 = scalar_lea.hbm %s11048_s1, 256 }
  0xad   : > { %s8481_s11 = scalar_lea.hbm %s9221_s7, 128  ;;  %p8487_p0 = scmp.lt.u32.totalorder %s9221_s7, %s11048_s1 }
  0xae   : > { %p8482_p3 = scmp.ne.s32.totalorder %s9221_s7, %s8481_s11  ;;  %p8488_p5 = scmp.lt.u32.totalorder %s8486_s29, %s8481_s11 }
  0xaf   : > { %p8490_p9 = scmp.lt.u32.totalorder %s8481_s11, %s9221_s7 }
  0xb0   : > { %p8484_p12 = pnand %p9230_p11, %p8482_p3  ;;  %p8489_p7 = por %p8488_p5, %p8487_p0 }
  0xb2   : > { %p8485_p13 = pneg %p8484_p12  ;;  %p8491_p10 = por %p8490_p9, %p8489_p7 }
  0xb4   : > { %p8492_p4 = pnand %p8491_p10, %p8485_p13 }
  0xb6   : > { %8495 = shalt.err (!%p8492_p4)
}
  0xb7   : > { %s8496_s9 = scalar_lea.vmem %s9223_s14, 128  ;;  %s8913_s6 = smov [#allocation5]  }
  0xb8   : > { %p8497_p3 = scmp.ne.s32.totalorder %s9223_s14, %s8496_s9  ;;  %s8501_s25 = sshll.u32 %s8913_s6, 4  ;;  %s8502_s25 = int_to_ptr.vmem [resolvable:$false] %s8501_s25 }
  0xb9   : > { %s8503_s0 = scalar_lea.vmem %s8502_s25, 256  ;;  %p8504_p6 = scmp.lt.s32.totalorder %s9223_s14, %s8502_s25 }
  0xba   : > { %p8499_p12 = pnand %p8497_p3, %p9230_p11  ;;  %p8505_p8 = scmp.lt.s32.totalorder %s8503_s0, %s8496_s9 }
  0xbc   : > { %p8500_p2 = pneg %p8499_p12  ;;  %p8506_p0 = por %p8505_p8, %p8504_p6 }
  0xbe   : > { %p8507_p5 = pnand %p8506_p0, %p8500_p2 }
  0xc0   : > { %8510 = shalt.err (!%p8507_p5)
}
  0xc1   : > { %s11050_s11 = scalar_lea.sflag [#allocation6], %s9210_s4  ;;  %s11051_s16 = sshll.u32 %s8903_s21, 7 }
  0xc2   : > { %7964 = dma.hbm_to_vmem [thread:$0]  (!%p9205_p1), %s9221_s7, 128, %s9223_s14, %s11050_s11  }
  0xc3   : > { %s11052_s3 = sld [smem:[#allocation47_spill]]  ;;  %s11053_s9 = sshll.u32 %s9195_s17, 3 }
  0xc4   : > { %s610_s0 = scalar_lea.vmem [#allocation8], %s11053_s9  ;;  %s11006_s20 = scalar_lea.sflag [#allocation9], %s9210_s4 }
  0xc5   : > { %s617_s1 = sshll.u32 %s610_s0, 4  ;;  %s618_s1 = int_to_ptr.vmem [resolvable:$true] %s617_s1 }
  0xc9   : > { %s9260_s25 = scalar_lea.hbm %s11052_s3, %s11051_s16  ;;  %s8516_s11 = scalar_lea.hbm %s11052_s3, 256 }
  0xca   : > { %s8511_s22 = scalar_lea.hbm %s9260_s25, 128  ;;  %p8517_p4 = scmp.lt.u32.totalorder %s9260_s25, %s11052_s3 }
  0xcb   : > { %p8512_p6 = scmp.ne.s32.totalorder %s9260_s25, %s8511_s22  ;;  %p8518_p10 = scmp.lt.u32.totalorder %s8516_s11, %s8511_s22 }
  0xcc   : > { %p8520_p7 = scmp.lt.u32.totalorder %s8511_s22, %s9260_s25 }
  0xcd   : > { %p8514_p8 = pnand %p8512_p6, %p9230_p11  ;;  %p8519_p13 = por %p8518_p10, %p8517_p4 }
  0xcf   : > { %p8515_p2 = pneg %p8514_p8  ;;  %p8521_p9 = por %p8520_p7, %p8519_p13 }
  0xd1   : > { %p8522_p3 = pnand %p8521_p9, %p8515_p2 }
  0xd3   : > { %8525 = shalt.err (!%p8522_p3)
}
  0xd4   : > { %s8526_s6 = scalar_lea.vmem %s618_s1, 128  ;;  %s8914_s9 = smov [#allocation8]  }
  0xd5   : > { %p8527_p12 = scmp.ne.s32.totalorder %s618_s1, %s8526_s6  ;;  %s8531_s0 = sshll.u32 %s8914_s9, 4  ;;  %s8532_s0 = int_to_ptr.vmem [resolvable:$false] %s8531_s0 }
  0xd6   : > { %s8533_s7 = scalar_lea.vmem %s8532_s0, 256  ;;  %p8534_p6 = scmp.lt.s32.totalorder %s618_s1, %s8532_s0 }
  0xd7   : > { %p8529_p0 = pnand %p8527_p12, %p9230_p11  ;;  %p8535_p8 = scmp.lt.s32.totalorder %s8533_s7, %s8526_s6 }
  0xd9   : > { %p8530_p5 = pneg %p8529_p0  ;;  %p8536_p1 = por %p8535_p8, %p8534_p6 }
  0xdb   : > { %p8537_p4 = pnand %p8536_p1, %p8530_p5 }
  0xdd   : > { %8540 = shalt.err (!%p8537_p4)
}
  0xde   : > { %p11054_p10 = scmp.ne.s32.totalorder %s11047_s5, 0  ;;  %s8915_s22 = smov [#allocation16]  }
  0xdf   : > { %s467_s14 = sshll.u32 %s8915_s22, 4  ;;  %s8916_s11 = smov [#allocation19]   ;;  %s468_s14 = int_to_ptr.vmem [resolvable:$true] %s467_s14 }
  0xe0   : > { %7970 = dma.hbm_to_vmem [thread:$0]  (!%p11054_p10), %s9260_s25, 128, %s618_s1, %s11006_s20  }
  0xe1   : > { %s493_s16 = sshll.u32 %s8916_s11, 4  ;;  %s8541_s0 = scalar_lea.hbm %s10967_s8, 320  ;;  %s494_s16 = int_to_ptr.vmem [resolvable:$true] %s493_s16 }
  0xe2   : > { %p8542_p1 = scmp.ne.s32.totalorder %s10967_s8, %s8541_s0  ;;  %p11055_p2 = scmp.ne.s32.totalorder %s11033_s26, 0 }
  0xe3   : > { %p8548_p9 = scmp.lt.u32.totalorder %s8541_s0, %s10967_s8 }
  0xe4   : > { %p8544_p13 = pnand %p8542_p1, %p11055_p2 }
  0xe6   : > { %p8545_p7 = pneg %p8544_p13 }
  0xe8   : > { %p8550_p3 = pnand %p8548_p9, %p8545_p7 }
  0xea   : > { %8553 = shalt.err (!%p8550_p3)
}
  0xeb   : > { %s8554_s1 = scalar_lea.vmem %s468_s14, 320  ;;  %p8562_p6 = scmp.lt.s32.totalorder %s468_s14, %s468_s14 }
  0xec   : > { %p8555_p12 = scmp.ne.s32.totalorder %s468_s14, %s8554_s1  ;;  %p8563_p8 = scmp.lt.s32.totalorder %s8554_s1, %s8554_s1 }
  0xee   : > { %p8557_p0 = pnand %p8555_p12, %p11055_p2  ;;  %p8564_p4 = por %p8563_p8, %p8562_p6 }
  0xf0   : > { %p8558_p5 = pneg %p8557_p0 }
  0xf2   : > { %p8565_p10 = pnand %p8564_p4, %p8558_p5 }
  0xf4   : > { %8568 = shalt.err (!%p8565_p10)
}
  0xf5   : > { %p11056_p1 = scmp.ne.s32.totalorder %s11031_s28, 0  ;;  %s11057_s25 = smov 4  }
  0xf6   : > { %s8569_s29 = scalar_lea.hbm %s10969_s10, 3584 }
  0xf7   : > { %7942 = dma.hbm_to_vmem [thread:$0]  (!%p11056_p1), %s10967_s8, 320, %s468_s14, [#allocation15], %s11036_s27, %s11036_s27, %s11057_s25  }
  0xf8   : > { %p8570_p13 = scmp.ne.s32.totalorder %s10969_s10, %s8569_s29  ;;  %p8576_p9 = scmp.lt.u32.totalorder %s8569_s29, %s10969_s10 }
  0xfa   : > { %p8572_p10 = pnand %p8570_p13, %p11055_p2 }
  0xfc   : > { %p8573_p7 = pneg %p8572_p10 }
  0xfe   : > { %p8578_p3 = pnand %p8576_p9, %p8573_p7 }
 0x100   : > { %8581 = shalt.err (!%p8578_p3)
}
 0x101   : > { %s8582_s1 = scalar_lea.vmem %s494_s16, 3584  ;;  %p8590_p6 = scmp.lt.s32.totalorder %s494_s16, %s494_s16 }
 0x102   : > { %p8583_p12 = scmp.ne.s32.totalorder %s494_s16, %s8582_s1  ;;  %p8591_p8 = scmp.lt.s32.totalorder %s8582_s1, %s8582_s1 }
 0x104   : > { %p8585_p0 = pnand %p8583_p12, %p11055_p2  ;;  %p8592_p4 = por %p8591_p8, %p8590_p6 }
 0x106   : > { %p8586_p5 = pneg %p8585_p0 }
 0x108   : > { %p8593_p11 = pnand %p8592_p4, %p8586_p5 }
 0x10a   : > { %8596 = shalt.err (!%p8593_p11)
}
 0x10b   : > { %7948 = dma.hbm_to_vmem [thread:$0]  (!%p11056_p1), %s10969_s10, 3584, %s494_s16, [#allocation18], %s11036_s27, %s11036_s27, %s11057_s25  }
 0x10c   : > { %s8917_s15 = smov [#allocation22]   ;;  %s8918_s11 = smov [#allocation23]  }
 0x10d   : > { %s519_s22 = sshll.u32 %s8917_s15, 4  ;;  %s532_s29 = sshll.u32 %s8918_s11, 4  ;;  %s520_s22 = int_to_ptr.vmem [resolvable:$true] %s519_s22  ;;  %s533_s29 = int_to_ptr.vmem [resolvable:$true] %s532_s29 }
 0x10e   : > { %s8597_s6 = scalar_lea.hbm %s10971_s12, 320 }
 0x10f   : > { %p8598_p11 = scmp.ne.s32.totalorder %s10971_s12, %s8597_s6  ;;  %p8604_p7 = scmp.lt.u32.totalorder %s8597_s6, %s10971_s12 }
 0x111   : > { %p8600_p13 = pnand %p8598_p11, %p11055_p2 }
 0x113   : > { %p8601_p10 = pneg %p8600_p13 }
 0x115   : > { %p8606_p9 = pnand %p8604_p7, %p8601_p10 }
 0x117   : > { %8609 = shalt.err (!%p8606_p9)
}
 0x118   : > { %s8610_s16 = scalar_lea.vmem %s520_s22, 320  ;;  %p8618_p5 = scmp.lt.s32.totalorder %s520_s22, %s520_s22 }
 0x119   : > { %p8611_p3 = scmp.ne.s32.totalorder %s520_s22, %s8610_s16  ;;  %p8619_p6 = scmp.lt.s32.totalorder %s8610_s16, %s8610_s16 }
 0x11b   : > { %p8613_p12 = pnand %p8611_p3, %p11055_p2  ;;  %p8620_p8 = por %p8619_p6, %p8618_p5 }
 0x11d   : > { %p8614_p0 = pneg %p8613_p12 }
 0x11f   : > { %p8621_p4 = pnand %p8620_p8, %p8614_p0 }
 0x121   : > { %8624 = shalt.err (!%p8621_p4)
}
 0x122   : > { %7954 = dma.hbm_to_vmem [thread:$0]  (!%p11056_p1), %s10971_s12, 320, %s520_s22, [#allocation21], %s11036_s27, %s11036_s27, %s11057_s25  }
 0x123   : > { %s8625_s9 = scalar_lea.hbm %s10972_s13, 1536 }
 0x124   : > { %p8626_p11 = scmp.ne.s32.totalorder %s10972_s13, %s8625_s9  ;;  %p8632_p7 = scmp.lt.u32.totalorder %s8625_s9, %s10972_s13 }
 0x126   : > { %p8628_p13 = pnand %p8626_p11, %p11055_p2 }
 0x128   : > { %p8629_p10 = pneg %p8628_p13 }
 0x12a   : > { %p8634_p9 = pnand %p8632_p7, %p8629_p10 }
 0x12c   : > { %8637 = shalt.err (!%p8634_p9)
}
 0x12d   : > { %s8638_s14 = scalar_lea.vmem %s533_s29, 1536  ;;  %p8646_p5 = scmp.lt.s32.totalorder %s533_s29, %s533_s29 }
 0x12e   : > { %p8639_p3 = scmp.ne.s32.totalorder %s533_s29, %s8638_s14  ;;  %p8647_p6 = scmp.lt.s32.totalorder %s8638_s14, %s8638_s14 }
 0x130   : > { %p8641_p12 = pnand %p8639_p3, %p11055_p2  ;;  %p8648_p8 = por %p8647_p6, %p8646_p5 }
 0x132   : > { %p8642_p0 = pneg %p8641_p12 }
 0x134   : > { %p8649_p4 = pnand %p8648_p8, %p8642_p0 }
 0x136   : > { %8652 = shalt.err (!%p8649_p4)
}
 0x137   : > { %7957 = dma.hbm_to_vmem [thread:$0]  (!%p11056_p1), %s10972_s13, 1536, %s533_s29, [#allocation24], %s11036_s27, %s11036_s27, %s11057_s25  }
 0x138   : > { %s6898_s26 = sshll.u32 %s9195_s17, 4  ;;  %s7094_s20 = sshll.u32 %s8903_s21, 8 }
 0x139   : > { %s11058_s11 = sld [smem:[#allocation44_spill]]  ;;  %s550_s9 = scalar_lea.vmem [#allocation2], %s6898_s26 }
 0x13a   : > { %s557_s0 = sshll.u32 %s550_s9, 4  ;;  %s547_s6 = scalar_lea.sflag [#allocation3], %s9195_s17  ;;  %s9379_s0 = int_to_ptr.vmem [resolvable:$true] %s557_s0 }
 0x13b   : > { %p11059_p1 = scmp.ne.s32.totalorder %s11049_s23, 0 }
 0x13f   : > { %s9375_s28 = scalar_lea.hbm %s11058_s11, %s7094_s20  ;;  %s8658_s29 = scalar_lea.hbm %s11058_s11, 512 }
 0x140   : > { %s8653_s7 = scalar_lea.hbm %s9375_s28, 256  ;;  %p8659_p10 = scmp.lt.u32.totalorder %s9375_s28, %s11058_s11 }
 0x141   : > { %p8654_p2 = scmp.ne.s32.totalorder %s9375_s28, %s8653_s7  ;;  %p8660_p7 = scmp.lt.u32.totalorder %s8658_s29, %s8653_s7 }
 0x142   : > { %p8662_p3 = scmp.lt.u32.totalorder %s8653_s7, %s9375_s28 }
 0x143   : > { %p8656_p11 = pnand %p8654_p2, %p11059_p1  ;;  %p8661_p9 = por %p8660_p7, %p8659_p10 }
 0x145   : > { %p8657_p13 = pneg %p8656_p11  ;;  %p8663_p12 = por %p8662_p3, %p8661_p9 }
 0x147   : > { %p8664_p0 = pnand %p8663_p12, %p8657_p13 }
 0x149   : > { %8667 = shalt.err (!%p8664_p0)
}
 0x14a   : > { %s8668_s22 = scalar_lea.vmem %s9379_s0, 256  ;;  %s8919_s16 = smov [#allocation2]  }
 0x14b   : > { %p8669_p5 = scmp.ne.s32.totalorder %s9379_s0, %s8668_s22  ;;  %s8673_s3 = sshll.u32 %s8919_s16, 4  ;;  %s8674_s3 = int_to_ptr.vmem [resolvable:$false] %s8673_s3 }
 0x14c   : > { %s8675_s15 = scalar_lea.vmem %s8674_s3, 512  ;;  %p8676_p4 = scmp.lt.s32.totalorder %s9379_s0, %s8674_s3 }
 0x14d   : > { %p8671_p6 = pnand %p8669_p5, %p11059_p1  ;;  %p8677_p2 = scmp.lt.s32.totalorder %s8675_s15, %s8668_s22 }
 0x14f   : > { %p8672_p8 = pneg %p8671_p6  ;;  %p8678_p11 = por %p8677_p2, %p8676_p4 }
 0x151   : > { %p8679_p10 = pnand %p8678_p11, %p8672_p8 }
 0x153   : > { %8682 = shalt.err (!%p8679_p10)
}
 0x154   : > { %s8920_s9 = smov 128   ;;  %s8921_s7 = smov 8  }
 0x155   : > { %p11060_p13 = scmp.ne.s32.totalorder %s11047_s5, 0  ;;  %s11061_s29 = sld [smem:[#allocation46_spill]] }
 0x156   : > { %s589_s14 = scalar_lea.vmem [#allocation7], %s6898_s26  ;;  %s6908_s16 = sshll.u32 %s8903_s21, 4 }
 0x157   : > { %7961 = dma.hbm_to_vmem [thread:$0]  (!%p11060_p13), %s9375_s28, 256, %s9379_s0, %s547_s6, %s8920_s9, %s8920_s9, %s8921_s7  }
 0x158   : > { %s596_s22 = sshll.u32 %s589_s14, 4  ;;  %s9417_s22 = int_to_ptr.vmem [resolvable:$true] %s596_s22 }
 0x15b   : > { %s9413_s1 = scalar_lea.hbm %s11061_s29, %s7094_s20  ;;  %s8688_s20 = scalar_lea.hbm %s11061_s29, 512 }
 0x15c   : > { %s8683_s3 = scalar_lea.hbm %s9413_s1, 256  ;;  %p8689_p12 = scmp.lt.u32.totalorder %s9413_s1, %s11061_s29 }
 0x15d   : > { %p8684_p7 = scmp.ne.s32.totalorder %s9413_s1, %s8683_s3  ;;  %p8690_p0 = scmp.lt.u32.totalorder %s8688_s20, %s8683_s3 }
 0x15e   : > { %p8692_p6 = scmp.lt.u32.totalorder %s8683_s3, %s9413_s1 }
 0x15f   : > { %p8686_p9 = pnand %p8684_p7, %p11059_p1  ;;  %p8691_p5 = por %p8690_p0, %p8689_p12 }
 0x161   : > { %p8687_p3 = pneg %p8686_p9  ;;  %p8693_p8 = por %p8692_p6, %p8691_p5 }
 0x163   : > { %p8694_p4 = pnand %p8693_p8, %p8687_p3 }
 0x165   : > { %8697 = shalt.err (!%p8694_p4)
}
 0x166   : > { %s8698_s26 = scalar_lea.vmem %s9417_s22, 256  ;;  %s8922_s27 = smov [#allocation7]  }
 0x167   : > { %p8699_p2 = scmp.ne.s32.totalorder %s9417_s22, %s8698_s26  ;;  %s8703_s25 = sshll.u32 %s8922_s27, 4  ;;  %s8704_s25 = int_to_ptr.vmem [resolvable:$false] %s8703_s25 }
 0x168   : > { %s8705_s14 = scalar_lea.vmem %s8704_s25, 512  ;;  %p8706_p7 = scmp.lt.s32.totalorder %s9417_s22, %s8704_s25 }
 0x169   : > { %p8701_p11 = pnand %p8699_p2, %p11059_p1  ;;  %p8707_p9 = scmp.lt.s32.totalorder %s8705_s14, %s8698_s26 }
 0x16b   : > { %p8702_p10 = pneg %p8701_p11  ;;  %p8708_p12 = por %p8707_p9, %p8706_p7 }
 0x16d   : > { %p8709_p0 = pnand %p8708_p12, %p8702_p10 }
 0x16f   : > { %8712 = shalt.err (!%p8709_p0)
}
 0x170   : > { %s11062_s3 = scalar_lea.sflag [#allocation6], %s9210_s4  ;;  %s11063_s20 = sld [smem:[#allocation48_spill]] }
 0x171   : > { %7967 = dma.hbm_to_vmem [thread:$0]  (!%p11060_p13), %s9413_s1, 256, %s9417_s22, %s11062_s3, %s8920_s9, %s8920_s9, %s8921_s7  }
 0x172   : > { %s627_s26 = scalar_lea.vmem [#allocation10], %s9195_s17 }
 0x173   : > { %s634_s27 = sshll.u32 %s627_s26, 4  ;;  %s635_s27 = int_to_ptr.vmem [resolvable:$true] %s634_s27 }
 0x176   : > { %s11064_s6 = smov %s11063_s20  ;;  %s9451_s15 = scalar_lea.hbm %s11063_s20, %s6908_s16 }
 0x177   : > { %s8713_s25 = scalar_lea.hbm %s9451_s15, 16  ;;  %s8718_s7 = scalar_lea.hbm %s11064_s6, 32 }
 0x178   : > { %p8714_p3 = scmp.ne.s32.totalorder %s9451_s15, %s8713_s25  ;;  %p8719_p8 = scmp.lt.u32.totalorder %s9451_s15, %s11064_s6 }
 0x179   : > { %p8720_p4 = scmp.lt.u32.totalorder %s8718_s7, %s8713_s25  ;;  %p8722_p11 = scmp.lt.u32.totalorder %s8713_s25, %s9451_s15 }
 0x17a   : > { %p8716_p5 = pnand %p8714_p3, %p11059_p1 }
 0x17b   : > { %p8721_p2 = por %p8720_p4, %p8719_p8 }
 0x17c   : > { %p8717_p6 = pneg %p8716_p5 }
 0x17d   : > { %p8723_p10 = por %p8722_p11, %p8721_p2 }
 0x17f   : > { %p8724_p7 = pnand %p8723_p10, %p8717_p6 }
 0x181   : > { %8727 = shalt.err (!%p8724_p7)
}
 0x182   : > { %s8728_s3 = scalar_lea.vmem %s635_s27, 16  ;;  %s8923_s28 = smov [#allocation10]  }
 0x183   : > { %p8729_p9 = scmp.ne.s32.totalorder %s635_s27, %s8728_s3  ;;  %s8733_s0 = sshll.u32 %s8923_s28, 4  ;;  %s8734_s0 = int_to_ptr.vmem [resolvable:$false] %s8733_s0 }
 0x184   : > { %s8735_s20 = scalar_lea.vmem %s8734_s0, 32  ;;  %p8736_p3 = scmp.lt.s32.totalorder %s635_s27, %s8734_s0 }
 0x185   : > { %p8731_p12 = pnand %p8729_p9, %p11059_p1  ;;  %p8737_p5 = scmp.lt.s32.totalorder %s8735_s20, %s8728_s3 }
 0x187   : > { %p8732_p0 = pneg %p8731_p12  ;;  %p8738_p13 = por %p8737_p5, %p8736_p3 }
 0x189   : > { %p8739_p4 = pnand %p8738_p13, %p8732_p0 }
 0x18b   : > { %8742 = shalt.err (!%p8739_p4)
}
 0x18c   : > { %p11065_p8 = scmp.ne.s32.totalorder %s11047_s5, 0  ;;  %s11066_s26 = scalar_lea.sflag [#allocation9], %s9210_s4 }
 0x18d   : > { %s11067_s9 = sld [smem:[#allocation49_spill]]  ;;  %s644_s1 = scalar_lea.vmem [#allocation11], %s9195_s17 }
 0x18e   : > { %7973 = dma.hbm_to_vmem [thread:$0]  (!%p11065_p8), %s9451_s15, 16, %s635_s27, %s11066_s26  }
 0x18f   : > { %s651_s22 = sshll.u32 %s644_s1, 4  ;;  %s642_s3 = scalar_lea.sflag [#allocation12], %s9210_s4  ;;  %s652_s22 = int_to_ptr.vmem [resolvable:$true] %s651_s22 }
 0x193   : > { %s9478_s7 = scalar_lea.hbm %s11067_s9, %s6908_s16  ;;  %s8748_s0 = scalar_lea.hbm %s11067_s9, 32 }
 0x194   : > { %s8743_s28 = scalar_lea.hbm %s9478_s7, 16  ;;  %p8749_p11 = scmp.lt.u32.totalorder %s9478_s7, %s11067_s9 }
 0x195   : > { %p8744_p13 = scmp.ne.s32.totalorder %s9478_s7, %s8743_s28  ;;  %p8750_p10 = scmp.lt.u32.totalorder %s8748_s0, %s8743_s28 }
 0x196   : > { %p8752_p9 = scmp.lt.u32.totalorder %s8743_s28, %s9478_s7 }
 0x197   : > { %p8746_p6 = pnand %p8744_p13, %p11059_p1  ;;  %p8751_p7 = por %p8750_p10, %p8749_p11 }
 0x199   : > { %p8747_p2 = pneg %p8746_p6  ;;  %p8753_p12 = por %p8752_p9, %p8751_p7 }
 0x19b   : > { %p8754_p0 = pnand %p8753_p12, %p8747_p2 }
 0x19d   : > { %8757 = shalt.err (!%p8754_p0)
}
 0x19e   : > { %s8758_s17 = scalar_lea.vmem %s652_s22, 16  ;;  %s8924_s4 = smov [#allocation11]  }
 0x19f   : > { %p8759_p3 = scmp.ne.s32.totalorder %s652_s22, %s8758_s17  ;;  %s8763_s26 = sshll.u32 %s8924_s4, 4  ;;  %s8764_s26 = int_to_ptr.vmem [resolvable:$false] %s8763_s26 }
 0x1a0   : > { %s8765_s25 = scalar_lea.vmem %s8764_s26, 32  ;;  %p8766_p13 = scmp.lt.s32.totalorder %s652_s22, %s8764_s26 }
 0x1a1   : > { %p8761_p5 = pnand %p8759_p3, %p11059_p1  ;;  %p8767_p6 = scmp.lt.s32.totalorder %s8765_s25, %s8758_s17 }
 0x1a3   : > { %p8762_p4 = pneg %p8761_p5  ;;  %p8768_p8 = por %p8767_p6, %p8766_p13 }
 0x1a5   : > { %p8769_p10 = pnand %p8768_p8, %p8762_p4 }
 0x1a7   : > { %8772 = shalt.err (!%p8769_p10)
}
 0x1a8   : > { %p11068_p11 = scmp.ne.s32.totalorder %s11047_s5, 0  ;;  %s11069_s14 = sld [smem:[#allocation40_spill]] }
 0x1aa   : > { %7976 = dma.hbm_to_vmem [thread:$0]  (!%p11068_p11), %s9478_s7, 16, %s652_s22, %s642_s3  }
 0x1ae   : > { %p11070_p2 = scmp.ne.s32.totalorder %s11069_s14, 0 }
 0x1af   : > { %s9502_s23 = sand.u32 (!%p11070_p2), 1, %s8895_s19   ;;  %p11071_p1 = scmp.ne.s32.totalorder (!%p11070_p2), %s11043_s2, 0 }
 0x1b0   : > { %660 = sbr.rel (%p11070_p2) target bundleno = 6786 (0x1a82), region = 76  ;;  %s9505_s1 = sshll.u32 (!%p11070_p2), %s9502_s23, 4 }
 0x1b1   : > { %s663_s28 = scalar_lea.sflag (!%p11070_p2), [#allocation3], %s9502_s23  ;;  %s666_s15 = scalar_lea.vmem (!%p11070_p2), [#allocation2], %s9505_s1 }
 0x1b7   : > { %8846 = dma.done.wait (%p11071_p1), %s663_s28, 256  }
 0x1b8   : > { %8848 = vsyncadd (%p11071_p1), %s663_s28, 4294967040  ;;  %s671_s5 = sand.u32 1, %s9046_s24   ;;  %s9515_s7 = sshll.u32 %s9502_s23, 3 }
 0x1b9   : > { %s672_s22 = scalar_lea.sflag [#allocation6], %s671_s5  ;;  %s675_s3 = scalar_lea.vmem [#allocation5], %s9515_s7 }
 0x1ba   : > { %8850 = dma.done.wait (%p11071_p1), %s672_s22, 384  }
 0x1bb   : > { %8852 = vsyncadd (%p11071_p1), %s672_s22, 4294966912  ;;  %s684_s27 = scalar_lea.vmem [#allocation7], %s9505_s1  ;;  %s690_s0 = scalar_lea.sflag [#allocation9], %s671_s5 }
 0x1bc   : > { %s693_s20 = scalar_lea.vmem [#allocation8], %s9515_s7 }
 0x1bd   : > { %8854 = dma.done.wait (%p11071_p1), %s690_s0, 144  }
 0x1be   : > { %8856 = vsyncadd (%p11071_p1), %s690_s0, 4294967152  ;;  %s9529_s16 = scalar_lea.vmem [#allocation10], %s9502_s23  ;;  %s707_s17 = scalar_lea.sflag [#allocation12], %s671_s5 }
 0x1bf   : > { %s9532_s4 = scalar_lea.vmem [#allocation11], %s9502_s23 }
 0x1c0   : > { %8858 = dma.done.wait (%p11071_p1), %s707_s17, 16  }
 0x1c1   : > { %8860 = vsyncadd (%p11071_p1), %s707_s17, 4294967280  ;;  %p11072_p8 = scmp.eq.s32.totalorder %s9046_s24, 0 }
 0x1c3   : > { %8862 = dma.done.wait (%p11072_p8), [#allocation12], 384   ;;  %p11073_p7 = pmov %p11072_p8 }
 0x1c5   : > { %8864 = vsyncadd (%p11073_p7), [#allocation12], 4294966912  ;;  %p11074_p9 = pmov %p11073_p7 }
 0x1c6   : > { %p11075_p12 = pmov %p11073_p7 }
 0x1c7   : > { %8866 = dma.done.wait (%p11074_p9), [#allocation15], 448  }
 0x1c8   : > { %8868 = vsyncadd (%p11075_p12), [#allocation15], 4294966848  ;;  %p11076_p0 = pmov %p11073_p7 }
 0x1ca   : > { %8870 = dma.done.wait (%p11076_p0), [#allocation18], 3968   ;;  %p11077_p3 = pmov %p11076_p0 }
 0x1cb   : > { %p11078_p5 = pmov %p11076_p0 }
 0x1cc   : > { %8872 = vsyncadd (%p11077_p3), [#allocation18], 4294963328 }
 0x1cd   : > { %8874 = dma.done.wait (%p11078_p5), [#allocation21], 512   ;;  %p11079_p4 = pmov %p11076_p0 }
 0x1ce   : > { %p11080_p13 = pmov %p11076_p0 }
 0x1cf   : > { %8876 = vsyncadd (%p11079_p4), [#allocation21], 4294966784 }
 0x1d0   : > { %8878 = dma.done.wait (%p11080_p13), [#allocation24], 1536   ;;  %p11081_p6 = pmov %p11076_p0 }
 0x1d1   : > { %v8925_v0 = vmov 0.0   ;;  %vm8926_vm0 = vmmov 0   ;;  %v8927_v1 = vmov 0   ;;  %v8098_v2 = vld [vmem:[#allocation13] sm:$0xff]   ;;  %v8100_v4 = vld [vmem:[#allocation13 + $0x8] sm:$0xff]   ;;  %v8102_v6 = vld [vmem:[#allocation13 + $0x10] sm:$0xff]  }
 0x1d2   : > { %8880 = vsyncadd (%p11081_p6), [#allocation24], 4294965760  ;;  %7301 = vmatprep.subr.bf16.mxu0 %v8925_v0  ;;  %7311 = vmatprep.subr.bf16.mxu1 %v8925_v0  ;;  %v8099_v3 = vld [vmem:[#allocation16] sm:$0xff]   ;;  %v8101_v5 = vld [vmem:[#allocation16 + $0x8] sm:$0xff]   ;;  %vm973_vm1 = vcmask 1043456   ;;  %vm2302_vm2 = vcmask 7168  }
 0x1d3   : > { %7307 = vmatprep.mubr.msk.bf16.mxu0 %vm8926_vm0, %v8925_v0  ;;  %7317 = vmatprep.mubr.msk.bf16.mxu1 %vm8926_vm0, %v8925_v0  ;;  %v8103_v7 = vld [vmem:[#allocation16 + $0x10] ss:$0 sps:$4 sm:$0xff]   ;;  %v9572_v9 = vld [vmem:[%s666_s15 + $0x8] sm:$0xff]  ;;  %v819_v11 = vld [vmem:[%s675_s3] sm:$0xff]  ;;  %vm889_vm3 = vcmask 392192   ;;  %vm969_vm4 = vcmask 326656  }
 0x1d4   : > { %8066 = vset.pattern.permute.xlu0 %v8927_v1  ;;  %8067 = vset.pattern.permute.xlu1 %v8927_v1  ;;  %v9568_v8 = vld [vmem:[%s666_s15] sm:$0xff]  ;;  %v820_v12 = vld [vmem:[%s684_s27] sm:$0xff]  ;;  %v863_v13 = vmax.f32 %v9572_v9, 0.0  ;;  %v946_v15 = vmax.f32 %v819_v11, 0.0  ;;  %v821_v16 = vld [vmem:[%s684_s27 + $0x8] sm:$0xff]  ;;  %v975_v18 = vsel %vm973_vm1, %v8103_v7, 0 }
 0x1d5   : > { %7302 = vmatpush3.bf16.msra.mxu0 %v8098_v2  ;;  %7312 = vmatpush3.bf16.msra.mxu1 %v8099_v3  ;;  %v862_v10 = vmax.f32 %v9568_v8, 0.0  ;;  %v2007_v14 = vpack.c.bf16 %v9572_v9, %v9568_v8  ;;  %v822_v17 = vld [vmem:[%s693_s20] sm:$0xff]  ;;  %v2303_v19 = vsel %vm2302_vm2, %v820_v12, 0.0  ;;  %v2304_v20 = vsel %vm2302_vm2, %v821_v16, 0.0  ;;  %s8928_s2 = smov 120   ;;  %s8929_s26 = smov 96  }
 0x1d6   : > { %7303 = vmatprep.subr.bf16.mxu0 %v8925_v0  ;;  %7313 = vmatprep.subr.bf16.mxu1 %v8925_v0  ;;  %v9591_v22 = vadd.f32 %v2304_v20, %v2303_v19  ;;  %v947_v23 = vpack.c.bf16 %v946_v15, %v946_v15  ;;  %v6925_v25 = vld [vmem:[#allocation14] ss:$0 sm:$0xff]  ;;  %v6930_v26 = vld [vmem:[#allocation14 + $0x1] ss:$0 sm:$0xff]  ;;  %vm1034_vm5 = vcmask 64512   ;;  %s8930_s25 = smov 112  }
 0x1d7   : > { %936 = vperm.xlu0 %8066, %v820_v12   ;;  %v864_v21 = vpack.c.bf16 %v863_v13, %v862_v10  ;;  %1019 = vperm.xlu1 %8067, %v822_v17   ;;  %s11012_s14 = smov 88   ;;  %s8932_s28 = smov 104   ;;  %vm1550_vm6 = vcmask 130048   ;;  %v8362_v8 = vld [vmem:[%s693_s20] sm:$0xff]  ;;  %vm1553_vm7 = vcmask 195584   ;;  %vm2021_vm8 = vcmask 261120  }
 0x1d8   : > { %s11010_s15 = smov 80   ;;  %s11008_s5 = smov 72   ;;  %v2313_v9 = vsel %vm2302_vm2, %v8362_v8, 0.0 }
 0x1d9   : > { %7304 = vmatpush3.bf16.msra.mxu0 %v8100_v4  ;;  %7314 = vmatpush3.bf16.msra.mxu1 %v8101_v5  ;;  %v6935_v4 = vld [vmem:[%s9532_s4] ss:$0 sm:$0xff]  ;;  %s8935_s22 = smov 56   ;;  %s8936_s27 = smov 64  }
 0x1da   : > { %7305 = vmatprep.subr.bf16.mxu0 %v8925_v0  ;;  %7315 = vmatprep.subr.bf16.mxu1 %v8925_v0  ;;  %s8937_s0 = smov 48   ;;  %s8938_s17 = smov 40  }
 0x1db   : > { %941 = vperm.xlu0 %8066, %v821_v16   ;;  %s11083_s20 = smov 80   ;;  %p11087_p11 = scmp.ne.s32.totalorder %s11044_s30, 0 }
 0x1dd   : > { %7306 = vmatpush3.bf16.msra.mxu0 %v8102_v6  ;;  %7316 = vmatpush3.bf16.msra.mxu1 %v975_v18 }
 0x1de   : > { %7321 = vmatprep.subr.bf16.mxu0 %v8925_v0  ;;  %7327 = vmatprep.subr.bf16.mxu1 %v8925_v0 }
 0x1e0   : > { %7308 = vmatmul.mubr.msk.bf16.vlgmr.msra.gmra.mrb[0].mxu0 %vm889_vm3, %v864_v21  ;;  %7318 = vmatmul.mubr.msk.bf16.vlgmr.msra.gmra.mrb[0].mxu1 %vm969_vm4, %v947_v23 }
 0x1e1   : > { %7323 = vmatprep.mubr.msk.bf16.mxu0 %vm8926_vm0, %v8925_v0  ;;  %7329 = vmatprep.mubr.msk.bf16.mxu1 %vm8926_vm0, %v8925_v0 }
 0x256   : > { %v9601_v24 = vpop.permute.xlu0 %936  ;;  %v9603_v28 = vpop.permute.xlu1 %1019 }
 0x25a   : > { %v9605_v38 = vpop.permute.xlu0 %941 }
 0x2b3   : > { %v927_v27 = vpop.f32.mrb[0].mxu0  ;;  %v1011_v30 = vpop.f32.mrb[0].mxu1 }
 0x2b4   : > { %v928_v29 = vadd.f32 %v6925_v25, %v927_v27  ;;  %v7309_v31 = vpop.f32.mrb[1].mxu0  ;;  %v1012_v32 = vadd.f32 %v6930_v26, %v1011_v30  ;;  %v7319_v33 = vpop.f32.mrb[1].mxu1 }
 0x2b5   : > { %v930_v34 = vpop.f32.mrb[2].mxu0  ;;  %v1014_v36 = vpop.f32.mrb[2].mxu1 }
 0x2b6   : > { %v931_v35 = vadd.f32 %v6925_v25, %v930_v34  ;;  %v7310_v37 = vpop.f32.mrb[3].mxu0  ;;  %v1022_v39 = vmul.f32 %v9603_v28, %v1012_v32  ;;  %v7320_v40 = vpop.f32.mrb[3].mxu1  ;;  %v944_v41 = vmul.f32 %v9601_v24, %v928_v29 }
 0x2b8   : > { %v945_v42 = vmul.f32 %v9605_v38, %v931_v35  ;;  %v9610_v43 = vpack.c.bf16 %v1022_v39, %v1022_v39 }
 0x2ba   : > { %v9612_v44 = vpack.c.bf16 %v945_v42, %v944_v41  ;;  %1157 = vrot.lane.b32.xlu0 %v9610_v43, %s8928_s2  ;;  %v1039_v45 = vsel %vm1034_vm5, %v9610_v43, 0 }
 0x2bb   : > { %7322 = vmatpush3.bf16.xpose.msra.mxu0 %v1039_v45 }
 0x2bc   : > { %1032 = vrot.lane.b32.xlu1 %v9612_v44, %s8929_s26  ;;  %7333 = vmatprep.subr.bf16.mxu0 %v8925_v0  ;;  %v1568_v56 = vsel %vm1034_vm5, %v9612_v44, 0 }
 0x2be   : > { %1280 = vrot.lane.b32.xlu0 %v9610_v43, %s8930_s25 }
 0x2c0   : > { %1155 = vrot.lane.b32.xlu1 %v9612_v44, %s11012_s14 }
 0x2c2   : > { %1403 = vrot.lane.b32.xlu0 %v9610_v43, %s8932_s28 }
 0x2c4   : > { %1278 = vrot.lane.b32.xlu1 %v9612_v44, %s11010_s15 }
 0x2c6   : > { %1562 = vrot.lane.b32.xlu0 %v9610_v43, %s8929_s26 }
 0x2c8   : > { %1401 = vrot.lane.b32.xlu1 %v9612_v44, %s11008_s5 }
 0x2ca   : > { %1668 = vrot.lane.b32.xlu0 %v9610_v43, %s11012_s14  ;;  %s11014_s14 = smov 24  }
 0x2cc   : > { %1670 = vrot.lane.b32.xlu1 %v9612_v44, %s8928_s2 }
 0x2ce   : > { %1776 = vrot.lane.b32.xlu0 %v9610_v43, %s11010_s15  ;;  %s8940_s15 = smov 16  }
 0x2d0   : > { %1778 = vrot.lane.b32.xlu1 %v9612_v44, %s8930_s25 }
 0x2d2   : > { %1884 = vrot.lane.b32.xlu0 %v9610_v43, %s11008_s5  ;;  %s8939_s5 = smov 8  }
 0x2d4   : > { %1886 = vrot.lane.b32.xlu1 %v9612_v44, %s8932_s28 }
 0x32c   : > { %v1158_v46 = vpop.permute.xlu0 %1157 }
 0x32d   : > { %v1163_v47 = vsel %vm1034_vm5, %v1158_v46, 0  ;;  %v6944_v46 = vld [vmem:[%s9529_s16] ss:$0 sm:$0xff] }
 0x32e   : > { %v1033_v48 = vpop.permute.xlu1 %1032 }
 0x32f   : > { %7324 = vmatmul.mubr.msk.bf16.vlgmr.msra.gmra.mrb[4].mxu0 %vm1034_vm5, %v1033_v48 }
 0x330   : > { %7334 = vmatpush3.bf16.xpose.msra.mxu0 %v1163_v47  ;;  %7335 = vmatprep.mubr.msk.bf16.mxu0 %vm8926_vm0, %v8925_v0  ;;  %v1281_v49 = vpop.permute.xlu0 %1280 }
 0x331   : > { %7345 = vmatprep.subr.bf16.mxu0 %v8925_v0  ;;  %v1286_v51 = vsel %vm1034_vm5, %v1281_v49, 0 }
 0x332   : > { %v1156_v50 = vpop.permute.xlu1 %1155 }
 0x334   : > { %v1404_v52 = vpop.permute.xlu0 %1403 }
 0x335   : > { %v1409_v54 = vsel %vm1034_vm5, %v1404_v52, 0 }
 0x336   : > { %v1279_v53 = vpop.permute.xlu1 %1278 }
 0x337   : > { %7336 = vmatmul.mubr.msk.bf16.vlgmr.msra.gmra.mrb[8].mxu0 %vm1034_vm5, %v1156_v50 }
 0x338   : > { %7346 = vmatpush3.bf16.xpose.msra.mxu0 %v1286_v51  ;;  %7347 = vmatprep.mubr.msk.bf16.mxu0 %vm8926_vm0, %v8925_v0  ;;  %v1563_v58 = vpop.permute.xlu0 %1562 }
 0x339   : > { %7357 = vmatprep.subr.bf16.mxu0 %v8925_v0 }
 0x33a   : > { %v1402_v55 = vpop.permute.xlu1 %1401 }
 0x33c   : > { %v1669_v61 = vpop.permute.xlu0 %1668 }
 0x33e   : > { %v1671_v57 = vpop.permute.xlu1 %1670 }
 0x33f   : > { %7348 = vmatmul.mubr.msk.bf16.vlgmr.msra.gmra.mrb[12].mxu0 %vm1034_vm5, %v1279_v53  ;;  %v1676_v59 = vsel %vm1034_vm5, %v1671_v57, 0 }
 0x340   : > { %7358 = vmatpush3.bf16.xpose.msra.mxu0 %v1409_v54  ;;  %7359 = vmatprep.mubr.msk.bf16.mxu0 %vm8926_vm0, %v8925_v0  ;;  %v1777_v1 = vpop.permute.xlu0 %1776 }
 0x341   : > { %7369 = vmatprep.subr.bf16.mxu0 %v8925_v0 }
 0x342   : > { %v1779_v60 = vpop.permute.xlu1 %1778 }
 0x343   : > { %v1784_v62 = vsel %vm1034_vm5, %v1779_v60, 0 }
 0x344   : > { %v1885_v3 = vpop.permute.xlu0 %1884 }
 0x346   : > { %v1887_v63 = vpop.permute.xlu1 %1886 }
 0x347   : > { %7360 = vmatmul.mubr.msk.bf16.vlgmr.msra.gmra.mrb[16].mxu0 %vm1034_vm5, %v1402_v55  ;;  %v1892_v2 = vsel %vm1034_vm5, %v1887_v63, 0 }
 0x348   : > { %7370 = vmatpush3.bf16.xpose.msra.mxu0 %v1568_v56  ;;  %7371 = vmatprep.mubr.msk.bf16.mxu0 %vm8926_vm0, %v8925_v0 }
 0x349   : > { %7381 = vmatprep.subr.bf16.mxu0 %v8925_v0 }
 0x34f   : > { %7372 = vmatmul.mubr.msk.bf16.vlgmr.msra.gmra.mrb[20].mxu0 %vm1034_vm5, %v1563_v58 }
 0x350   : > { %7382 = vmatpush3.bf16.xpose.msra.mxu0 %v1676_v59  ;;  %7383 = vmatprep.mubr.msk.bf16.mxu0 %vm8926_vm0, %v8925_v0 }
 0x351   : > { %7393 = vmatprep.subr.bf16.mxu0 %v8925_v0 }
 0x357   : > { %7384 = vmatmul.mubr.msk.bf16.vlgmr.msra.gmra.mrb[24].mxu0 %vm1034_vm5, %v1669_v61 }
 0x358   : > { %7394 = vmatpush3.bf16.xpose.msra.mxu0 %v1784_v62  ;;  %7395 = vmatprep.mubr.msk.bf16.mxu0 %vm8926_vm0, %v8925_v0 }
 0x359   : > { %7405 = vmatprep.subr.bf16.mxu0 %v8925_v0 }
 0x35f   : > { %7396 = vmatmul.mubr.msk.bf16.vlgmr.msra.gmra.mrb[28].mxu0 %vm1034_vm5, %v1777_v1 }
 0x360   : > { %7406 = vmatpush3.bf16.xpose.msra.mxu0 %v1892_v2  ;;  %7407 = vmatprep.mubr.msk.bf16.mxu0 %vm8926_vm0, %v8925_v0 }
 0x361   : > { %7417 = vmatprep.subr.bf16.mxu0 %v8925_v0 }
 0x367   : > { %7408 = vmatmul.mubr.msk.bf16.vlgmr.msra.gmra.mrb[32].mxu0 %vm1034_vm5, %v1885_v3 }
 0x368   : > { %7421 = vmatprep.mubr.msk.bf16.mxu0 %vm8926_vm0, %v8925_v0 }
 0x402   : > { %v1075_v5 = vpop.f32.mrb[4].mxu0 }
 0x403   : > { %v9685_v6 = vadd.f32 %v6935_v4, %v1075_v5  ;;  %v7325_v7 = vpop.f32.mrb[5].mxu0 }
 0x404   : > { %v1078_v10 = vpop.f32.mrb[6].mxu0 }
 0x405   : > { %v9687_v11 = vadd.f32 %v6935_v4, %v1078_v10  ;;  %v7326_v12 = vpop.f32.mrb[7].mxu0  ;;  %v1082_v13 = vsel %vm1034_vm5, %v9685_v6, -inf }
 0x406   : > { %1083 = vmax.xlane.f32.xlu1 %v1082_v13 }
 0x407   : > { %v1085_v15 = vsel %vm1034_vm5, %v9687_v11, -inf }
 0x408   : > { %1086 = vmax.xlane.f32.xlu0 %v1085_v15 }
 0x40a   : > { %v1199_v16 = vpop.f32.mrb[8].mxu0 }
 0x40b   : > { %v9693_v17 = vadd.f32 %v6935_v4, %v1199_v16  ;;  %v7337_v18 = vpop.f32.mrb[9].mxu0 }
 0x40c   : > { %v1202_v19 = vpop.f32.mrb[10].mxu0 }
 0x40d   : > { %v9695_v20 = vadd.f32 %v6935_v4, %v1202_v19  ;;  %v7338_v21 = vpop.f32.mrb[11].mxu0  ;;  %v1206_v23 = vsel %vm1034_vm5, %v9693_v17, -inf }
 0x40e   : > { %1207 = vmax.xlane.f32.xlu0 %v1206_v23 }
 0x40f   : > { %v1209_v25 = vsel %vm1034_vm5, %v9695_v20, -inf }
 0x410   : > { %1210 = vmax.xlane.f32.xlu1 %v1209_v25 }
 0x412   : > { %v1322_v26 = vpop.f32.mrb[12].mxu0 }
 0x413   : > { %v9701_v27 = vadd.f32 %v6935_v4, %v1322_v26  ;;  %v7349_v29 = vpop.f32.mrb[13].mxu0 }
 0x414   : > { %v1325_v30 = vpop.f32.mrb[14].mxu0 }
 0x415   : > { %v9703_v31 = vadd.f32 %v6935_v4, %v1325_v30  ;;  %v7350_v32 = vpop.f32.mrb[15].mxu0  ;;  %v1329_v33 = vsel %vm1034_vm5, %v9701_v27, -inf }
 0x416   : > { %1330 = vmax.xlane.f32.xlu0 %v1329_v33 }
 0x417   : > { %v1332_v34 = vsel %vm1034_vm5, %v9703_v31, -inf }
 0x418   : > { %1333 = vmax.xlane.f32.xlu1 %v1332_v34 }
 0x41a   : > { %v1445_v35 = vpop.f32.mrb[16].mxu0 }
 0x41b   : > { %v9709_v36 = vadd.f32 %v6935_v4, %v1445_v35  ;;  %v7361_v37 = vpop.f32.mrb[17].mxu0 }
 0x41c   : > { %v1448_v39 = vpop.f32.mrb[18].mxu0 }
 0x41d   : > { %v9711_v40 = vadd.f32 %v6935_v4, %v1448_v39  ;;  %v7362_v41 = vpop.f32.mrb[19].mxu0  ;;  %v1452_v42 = vsel %vm1034_vm5, %v9709_v36, -inf }
 0x41e   : > { %1453 = vmax.xlane.f32.xlu0 %v1452_v42 }
 0x41f   : > { %v1455_v45 = vsel %vm1034_vm5, %v9711_v40, -inf }
 0x420   : > { %1456 = vmax.xlane.f32.xlu1 %v1455_v45 }
 0x422   : > { %v1604_v47 = vpop.f32.mrb[20].mxu0 }
 0x423   : > { %v9718_v48 = vadd.f32 %v6944_v46, %v1604_v47  ;;  %v7373_v49 = vpop.f32.mrb[21].mxu0 }
 0x424   : > { %v1607_v50 = vpop.f32.mrb[22].mxu0 }
 0x425   : > { %v7374_v51 = vpop.f32.mrb[23].mxu0  ;;  %v1610_v52 = vsel %vm1550_vm6, %v9718_v48, -inf }
 0x426   : > { %1611 = vmax.xlane.f32.xlu0 %v1610_v52 }
 0x42a   : > { %v1712_v53 = vpop.f32.mrb[24].mxu0 }
 0x42b   : > { %v9722_v54 = vadd.f32 %v6944_v46, %v1712_v53  ;;  %v7385_v55 = vpop.f32.mrb[25].mxu0 }
 0x42c   : > { %v1715_v56 = vpop.f32.mrb[26].mxu0 }
 0x42d   : > { %v7386_v57 = vpop.f32.mrb[27].mxu0  ;;  %v1718_v58 = vsel %vm1550_vm6, %v9722_v54, -inf }
 0x42e   : > { %1719 = vmax.xlane.f32.xlu1 %v1718_v58 }
 0x432   : > { %v1820_v59 = vpop.f32.mrb[28].mxu0 }
 0x433   : > { %v9726_v60 = vadd.f32 %v6944_v46, %v1820_v59  ;;  %v7397_v61 = vpop.f32.mrb[29].mxu0 }
 0x434   : > { %v1823_v62 = vpop.f32.mrb[30].mxu0 }
 0x435   : > { %v7398_v63 = vpop.f32.mrb[31].mxu0  ;;  %v1826_v1 = vsel %vm1550_vm6, %v9726_v60, -inf }
 0x436   : > { %1827 = vmax.xlane.f32.xlu0 %v1826_v1 }
 0x43a   : > { %v1928_v2 = vpop.f32.mrb[32].mxu0 }
 0x43b   : > { %v7409_v3 = vpop.f32.mrb[33].mxu0  ;;  %v9734_v7 = vadd.f32 %v6944_v46, %v1928_v2 }
 0x43c   : > { %v1931_v4 = vpop.f32.mrb[34].mxu0 }
 0x43d   : > { %v7410_v5 = vpop.f32.mrb[35].mxu0  ;;  %v1934_v10 = vsel %vm1550_vm6, %v9734_v7, -inf }
 0x43f   : > { %1229 = vrot.lane.b32.xlu1 %v9610_v43, %s8935_s22 }
 0x44c   : > { %1106 = vrot.lane.b32.xlu0 %v9610_v43, %s8936_s27 }
 0x463   : > { %1935 = vmax.xlane.f32.xlu1 %v1934_v10 }
 0x474   : > { %1352 = vrot.lane.b32.xlu1 %v9610_v43, %s8937_s0 }
 0x493   : > { %v1084_v12 = vpop.xlane.xlu1 %1083 }
 0x494   : > { %v1088_v13 = vsub.f32 %v9685_v6, %v1084_v12 }
 0x495   : > { %v1087_v15 = vpop.xlane.xlu0 %1086 }
 0x496   : > { %v1090_v16 = vmul.f32 1.442695, %v1088_v13  ;;  %v1089_v18 = vsub.f32 %v9687_v11, %v1087_v15 }
 0x498   : > { %8150 = vpow2.f32 %v1090_v16  ;;  %v1092_v19 = vmul.f32 1.442695, %v1089_v18 }
 0x49a   : > { %8152 = vpow2.f32 %v1092_v19 }
 0x49b   : > { %v1208_v21 = vpop.xlane.xlu0 %1207 }
 0x49c   : > { %v1212_v23 = vsub.f32 %v9693_v17, %v1208_v21 }
 0x49d   : > { %v1211_v25 = vpop.xlane.xlu1 %1210 }
 0x49e   : > { %v1214_v26 = vmul.f32 1.442695, %v1212_v23  ;;  %v1213_v29 = vsub.f32 %v9695_v20, %v1211_v25 }
 0x4a0   : > { %8154 = vpow2.f32 %v1214_v26  ;;  %v1216_v30 = vmul.f32 1.442695, %v1213_v29 }
 0x4a2   : > { %v9744_v32 = vpop.eup %8150  ;;  %8156 = vpow2.f32 %v1216_v30 }
 0x4a3   : > { %v1331_v6 = vpop.xlane.xlu0 %1330  ;;  %v1094_v33 = vsel %vm1034_vm5, %v9744_v32, 0.0 }
 0x4a4   : > { %v9748_v11 = vpop.eup %8152  ;;  %v1335_v34 = vsub.f32 %v9701_v27, %v1331_v6  ;;  %1095 = vadd.xlane.f32.xlu0 %v1094_v33 }
 0x4a5   : > { %v1334_v35 = vpop.xlane.xlu1 %1333  ;;  %v1097_v17 = vsel %vm1034_vm5, %v9748_v11, 0.0 }
 0x4a6   : > { %v1337_v37 = vmul.f32 1.442695, %v1335_v34  ;;  %v1336_v20 = vsub.f32 %v9703_v31, %v1334_v35  ;;  %1098 = vadd.xlane.f32.xlu1 %v1097_v17 }
 0x4a8   : > { %8158 = vpow2.f32 %v1337_v37  ;;  %v1339_v39 = vmul.f32 1.442695, %v1336_v20 }
 0x4aa   : > { %v9754_v41 = vpop.eup %8154  ;;  %8160 = vpow2.f32 %v1339_v39 }
 0x4ab   : > { %v1454_v42 = vpop.xlane.xlu0 %1453  ;;  %v1218_v45 = vsel %vm1034_vm5, %v9754_v41, 0.0 }
 0x4ac   : > { %v9758_v46 = vpop.eup %8156  ;;  %v1458_v27 = vsub.f32 %v9709_v36, %v1454_v42  ;;  %1219 = vadd.xlane.f32.xlu0 %v1218_v45 }
 0x4ad   : > { %v1457_v47 = vpop.xlane.xlu1 %1456  ;;  %v1221_v49 = vsel %vm1034_vm5, %v9758_v46, 0.0 }
 0x4ae   : > { %v1460_v31 = vmul.f32 1.442695, %v1458_v27  ;;  %v1459_v50 = vsub.f32 %v9711_v40, %v1457_v47  ;;  %1222 = vadd.xlane.f32.xlu1 %v1221_v49 }
 0x4b0   : > { %8162 = vpow2.f32 %v1460_v31  ;;  %v1462_v51 = vmul.f32 1.442695, %v1459_v50 }
 0x4b2   : > { %v9764_v52 = vpop.eup %8158  ;;  %8164 = vpow2.f32 %v1462_v51 }
 0x4b3   : > { %v1612_v53 = vpop.xlane.xlu0 %1611  ;;  %v1341_v55 = vsel %vm1034_vm5, %v9764_v52, 0.0 }
 0x4b4   : > { %v9768_v56 = vpop.eup %8160  ;;  %v1613_v36 = vsub.f32 %v9718_v48, %v1612_v53  ;;  %1342 = vadd.xlane.f32.xlu0 %v1341_v55 }
 0x4b5   : > { %v1344_v57 = vsel %vm1034_vm5, %v9768_v56, 0.0 }
 0x4b6   : > { %v1614_v58 = vmul.f32 1.442695, %v1613_v36  ;;  %1345 = vadd.xlane.f32.xlu1 %v1344_v57 }
 0x4b8   : > { %8166 = vpow2.f32 %v1614_v58 }
 0x4ba   : > { %v9773_v40 = vpop.eup %8162 }
 0x4bb   : > { %v1464_v59 = vsel %vm1034_vm5, %v9773_v40, 0.0 }
 0x4bc   : > { %v9777_v61 = vpop.eup %8164  ;;  %1465 = vadd.xlane.f32.xlu0 %v1464_v59 }
 0x4bd   : > { %v1467_v62 = vsel %vm1034_vm5, %v9777_v61, 0.0 }
 0x4be   : > { %1468 = vadd.xlane.f32.xlu1 %v1467_v62 }
 0x4c2   : > { %v9781_v48 = vpop.eup %8166 }
 0x4c3   : > { %v1828_v63 = vpop.xlane.xlu0 %1827  ;;  %v1616_v1 = vsel %vm1550_vm6, %v9781_v48, 0.0 }
 0x4c4   : > { %v1829_v2 = vsub.f32 %v9726_v60, %v1828_v63  ;;  %1617 = vadd.xlane.f32.xlu1 %v1616_v1  ;;  %v1720_v60 = vpop.xlane.xlu1 %1719 }
 0x4c5   : > { %v1721_v13 = vsub.f32 %v9722_v54, %v1720_v60 }
 0x4c6   : > { %v1830_v3 = vmul.f32 1.442695, %v1829_v2 }
 0x4c7   : > { %v1107_v4 = vpop.permute.xlu0 %1106  ;;  %v1722_v15 = vmul.f32 1.442695, %v1721_v13 }
 0x4c8   : > { %8168 = vpow2.f32 %v1830_v3  ;;  %v1112_v5 = vsel %vm973_vm1, %v1107_v4, 0  ;;  %v1230_v16 = vpop.permute.xlu1 %1229 }
 0x4c9   : > { %7328 = vmatpush3.bf16.msra.mxu1 %v1112_v5  ;;  %8170 = vpow2.f32 %v1722_v15 }
 0x4ca   : > { %7339 = vmatprep.subr.bf16.mxu1 %v8925_v0 }
 0x4d2   : > { %v9788_v10 = vpop.eup %8168  ;;  %1475 = vrot.lane.b32.xlu0 %v9610_v43, %s8938_s17 }
 0x4d3   : > { %v1832_v12 = vsel %vm1550_vm6, %v9788_v10, 0.0  ;;  %v9795_v18 = vpop.eup %8170 }
 0x4d4   : > { %1833 = vadd.xlane.f32.xlu1 %v1832_v12  ;;  %v1724_v21 = vsel %vm1550_vm6, %v9795_v18, 0.0 }
 0x4f0   : > { %v1936_v19 = vpop.xlane.xlu1 %1935 }
 0x4f1   : > { %v1937_v23 = vsub.f32 %v9734_v7, %v1936_v19  ;;  %1725 = vadd.xlane.f32.xlu0 %v1724_v21 }
 0x4f3   : > { %v1938_v43 = vmul.f32 1.442695, %v1937_v23 }
 0x4f4   : > { %v1353_v54 = vpop.permute.xlu1 %1352 }
 0x4f5   : > { %8172 = vpow2.f32 %v1938_v43  ;;  %v1358_v49 = vsel %vm973_vm1, %v1353_v54, 0 }
 0x4ff   : > { %v9800_v25 = vpop.eup %8172 }
 0x500   : > { %v1940_v26 = vsel %vm1550_vm6, %v9800_v25, 0.0 }
 0x501   : > { %1941 = vadd.xlane.f32.xlu1 %v1940_v26 }
 0x507   : > { %1730 = vrot.lane.b32.xlu0 %v9612_v44, %s8935_s22 }
 0x50b   : > { %1838 = vrot.lane.b32.xlu0 %v9612_v44, %s8937_s0 }
 0x50f   : > { %1946 = vrot.lane.b32.xlu0 %v9612_v44, %s8938_s17 }
 0x512   : > { %1622 = vrot.lane.b32.xlu1 %v9612_v44, %s8936_s27  ;;  %v1235_v44 = vsel %vm973_vm1, %v1230_v16, 0 }
 0x531   : > { %v1096_v7 = vpop.xlane.xlu0 %1095 }
 0x532   : > { %8174 = vrcp.f32 %v1096_v7 }
 0x533   : > { %v1099_v29 = vpop.xlane.xlu1 %1098 }
 0x534   : > { %8176 = vrcp.f32 %v1099_v29 }
 0x539   : > { %v1220_v30 = vpop.xlane.xlu0 %1219 }
 0x53a   : > { %8178 = vrcp.f32 %v1220_v30 }
 0x53b   : > { %v1223_v6 = vpop.xlane.xlu1 %1222 }
 0x53c   : > { %v8175_v33 = vpop.eup %8174  ;;  %8180 = vrcp.f32 %v1223_v6  ;;  %v8104_v6 = vld [vmem:[#allocation17] sm:$0xff]  }
 0x53d   : > { %v1102_v35 = vmul.f32 %v8175_v33, %v9744_v32 }
 0x53e   : > { %v8177_v34 = vpop.eup %8176 }
 0x53f   : > { %v1103_v17 = vmul.f32 %v8177_v34, %v9748_v11  ;;  %v8105_v34 = vld [vmem:[#allocation19] sm:$0xff]  }
 0x540   : > { %7418 = vmatpush3.bf16.msra.mxu0 %v8105_v34 }
 0x541   : > { %v1343_v37 = vpop.xlane.xlu0 %1342  ;;  %v1104_v20 = vpack.c.bf16 %v1103_v17, %v1102_v35  ;;  %v8106_v17 = vld [vmem:[#allocation17 + $0x8] sm:$0xff]   ;;  %7419 = vmatprep.subr.bf16.mxu0 %v8925_v0 }
 0x542   : > { %8182 = vrcp.f32 %v1343_v37 }
 0x543   : > { %7330 = vmatmul.mubr.msk.bf16.vlgmr.msra.gmra.mrb[4].mxu1 %vm1034_vm5, %v1104_v20  ;;  %v1346_v39 = vpop.xlane.xlu1 %1345 }
 0x544   : > { %v8179_v42 = vpop.eup %8178  ;;  %7340 = vmatpush3.bf16.msra.mxu1 %v1235_v44  ;;  %8184 = vrcp.f32 %v1346_v39  ;;  %7341 = vmatprep.mubr.msk.bf16.mxu1 %vm8926_vm0, %v8925_v0  ;;  %v8107_v44 = vld [vmem:[#allocation19 + $0x8] sm:$0xff]   ;;  %v8108_v39 = vld [vmem:[#allocation17 + $0x10] sm:$0xff]  }
 0x545   : > { %7351 = vmatprep.subr.bf16.mxu1 %v8925_v0  ;;  %v1226_v32 = vmul.f32 %v8179_v42, %v9754_v41  ;;  %7420 = vmatpush3.bf16.msra.mxu0 %v8107_v44 }
 0x546   : > { %v8181_v45 = vpop.eup %8180  ;;  %7435 = vmatprep.subr.bf16.mxu0 %v8925_v0 }
 0x547   : > { %v1227_v11 = vmul.f32 %v8181_v45, %v9758_v46 }
 0x549   : > { %v1466_v27 = vpop.xlane.xlu0 %1465  ;;  %v1228_v47 = vpack.c.bf16 %v1227_v11, %v1226_v32 }
 0x54a   : > { %8186 = vrcp.f32 %v1466_v27 }
 0x54b   : > { %7342 = vmatmul.mubr.msk.bf16.vlgmr.msra.gmra.mrb[8].mxu1 %vm1034_vm5, %v1228_v47  ;;  %v1469_v31 = vpop.xlane.xlu1 %1468 }
 0x54c   : > { %v8183_v50 = vpop.eup %8182  ;;  %7352 = vmatpush3.bf16.msra.mxu1 %v1358_v49  ;;  %8188 = vrcp.f32 %v1469_v31  ;;  %7353 = vmatprep.mubr.msk.bf16.mxu1 %vm8926_vm0, %v8925_v0 }
 0x54d   : > { %7363 = vmatprep.subr.bf16.mxu1 %v8925_v0  ;;  %v1349_v41 = vmul.f32 %v8183_v50, %v9764_v52  ;;  %v1476_v53 = vpop.permute.xlu0 %1475  ;;  %v2306_v50 = vrot.slane %v9591_v22, 4 }
 0x54e   : > { %v8185_v51 = vpop.eup %8184  ;;  %v1481_v36 = vsel %vm973_vm1, %v1476_v53, 0  ;;  %v2314_v53 = vrot.slane %v2313_v9, 4 }
 0x54f   : > { %v1350_v46 = vmul.f32 %v8185_v51, %v9768_v56  ;;  %v8109_v51 = vld [vmem:[#allocation22] sm:$0xff]  }
 0x551   : > { %v1351_v55 = vpack.c.bf16 %v1350_v46, %v1349_v41  ;;  %v1618_v56 = vpop.xlane.xlu1 %1617  ;;  %v2307_v41 = vadd.f32 %v2306_v50, %v9591_v22 }
 0x552   : > { %8190 = vrcp.f32 %v1618_v56 }
 0x553   : > { %7354 = vmatmul.mubr.msk.bf16.vlgmr.msra.gmra.mrb[12].mxu1 %vm1034_vm5, %v1351_v55  ;;  %v2308_v46 = vrot.slane %v2307_v41, 2 }
 0x554   : > { %v8187_v57 = vpop.eup %8186  ;;  %7364 = vmatpush3.bf16.msra.mxu1 %v1481_v36  ;;  %7365 = vmatprep.mubr.msk.bf16.mxu1 %vm8926_vm0, %v8925_v0 }
 0x555   : > { %7375 = vmatprep.subr.bf16.mxu1 %v8925_v0  ;;  %v1472_v59 = vmul.f32 %v8187_v57, %v9773_v40 }
 0x556   : > { %v8189_v58 = vpop.eup %8188 }
 0x557   : > { %v1473_v52 = vmul.f32 %v8189_v58, %v9777_v61  ;;  %v8110_v58 = vld [vmem:[#allocation22 + $0x8] sm:$0xff]  }
 0x559   : > { %v1474_v62 = vpack.c.bf16 %v1473_v52, %v1472_v59  ;;  %v8112_v59 = vld [vmem:[#allocation22 + $0x10] ss:$0 sps:$4 sm:$0xff]   ;;  %v2315_v52 = vadd.f32 %v2314_v53, %v2313_v9  ;;  %v8114_v53 = vld [vmem:[#allocation23] sm:$0xff]  }
 0x55a   : > { %v2212_v22 = vsel %vm973_vm1, %v8112_v59, 0 }
 0x55b   : > { %7366 = vmatmul.mubr.msk.bf16.vlgmr.msra.gmra.mrb[16].mxu1 %vm1034_vm5, %v1474_v62  ;;  %v2309_v62 = vadd.f32 %v2308_v46, %v2307_v41 }
 0x55c   : > { %7377 = vmatprep.mubr.msk.bf16.mxu1 %vm8926_vm0, %v8925_v0  ;;  %v8191_v2 = vpop.eup %8190 }
 0x55d   : > { %v1620_v4 = vmul.f32 %v8191_v2, %v9781_v48  ;;  %v2316_v2 = vrot.slane %v2315_v52, 2 }
 0x55f   : > { %v1621_v40 = vpack.c.bf16 %v1620_v4, %v1620_v4  ;;  %v2310_v4 = vrot.slane %v2309_v62, 1 }
 0x561   : > { %v1834_v1 = vpop.xlane.xlu1 %1833 }
 0x57e   : > { %v1726_v63 = vpop.xlane.xlu0 %1725 }
 0x57f   : > { %8192 = vrcp.f32 %v1726_v63  ;;  %v8363_v63 = vld [vmem:[%s675_s3] sm:$0xff]  ;;  %s11082_s3 = smov 88  }
 0x580   : > { %8194 = vrcp.f32 %v1834_v1  ;;  %v2136_v1 = vpack.c.bf16 %v8363_v63, %v8363_v63 }
 0x582   : > { %v1731_v12 = vpop.permute.xlu0 %1730 }
 0x586   : > { %v1839_v15 = vpop.permute.xlu0 %1838 }
 0x589   : > { %v8193_v61 = vpop.eup %8192 }
 0x58a   : > { %v1728_v60 = vmul.f32 %v8193_v61, %v9795_v18  ;;  %v8195_v13 = vpop.eup %8194  ;;  %v1947_v23 = vpop.permute.xlu0 %1946  ;;  %v2317_v61 = vadd.f32 %v2316_v2, %v2315_v52 }
 0x58b   : > { %v1836_v16 = vmul.f32 %v8195_v13, %v9788_v10 }
 0x58c   : > { %v1729_v48 = vpack.c.bf16 %v1728_v60, %v1728_v60 }
 0x58d   : > { %v1837_v19 = vpack.c.bf16 %v1836_v16, %v1836_v16 }
 0x58e   : > { %v1942_v3 = vpop.xlane.xlu1 %1941 }
 0x58f   : > { %8196 = vrcp.f32 %v1942_v3 }
 0x592   : > { %v1623_v5 = vpop.permute.xlu1 %1622 }
 0x593   : > { %7376 = vmatpush3.bf16.msra.mxu1 %v1623_v5 }
 0x594   : > { %7387 = vmatprep.subr.bf16.mxu1 %v8925_v0 }
 0x596   : > { %7378 = vmatmul.mubr.msk.bf16.vlgmr.msra.gmra.mrb[20].mxu1 %vm1550_vm6, %v1621_v40 }
 0x597   : > { %7388 = vmatpush3.bf16.msra.mxu1 %v1731_v12  ;;  %7389 = vmatprep.mubr.msk.bf16.mxu1 %vm8926_vm0, %v8925_v0  ;;  %v2311_v12 = vadd.f32 %v2310_v4, %v2309_v62 }
 0x598   : > { %7399 = vmatprep.subr.bf16.mxu1 %v8925_v0 }
 0x599   : > { %v8197_v21 = vpop.eup %8196  ;;  %v2312_v13 = vmax.f32 %v2311_v12, 1.0 }
 0x59a   : > { %v1944_v18 = vmul.f32 %v8197_v21, %v9800_v25 }
 0x59c   : > { %v1945_v43 = vpack.c.bf16 %v1944_v18, %v1944_v18 }
 0x59e   : > { %7390 = vmatmul.mubr.msk.bf16.vlgmr.msra.gmra.mrb[24].mxu1 %vm1550_vm6, %v1729_v48 }
 0x59f   : > { %7400 = vmatpush3.bf16.msra.mxu1 %v1839_v15  ;;  %7401 = vmatprep.mubr.msk.bf16.mxu1 %vm8926_vm0, %v8925_v0  ;;  %v2318_v15 = vrot.slane %v2317_v61, 1 }
 0x5a0   : > { %7411 = vmatprep.subr.bf16.mxu1 %v8925_v0 }
 0x5a1   : > { %v2319_v21 = vadd.f32 %v2318_v15, %v2317_v61 }
 0x5a6   : > { %7402 = vmatmul.mubr.msk.bf16.vlgmr.msra.gmra.mrb[28].mxu1 %vm1550_vm6, %v1837_v19 }
 0x5a7   : > { %7412 = vmatpush3.bf16.msra.mxu1 %v1947_v23  ;;  %7413 = vmatprep.mubr.msk.bf16.mxu1 %vm8926_vm0, %v8925_v0 }
 0x5a8   : > { %7425 = vmatprep.subr.bf16.mxu1 %v8925_v0 }
 0x5ae   : > { %7414 = vmatmul.mubr.msk.bf16.vlgmr.msra.gmra.mrb[32].mxu1 %vm1550_vm6, %v1945_v43  ;;  %v2320_v43 = vmax.f32 %v2319_v21, 1.0 }
 0x5af   : > { %7431 = vmatprep.mubr.msk.bf16.mxu1 %vm8926_vm0, %v8925_v0  ;;  %7426 = vmatpush3.bf16.msra.mxu1 %v8104_v6 }
 0x5b0   : > { %7427 = vmatprep.subr.bf16.mxu1 %v8925_v0 }
 0x5b3   : > { %7428 = vmatpush3.bf16.msra.mxu1 %v8106_v17 }
 0x5b4   : > { %7429 = vmatprep.subr.bf16.mxu1 %v8925_v0 }
 0x5b7   : > { %7430 = vmatpush3.bf16.msra.mxu1 %v8108_v39 }
 0x5b8   : > { %7443 = vmatprep.subr.bf16.mxu1 %v8925_v0 }
 0x5ba   : > { %7432 = vmatmul.mubr.msk.bf16.vlgmr.msra.gmra.mrb[36].mxu1 %vm889_vm3, %v2007_v14 }
 0x5bb   : > { %7449 = vmatprep.mubr.msk.bf16.mxu1 %vm8926_vm0, %v8925_v0  ;;  %7444 = vmatpush3.bf16.msra.mxu1 %v8109_v51 }
 0x5bc   : > { %7445 = vmatprep.subr.bf16.mxu1 %v8925_v0 }
 0x5bf   : > { %7446 = vmatpush3.bf16.msra.mxu1 %v8110_v58 }
 0x5c0   : > { %7447 = vmatprep.subr.bf16.mxu1 %v8925_v0 }
 0x5c3   : > { %7448 = vmatpush3.bf16.msra.mxu1 %v2212_v22 }
 0x5c4   : > { %7469 = vmatprep.subr.bf16.mxu1 %v8925_v0 }
 0x5c6   : > { %7450 = vmatmul.mubr.msk.bf16.vlgmr.msra.gmra.mrb[40].mxu1 %vm969_vm4, %v2136_v1 }
 0x5c7   : > { %7473 = vmatprep.mubr.msk.bf16.mxu1 %vm8926_vm0, %v8925_v0  ;;  %7470 = vmatpush3.bf16.msra.mxu1 %v8114_v53  ;;  %v8121_v53 = vld [vmem:[#allocation23 + $0x18] sm:$0xff]  }
 0x5c8   : > { %7471 = vmatprep.subr.bf16.mxu1 %v8925_v0 }
 0x616   : > { %v9858_v10 = vpop.f32.mrb[4].mxu1 }
 0x617   : > { %v7331_v26 = vpop.f32.mrb[5].mxu1 }
 0x618   : > { %v9860_v54 = vpop.f32.mrb[6].mxu1 }
 0x619   : > { %v7332_v7 = vpop.f32.mrb[7].mxu1 }
 0x61e   : > { %v1271_v29 = vpop.f32.mrb[8].mxu1 }
 0x61f   : > { %v7343_v30 = vpop.f32.mrb[9].mxu1 }
 0x620   : > { %v1274_v33 = vpop.f32.mrb[10].mxu1 }
 0x621   : > { %v8068_v25 = vpack.i.bf16 %v1274_v33, %v1271_v29  ;;  %v7344_v35 = vpop.f32.mrb[11].mxu1 }
 0x623   : > { %8069 = vrot.lane.b32.xlu1 %v8068_v25, %s8939_s5 }
 0x626   : > { %v1394_v37 = vpop.f32.mrb[12].mxu1 }
 0x627   : > { %v7355_v20 = vpop.f32.mrb[13].mxu1 }
 0x628   : > { %v1397_v42 = vpop.f32.mrb[14].mxu1 }
 0x629   : > { %v8073_v45 = vpack.i.bf16 %v1397_v42, %v1394_v37  ;;  %v7356_v32 = vpop.f32.mrb[15].mxu1 }
 0x62b   : > { %8074 = vrot.lane.b32.xlu0 %v8073_v45, %s8940_s15 }
 0x62e   : > { %v1517_v11 = vpop.f32.mrb[16].mxu1 }
 0x62f   : > { %v7367_v27 = vpop.f32.mrb[17].mxu1 }
 0x630   : > { %v1520_v47 = vpop.f32.mrb[18].mxu1 }
 0x631   : > { %v8078_v49 = vpack.i.bf16 %v1520_v47, %v1517_v11  ;;  %v7368_v31 = vpop.f32.mrb[19].mxu1  ;;  %v8111_v11 = vld [vmem:[#allocation19 + $0x10] sm:$0xff]  }
 0x633   : > { %8079 = vrot.lane.b32.xlu1 %v8078_v49, %s11014_s14 }
 0x669   : > { %v9882_v14 = vpop.f32.mrb[20].mxu1 }
 0x66a   : > { %v7379_v55 = vpop.f32.mrb[21].mxu1 }
 0x66b   : > { %v1665_v36 = vpop.f32.mrb[22].mxu1 }
 0x66c   : > { %v7380_v57 = vpop.f32.mrb[23].mxu1  ;;  %v8116_v36 = vld [vmem:[#allocation19 + $0x20] sm:$0xff]  }
 0x66d   : > { %v8117_v57 = vld [vmem:[#allocation19 + $0x28] sm:$0xff]  }
 0x671   : > { %v1770_v56 = vpop.f32.mrb[24].mxu1 }
 0x672   : > { %1993 = vrot.lane.b32.xlu0 %v1770_v56, %s8939_s5  ;;  %v7391_v3 = vpop.f32.mrb[25].mxu1  ;;  %v6960_v56 = vld [vmem:[#allocation20] ss:$0 sm:$0xff] }
 0x673   : > { %v1773_v5 = vpop.f32.mrb[26].mxu1 }
 0x674   : > { %v7392_v40 = vpop.f32.mrb[27].mxu1 }
 0x679   : > { %v1878_v60 = vpop.f32.mrb[28].mxu1 }
 0x67a   : > { %1997 = vrot.lane.b32.xlu1 %v1878_v60, %s8940_s15  ;;  %v7403_v48 = vpop.f32.mrb[29].mxu1 }
 0x67b   : > { %v1881_v16 = vpop.f32.mrb[30].mxu1 }
 0x67c   : > { %v7404_v19 = vpop.f32.mrb[31].mxu1 }
 0x67e   : > { %2334 = vperm.xlu1 %8067, %v2312_v13  }
 0x681   : > { %v1986_v23 = vpop.f32.mrb[32].mxu1 }
 0x682   : > { %2001 = vrot.lane.b32.xlu0 %v1986_v23, %s11014_s14  ;;  %v7415_v18 = vpop.f32.mrb[33].mxu1 }
 0x683   : > { %v1989_v26 = vpop.f32.mrb[34].mxu1 }
 0x684   : > { %v7416_v7 = vpop.f32.mrb[35].mxu1 }
 0x686   : > { %2349 = vperm.xlu0 %8066, %v2320_v43  }
 0x68d   : > { %v2121_v8 = vpop.f32.mrb[36].mxu1 }
 0x68e   : > { %v7433_v9 = vpop.f32.mrb[37].mxu1 }
 0x68f   : > { %v2124_v46 = vpop.f32.mrb[38].mxu1  ;;  %v8120_v9 = vld [vmem:[#allocation23 + $0x10] sm:$0xff]  }
 0x690   : > { %v7434_v55 = vpop.f32.mrb[39].mxu1 }
 0x695   : > { %v8070_v29 = vpop.permute.xlu1 %8069 }
 0x696   : > { %v8072_v6 = vunpack.i.h.bf16 %v8070_v29  ;;  %v8071_v33 = vunpack.i.l.bf16 %v8070_v29 }
 0x698   : > { %v1549_v17 = vsel %vm1034_vm5, %v9860_v54, %v8072_v6  ;;  %v1548_v37 = vsel %vm1034_vm5, %v9858_v10, %v8071_v33  ;;  %v8113_v54 = vld [vmem:[#allocation19 + $0x18] sm:$0xff]  }
 0x699   : > { %v2248_v58 = vpop.f32.mrb[40].mxu1 }
 0x69a   : > { %v7451_v59 = vpop.f32.mrb[41].mxu1 }
 0x69b   : > { %v2251_v52 = vpop.f32.mrb[42].mxu1 }
 0x69c   : > { %v7452_v62 = vpop.f32.mrb[43].mxu1 }
 0x69d   : > { %v8075_v30 = vpop.permute.xlu0 %8074 }
 0x69e   : > { %v8077_v34 = vunpack.i.h.bf16 %v8075_v30  ;;  %v8076_v25 = vunpack.i.l.bf16 %v8075_v30 }
 0x6a0   : > { %v1551_v39 = vsel %vm1550_vm6, %v1548_v37, %v8076_v25  ;;  %v1552_v42 = vsel %vm1550_vm6, %v1549_v17, %v8077_v34  ;;  %v8118_v34 = vld [vmem:[#allocation19 + $0x30] sm:$0xff]   ;;  %v6968_v17 = vld [vmem:[#allocation20 + $0x1] ss:$0 sm:$0xff] }
 0x6a5   : > { %v8080_v35 = vpop.permute.xlu1 %8079 }
 0x6a6   : > { %v8082_v20 = vunpack.i.h.bf16 %v8080_v35  ;;  %v8081_v44 = vunpack.i.l.bf16 %v8080_v35  ;;  %v8119_v35 = vld [vmem:[#allocation19 + $0x38] sm:$0xff]  }
 0x6a8   : > { %v1554_v45 = vsel %vm1553_vm7, %v1551_v39, %v8081_v44  ;;  %v1555_v32 = vsel %vm1553_vm7, %v1552_v42, %v8082_v20 }
 0x6a9   : > { %v2008_v27 = vpack.c.bf16 %v1555_v32, %v1554_v45 }
 0x6ab   : > { %7422 = vmatmul.mubr.msk.bf16.vlgmr.msra.gmra.mrb[36].mxu0 %vm2021_vm8, %v2008_v27 }
 0x6ac   : > { %7436 = vmatpush3.bf16.msra.mxu0 %v8111_v11  ;;  %7439 = vmatprep.mubr.msk.bf16.mxu0 %vm8926_vm0, %v8925_v0 }
 0x6ad   : > { %7437 = vmatprep.subr.bf16.mxu0 %v8925_v0 }
 0x6b0   : > { %7438 = vmatpush3.bf16.msra.mxu0 %v8113_v54 }
 0x6b1   : > { %7453 = vmatprep.subr.bf16.mxu0 %v8925_v0 }
 0x6e4   : > { %v1994_v10 = vpop.permute.xlu0 %1993 }
 0x6e5   : > { %v2004_v49 = vsel %vm1034_vm5, %v9882_v14, %v1994_v10  ;;  %v8115_v14 = vld [vmem:[#allocation23 + $0x8] sm:$0xff]  }
 0x6e6   : > { %7472 = vmatpush3.bf16.msra.mxu1 %v8115_v14 }
 0x6e7   : > { %7485 = vmatprep.subr.bf16.mxu1 %v8925_v0 }
 0x6ec   : > { %v1998_v47 = vpop.permute.xlu1 %1997 }
 0x6ed   : > { %v2005_v31 = vsel %vm1550_vm6, %v2004_v49, %v1998_v47 }
 0x6f4   : > { %v2002_v50 = vpop.permute.xlu0 %2001 }
 0x6f5   : > { %v2006_v51 = vsel %vm1553_vm7, %v2005_v31, %v2002_v50 }
 0x6f6   : > { %v2137_v41 = vpack.c.bf16 %v2006_v51, %v2006_v51 }
 0x6f8   : > { %7440 = vmatmul.mubr.msk.bf16.vlgmr.msra.gmra.mrb[40].mxu0 %vm2021_vm8, %v2137_v41 }
 0x6f9   : > { %7457 = vmatprep.mubr.msk.bf16.mxu0 %vm8926_vm0, %v8925_v0  ;;  %7454 = vmatpush3.bf16.msra.mxu0 %v8116_v36  ;;  %v6977_v36 = vld [vmem:[#allocation14 + $0x2] ss:$0 sm:$0xff] }
 0x6fa   : > { %7455 = vmatprep.subr.bf16.mxu0 %v8925_v0 }
 0x6fd   : > { %7456 = vmatpush3.bf16.msra.mxu0 %v8117_v57  ;;  %v2335_v19 = vpop.permute.xlu1 %2334 }
 0x6fe   : > { %7461 = vmatprep.subr.bf16.mxu0 %v8925_v0  ;;  %8198 = vrcp.f32 %v2335_v19 }
 0x705   : > { %v2350_v11 = vpop.permute.xlu0 %2349 }
 0x706   : > { %8200 = vrcp.f32 %v2350_v11 }
 0x708   : > { %v9934_v30 = vpop.eup %8198 }
 0x710   : > { %v9947_v51 = vpop.eup %8200 }
 0x77e   : > { %v2059_v22 = vpop.f32.mrb[36].mxu0 }
 0x77f   : > { %v2122_v63 = vadd.f32 %v2121_v8, %v2059_v22  ;;  %v7423_v1 = vpop.f32.mrb[37].mxu0 }
 0x780   : > { %v2062_v2 = vpop.f32.mrb[38].mxu0 }
 0x781   : > { %v9919_v3 = vadd.f32 %v6960_v56, %v2122_v63  ;;  %v2125_v4 = vadd.f32 %v2124_v46, %v2062_v2  ;;  %v7424_v5 = vpop.f32.mrb[39].mxu0 }
 0x783   : > { %v2321_v40 = vmul.f32 %v9919_v3, %v9601_v24  ;;  %v9923_v61 = vadd.f32 %v6960_v56, %v2125_v4  ;;  %v2480_v12 = vmax.f32 %v9919_v3, 0.0 }
 0x785   : > { %v2322_v60 = vmul.f32 %v9923_v61, %v9605_v38  ;;  %v2481_v48 = vmax.f32 %v9923_v61, 0.0  ;;  %v2323_v13 = vsel %vm2021_vm8, %v2321_v40, 0.0  ;;  %v2267_v40 = vld [vmem:[#allocation20 + $0x2] sm:$0x1] }
 0x787   : > { %v2324_v15 = vsel %vm2021_vm8, %v2322_v60, 0.0  ;;  %v2482_v16 = vpack.c.bf16 %v2481_v48, %v2480_v12  ;;  %v2274_v12 = vld [vmem:[#allocation20 + $0x3] sm:$0x1] }
 0x788   : > { %v2325_v21 = vadd.f32 %v2324_v15, %v2323_v13 }
 0x789   : > { %7474 = vmatmul.mubr.msk.bf16.vlgmr.msra.gmra.mrb[44].mxu1 %vm2021_vm8, %v2482_v16 }
 0x78a   : > { %v2326_v23 = vrot.slane %v2325_v21, 4  ;;  %7487 = vmatprep.mubr.msk.bf16.mxu1 %vm8926_vm0, %v8925_v0 }
 0x78c   : > { %v2327_v18 = vadd.f32 %v2326_v23, %v2325_v21 }
 0x78e   : > { %v2328_v43 = vrot.slane %v2327_v18, 2 }
 0x790   : > { %v2329_v26 = vadd.f32 %v2328_v43, %v2327_v18  ;;  %v6981_v18 = vld [vmem:[#allocation14 + $0x3] ss:$0 sm:$0xff] }
 0x792   : > { %v2330_v7 = vrot.slane %v2329_v26, 1 }
 0x794   : > { %v2331_v29 = vadd.f32 %v2330_v7, %v2329_v26 }
 0x796   : > { %v2338_v6 = vmul.f32 %v9934_v30, %v2331_v29 }
 0x798   : > { %v2354_v33 = vmax.f32 %v2338_v6, 0.0 }
 0x79a   : > { %v2355_v25 = vpack.c.bf16 %v2354_v33, %v2354_v33 }
 0x79c   : > { %7458 = vmatmul.mubr.msk.bf16.vlgmr.msra.gmra.mrb[44].mxu0 %vm2021_vm8, %v2355_v25 }
 0x79d   : > { %7462 = vmatpush3.bf16.msra.mxu0 %v8118_v34  ;;  %7465 = vmatprep.mubr.msk.bf16.mxu0 %vm8926_vm0, %v8925_v0 }
 0x79e   : > { %7463 = vmatprep.subr.bf16.mxu0 %v8925_v0 }
 0x7a1   : > { %7464 = vmatpush3.bf16.msra.mxu0 %v8119_v35 }
 0x7a2   : > { %7477 = vmatprep.subr.bf16.mxu0 %v8925_v0 }
 0x7cb   : > { %v2187_v37 = vpop.f32.mrb[40].mxu0 }
 0x7cc   : > { %v2249_v20 = vadd.f32 %v2248_v58, %v2187_v37  ;;  %v7441_v44 = vpop.f32.mrb[41].mxu0  ;;  %v2612_v37 = vlaneseq }
 0x7cd   : > { %v2190_v39 = vpop.f32.mrb[42].mxu0 }
 0x7ce   : > { %v9942_v42 = vadd.f32 %v6968_v17, %v2249_v20  ;;  %v7442_v45 = vpop.f32.mrb[43].mxu0  ;;  %v2613_v20 = vshrl.u32 %v2612_v37, 7 }
 0x7d0   : > { %v2339_v32 = vmul.f32 %v9942_v42, %v9603_v28  ;;  %v2547_v55 = vmax.f32 %v9942_v42, 0.0  ;;  %v9974_v45 = vsub.s32 0, %v2613_v20 }
 0x7d2   : > { %v2340_v27 = vsel %vm2021_vm8, %v2339_v32, 0.0  ;;  %v2548_v14 = vpack.c.bf16 %v2547_v55, %v2547_v55 }
 0x7d3   : > { %v2341_v54 = vrot.slane %v2340_v27, 4 }
 0x7d5   : > { %v2342_v10 = vadd.f32 %v2341_v54, %v2340_v27 }
 0x7d7   : > { %v2343_v47 = vrot.slane %v2342_v10, 2 }
 0x7d9   : > { %v2344_v49 = vadd.f32 %v2343_v47, %v2342_v10 }
 0x7db   : > { %v2345_v31 = vrot.slane %v2344_v49, 1 }
 0x7dd   : > { %v2346_v50 = vadd.f32 %v2345_v31, %v2344_v49 }
 0x7df   : > { %v2353_v41 = vmul.f32 %v9947_v51, %v2346_v50 }
 0x7e1   : > { %v2417_v8 = vmax.f32 %v2353_v41, 0.0 }
 0x7e3   : > { %v2418_v46 = vpack.c.bf16 %v2417_v8, %v2417_v8 }
 0x7e5   : > { %7466 = vmatmul.mubr.msk.bf16.vlgmr.msra.gmra.mrb[48].mxu0 %vm2021_vm8, %v2418_v46 }
 0x7e6   : > { %7478 = vmatpush3.bf16.msra.mxu0 %v8120_v9  ;;  %7481 = vmatprep.mubr.msk.bf16.mxu0 %vm8926_vm0, %v8925_v0 }
 0x7e7   : > { %7479 = vmatprep.subr.bf16.mxu0 %v8925_v0 }
 0x7ea   : > { %7480 = vmatpush3.bf16.msra.mxu0 %v8121_v53 }
 0x7eb   : > { %7491 = vmatprep.subr.bf16.mxu0 %v8925_v0 }
 0x7ed   : > { %7482 = vmatmul.mubr.msk.bf16.vlgmr.msra.gmra.mrb[52].mxu0 %vm2021_vm8, %v2548_v14 }
 0x7ee   : > { %7493 = vmatprep.mubr.msk.bf16.mxu0 %vm8926_vm0, %v8925_v0 }
 0x85c   : > { %v2538_v57 = vpop.f32.mrb[44].mxu1 }
 0x85d   : > { %v2539_v58 = vadd.f32 %v6977_v36, %v2538_v57  ;;  %v7475_v59 = vpop.f32.mrb[45].mxu1 }
 0x85e   : > { %v2541_v52 = vpop.f32.mrb[46].mxu1 }
 0x85f   : > { %v9960_v62 = vmul.f32 %v2539_v58, %v9601_v24  ;;  %v2542_v22 = vadd.f32 %v6977_v36, %v2541_v52  ;;  %v7476_v56 = vpop.f32.mrb[47].mxu1 }
 0x861   : > { %v9963_v63 = vmul.f32 %v2542_v22, %v9605_v38  ;;  %2618 = vrot.lane.b32.xlu1 %v9960_v62, %s8929_s26 }
 0x863   : > { %2620 = vrot.lane.b32.xlu0 %v9963_v63, %s8929_s26 }
 0x86f   : > { %v2405_v1 = vpop.f32.mrb[44].mxu0 }
 0x870   : > { %v7459_v2 = vpop.f32.mrb[45].mxu0  ;;  %v2406_v60 = vadd.f32 %v2405_v1, %v2267_v40 }
 0x871   : > { %v2408_v4 = vpop.f32.mrb[46].mxu0 }
 0x872   : > { %v7460_v5 = vpop.f32.mrb[47].mxu0  ;;  %v6972_v19 = vmul.f32 -1.442695, %v2406_v60 }
 0x8b8   : > { %v2468_v48 = vpop.f32.mrb[48].mxu0 }
 0x8b9   : > { %v2469_v13 = vadd.f32 %v2468_v48, %v2274_v12  ;;  %v7467_v15 = vpop.f32.mrb[49].mxu0 }
 0x8ba   : > { %v2471_v16 = vpop.f32.mrb[50].mxu0 }
 0x8bb   : > { %v6976_v21 = vmul.f32 -1.442695, %v2469_v13  ;;  %v7468_v23 = vpop.f32.mrb[51].mxu0 }
 0x8bd   : > { %8202 = vpow2.f32 %v6976_v21 }
 0x8be   : > { %8204 = vpow2.f32 %v6972_v19 }
 0x8c0   : > { %v2604_v43 = vpop.f32.mrb[52].mxu0 }
 0x8c1   : > { %v2605_v26 = vadd.f32 %v6981_v18, %v2604_v43  ;;  %v7483_v7 = vpop.f32.mrb[53].mxu0  ;;  %v10030_v18 = vld [vmem:[%s9529_s16] ss:$0 sm:$0xff] }
 0x8c2   : > { %v2607_v29 = vpop.f32.mrb[54].mxu0 }
 0x8c3   : > { %v9970_v6 = vmul.f32 %v2605_v26, %v9603_v28  ;;  %v7484_v33 = vpop.f32.mrb[55].mxu0 }
 0x8c5   : > { %2634 = vrot.lane.b32.xlu1 %v9970_v6, %s8929_s26 }
 0x8c7   : > { %v8203_v34 = vpop.eup %8202 }
 0x8c8   : > { %v2477_v25 = vadd.f32 1.0, %v8203_v34  ;;  %v8205_v35 = vpop.eup %8204 }
 0x8c9   : > { %v2414_v17 = vadd.f32 1.0, %v8205_v35 }
 0x8ca   : > { %8206 = vrcp.f32 %v2477_v25 }
 0x8cb   : > { %8208 = vrcp.f32 %v2414_v17 }
 0x8d3   : > { %v2619_v11 = vpop.permute.xlu1 %2618 }
 0x8d4   : > { %v8207_v44 = vpop.eup %8206 }
 0x8d5   : > { %v2611_v39 = vadd.f32 1.0, %v8207_v44  ;;  %v2621_v27 = vpop.permute.xlu0 %2620  ;;  %v8209_v31 = vpop.eup %8208 }
 0x8d6   : > { %v2628_v8 = vadd.f32 1.0, %v8209_v31 }
 0x8d7   : > { %v2615_v32 = vrot.slane %v2611_v39, %v9974_v45 }
 0x8d8   : > { %v2632_v46 = vrot.slane %v2628_v8, %v9974_v45 }
 0x8d9   : > { %v2624_v54 = vmul.f32 %v2619_v11, %v2615_v32  ;;  %v2625_v10 = vmul.f32 %v2621_v27, %v2615_v32  ;;  %v2626_v47 = vmul.f32 %v2615_v32, %v9960_v62  ;;  %v2627_v49 = vmul.f32 %v2615_v32, %v9963_v63 }
 0x8da   : > { %v2638_v53 = vmul.f32 %v2632_v46, %v9970_v6 }
 0x8db   : > { %v2639_v50 = vpack.c.bf16 %v2625_v10, %v2624_v54  ;;  %v2640_v41 = vpack.c.bf16 %v2627_v49, %v2626_v47 }
 0x8dc   : > { %v3156_v55 = vpack.c.bf16 %v2638_v53, %v2638_v53 }
 0x8dd   : > { %2764 = vrot.lane.b32.xlu0 %v2640_v41, %s8928_s2  ;;  %2761 = vrot.lane.b32.xlu1 %v2639_v50, %s8928_s2  ;;  %v2646_v9 = vsel %vm1034_vm5, %v2640_v41, 0 }
 0x8de   : > { %7486 = vmatpush3.bf16.xpose.msra.mxu1 %v2646_v9  ;;  %v3162_v40 = vsel %vm1034_vm5, %v3156_v55, 0 }
 0x8df   : > { %7497 = vmatprep.subr.bf16.mxu1 %v8925_v0 }
 0x8e1   : > { %2885 = vrot.lane.b32.xlu0 %v2640_v41, %s8930_s25  ;;  %2883 = vrot.lane.b32.xlu1 %v2639_v50, %s8930_s25 }
 0x8e5   : > { %3006 = vrot.lane.b32.xlu0 %v2640_v41, %s8932_s28  ;;  %7488 = vmatmul.mubr.msk.bf16.vlgmr.msra.gmra.mrb[48].mxu1 %vm1034_vm5, %v2639_v50 }
 0x8e6   : > { %3004 = vrot.lane.b32.xlu1 %v2639_v50, %s8932_s28  ;;  %7499 = vmatprep.mubr.msk.bf16.mxu1 %vm8926_vm0, %v8925_v0 }
 0x8e9   : > { %3269 = vrot.lane.b32.xlu0 %v3156_v55, %s8928_s2 }
 0x8ed   : > { %3379 = vrot.lane.b32.xlu0 %v3156_v55, %s8930_s25 }
 0x8f1   : > { %3489 = vrot.lane.b32.xlu0 %v3156_v55, %s8932_s28 }
 0x937   : > { %v2635_v14 = vpop.permute.xlu1 %2634 }
 0x938   : > { %v2637_v36 = vmul.f32 %v2635_v14, %v2632_v46 }
 0x93a   : > { %v3155_v57 = vpack.c.bf16 %v2637_v36, %v2637_v36 }
 0x93c   : > { %3266 = vrot.lane.b32.xlu1 %v3155_v57, %s8928_s2 }
 0x940   : > { %3377 = vrot.lane.b32.xlu1 %v3155_v57, %s8930_s25 }
 0x944   : > { %3487 = vrot.lane.b32.xlu1 %v3155_v57, %s8932_s28 }
 0x94f   : > { %v2765_v58 = vpop.permute.xlu0 %2764  ;;  %v2762_v22 = vpop.permute.xlu1 %2761 }
 0x950   : > { %v2770_v59 = vsel %vm1034_vm5, %v2765_v58, 0 }
 0x951   : > { %7498 = vmatpush3.bf16.xpose.msra.mxu1 %v2770_v59 }
 0x952   : > { %7509 = vmatprep.subr.bf16.mxu1 %v8925_v0 }
 0x953   : > { %v2886_v52 = vpop.permute.xlu0 %2885  ;;  %v2884_v2 = vpop.permute.xlu1 %2883 }
 0x954   : > { %v2891_v56 = vsel %vm1034_vm5, %v2886_v52, 0  ;;  %v10071_v52 = vld [vmem:[%s9532_s4] ss:$0 sm:$0xff] }
 0x957   : > { %v3007_v1 = vpop.permute.xlu0 %3006 }
 0x958   : > { %7500 = vmatmul.mubr.msk.bf16.vlgmr.msra.gmra.mrb[52].mxu1 %vm1034_vm5, %v2762_v22  ;;  %v3012_v4 = vsel %vm1034_vm5, %v3007_v1, 0  ;;  %v3005_v5 = vpop.permute.xlu1 %3004 }
 0x959   : > { %7510 = vmatpush3.bf16.xpose.msra.mxu1 %v2891_v56  ;;  %7511 = vmatprep.mubr.msk.bf16.mxu1 %vm8926_vm0, %v8925_v0 }
 0x95a   : > { %7521 = vmatprep.subr.bf16.mxu1 %v8925_v0 }
 0x95b   : > { %v3270_v12 = vpop.permute.xlu0 %3269 }
 0x95c   : > { %v3275_v60 = vsel %vm1034_vm5, %v3270_v12, 0 }
 0x95f   : > { %v3380_v48 = vpop.permute.xlu0 %3379 }
 0x960   : > { %7512 = vmatmul.mubr.msk.bf16.vlgmr.msra.gmra.mrb[56].mxu1 %vm1034_vm5, %v2884_v2  ;;  %v3385_v15 = vsel %vm1034_vm5, %v3380_v48, 0 }
 0x961   : > { %7522 = vmatpush3.bf16.xpose.msra.mxu1 %v3012_v4  ;;  %7523 = vmatprep.mubr.msk.bf16.mxu1 %vm8926_vm0, %v8925_v0 }
 0x962   : > { %7533 = vmatprep.subr.bf16.mxu1 %v8925_v0 }
 0x963   : > { %v3490_v16 = vpop.permute.xlu0 %3489 }
 0x964   : > { %v3495_v21 = vsel %vm1034_vm5, %v3490_v16, 0 }
 0x968   : > { %7524 = vmatmul.mubr.msk.bf16.vlgmr.msra.gmra.mrb[60].mxu1 %vm1034_vm5, %v3005_v5 }
 0x969   : > { %7534 = vmatpush3.bf16.xpose.msra.mxu1 %v3162_v40  ;;  %7535 = vmatprep.mubr.msk.bf16.mxu1 %vm8926_vm0, %v8925_v0 }
 0x96a   : > { %7545 = vmatprep.subr.bf16.mxu1 %v8925_v0 }
 0x970   : > { %7536 = vmatmul.mubr.msk.bf16.vlgmr.msra.gmra.mrb[64].mxu1 %vm1034_vm5, %v3155_v57 }
 0x971   : > { %7546 = vmatpush3.bf16.xpose.msra.mxu1 %v3275_v60  ;;  %7547 = vmatprep.mubr.msk.bf16.mxu1 %vm8926_vm0, %v8925_v0 }
 0x972   : > { %7557 = vmatprep.subr.bf16.mxu1 %v8925_v0 }
 0x9ae   : > { %v3267_v13 = vpop.permute.xlu1 %3266 }
 0x9af   : > { %7548 = vmatmul.mubr.msk.bf16.vlgmr.msra.gmra.mrb[68].mxu1 %vm1034_vm5, %v3267_v13 }
 0x9b0   : > { %7558 = vmatpush3.bf16.xpose.msra.mxu1 %v3385_v15  ;;  %7559 = vmatprep.mubr.msk.bf16.mxu1 %vm8926_vm0, %v8925_v0 }
 0x9b1   : > { %7569 = vmatprep.subr.bf16.mxu1 %v8925_v0 }
 0x9b2   : > { %v3378_v19 = vpop.permute.xlu1 %3377 }
 0x9b6   : > { %v3488_v35 = vpop.permute.xlu1 %3487 }
 0x9b7   : > { %7560 = vmatmul.mubr.msk.bf16.vlgmr.msra.gmra.mrb[72].mxu1 %vm1034_vm5, %v3378_v19 }
 0x9b8   : > { %7570 = vmatpush3.bf16.xpose.msra.mxu1 %v3495_v21  ;;  %v2682_v23 = vpop.f32.mrb[48].mxu1  ;;  %7571 = vmatprep.mubr.msk.bf16.mxu1 %vm8926_vm0, %v8925_v0 }
 0x9b9   : > { %v2683_v43 = vadd.f32 %v10030_v18, %v2682_v23  ;;  %v7489_v26 = vpop.f32.mrb[49].mxu1  ;;  %7581 = vmatprep.subr.bf16.mxu1 %v8925_v0 }
 0x9ba   : > { %v2685_v7 = vpop.f32.mrb[50].mxu1 }
 0x9bb   : > { %v2686_v29 = vadd.f32 %v10030_v18, %v2685_v7  ;;  %v7490_v33 = vpop.f32.mrb[51].mxu1  ;;  %v2689_v34 = vsel %vm1550_vm6, %v2683_v43, -inf }
 0x9bc   : > { %2690 = vmax.xlane.f32.xlu0 %v2689_v34 }
 0x9bd   : > { %v2692_v25 = vsel %vm1550_vm6, %v2686_v29, -inf }
 0x9be   : > { %2693 = vmax.xlane.f32.xlu1 %v2692_v25 }
 0x9bf   : > { %7572 = vmatmul.mubr.msk.bf16.vlgmr.msra.gmra.mrb[76].mxu1 %vm1034_vm5, %v3488_v35 }
 0x9c0   : > { %7585 = vmatprep.mubr.msk.bf16.mxu1 %vm8926_vm0, %v8925_v0 }
 0xa2b   : > { %v2806_v17 = vpop.f32.mrb[52].mxu1 }
 0xa2c   : > { %v10041_v37 = vadd.f32 %v10030_v18, %v2806_v17  ;;  %v7501_v20 = vpop.f32.mrb[53].mxu1 }
 0xa2d   : > { %v2809_v44 = vpop.f32.mrb[54].mxu1 }
 0xa2e   : > { %v10044_v39 = vadd.f32 %v10030_v18, %v2809_v44  ;;  %v7502_v32 = vpop.f32.mrb[55].mxu1  ;;  %v2813_v11 = vsel %vm1550_vm6, %v10041_v37, -inf }
 0xa2f   : > { %2814 = vmax.xlane.f32.xlu0 %v2813_v11 }
 0xa30   : > { %v2816_v27 = vsel %vm1550_vm6, %v10044_v39, -inf }
 0xa33   : > { %v2927_v54 = vpop.f32.mrb[56].mxu1  ;;  %2817 = vmax.xlane.f32.xlu0 %v2816_v27 }
 0xa34   : > { %v10051_v10 = vadd.f32 %v10030_v18, %v2927_v54  ;;  %v7513_v47 = vpop.f32.mrb[57].mxu1 }
 0xa35   : > { %v2930_v49 = vpop.f32.mrb[58].mxu1  ;;  %v2641_v47 = vpack.c.bf16 %v9963_v63, %v9960_v62 }
 0xa36   : > { %v10054_v31 = vadd.f32 %v10030_v18, %v2930_v49  ;;  %v7514_v50 = vpop.f32.mrb[59].mxu1  ;;  %v2934_v41 = vsel %vm1550_vm6, %v10051_v10, -inf }
 0xa37   : > { %2935 = vmax.xlane.f32.xlu1 %v2934_v41 }
 0xa38   : > { %v2937_v8 = vsel %vm1550_vm6, %v10054_v31, -inf }
 0xa39   : > { %2938 = vmax.xlane.f32.xlu0 %v2937_v8 }
 0xa3b   : > { %v3048_v9 = vpop.f32.mrb[60].mxu1 }
 0xa3c   : > { %v10061_v46 = vadd.f32 %v10030_v18, %v3048_v9  ;;  %v7525_v53 = vpop.f32.mrb[61].mxu1 }
 0xa3d   : > { %v3051_v55 = vpop.f32.mrb[62].mxu1 }
 0xa3e   : > { %v10064_v14 = vadd.f32 %v10030_v18, %v3051_v55  ;;  %v7526_v36 = vpop.f32.mrb[63].mxu1  ;;  %v3055_v57 = vsel %vm1550_vm6, %v10061_v46, -inf }
 0xa3f   : > { %3056 = vmax.xlane.f32.xlu1 %v3055_v57 }
 0xa40   : > { %v3058_v58 = vsel %vm1550_vm6, %v10064_v14, -inf }
 0xa41   : > { %3059 = vmax.xlane.f32.xlu0 %v3058_v58 }
 0xa43   : > { %v3198_v59 = vpop.f32.mrb[64].mxu1 }
 0xa44   : > { %v10074_v22 = vadd.f32 %v10071_v52, %v3198_v59  ;;  %v7537_v56 = vpop.f32.mrb[65].mxu1 }
 0xa45   : > { %v3201_v1 = vpop.f32.mrb[66].mxu1 }
 0xa46   : > { %v7538_v2 = vpop.f32.mrb[67].mxu1  ;;  %v3204_v4 = vsel %vm1034_vm5, %v10074_v22, -inf }
 0xa47   : > { %3205 = vmax.xlane.f32.xlu1 %v3204_v4 }
 0xa49   : > { %v2691_v5 = vpop.xlane.xlu0 %2690 }
 0xa4a   : > { %v2695_v40 = vsub.f32 %v2683_v43, %v2691_v5 }
 0xa4b   : > { %v2694_v12 = vpop.xlane.xlu1 %2693 }
 0xa4c   : > { %v2697_v60 = vmul.f32 1.442695, %v2695_v40  ;;  %v2696_v48 = vsub.f32 %v2686_v29, %v2694_v12 }
 0xa4e   : > { %8210 = vpow2.f32 %v2697_v60  ;;  %v2699_v13 = vmul.f32 1.442695, %v2696_v48 }
 0xa50   : > { %8212 = vpow2.f32 %v2699_v13 }
 0xa58   : > { %v10078_v15 = vpop.eup %8210 }
 0xa59   : > { %v2701_v16 = vsel %vm1550_vm6, %v10078_v15, 0.0 }
 0xa5a   : > { %v10082_v19 = vpop.eup %8212  ;;  %2702 = vadd.xlane.f32.xlu1 %v2701_v16 }
 0xa5b   : > { %v2704_v21 = vsel %vm1550_vm6, %v10082_v19, 0.0 }
 0xa5c   : > { %2705 = vadd.xlane.f32.xlu0 %v2704_v21 }
 0xa82   : > { %v3311_v23 = vpop.f32.mrb[68].mxu1 }
 0xa83   : > { %v10087_v43 = vadd.f32 %v10071_v52, %v3311_v23  ;;  %v7549_v26 = vpop.f32.mrb[69].mxu1 }
 0xa84   : > { %v3314_v7 = vpop.f32.mrb[70].mxu1 }
 0xa85   : > { %v7550_v29 = vpop.f32.mrb[71].mxu1  ;;  %v3317_v33 = vsel %vm1034_vm5, %v10087_v43, -inf }
 0xa86   : > { %3318 = vmax.xlane.f32.xlu0 %v3317_v33 }
 0xa8a   : > { %v3421_v34 = vpop.f32.mrb[72].mxu1 }
 0xa8b   : > { %v10092_v25 = vadd.f32 %v10071_v52, %v3421_v34  ;;  %v7561_v35 = vpop.f32.mrb[73].mxu1 }
 0xa8c   : > { %v3424_v17 = vpop.f32.mrb[74].mxu1 }
 0xa8d   : > { %v7562_v20 = vpop.f32.mrb[75].mxu1  ;;  %v3427_v44 = vsel %vm1034_vm5, %v10092_v25, -inf }
 0xa8e   : > { %3428 = vmax.xlane.f32.xlu1 %v3427_v44 }
 0xa92   : > { %v3531_v32 = vpop.f32.mrb[76].mxu1 }
 0xa93   : > { %v7573_v11 = vpop.f32.mrb[77].mxu1  ;;  %v10101_v49 = vadd.f32 %v10071_v52, %v3531_v32 }
 0xa94   : > { %v3534_v27 = vpop.f32.mrb[78].mxu1 }
 0xa95   : > { %v7574_v54 = vpop.f32.mrb[79].mxu1  ;;  %v3537_v50 = vsel %vm1034_vm5, %v10101_v49, -inf }
 0xa9c   : > { %2836 = vrot.lane.b32.xlu0 %v2641_v47, %s8935_s22 }
 0xa9f   : > { %2713 = vrot.lane.b32.xlu1 %v2641_v47, %s8936_s27 }
 0xabb   : > { %3538 = vmax.xlane.f32.xlu0 %v3537_v50 }
 0xabc   : > { %v2815_v41 = vpop.xlane.xlu0 %2814 }
 0xabd   : > { %v2819_v8 = vsub.f32 %v10041_v37, %v2815_v41 }
 0xabf   : > { %v2821_v9 = vmul.f32 1.442695, %v2819_v8 }
 0xac0   : > { %v2818_v56 = vpop.xlane.xlu0 %2817 }
 0xac1   : > { %8214 = vpow2.f32 %v2821_v9  ;;  %v2820_v1 = vsub.f32 %v10044_v39, %v2818_v56 }
 0xac3   : > { %v2823_v5 = vmul.f32 1.442695, %v2820_v1 }
 0xac4   : > { %v2936_v53 = vpop.xlane.xlu1 %2935 }
 0xac5   : > { %v2940_v55 = vsub.f32 %v10051_v10, %v2936_v53 }
 0xac6   : > { %v2939_v4 = vpop.xlane.xlu0 %2938 }
 0xac7   : > { %v2942_v62 = vmul.f32 1.442695, %v2940_v55  ;;  %v2941_v40 = vsub.f32 %v10054_v31, %v2939_v4 }
 0xac9   : > { %8216 = vpow2.f32 %v2942_v62  ;;  %v2944_v60 = vmul.f32 1.442695, %v2941_v40 }
 0xacb   : > { %v10107_v63 = vpop.eup %8214 }
 0xacc   : > { %v3057_v36 = vpop.xlane.xlu1 %3056  ;;  %v2825_v57 = vsel %vm1550_vm6, %v10107_v63, 0.0 }
 0xacd   : > { %v3061_v58 = vsub.f32 %v10061_v46, %v3057_v36  ;;  %2826 = vadd.xlane.f32.xlu1 %v2825_v57 }
 0xace   : > { %v3060_v12 = vpop.xlane.xlu0 %3059 }
 0xacf   : > { %v3063_v59 = vmul.f32 1.442695, %v3061_v58  ;;  %v3062_v48 = vsub.f32 %v10064_v14, %v3060_v12 }
 0xad1   : > { %8218 = vpow2.f32 %v3063_v59  ;;  %2957 = vrot.lane.b32.xlu0 %v2641_v47, %s8937_s0  ;;  %v3065_v16 = vmul.f32 1.442695, %v3062_v48 }
 0xad2   : > { %8220 = vpow2.f32 %v2823_v5 }
 0xad3   : > { %v10113_v37 = vpop.eup %8216  ;;  %8222 = vpow2.f32 %v2944_v60 }
 0xad4   : > { %v2946_v10 = vsel %vm1550_vm6, %v10113_v37, 0.0  ;;  %v3206_v13 = vpop.xlane.xlu1 %3205  ;;  %8224 = vpow2.f32 %v3065_v16 }
 0xad5   : > { %2947 = vadd.xlane.f32.xlu1 %v2946_v10  ;;  %v3207_v39 = vsub.f32 %v10074_v22, %v3206_v13 }
 0xad7   : > { %v3208_v21 = vmul.f32 1.442695, %v3207_v39 }
 0xad9   : > { %8226 = vpow2.f32 %v3208_v21 }
 0xadb   : > { %v10118_v2 = vpop.eup %8218 }
 0xadc   : > { %v3067_v46 = vsel %vm1550_vm6, %v10118_v2, 0.0  ;;  %v10125_v23 = vpop.eup %8220 }
 0xadd   : > { %3068 = vadd.xlane.f32.xlu1 %v3067_v46  ;;  %v2828_v31 = vsel %vm1550_vm6, %v10125_v23, 0.0  ;;  %v10130_v26 = vpop.eup %8222 }
 0xade   : > { %v2949_v14 = vsel %vm1550_vm6, %v10130_v26, 0.0  ;;  %v10134_v7 = vpop.eup %8224 }
 0xadf   : > { %v3070_v22 = vsel %vm1550_vm6, %v10134_v7, 0.0 }
 0xae3   : > { %v10138_v29 = vpop.eup %8226 }
 0xae4   : > { %v3210_v33 = vsel %vm1034_vm5, %v10138_v29, 0.0 }
 0xae7   : > { %v2703_v35 = vpop.xlane.xlu1 %2702 }
 0xae9   : > { %v2706_v34 = vpop.xlane.xlu0 %2705 }
 0xaea   : > { %8228 = vrcp.f32 %v2706_v34 }
 0xaeb   : > { %8230 = vrcp.f32 %v2703_v35 }
 0xaee   : > { %3078 = vrot.lane.b32.xlu1 %v2641_v47, %s8938_s17 }
 0xaf0   : > { %2829 = vadd.xlane.f32.xlu0 %v2828_v31 }
 0xaf4   : > { %2950 = vadd.xlane.f32.xlu0 %v2949_v14  ;;  %v8229_v32 = vpop.eup %8228 }
 0xaf5   : > { %v8231_v27 = vpop.eup %8230  ;;  %v2710_v47 = vmul.f32 %v8229_v32, %v10082_v19 }
 0xaf6   : > { %v2709_v41 = vmul.f32 %v8231_v27, %v10078_v15 }
 0xaf8   : > { %3071 = vadd.xlane.f32.xlu0 %v3070_v22  ;;  %v2711_v9 = vpack.c.bf16 %v2710_v47, %v2709_v41 }
 0xafc   : > { %3211 = vadd.xlane.f32.xlu0 %v3210_v33 }
 0xb13   : > { %v3319_v17 = vpop.xlane.xlu0 %3318 }
 0xb14   : > { %v3320_v20 = vsub.f32 %v10087_v43, %v3319_v17 }
 0xb16   : > { %v3321_v44 = vmul.f32 1.442695, %v3320_v20 }
 0xb17   : > { %v2837_v43 = vpop.permute.xlu0 %2836 }
 0xb18   : > { %8232 = vpow2.f32 %v3321_v44 }
 0xb1b   : > { %v3429_v11 = vpop.xlane.xlu1 %3428 }
 0xb1c   : > { %v3430_v54 = vsub.f32 %v10092_v25, %v3429_v11  ;;  %v3157_v25 = vpack.c.bf16 %v9970_v6, %v9970_v6 }
 0xb1e   : > { %v3431_v50 = vmul.f32 1.442695, %v3430_v54 }
 0xb1f   : > { %v2714_v8 = vpop.permute.xlu1 %2713 }
 0xb20   : > { %8234 = vpow2.f32 %v3431_v50  ;;  %7492 = vmatpush3.bf16.msra.mxu0 %v2714_v8 }
 0xb21   : > { %7503 = vmatprep.subr.bf16.mxu0 %v8925_v0 }
 0xb22   : > { %v10147_v53 = vpop.eup %8232 }
 0xb23   : > { %7494 = vmatmul.mubr.msk.bf16.vlgmr.msra.gmra.mrb[56].mxu0 %vm1550_vm6, %v2711_v9  ;;  %v3323_v55 = vsel %vm1034_vm5, %v10147_v53, 0.0 }
 0xb24   : > { %3324 = vadd.xlane.f32.xlu1 %v3323_v55  ;;  %7504 = vmatpush3.bf16.msra.mxu0 %v2837_v43 }
 0xb25   : > { %7505 = vmatprep.mubr.msk.bf16.mxu0 %vm8926_vm0, %v8925_v0  ;;  %7515 = vmatprep.subr.bf16.mxu0 %v8925_v0 }
 0xb2a   : > { %v10155_v15 = vpop.eup %8234 }
 0xb2b   : > { %v3433_v19 = vsel %vm1034_vm5, %v10155_v15, 0.0 }
 0xb2c   : > { %3434 = vadd.xlane.f32.xlu0 %v3433_v19 }
 0xb35   : > { %3329 = vrot.lane.b32.xlu1 %v3157_v25, %s8935_s22 }
 0xb39   : > { %3439 = vrot.lane.b32.xlu1 %v3157_v25, %s8937_s0 }
 0xb3d   : > { %3549 = vrot.lane.b32.xlu1 %v3157_v25, %s8938_s17 }
 0xb48   : > { %v3539_v62 = vpop.xlane.xlu0 %3538 }
 0xb49   : > { %v3540_v36 = vsub.f32 %v10101_v49, %v3539_v62 }
 0xb4b   : > { %v3541_v57 = vmul.f32 1.442695, %v3540_v36 }
 0xb4c   : > { %v2958_v6 = vpop.permute.xlu0 %2957 }
 0xb4d   : > { %8236 = vpow2.f32 %v3541_v57 }
 0xb57   : > { %v10165_v58 = vpop.eup %8236 }
 0xb58   : > { %v3543_v59 = vsel %vm1034_vm5, %v10165_v58, 0.0 }
 0xb59   : > { %3544 = vadd.xlane.f32.xlu0 %v3543_v59 }
 0xb5a   : > { %v2827_v10 = vpop.xlane.xlu1 %2826 }
 0xb5b   : > { %8238 = vrcp.f32 %v2827_v10 }
 0xb62   : > { %v2948_v1 = vpop.xlane.xlu1 %2947 }
 0xb65   : > { %v8239_v49 = vpop.eup %8238 }
 0xb66   : > { %v2833_v40 = vmul.f32 %v8239_v49, %v10107_v63 }
 0xb6a   : > { %v3069_v12 = vpop.xlane.xlu1 %3068 }
 0xb6f   : > { %3217 = vrot.lane.b32.xlu0 %v3157_v25, %s8936_s27 }
 0xb7d   : > { %v2830_v56 = vpop.xlane.xlu0 %2829 }
 0xb7e   : > { %8240 = vrcp.f32 %v2830_v56 }
 0xb81   : > { %v2951_v4 = vpop.xlane.xlu0 %2950 }
 0xb82   : > { %8242 = vrcp.f32 %v2951_v4  ;;  %v8122_v4 = vld [vmem:[#allocation19 + $0x40] sm:$0xff]  }
 0xb83   : > { %8244 = vrcp.f32 %v2948_v1  ;;  %7582 = vmatpush3.bf16.msra.mxu1 %v8122_v4  ;;  %v8129_v4 = vld [vmem:[#allocation23 + $0x38] sm:$0xff]  }
 0xb84   : > { %7583 = vmatprep.subr.bf16.mxu1 %v8925_v0 }
 0xb85   : > { %v3072_v46 = vpop.xlane.xlu0 %3071 }
 0xb86   : > { %8246 = vrcp.f32 %v3072_v46 }
 0xb87   : > { %8248 = vrcp.f32 %v3069_v12 }
 0xb88   : > { %v8241_v5 = vpop.eup %8240 }
 0xb89   : > { %v2834_v60 = vmul.f32 %v8241_v5, %v10125_v23  ;;  %v3079_v23 = vpop.permute.xlu1 %3078 }
 0xb8b   : > { %v2835_v48 = vpack.c.bf16 %v2834_v60, %v2833_v40 }
 0xb8c   : > { %v8243_v13 = vpop.eup %8242 }
 0xb8d   : > { %7506 = vmatmul.mubr.msk.bf16.vlgmr.msra.gmra.mrb[60].mxu0 %vm1550_vm6, %v2835_v48  ;;  %v8245_v16 = vpop.eup %8244  ;;  %v2955_v39 = vmul.f32 %v8243_v13, %v10130_v26 }
 0xb8e   : > { %7516 = vmatpush3.bf16.msra.mxu0 %v2958_v6  ;;  %7517 = vmatprep.mubr.msk.bf16.mxu0 %vm8926_vm0, %v8925_v0  ;;  %v2954_v63 = vmul.f32 %v8245_v16, %v10113_v37  ;;  %v3212_v37 = vpop.xlane.xlu0 %3211 }
 0xb8f   : > { %7527 = vmatprep.subr.bf16.mxu0 %v8925_v0  ;;  %8250 = vrcp.f32 %v3212_v37 }
 0xb90   : > { %v2956_v21 = vpack.c.bf16 %v2955_v39, %v2954_v63  ;;  %v8247_v31 = vpop.eup %8246 }
 0xb91   : > { %v8249_v14 = vpop.eup %8248  ;;  %v3076_v22 = vmul.f32 %v8247_v31, %v10134_v7  ;;  %v8124_v31 = vld [vmem:[#allocation19 + $0x50] sm:$0xff]  }
 0xb92   : > { %v3075_v26 = vmul.f32 %v8249_v14, %v10118_v2 }
 0xb94   : > { %v3077_v33 = vpack.c.bf16 %v3076_v22, %v3075_v26 }
 0xb95   : > { %7518 = vmatmul.mubr.msk.bf16.vlgmr.msra.gmra.mrb[64].mxu0 %vm1550_vm6, %v2956_v21 }
 0xb96   : > { %7528 = vmatpush3.bf16.msra.mxu0 %v3079_v23  ;;  %7529 = vmatprep.mubr.msk.bf16.mxu0 %vm8926_vm0, %v8925_v0 }
 0xb97   : > { %7539 = vmatprep.subr.bf16.mxu0 %v8925_v0 }
 0xb99   : > { %v8251_v17 = vpop.eup %8250 }
 0xb9a   : > { %v3214_v44 = vmul.f32 %v8251_v17, %v10138_v29 }
 0xb9c   : > { %v3215_v2 = vpack.c.bf16 %v3214_v44, %v3214_v44 }
 0xb9d   : > { %7530 = vmatmul.mubr.msk.bf16.vlgmr.msra.gmra.mrb[68].mxu0 %vm1550_vm6, %v3077_v33  ;;  %v8125_v33 = vld [vmem:[#allocation19 + $0x58] sm:$0xff]  }
 0xb9e   : > { %7541 = vmatprep.mubr.msk.bf16.mxu0 %vm8926_vm0, %v8925_v0 }
 0xbb1   : > { %v3325_v34 = vpop.xlane.xlu1 %3324 }
 0xbb2   : > { %8252 = vrcp.f32 %v3325_v34 }
 0xbb5   : > { %v3330_v11 = vpop.permute.xlu1 %3329 }
 0xbb6   : > { %v3335_v54 = vsel %vm973_vm1, %v3330_v11, 0 }
 0xbb9   : > { %v3435_v35 = vpop.xlane.xlu0 %3434  ;;  %v3440_v47 = vpop.permute.xlu1 %3439 }
 0xbba   : > { %8254 = vrcp.f32 %v3435_v35  ;;  %v3445_v9 = vsel %vm973_vm1, %v3440_v47, 0 }
 0xbbc   : > { %v8253_v27 = vpop.eup %8252 }
 0xbbd   : > { %v3327_v29 = vmul.f32 %v8253_v27, %v10147_v53  ;;  %v3550_v25 = vpop.permute.xlu1 %3549 }
 0xbbe   : > { %v3555_v57 = vsel %vm973_vm1, %v3550_v25, 0 }
 0xbbf   : > { %v3328_v50 = vpack.c.bf16 %v3327_v29, %v3327_v29 }
 0xbc4   : > { %v8255_v41 = vpop.eup %8254 }
 0xbc5   : > { %v3437_v53 = vmul.f32 %v8255_v41, %v10155_v15 }
 0xbc7   : > { %v3438_v62 = vpack.c.bf16 %v3437_v53, %v3437_v53 }
 0xbe6   : > { %v3545_v20 = vpop.xlane.xlu0 %3544 }
 0xbe7   : > { %8256 = vrcp.f32 %v3545_v20 }
 0xbea   : > { %v3218_v7 = vpop.permute.xlu0 %3217 }
 0xbeb   : > { %v3223_v32 = vsel %vm973_vm1, %v3218_v7, 0 }
 0xbec   : > { %7540 = vmatpush3.bf16.msra.mxu0 %v3223_v32 }
 0xbed   : > { %7551 = vmatprep.subr.bf16.mxu0 %v8925_v0 }
 0xbef   : > { %7542 = vmatmul.mubr.msk.bf16.vlgmr.msra.gmra.mrb[72].mxu0 %vm1034_vm5, %v3215_v2 }
 0xbf0   : > { %7552 = vmatpush3.bf16.msra.mxu0 %v3335_v54  ;;  %7553 = vmatprep.mubr.msk.bf16.mxu0 %vm8926_vm0, %v8925_v0 }
 0xbf1   : > { %7563 = vmatprep.subr.bf16.mxu0 %v8925_v0  ;;  %v8257_v36 = vpop.eup %8256 }
 0xbf2   : > { %v3547_v59 = vmul.f32 %v8257_v36, %v10165_v58  ;;  %v8123_v58 = vld [vmem:[#allocation19 + $0x48] sm:$0xff]  }
 0xbf3   : > { %7584 = vmatpush3.bf16.msra.mxu1 %v8123_v58  ;;  %v7001_v58 = vld [vmem:[#allocation20 + $0x4] ss:$0 sm:$0xff] }
 0xbf4   : > { %v3548_v6 = vpack.c.bf16 %v3547_v59, %v3547_v59  ;;  %7597 = vmatprep.subr.bf16.mxu1 %v8925_v0 }
 0xbf6   : > { %v10196_v8 = vpop.f32.mrb[56].mxu0 }
 0xbf7   : > { %v7495_v43 = vpop.f32.mrb[57].mxu0  ;;  %7554 = vmatmul.mubr.msk.bf16.vlgmr.msra.gmra.mrb[76].mxu0 %vm1034_vm5, %v3328_v50 }
 0xbf8   : > { %7564 = vmatpush3.bf16.msra.mxu0 %v3445_v9  ;;  %v10200_v55 = vpop.f32.mrb[58].mxu0  ;;  %7565 = vmatprep.mubr.msk.bf16.mxu0 %vm8926_vm0, %v8925_v0 }
 0xbf9   : > { %v7496_v19 = vpop.f32.mrb[59].mxu0  ;;  %7575 = vmatprep.subr.bf16.mxu0 %v8925_v0 }
 0xbff   : > { %7566 = vmatmul.mubr.msk.bf16.vlgmr.msra.gmra.mrb[80].mxu0 %vm1034_vm5, %v3438_v62 }
 0xc00   : > { %7576 = vmatpush3.bf16.msra.mxu0 %v3555_v57  ;;  %7577 = vmatprep.mubr.msk.bf16.mxu0 %vm8926_vm0, %v8925_v0 }
 0xc01   : > { %7589 = vmatprep.subr.bf16.mxu0 %v8925_v0 }
 0xc07   : > { %7578 = vmatmul.mubr.msk.bf16.vlgmr.msra.gmra.mrb[84].mxu0 %vm1034_vm5, %v3548_v6 }
 0xc08   : > { %7593 = vmatprep.mubr.msk.bf16.mxu0 %vm8926_vm0, %v8925_v0  ;;  %7590 = vmatpush3.bf16.msra.mxu0 %v8124_v31 }
 0xc09   : > { %7591 = vmatprep.subr.bf16.mxu0 %v8925_v0 }
 0xc0c   : > { %7592 = vmatpush3.bf16.msra.mxu0 %v8125_v33  ;;  %v7009_v33 = vld [vmem:[#allocation14 + $0x4] ss:$0 sm:$0xff] }
 0xc0d   : > { %7605 = vmatprep.subr.bf16.mxu0 %v8925_v0 }
 0xc60   : > { %v2876_v15 = vpop.f32.mrb[60].mxu0 }
 0xc61   : > { %3127 = vrot.lane.b32.xlu1 %v2876_v15, %s8939_s5  ;;  %v7507_v10 = vpop.f32.mrb[61].mxu0 }
 0xc62   : > { %v2879_v56 = vpop.f32.mrb[62].mxu0 }
 0xc63   : > { %v7508_v1 = vpop.f32.mrb[63].mxu0 }
 0xc64   : > { %v8128_v1 = vld [vmem:[#allocation23 + $0x30] sm:$0xff]  }
 0xc65   : > { %3129 = vrot.lane.b32.xlu1 %v2879_v56, %s8939_s5 }
 0xc68   : > { %v2997_v49 = vpop.f32.mrb[64].mxu0 }
 0xc69   : > { %3135 = vrot.lane.b32.xlu0 %v2997_v49, %s8940_s15  ;;  %v7519_v46 = vpop.f32.mrb[65].mxu0 }
 0xc6a   : > { %v3000_v5 = vpop.f32.mrb[66].mxu0 }
 0xc6b   : > { %3137 = vrot.lane.b32.xlu1 %v3000_v5, %s8940_s15  ;;  %v7520_v40 = vpop.f32.mrb[67].mxu0 }
 0xc70   : > { %v3118_v12 = vpop.f32.mrb[68].mxu0 }
 0xc71   : > { %3143 = vrot.lane.b32.xlu0 %v3118_v12, %s11014_s14  ;;  %v7531_v60 = vpop.f32.mrb[69].mxu0 }
 0xc72   : > { %v3121_v48 = vpop.f32.mrb[70].mxu0 }
 0xc73   : > { %3145 = vrot.lane.b32.xlu1 %v3121_v48, %s11014_s14  ;;  %v7532_v13 = vpop.f32.mrb[71].mxu0 }
 0xcc2   : > { %v3259_v16 = vpop.f32.mrb[72].mxu0 }
 0xcc3   : > { %v7543_v39 = vpop.f32.mrb[73].mxu0 }
 0xcc4   : > { %v3262_v63 = vpop.f32.mrb[74].mxu0  ;;  %v7005_v39 = vld [vmem:[#allocation20 + $0x5] ss:$0 sm:$0xff] }
 0xcc5   : > { %v7544_v21 = vpop.f32.mrb[75].mxu0 }
 0xcca   : > { %v3371_v23 = vpop.f32.mrb[76].mxu0 }
 0xccb   : > { %3598 = vrot.lane.b32.xlu0 %v3371_v23, %s8939_s5  ;;  %v7555_v14 = vpop.f32.mrb[77].mxu0 }
 0xccc   : > { %v3374_v22 = vpop.f32.mrb[78].mxu0 }
 0xccd   : > { %v7556_v26 = vpop.f32.mrb[79].mxu0 }
 0xcd2   : > { %v3481_v37 = vpop.f32.mrb[80].mxu0 }
 0xcd3   : > { %3602 = vrot.lane.b32.xlu1 %v3481_v37, %s8940_s15  ;;  %v7567_v34 = vpop.f32.mrb[81].mxu0  ;;  %v3128_v20 = vpop.permute.xlu1 %3127 }
 0xcd4   : > { %v3484_v35 = vpop.f32.mrb[82].mxu0  ;;  %v3149_v29 = vsel %vm1034_vm5, %v10196_v8, %v3128_v20  ;;  %v8126_v8 = vld [vmem:[#allocation23 + $0x20] sm:$0xff]  }
 0xcd5   : > { %v7568_v17 = vpop.f32.mrb[83].mxu0 }
 0xcd7   : > { %v3130_v11 = vpop.permute.xlu1 %3129 }
 0xcd8   : > { %v3150_v41 = vsel %vm1034_vm5, %v10200_v55, %v3130_v11  ;;  %v8127_v55 = vld [vmem:[#allocation23 + $0x28] sm:$0xff]  }
 0xcda   : > { %v3591_v44 = vpop.f32.mrb[84].mxu0 }
 0xcdb   : > { %3606 = vrot.lane.b32.xlu0 %v3591_v44, %s11014_s14  ;;  %v7579_v7 = vpop.f32.mrb[85].mxu0  ;;  %v3136_v27 = vpop.permute.xlu0 %3135  ;;  %s11084_s14 = smov 72  }
 0xcdc   : > { %v3594_v32 = vpop.f32.mrb[86].mxu0  ;;  %v3151_v47 = vsel %vm1550_vm6, %v3149_v29, %v3136_v27 }
 0xcdd   : > { %v7580_v2 = vpop.f32.mrb[87].mxu0  ;;  %v3138_v54 = vpop.permute.xlu1 %3137 }
 0xcde   : > { %v3152_v43 = vsel %vm1550_vm6, %v3150_v41, %v3138_v54  ;;  %v7013_v2 = vld [vmem:[#allocation14 + $0x5] ss:$0 sm:$0xff] }
 0xce3   : > { %v3144_v50 = vpop.permute.xlu0 %3143 }
 0xce4   : > { %v3153_v9 = vsel %vm1553_vm7, %v3151_v47, %v3144_v50 }
 0xce5   : > { %v3146_v19 = vpop.permute.xlu1 %3145  ;;  %v3612_v25 = vadd.f32 %v3153_v9, %v9919_v3 }
 0xce6   : > { %v3154_v53 = vsel %vm1553_vm7, %v3152_v43, %v3146_v19 }
 0xce7   : > { %v3613_v62 = vadd.f32 %v3154_v53, %v9923_v61 }
 0xce9   : > { %v3614_v36 = vpack.c.bf16 %v3613_v62, %v3612_v25 }
 0xceb   : > { %7586 = vmatmul.mubr.msk.bf16.vlgmr.msra.gmra.mrb[80].mxu1 %vm2021_vm8, %v3614_v36 }
 0xcec   : > { %7601 = vmatprep.mubr.msk.bf16.mxu1 %vm8926_vm0, %v8925_v0  ;;  %7598 = vmatpush3.bf16.msra.mxu1 %v8126_v8 }
 0xced   : > { %7599 = vmatprep.subr.bf16.mxu1 %v8925_v0 }
 0xcf0   : > { %7600 = vmatpush3.bf16.msra.mxu1 %v8127_v55 }
 0xcf1   : > { %7613 = vmatprep.subr.bf16.mxu1 %v8925_v0 }
 0xd3d   : > { %v3599_v57 = vpop.permute.xlu0 %3598 }
 0xd3e   : > { %v3609_v3 = vsel %vm1034_vm5, %v3259_v16, %v3599_v57 }
 0xd45   : > { %v3603_v59 = vpop.permute.xlu1 %3602 }
 0xd46   : > { %v3610_v61 = vsel %vm1550_vm6, %v3609_v3, %v3603_v59 }
 0xd4d   : > { %v3607_v6 = vpop.permute.xlu0 %3606 }
 0xd4e   : > { %v3611_v15 = vsel %vm1553_vm7, %v3610_v61, %v3607_v6 }
 0xd4f   : > { %v3677_v10 = vadd.f32 %v3611_v15, %v9942_v42 }
 0xd51   : > { %v3678_v56 = vpack.c.bf16 %v3677_v10, %v3677_v10 }
 0xd53   : > { %7594 = vmatmul.mubr.msk.bf16.vlgmr.msra.gmra.mrb[88].mxu0 %vm2021_vm8, %v3678_v56 }
 0xd54   : > { %7609 = vmatprep.mubr.msk.bf16.mxu0 %vm8926_vm0, %v8925_v0  ;;  %7606 = vmatpush3.bf16.msra.mxu0 %v8128_v1 }
 0xd55   : > { %7607 = vmatprep.subr.bf16.mxu0 %v8925_v0 }
 0xd58   : > { %7608 = vmatpush3.bf16.msra.mxu0 %v8129_v4 }
 0xd59   : > { %7619 = vmatprep.subr.bf16.mxu0 %v8925_v0 }
 0xdbe   : > { %v3670_v49 = vpop.f32.mrb[80].mxu1 }
 0xdbf   : > { %v10252_v46 = vadd.f32 %v7001_v58, %v3670_v49  ;;  %v7587_v5 = vpop.f32.mrb[81].mxu1 }
 0xdc0   : > { %v3673_v42 = vpop.f32.mrb[82].mxu1 }
 0xdc1   : > { %v10254_v40 = vadd.f32 %v7001_v58, %v3673_v42  ;;  %v7588_v12 = vpop.f32.mrb[83].mxu1  ;;  %v3778_v60 = vmax.f32 %v10252_v46, 0.0 }
 0xdc3   : > { %v3779_v48 = vmax.f32 %v10254_v40, 0.0  ;;  %v4878_v13 = vpack.c.bf16 %v10254_v40, %v10252_v46 }
 0xdc5   : > { %v3780_v16 = vpack.c.bf16 %v3779_v48, %v3778_v60 }
 0xdc7   : > { %7602 = vmatmul.mubr.msk.bf16.vlgmr.msra.gmra.mrb[84].mxu1 %vm2021_vm8, %v3780_v16 }
 0xdc8   : > { %7615 = vmatprep.mubr.msk.bf16.mxu1 %vm8926_vm0, %v8925_v0 }
 0xe26   : > { %v3734_v63 = vpop.f32.mrb[88].mxu0 }
 0xe27   : > { %v10263_v21 = vadd.f32 %v7005_v39, %v3734_v63  ;;  %v7595_v31 = vpop.f32.mrb[89].mxu0 }
 0xe28   : > { %v3737_v23 = vpop.f32.mrb[90].mxu0 }
 0xe29   : > { %v3845_v14 = vmax.f32 %v10263_v21, 0.0  ;;  %v7596_v22 = vpop.f32.mrb[91].mxu0 }
 0xe2b   : > { %v3846_v26 = vpack.c.bf16 %v3845_v14, %v3845_v14 }
 0xe2d   : > { %7610 = vmatmul.mubr.msk.bf16.vlgmr.msra.gmra.mrb[92].mxu0 %vm2021_vm8, %v3846_v26 }
 0xe2e   : > { %7621 = vmatprep.mubr.msk.bf16.mxu0 %vm8926_vm0, %v8925_v0 }
 0xe9a   : > { %v3836_v37 = vpop.f32.mrb[84].mxu1 }
 0xe9b   : > { %v3837_v34 = vadd.f32 %v7009_v33, %v3836_v37  ;;  %v7603_v35 = vpop.f32.mrb[85].mxu1 }
 0xe9c   : > { %v3839_v17 = vpop.f32.mrb[86].mxu1 }
 0xe9d   : > { %v3840_v20 = vadd.f32 %v7009_v33, %v3839_v17  ;;  %v7604_v44 = vpop.f32.mrb[87].mxu1  ;;  %v3843_v7 = vmul.f32 %v3837_v34, %v9601_v24 }
 0xe9f   : > { %v3844_v32 = vmul.f32 %v3840_v20, %v9605_v38 }
 0xea1   : > { %v10271_v11 = vpack.c.bf16 %v3844_v32, %v3843_v7 }
 0xea3   : > { %3912 = vrot.lane.b32.xlu1 %v10271_v11, %s8929_s26  ;;  %v4439_v61 = vsel %vm1034_vm5, %v10271_v11, 0 }
 0xea7   : > { %4034 = vrot.lane.b32.xlu1 %v10271_v11, %s11082_s3 }
 0xeab   : > { %4157 = vrot.lane.b32.xlu1 %v10271_v11, %s11083_s20 }
 0xeaf   : > { %4280 = vrot.lane.b32.xlu1 %v10271_v11, %s11084_s14 }
 0xeb3   : > { %4541 = vrot.lane.b32.xlu1 %v10271_v11, %s8928_s2 }
 0xeb7   : > { %4649 = vrot.lane.b32.xlu1 %v10271_v11, %s8930_s25 }
 0xebb   : > { %4757 = vrot.lane.b32.xlu1 %v10271_v11, %s8932_s28 }
 0xf00   : > { %v3902_v27 = vpop.f32.mrb[92].mxu0 }
 0xf01   : > { %v3903_v54 = vadd.f32 %v7013_v2, %v3902_v27  ;;  %v7611_v29 = vpop.f32.mrb[93].mxu0 }
 0xf02   : > { %v3905_v47 = vpop.f32.mrb[94].mxu0 }
 0xf03   : > { %v3908_v50 = vmul.f32 %v3903_v54, %v9603_v28  ;;  %v7612_v41 = vpop.f32.mrb[95].mxu0 }
 0xf05   : > { %v10288_v9 = vpack.c.bf16 %v3908_v50, %v3908_v50 }
 0xf07   : > { %4036 = vrot.lane.b32.xlu0 %v10288_v9, %s8928_s2  ;;  %v3918_v43 = vsel %vm1034_vm5, %v10288_v9, 0 }
 0xf08   : > { %7614 = vmatpush3.bf16.xpose.msra.mxu1 %v3918_v43 }
 0xf09   : > { %7625 = vmatprep.subr.bf16.mxu1 %v8925_v0 }
 0xf0b   : > { %4159 = vrot.lane.b32.xlu0 %v10288_v9, %s8930_s25 }
 0xf0f   : > { %4282 = vrot.lane.b32.xlu0 %v10288_v9, %s8932_s28 }
 0xf13   : > { %4433 = vrot.lane.b32.xlu0 %v10288_v9, %s8929_s26 }
 0xf15   : > { %v3913_v19 = vpop.permute.xlu1 %3912 }
 0xf16   : > { %7616 = vmatmul.mubr.msk.bf16.vlgmr.msra.gmra.mrb[88].mxu1 %vm1034_vm5, %v3913_v19 }
 0xf17   : > { %4539 = vrot.lane.b32.xlu0 %v10288_v9, %s11082_s3  ;;  %7627 = vmatprep.mubr.msk.bf16.mxu1 %vm8926_vm0, %v8925_v0 }
 0xf19   : > { %v4035_v36 = vpop.permute.xlu1 %4034 }
 0xf1b   : > { %4647 = vrot.lane.b32.xlu0 %v10288_v9, %s11083_s20 }
 0xf1d   : > { %v4158_v57 = vpop.permute.xlu1 %4157 }
 0xf1f   : > { %4755 = vrot.lane.b32.xlu0 %v10288_v9, %s11084_s14  ;;  %s11085_s14 = smov 24  }
 0xf21   : > { %v4281_v3 = vpop.permute.xlu1 %4280 }
 0xf25   : > { %v4542_v6 = vpop.permute.xlu1 %4541 }
 0xf26   : > { %v4547_v10 = vsel %vm1034_vm5, %v4542_v6, 0 }
 0xf29   : > { %v4650_v56 = vpop.permute.xlu1 %4649 }
 0xf2a   : > { %v4655_v4 = vsel %vm1034_vm5, %v4650_v56, 0 }
 0xf2d   : > { %v4758_v58 = vpop.permute.xlu1 %4757 }
 0xf2e   : > { %v4763_v5 = vsel %vm1034_vm5, %v4758_v58, 0 }
 0xf79   : > { %v4037_v53 = vpop.permute.xlu0 %4036 }
 0xf7a   : > { %v4042_v25 = vsel %vm1034_vm5, %v4037_v53, 0 }
 0xf7b   : > { %7626 = vmatpush3.bf16.xpose.msra.mxu1 %v4042_v25 }
 0xf7c   : > { %7637 = vmatprep.subr.bf16.mxu1 %v8925_v0 }
 0xf7d   : > { %v4160_v62 = vpop.permute.xlu0 %4159 }
 0xf7e   : > { %v4165_v8 = vsel %vm1034_vm5, %v4160_v62, 0 }
 0xf81   : > { %v4283_v55 = vpop.permute.xlu0 %4282 }
 0xf82   : > { %7628 = vmatmul.mubr.msk.bf16.vlgmr.msra.gmra.mrb[92].mxu1 %vm1034_vm5, %v4035_v36  ;;  %v4288_v59 = vsel %vm1034_vm5, %v4283_v55, 0 }
 0xf83   : > { %7638 = vmatpush3.bf16.xpose.msra.mxu1 %v4165_v8  ;;  %7639 = vmatprep.mubr.msk.bf16.mxu1 %vm8926_vm0, %v8925_v0 }
 0xf84   : > { %7649 = vmatprep.subr.bf16.mxu1 %v8925_v0 }
 0xf85   : > { %v4434_v15 = vpop.permute.xlu0 %4433 }
 0xf89   : > { %v4540_v1 = vpop.permute.xlu0 %4539 }
 0xf8a   : > { %7640 = vmatmul.mubr.msk.bf16.vlgmr.msra.gmra.mrb[96].mxu1 %vm1034_vm5, %v4158_v57 }
 0xf8b   : > { %7650 = vmatpush3.bf16.xpose.msra.mxu1 %v4288_v59  ;;  %7651 = vmatprep.mubr.msk.bf16.mxu1 %vm8926_vm0, %v8925_v0 }
 0xf8c   : > { %7661 = vmatprep.subr.bf16.mxu1 %v8925_v0 }
 0xf8d   : > { %v4648_v49 = vpop.permute.xlu0 %4647 }
 0xf91   : > { %v4756_v42 = vpop.permute.xlu0 %4755 }
 0xf92   : > { %7652 = vmatmul.mubr.msk.bf16.vlgmr.msra.gmra.mrb[100].mxu1 %vm1034_vm5, %v4281_v3 }
 0xf93   : > { %7662 = vmatpush3.bf16.xpose.msra.mxu1 %v4439_v61  ;;  %7663 = vmatprep.mubr.msk.bf16.mxu1 %vm8926_vm0, %v8925_v0  ;;  %v8366_v61 = vld [vmem:[%s9529_s16] ss:$0 sm:$0xff] }
 0xf94   : > { %7673 = vmatprep.subr.bf16.mxu1 %v8925_v0 }
 0xf9a   : > { %7664 = vmatmul.mubr.msk.bf16.vlgmr.msra.gmra.mrb[104].mxu1 %vm1034_vm5, %v4434_v15 }
 0xf9b   : > { %7674 = vmatpush3.bf16.xpose.msra.mxu1 %v4547_v10  ;;  %7675 = vmatprep.mubr.msk.bf16.mxu1 %vm8926_vm0, %v8925_v0 }
 0xf9c   : > { %7685 = vmatprep.subr.bf16.mxu1 %v8925_v0 }
 0xfa2   : > { %7676 = vmatmul.mubr.msk.bf16.vlgmr.msra.gmra.mrb[108].mxu1 %vm1034_vm5, %v4540_v1 }
 0xfa3   : > { %7686 = vmatpush3.bf16.xpose.msra.mxu1 %v4655_v4  ;;  %7687 = vmatprep.mubr.msk.bf16.mxu1 %vm8926_vm0, %v8925_v0 }
 0xfa4   : > { %7697 = vmatprep.subr.bf16.mxu1 %v8925_v0 }
 0xfaa   : > { %7688 = vmatmul.mubr.msk.bf16.vlgmr.msra.gmra.mrb[112].mxu1 %vm1034_vm5, %v4648_v49 }
 0xfab   : > { %7698 = vmatpush3.bf16.xpose.msra.mxu1 %v4763_v5  ;;  %7699 = vmatprep.mubr.msk.bf16.mxu1 %vm8926_vm0, %v8925_v0 }
 0xfac   : > { %7709 = vmatprep.subr.bf16.mxu1 %v8925_v0 }
 0xfb2   : > { %7700 = vmatmul.mubr.msk.bf16.vlgmr.msra.gmra.mrb[116].mxu1 %vm1034_vm5, %v4756_v42 }
 0xfb3   : > { %7713 = vmatprep.mubr.msk.bf16.mxu1 %vm8926_vm0, %v8925_v0 }
 0xfe9   : > { %v3954_v12 = vpop.f32.mrb[88].mxu1 }
 0xfea   : > { %v10347_v60 = vadd.f32 %v10071_v52, %v3954_v12  ;;  %v7617_v48 = vpop.f32.mrb[89].mxu1 }
 0xfeb   : > { %v3957_v16 = vpop.f32.mrb[90].mxu1 }
 0xfec   : > { %v10350_v39 = vadd.f32 %v10071_v52, %v3957_v16  ;;  %v7618_v63 = vpop.f32.mrb[91].mxu1  ;;  %v3961_v31 = vsel %vm1034_vm5, %v10347_v60, -inf }
 0xfed   : > { %3962 = vmax.xlane.f32.xlu1 %v3961_v31 }
 0xfee   : > { %v3964_v23 = vsel %vm1034_vm5, %v10350_v39, -inf }
 0xfef   : > { %3965 = vmax.xlane.f32.xlu0 %v3964_v23 }
0x1055   : > { %v4078_v14 = vpop.f32.mrb[92].mxu1 }
0x1056   : > { %v10357_v22 = vadd.f32 %v10071_v52, %v4078_v14  ;;  %v7629_v26 = vpop.f32.mrb[93].mxu1 }
0x1057   : > { %v4081_v33 = vpop.f32.mrb[94].mxu1 }
0x1058   : > { %v10360_v37 = vadd.f32 %v10071_v52, %v4081_v33  ;;  %v7630_v34 = vpop.f32.mrb[95].mxu1  ;;  %v4085_v35 = vsel %vm1034_vm5, %v10357_v22, -inf }
0x1059   : > { %4086 = vmax.xlane.f32.xlu0 %v4085_v35 }
0x105a   : > { %v4088_v17 = vsel %vm1034_vm5, %v10360_v37, -inf }
0x105b   : > { %4089 = vmax.xlane.f32.xlu1 %v4088_v17 }
0x105d   : > { %v4201_v20 = vpop.f32.mrb[96].mxu1 }
0x105e   : > { %v10367_v44 = vadd.f32 %v10071_v52, %v4201_v20  ;;  %v7641_v7 = vpop.f32.mrb[97].mxu1 }
0x105f   : > { %v4204_v32 = vpop.f32.mrb[98].mxu1 }
0x1060   : > { %v10370_v2 = vadd.f32 %v10071_v52, %v4204_v32  ;;  %v7642_v27 = vpop.f32.mrb[99].mxu1  ;;  %v4208_v54 = vsel %vm1034_vm5, %v10367_v44, -inf }
0x1061   : > { %4209 = vmax.xlane.f32.xlu0 %v4208_v54 }
0x1062   : > { %v4211_v29 = vsel %vm1034_vm5, %v10370_v2, -inf }
0x1063   : > { %4212 = vmax.xlane.f32.xlu1 %v4211_v29 }
0x1065   : > { %v4324_v47 = vpop.f32.mrb[100].mxu1 }
0x1066   : > { %v10377_v50 = vadd.f32 %v10071_v52, %v4324_v47  ;;  %v7653_v41 = vpop.f32.mrb[101].mxu1 }
0x1067   : > { %v4327_v43 = vpop.f32.mrb[102].mxu1 }
0x1068   : > { %v10380_v19 = vadd.f32 %v10071_v52, %v4327_v43  ;;  %v7654_v53 = vpop.f32.mrb[103].mxu1  ;;  %v4331_v25 = vsel %vm1034_vm5, %v10377_v50, -inf }
0x1069   : > { %4332 = vmax.xlane.f32.xlu0 %v4331_v25 }
0x106a   : > { %v4334_v62 = vsel %vm1034_vm5, %v10380_v19, -inf }
0x106b   : > { %4335 = vmax.xlane.f32.xlu1 %v4334_v62 }
0x106d   : > { %v4475_v36 = vpop.f32.mrb[104].mxu1 }
0x106e   : > { %v10387_v8 = vadd.f32 %v10030_v18, %v4475_v36  ;;  %v7665_v55 = vpop.f32.mrb[105].mxu1 }
0x106f   : > { %v4478_v57 = vpop.f32.mrb[106].mxu1 }
0x1070   : > { %v7666_v59 = vpop.f32.mrb[107].mxu1  ;;  %v4481_v52 = vsel %vm1550_vm6, %v10387_v8, -inf }
0x1071   : > { %4482 = vmax.xlane.f32.xlu0 %v4481_v52 }
0x1075   : > { %v4583_v3 = vpop.f32.mrb[108].mxu1 }
0x1076   : > { %v10392_v6 = vadd.f32 %v8366_v61, %v4583_v3  ;;  %v7677_v15 = vpop.f32.mrb[109].mxu1 }
0x1077   : > { %v4586_v10 = vpop.f32.mrb[110].mxu1 }
0x1078   : > { %v7678_v56 = vpop.f32.mrb[111].mxu1  ;;  %v4589_v1 = vsel %vm1550_vm6, %v10392_v6, -inf }
0x1079   : > { %4590 = vmax.xlane.f32.xlu1 %v4589_v1 }
0x107a   : > { %v3963_v16 = vpop.xlane.xlu1 %3962 }
0x107b   : > { %v3967_v63 = vsub.f32 %v10347_v60, %v3963_v16 }
0x107c   : > { %v3966_v23 = vpop.xlane.xlu0 %3965 }
0x107d   : > { %v4691_v18 = vpop.f32.mrb[112].mxu1  ;;  %v3969_v31 = vmul.f32 1.442695, %v3967_v63  ;;  %v3968_v14 = vsub.f32 %v10350_v39, %v3966_v23 }
0x107e   : > { %v7689_v4 = vpop.f32.mrb[113].mxu1  ;;  %v10402_v33 = vadd.f32 %v8366_v61, %v4691_v18 }
0x107f   : > { %v4694_v58 = vpop.f32.mrb[114].mxu1  ;;  %8258 = vpow2.f32 %v3969_v31  ;;  %v3971_v26 = vmul.f32 1.442695, %v3968_v14 }
0x1080   : > { %v7690_v49 = vpop.f32.mrb[115].mxu1  ;;  %v4697_v34 = vsel %vm1550_vm6, %v10402_v33, -inf }
0x1081   : > { %8260 = vpow2.f32 %v3971_v26 }
0x1085   : > { %v4799_v5 = vpop.f32.mrb[116].mxu1 }
0x1086   : > { %v7701_v42 = vpop.f32.mrb[117].mxu1  ;;  %v10408_v17 = vadd.f32 %v8366_v61, %v4799_v5 }
0x1087   : > { %3985 = vrot.lane.b32.xlu0 %v10288_v9, %s8936_s27  ;;  %v4802_v12 = vpop.f32.mrb[118].mxu1 }
0x1088   : > { %v7702_v48 = vpop.f32.mrb[119].mxu1  ;;  %v4805_v20 = vsel %vm1550_vm6, %v10408_v17, -inf }
0x1089   : > { %v10406_v35 = vpop.eup %8258 }
0x108a   : > { %4108 = vrot.lane.b32.xlu1 %v10288_v9, %s8935_s22  ;;  %v3973_v60 = vsel %vm1034_vm5, %v10406_v35, 0.0 }
0x108b   : > { %v10414_v39 = vpop.eup %8260 }
0x108c   : > { %v3976_v7 = vsel %vm1034_vm5, %v10414_v39, 0.0 }
0x10a6   : > { %4698 = vmax.xlane.f32.xlu0 %v4697_v34 }
0x10aa   : > { %3974 = vadd.xlane.f32.xlu0 %v3973_v60 }
0x10ae   : > { %4806 = vmax.xlane.f32.xlu1 %v4805_v20 }
0x10b2   : > { %3977 = vadd.xlane.f32.xlu1 %v3976_v7 }
0x10e6   : > { %v4087_v32 = vpop.xlane.xlu0 %4086 }
0x10e7   : > { %v4091_v27 = vsub.f32 %v10357_v22, %v4087_v32 }
0x10e8   : > { %v4090_v54 = vpop.xlane.xlu1 %4089 }
0x10e9   : > { %v4093_v29 = vmul.f32 1.442695, %v4091_v27  ;;  %v4092_v47 = vsub.f32 %v10360_v37, %v4090_v54 }
0x10eb   : > { %8262 = vpow2.f32 %v4093_v29  ;;  %v4095_v41 = vmul.f32 1.442695, %v4092_v47 }
0x10ed   : > { %8264 = vpow2.f32 %v4095_v41 }
0x10ee   : > { %v4210_v43 = vpop.xlane.xlu0 %4209 }
0x10ef   : > { %v4214_v53 = vsub.f32 %v10367_v44, %v4210_v43 }
0x10f0   : > { %v4213_v25 = vpop.xlane.xlu1 %4212 }
0x10f1   : > { %v4216_v62 = vmul.f32 1.442695, %v4214_v53  ;;  %v4215_v36 = vsub.f32 %v10370_v2, %v4213_v25 }
0x10f3   : > { %8266 = vpow2.f32 %v4216_v62  ;;  %v4218_v55 = vmul.f32 1.442695, %v4215_v36 }
0x10f5   : > { %v10422_v57 = vpop.eup %8262  ;;  %8268 = vpow2.f32 %v4218_v55 }
0x10f6   : > { %v4097_v22 = vsel %vm1034_vm5, %v10422_v57, 0.0  ;;  %v4333_v3 = vpop.xlane.xlu0 %4332 }
0x10f7   : > { %v10426_v59 = vpop.eup %8264  ;;  %4098 = vadd.xlane.f32.xlu0 %v4097_v22  ;;  %v4337_v49 = vsub.f32 %v10377_v50, %v4333_v3 }
0x10f8   : > { %v4336_v37 = vpop.xlane.xlu1 %4335  ;;  %v4100_v52 = vsel %vm1034_vm5, %v10426_v59, 0.0 }
0x10f9   : > { %v4338_v44 = vsub.f32 %v10380_v19, %v4336_v37  ;;  %4101 = vadd.xlane.f32.xlu1 %v4100_v52  ;;  %v4339_v42 = vmul.f32 1.442695, %v4337_v49 }
0x10fb   : > { %v4341_v2 = vmul.f32 1.442695, %v4338_v44 }
0x10fd   : > { %v10431_v61 = vpop.eup %8266  ;;  %8270 = vpow2.f32 %v4341_v2 }
0x10fe   : > { %v4483_v15 = vpop.xlane.xlu0 %4482  ;;  %v4220_v10 = vsel %vm1034_vm5, %v10431_v61, 0.0  ;;  %8272 = vpow2.f32 %v4339_v42 }
0x10ff   : > { %v10435_v56 = vpop.eup %8268  ;;  %4221 = vadd.xlane.f32.xlu0 %v4220_v10  ;;  %v4484_v16 = vsub.f32 %v10387_v8, %v4483_v15 }
0x1100   : > { %v4223_v1 = vsel %vm1034_vm5, %v10435_v56, 0.0 }
0x1101   : > { %4224 = vadd.xlane.f32.xlu1 %v4223_v1  ;;  %v4485_v63 = vmul.f32 1.442695, %v4484_v16 }
0x1102   : > { %v3986_v18 = vpop.permute.xlu0 %3985 }
0x1103   : > { %v3991_v19 = vsel %vm973_vm1, %v3986_v18, 0 }
0x1104   : > { %7620 = vmatpush3.bf16.msra.mxu0 %v3991_v19 }
0x1105   : > { %7631 = vmatprep.subr.bf16.mxu0 %v8925_v0 }
0x1106   : > { %v4591_v5 = vpop.xlane.xlu1 %4590 }
0x1107   : > { %v10441_v4 = vpop.eup %8270  ;;  %v4592_v12 = vsub.f32 %v10392_v6, %v4591_v5 }
0x1108   : > { %v4346_v58 = vsel %vm1034_vm5, %v10441_v4, 0.0  ;;  %v10452_v31 = vpop.eup %8272 }
0x1109   : > { %4347 = vadd.xlane.f32.xlu1 %v4346_v58  ;;  %v4593_v48 = vmul.f32 1.442695, %v4592_v12  ;;  %v4343_v14 = vsel %vm1034_vm5, %v10452_v31, 0.0 }
0x110a   : > { %v4109_v6 = vpop.permute.xlu1 %4108 }
0x110b   : > { %8274 = vpow2.f32 %v4593_v48  ;;  %v4114_v36 = vsel %vm973_vm1, %v4109_v6, 0 }
0x110c   : > { %8276 = vpow2.f32 %v4485_v63 }
0x1115   : > { %4231 = vrot.lane.b32.xlu0 %v10288_v9, %s8937_s0 }
0x111a   : > { %4354 = vrot.lane.b32.xlu1 %v10288_v9, %s8938_s17  ;;  %v10456_v9 = vpop.eup %8274 }
0x111b   : > { %v4595_v34 = vsel %vm1550_vm6, %v10456_v9, 0.0  ;;  %v10461_v8 = vpop.eup %8276 }
0x111c   : > { %v4487_v32 = vsel %vm1550_vm6, %v10461_v8, 0.0 }
0x1133   : > { %v4699_v23 = vpop.xlane.xlu0 %4698 }
0x1134   : > { %v4700_v50 = vsub.f32 %v10402_v33, %v4699_v23  ;;  %4344 = vadd.xlane.f32.xlu0 %v4343_v14 }
0x1136   : > { %v4701_v26 = vmul.f32 1.442695, %v4700_v50 }
0x1137   : > { %v3975_v20 = vpop.xlane.xlu0 %3974 }
0x1138   : > { %8278 = vpow2.f32 %v4701_v26  ;;  %4596 = vadd.xlane.f32.xlu0 %v4595_v34 }
0x1139   : > { %8280 = vrcp.f32 %v3975_v20 }
0x113b   : > { %v4807_v60 = vpop.xlane.xlu1 %4806 }
0x113c   : > { %v4808_v7 = vsub.f32 %v10408_v17, %v4807_v60 }
0x113e   : > { %v4809_v27 = vmul.f32 1.442695, %v4808_v7  ;;  %4488 = vadd.xlane.f32.xlu1 %v4487_v32 }
0x113f   : > { %v3978_v33 = vpop.xlane.xlu1 %3977 }
0x1140   : > { %8282 = vpow2.f32 %v4809_v27 }
0x1141   : > { %8284 = vrcp.f32 %v3978_v33 }
0x1142   : > { %v10466_v54 = vpop.eup %8278 }
0x1143   : > { %v4703_v29 = vsel %vm1550_vm6, %v10466_v54, 0.0  ;;  %v8281_v47 = vpop.eup %8280 }
0x1144   : > { %4704 = vadd.xlane.f32.xlu0 %v4703_v29  ;;  %v3981_v53 = vmul.f32 %v8281_v47, %v10406_v35  ;;  %v8130_v47 = vld [vmem:[#allocation19 + $0x60] sm:$0xff]  }
0x114a   : > { %v10470_v41 = vpop.eup %8282 }
0x114b   : > { %v8285_v43 = vpop.eup %8284  ;;  %v4811_v17 = vsel %vm1550_vm6, %v10470_v41, 0.0 }
0x114c   : > { %v3982_v25 = vmul.f32 %v8285_v43, %v10414_v39  ;;  %4812 = vadd.xlane.f32.xlu0 %v4811_v17  ;;  %v8132_v17 = vld [vmem:[#allocation19 + $0x80] sm:$0xff]  }
0x114e   : > { %v3983_v62 = vpack.c.bf16 %v3982_v25, %v3981_v53  ;;  %v5000_v53 = vpack.c.bf16 %v10263_v21, %v10263_v21 }
0x114f   : > { %4601 = vrot.lane.b32.xlu1 %v10271_v11, %s8935_s22 }
0x1150   : > { %7622 = vmatmul.mubr.msk.bf16.vlgmr.msra.gmra.mrb[96].mxu0 %vm1034_vm5, %v3983_v62 }
0x1151   : > { %7632 = vmatpush3.bf16.msra.mxu0 %v4114_v36  ;;  %7633 = vmatprep.mubr.msk.bf16.mxu0 %vm8926_vm0, %v8925_v0 }
0x1152   : > { %7643 = vmatprep.subr.bf16.mxu0 %v8925_v0 }
0x1153   : > { %4709 = vrot.lane.b32.xlu1 %v10271_v11, %s8937_s0 }
0x1157   : > { %4817 = vrot.lane.b32.xlu1 %v10271_v11, %s8938_s17 }
0x1162   : > { %4493 = vrot.lane.b32.xlu0 %v10271_v11, %s8936_s27 }
0x1184   : > { %v4099_v35 = vpop.xlane.xlu0 %4098 }
0x1185   : > { %8286 = vrcp.f32 %v4099_v35 }
0x1186   : > { %v4102_v39 = vpop.xlane.xlu1 %4101 }
0x1187   : > { %8288 = vrcp.f32 %v4102_v39  ;;  %v8134_v39 = vld [vmem:[#allocation19 + $0x70] sm:$0xff]  }
0x1188   : > { %7710 = vmatpush3.bf16.msra.mxu1 %v8134_v39  ;;  %v8137_v39 = vld [vmem:[#allocation19 + $0x98] sm:$0xff]  }
0x1189   : > { %7711 = vmatprep.subr.bf16.mxu1 %v8925_v0 }
0x118c   : > { %v4222_v55 = vpop.xlane.xlu0 %4221 }
0x118d   : > { %8290 = vrcp.f32 %v4222_v55 }
0x118e   : > { %v4225_v22 = vpop.xlane.xlu1 %4224 }
0x118f   : > { %v8287_v37 = vpop.eup %8286  ;;  %8292 = vrcp.f32 %v4225_v22 }
0x1190   : > { %v4105_v44 = vmul.f32 %v8287_v37, %v10422_v57  ;;  %v4232_v2 = vpop.permute.xlu0 %4231 }
0x1191   : > { %v8289_v52 = vpop.eup %8288  ;;  %v4237_v10 = vsel %vm973_vm1, %v4232_v2, 0  ;;  %v8135_v2 = vld [vmem:[#allocation19 + $0x78] sm:$0xff]  }
0x1192   : > { %v4106_v3 = vmul.f32 %v8289_v52, %v10426_v59  ;;  %7712 = vmatpush3.bf16.msra.mxu1 %v8135_v2  ;;  %v8142_v2 = vld [vmem:[#allocation19 + $0xb0] sm:$0xff]  }
0x1193   : > { %7725 = vmatprep.subr.bf16.mxu1 %v8925_v0 }
0x1194   : > { %v4107_v15 = vpack.c.bf16 %v4106_v3, %v4105_v44 }
0x1196   : > { %7634 = vmatmul.mubr.msk.bf16.vlgmr.msra.gmra.mrb[100].mxu0 %vm1034_vm5, %v4107_v15  ;;  %v4348_v11 = vpop.xlane.xlu1 %4347 }
0x1197   : > { %v8291_v1 = vpop.eup %8290  ;;  %7644 = vmatpush3.bf16.msra.mxu0 %v4237_v10  ;;  %7645 = vmatprep.mubr.msk.bf16.mxu0 %vm8926_vm0, %v8925_v0  ;;  %8294 = vrcp.f32 %v4348_v11 }
0x1198   : > { %7655 = vmatprep.subr.bf16.mxu0 %v8925_v0  ;;  %v4228_v19 = vmul.f32 %v8291_v1, %v10431_v61 }
0x1199   : > { %v8293_v18 = vpop.eup %8292 }
0x119a   : > { %v4229_v57 = vmul.f32 %v8293_v18, %v10435_v56  ;;  %v4355_v59 = vpop.permute.xlu1 %4354 }
0x119b   : > { %v4360_v49 = vsel %vm973_vm1, %v4355_v59, 0 }
0x119c   : > { %v4230_v58 = vpack.c.bf16 %v4229_v57, %v4228_v19 }
0x119e   : > { %7646 = vmatmul.mubr.msk.bf16.vlgmr.msra.gmra.mrb[104].mxu0 %vm1034_vm5, %v4230_v58 }
0x119f   : > { %7656 = vmatpush3.bf16.msra.mxu0 %v4360_v49  ;;  %7657 = vmatprep.mubr.msk.bf16.mxu0 %vm8926_vm0, %v8925_v0 }
0x11a0   : > { %7667 = vmatprep.subr.bf16.mxu0 %v8925_v0 }
0x11a1   : > { %v8295_v42 = vpop.eup %8294 }
0x11a2   : > { %v4352_v56 = vmul.f32 %v8295_v42, %v10441_v4 }
0x11c1   : > { %v4345_v5 = vpop.xlane.xlu0 %4344 }
0x11c2   : > { %8296 = vrcp.f32 %v4345_v5 }
0x11c5   : > { %v4597_v63 = vpop.xlane.xlu0 %4596 }
0x11cb   : > { %v4489_v12 = vpop.xlane.xlu1 %4488 }
0x11cc   : > { %v8297_v61 = vpop.eup %8296  ;;  %8298 = vrcp.f32 %v4489_v12 }
0x11cd   : > { %v4351_v48 = vmul.f32 %v8297_v61, %v10452_v31  ;;  %8300 = vrcp.f32 %v4597_v63 }
0x11cf   : > { %v4353_v16 = vpack.c.bf16 %v4352_v56, %v4351_v48  ;;  %v4602_v34 = vpop.permute.xlu1 %4601 }
0x11d1   : > { %7658 = vmatmul.mubr.msk.bf16.vlgmr.msra.gmra.mrb[108].mxu0 %vm1034_vm5, %v4353_v16  ;;  %v4705_v23 = vpop.xlane.xlu0 %4704 }
0x11d2   : > { %7669 = vmatprep.mubr.msk.bf16.mxu0 %vm8926_vm0, %v8925_v0  ;;  %8302 = vrcp.f32 %v4705_v23 }
0x11d3   : > { %v4710_v7 = vpop.permute.xlu1 %4709 }
0x11d6   : > { %v8299_v14 = vpop.eup %8298 }
0x11d7   : > { %v4491_v26 = vmul.f32 %v8299_v14, %v10461_v8  ;;  %v8301_v31 = vpop.eup %8300  ;;  %v4818_v29 = vpop.permute.xlu1 %4817 }
0x11d8   : > { %v4599_v60 = vmul.f32 %v8301_v31, %v10456_v9 }
0x11d9   : > { %v4813_v50 = vpop.xlane.xlu0 %4812  ;;  %v4492_v4 = vpack.c.bf16 %v4491_v26, %v4491_v26 }
0x11da   : > { %8304 = vrcp.f32 %v4813_v50  ;;  %v4600_v8 = vpack.c.bf16 %v4599_v60, %v4599_v60 }
0x11dc   : > { %v8303_v20 = vpop.eup %8302 }
0x11dd   : > { %v4494_v6 = vpop.permute.xlu0 %4493  ;;  %v4707_v32 = vmul.f32 %v8303_v20, %v10466_v54  ;;  %v8131_v54 = vld [vmem:[#allocation19 + $0x68] sm:$0xff]  }
0x11de   : > { %7668 = vmatpush3.bf16.msra.mxu0 %v4494_v6 }
0x11df   : > { %7679 = vmatprep.subr.bf16.mxu0 %v8925_v0  ;;  %v4708_v27 = vpack.c.bf16 %v4707_v32, %v4707_v32 }
0x11e1   : > { %7670 = vmatmul.mubr.msk.bf16.vlgmr.msra.gmra.mrb[112].mxu0 %vm1550_vm6, %v4492_v4 }
0x11e2   : > { %7680 = vmatpush3.bf16.msra.mxu0 %v4602_v34  ;;  %7681 = vmatprep.mubr.msk.bf16.mxu0 %vm8926_vm0, %v8925_v0 }
0x11e3   : > { %7691 = vmatprep.subr.bf16.mxu0 %v8925_v0 }
0x11e4   : > { %v8305_v33 = vpop.eup %8304 }
0x11e5   : > { %v4815_v9 = vmul.f32 %v8305_v33, %v10470_v41  ;;  %v8133_v41 = vld [vmem:[#allocation19 + $0x88] sm:$0xff]  }
0x11e7   : > { %v4816_v43 = vpack.c.bf16 %v4815_v9, %v4815_v9 }
0x11e9   : > { %7682 = vmatmul.mubr.msk.bf16.vlgmr.msra.gmra.mrb[116].mxu0 %vm1550_vm6, %v4600_v8 }
0x11ea   : > { %7692 = vmatpush3.bf16.msra.mxu0 %v4710_v7  ;;  %7693 = vmatprep.mubr.msk.bf16.mxu0 %vm8926_vm0, %v8925_v0 }
0x11eb   : > { %7703 = vmatprep.subr.bf16.mxu0 %v8925_v0 }
0x11f1   : > { %7694 = vmatmul.mubr.msk.bf16.vlgmr.msra.gmra.mrb[120].mxu0 %vm1550_vm6, %v4708_v27 }
0x11f2   : > { %7704 = vmatpush3.bf16.msra.mxu0 %v4818_v29  ;;  %7705 = vmatprep.mubr.msk.bf16.mxu0 %vm8926_vm0, %v8925_v0 }
0x11f3   : > { %7717 = vmatprep.subr.bf16.mxu0 %v8925_v0 }
0x11f9   : > { %7706 = vmatmul.mubr.msk.bf16.vlgmr.msra.gmra.mrb[124].mxu0 %vm1550_vm6, %v4816_v43 }
0x11fa   : > { %7718 = vmatpush3.bf16.msra.mxu0 %v8130_v47  ;;  %7721 = vmatprep.mubr.msk.bf16.mxu0 %vm8926_vm0, %v8925_v0 }
0x11fb   : > { %7719 = vmatprep.subr.bf16.mxu0 %v8925_v0 }
0x11fe   : > { %7720 = vmatpush3.bf16.msra.mxu0 %v8131_v54 }
0x11ff   : > { %7733 = vmatprep.subr.bf16.mxu0 %v8925_v0 }
0x1201   : > { %7722 = vmatmul.mubr.msk.bf16.vlgmr.msra.gmra.mrb[128].mxu0 %vm2021_vm8, %v4878_v13 }
0x1202   : > { %7734 = vmatpush3.bf16.msra.mxu0 %v8132_v17  ;;  %7737 = vmatprep.mubr.msk.bf16.mxu0 %vm8926_vm0, %v8925_v0 }
0x1203   : > { %7735 = vmatprep.subr.bf16.mxu0 %v8925_v0 }
0x1206   : > { %7736 = vmatpush3.bf16.msra.mxu0 %v8133_v41 }
0x1207   : > { %7749 = vmatprep.subr.bf16.mxu0 %v8925_v0 }
0x1209   : > { %7738 = vmatmul.mubr.msk.bf16.vlgmr.msra.gmra.mrb[132].mxu0 %vm2021_vm8, %v5000_v53 }
0x120a   : > { %7753 = vmatprep.mubr.msk.bf16.mxu0 %vm8926_vm0, %v8925_v0  ;;  %7750 = vmatpush3.bf16.msra.mxu0 %v8142_v2 }
0x120b   : > { %7751 = vmatprep.subr.bf16.mxu0 %v8925_v0 }
0x1223   : > { %v10543_v46 = vpop.f32.mrb[96].mxu0 }
0x1224   : > { %v7623_v40 = vpop.f32.mrb[97].mxu0 }
0x1225   : > { %v4030_v13 = vpop.f32.mrb[98].mxu0 }
0x1226   : > { %v7624_v25 = vpop.f32.mrb[99].mxu0 }
0x1269   : > { %v4150_v62 = vpop.f32.mrb[100].mxu0 }
0x126a   : > { %v7635_v36 = vpop.f32.mrb[101].mxu0 }
0x126b   : > { %v4153_v35 = vpop.f32.mrb[102].mxu0  ;;  %v8136_v36 = vld [vmem:[#allocation19 + $0x90] sm:$0xff]  }
0x126c   : > { %v8083_v55 = vpack.i.bf16 %v4153_v35, %v4150_v62  ;;  %v7636_v22 = vpop.f32.mrb[103].mxu0 }
0x126e   : > { %8084 = vrot.lane.b32.xlu1 %v8083_v55, %s8939_s5 }
0x1271   : > { %v4273_v21 = vpop.f32.mrb[104].mxu0 }
0x1272   : > { %v7647_v37 = vpop.f32.mrb[105].mxu0 }
0x1273   : > { %v4276_v52 = vpop.f32.mrb[106].mxu0 }
0x1274   : > { %v8088_v44 = vpack.i.bf16 %v4276_v52, %v4273_v21  ;;  %v7648_v3 = vpop.f32.mrb[107].mxu0 }
0x1275   : > { %v8139_v3 = vld [vmem:[#allocation19 + $0xa8] sm:$0xff]  }
0x1276   : > { %8089 = vrot.lane.b32.xlu0 %v8088_v44, %s8940_s15  ;;  %v8138_v44 = vld [vmem:[#allocation19 + $0xa0] sm:$0xff]  }
0x12a4   : > { %v4396_v15 = vpop.f32.mrb[108].mxu0 }
0x12a5   : > { %v7659_v10 = vpop.f32.mrb[109].mxu0 }
0x12a6   : > { %v4399_v11 = vpop.f32.mrb[110].mxu0  ;;  %v7039_v10 = vld [vmem:[#allocation20 + $0x6] ss:$0 sm:$0xff] }
0x12a7   : > { %v8093_v1 = vpack.i.bf16 %v4399_v11, %v4396_v15  ;;  %v7660_v18 = vpop.f32.mrb[111].mxu0  ;;  %v8143_v15 = vld [vmem:[#allocation19 + $0xb8] sm:$0xff]  }
0x12a8   : > { %7752 = vmatpush3.bf16.msra.mxu0 %v8143_v15 }
0x12a9   : > { %8094 = vrot.lane.b32.xlu1 %v8093_v1, %s11085_s14  ;;  %7765 = vmatprep.subr.bf16.mxu0 %v8925_v0 }
0x12b4   : > { %v4533_v19 = vpop.f32.mrb[112].mxu0 }
0x12b5   : > { %v7671_v57 = vpop.f32.mrb[113].mxu0 }
0x12b6   : > { %v4536_v59 = vpop.f32.mrb[114].mxu0 }
0x12b7   : > { %v7672_v58 = vpop.f32.mrb[115].mxu0 }
0x12bc   : > { %v4641_v49 = vpop.f32.mrb[116].mxu0 }
0x12bd   : > { %4864 = vrot.lane.b32.xlu0 %v4641_v49, %s8939_s5  ;;  %v7683_v5 = vpop.f32.mrb[117].mxu0 }
0x12be   : > { %v4644_v42 = vpop.f32.mrb[118].mxu0 }
0x12bf   : > { %v7684_v12 = vpop.f32.mrb[119].mxu0 }
0x12c4   : > { %v4749_v61 = vpop.f32.mrb[120].mxu0 }
0x12c5   : > { %4868 = vrot.lane.b32.xlu1 %v4749_v61, %s8940_s15  ;;  %v7695_v56 = vpop.f32.mrb[121].mxu0 }
0x12c6   : > { %v4752_v48 = vpop.f32.mrb[122].mxu0 }
0x12c7   : > { %v7696_v16 = vpop.f32.mrb[123].mxu0 }
0x12cc   : > { %v4857_v63 = vpop.f32.mrb[124].mxu0 }
0x12cd   : > { %4872 = vrot.lane.b32.xlu0 %v4857_v63, %s11085_s14  ;;  %v7707_v23 = vpop.f32.mrb[125].mxu0 }
0x12ce   : > { %v4860_v14 = vpop.f32.mrb[126].mxu0 }
0x12cf   : > { %v7708_v50 = vpop.f32.mrb[127].mxu0 }
0x12d4   : > { %v4985_v26 = vpop.f32.mrb[128].mxu0 }
0x12d5   : > { %v7723_v6 = vpop.f32.mrb[129].mxu0 }
0x12d6   : > { %v4988_v4 = vpop.f32.mrb[130].mxu0 }
0x12d7   : > { %v7724_v31 = vpop.f32.mrb[131].mxu0 }
0x12dc   : > { %v10553_v34 = vpop.f32.mrb[132].mxu0 }
0x12dd   : > { %v7739_v60 = vpop.f32.mrb[133].mxu0 }
0x12de   : > { %v5109_v8 = vpop.f32.mrb[134].mxu0  ;;  %v8141_v60 = vld [vmem:[#allocation23 + $0x48] sm:$0xff]  }
0x12df   : > { %v7740_v20 = vpop.f32.mrb[135].mxu0 }
0x12e0   : > { %v8085_v7 = vpop.permute.xlu1 %8084 }
0x12e1   : > { %v8087_v27 = vunpack.i.h.bf16 %v8085_v7  ;;  %v8086_v33 = vunpack.i.l.bf16 %v8085_v7  ;;  %v7046_v7 = vld [vmem:[#allocation20 + $0x7] ss:$0 sm:$0xff] }
0x12e3   : > { %v4428_v43 = vsel %vm1034_vm5, %v4030_v13, %v8087_v27  ;;  %v4427_v54 = vsel %vm1034_vm5, %v10543_v46, %v8086_v33 }
0x12e8   : > { %v8090_v32 = vpop.permute.xlu0 %8089 }
0x12e9   : > { %v8092_v29 = vunpack.i.h.bf16 %v8090_v32  ;;  %v8091_v9 = vunpack.i.l.bf16 %v8090_v32 }
0x12eb   : > { %v4430_v53 = vsel %vm1550_vm6, %v4428_v43, %v8092_v29  ;;  %v4429_v40 = vsel %vm1550_vm6, %v4427_v54, %v8091_v9 }
0x131b   : > { %v8095_v47 = vpop.permute.xlu1 %8094 }
0x131c   : > { %v8097_v17 = vunpack.i.h.bf16 %v8095_v47  ;;  %v8096_v41 = vunpack.i.l.bf16 %v8095_v47 }
0x131e   : > { %v4432_v25 = vsel %vm1553_vm7, %v4430_v53, %v8097_v17  ;;  %v4431_v62 = vsel %vm1553_vm7, %v4429_v40, %v8096_v41 }
0x131f   : > { %v4879_v35 = vpack.c.bf16 %v4432_v25, %v4431_v62 }
0x1321   : > { %7714 = vmatmul.mubr.msk.bf16.vlgmr.msra.gmra.mrb[120].mxu1 %vm2021_vm8, %v4879_v35  ;;  %v8144_v35 = vld [vmem:[#allocation23 + $0x50] sm:$0xff]  }
0x1322   : > { %7726 = vmatpush3.bf16.msra.mxu1 %v8136_v36  ;;  %7729 = vmatprep.mubr.msk.bf16.mxu1 %vm8926_vm0, %v8925_v0 }
0x1323   : > { %7727 = vmatprep.subr.bf16.mxu1 %v8925_v0 }
0x1326   : > { %7728 = vmatpush3.bf16.msra.mxu1 %v8137_v39 }
0x1327   : > { %7741 = vmatprep.subr.bf16.mxu1 %v8925_v0 }
0x132f   : > { %v4865_v46 = vpop.permute.xlu0 %4864 }
0x1330   : > { %v4875_v55 = vsel %vm1034_vm5, %v4533_v19, %v4865_v46  ;;  %v8145_v46 = vld [vmem:[#allocation23 + $0x58] sm:$0xff]  }
0x1337   : > { %v4869_v13 = vpop.permute.xlu1 %4868 }
0x1338   : > { %v4876_v22 = vsel %vm1550_vm6, %v4875_v55, %v4869_v13 }
0x133f   : > { %v4873_v21 = vpop.permute.xlu0 %4872 }
0x1340   : > { %v4877_v37 = vsel %vm1553_vm7, %v4876_v22, %v4873_v21 }
0x1341   : > { %v5001_v52 = vpack.c.bf16 %v4877_v37, %v4877_v37 }
0x1343   : > { %7730 = vmatmul.mubr.msk.bf16.vlgmr.msra.gmra.mrb[124].mxu1 %vm2021_vm8, %v5001_v52  ;;  %v7055_v52 = vld [vmem:[#allocation14 + $0x6] ss:$0 sm:$0xff] }
0x1344   : > { %7745 = vmatprep.mubr.msk.bf16.mxu1 %vm8926_vm0, %v8925_v0  ;;  %7742 = vmatpush3.bf16.msra.mxu1 %v8138_v44 }
0x1345   : > { %7743 = vmatprep.subr.bf16.mxu1 %v8925_v0 }
0x1348   : > { %7744 = vmatpush3.bf16.msra.mxu1 %v8139_v3 }
0x1349   : > { %7757 = vmatprep.subr.bf16.mxu1 %v8925_v0 }
0x13f4   : > { %v4929_v11 = vpop.f32.mrb[120].mxu1 }
0x13f5   : > { %v4986_v1 = vadd.f32 %v4985_v26, %v4929_v11  ;;  %v7715_v18 = vpop.f32.mrb[121].mxu1 }
0x13f6   : > { %v4932_v19 = vpop.f32.mrb[122].mxu1 }
0x13f7   : > { %v10577_v57 = vadd.f32 %v7039_v10, %v4986_v1  ;;  %v4989_v59 = vadd.f32 %v4988_v4, %v4932_v19  ;;  %v7716_v58 = vpop.f32.mrb[123].mxu1  ;;  %v8140_v4 = vld [vmem:[#allocation23 + $0x40] sm:$0xff]  }
0x13f8   : > { %v5132_v58 = vld [vmem:[#allocation20 + $0x9] sm:$0x1] }
0x13f9   : > { %v5161_v49 = vmul.f32 %v10577_v57, %v9601_v24  ;;  %v10581_v5 = vadd.f32 %v7039_v10, %v4989_v59  ;;  %v5308_v20 = vmax.f32 %v10577_v57, 0.0  ;;  %v5125_v59 = vld [vmem:[#allocation20 + $0x8] sm:$0x1] }
0x13fb   : > { %v5162_v42 = vmul.f32 %v10581_v5, %v9605_v38  ;;  %v5163_v12 = vsel %vm2021_vm8, %v5161_v49, 0.0  ;;  %v5309_v8 = vmax.f32 %v10581_v5, 0.0 }
0x13fd   : > { %v5164_v61 = vsel %vm2021_vm8, %v5162_v42, 0.0  ;;  %v5310_v33 = vpack.c.bf16 %v5309_v8, %v5308_v20 }
0x13fe   : > { %v5165_v56 = vadd.f32 %v5164_v61, %v5163_v12 }
0x1400   : > { %v5166_v48 = vrot.slane %v5165_v56, 4 }
0x1402   : > { %v5167_v16 = vadd.f32 %v5166_v48, %v5165_v56 }
0x1404   : > { %v5168_v63 = vrot.slane %v5167_v16, 2 }
0x1406   : > { %v5169_v23 = vadd.f32 %v5168_v63, %v5167_v16  ;;  %v7059_v63 = vld [vmem:[#allocation14 + $0x7] ss:$0 sm:$0xff] }
0x1408   : > { %v5170_v14 = vrot.slane %v5169_v23, 1 }
0x140a   : > { %v5171_v50 = vadd.f32 %v5170_v14, %v5169_v23 }
0x140c   : > { %v5172_v26 = vmul.f32 %v9934_v30, %v5171_v50 }
0x140e   : > { %v5182_v6 = vmax.f32 %v5172_v26, 0.0 }
0x1410   : > { %v5183_v31 = vpack.c.bf16 %v5182_v6, %v5182_v6 }
0x1412   : > { %7746 = vmatmul.mubr.msk.bf16.vlgmr.msra.gmra.mrb[128].mxu1 %vm2021_vm8, %v5183_v31 }
0x1413   : > { %7758 = vmatpush3.bf16.msra.mxu1 %v8140_v4  ;;  %7761 = vmatprep.mubr.msk.bf16.mxu1 %vm8926_vm0, %v8925_v0 }
0x1414   : > { %7759 = vmatprep.subr.bf16.mxu1 %v8925_v0 }
0x1416   : > { %v5051_v32 = vpop.f32.mrb[124].mxu1 }
0x1417   : > { %v5107_v30 = vadd.f32 %v10553_v34, %v5051_v32  ;;  %v7731_v27 = vpop.f32.mrb[125].mxu1  ;;  %7760 = vmatpush3.bf16.msra.mxu1 %v8141_v60 }
0x1418   : > { %v5054_v29 = vpop.f32.mrb[126].mxu1  ;;  %7773 = vmatprep.subr.bf16.mxu1 %v8925_v0 }
0x1419   : > { %v10596_v9 = vadd.f32 %v7046_v7, %v5107_v30  ;;  %v7732_v47 = vpop.f32.mrb[127].mxu1 }
0x141a   : > { %7762 = vmatmul.mubr.msk.bf16.vlgmr.msra.gmra.mrb[132].mxu1 %vm2021_vm8, %v5310_v33 }
0x141b   : > { %v5173_v43 = vmul.f32 %v10596_v9, %v9603_v28  ;;  %7775 = vmatprep.mubr.msk.bf16.mxu1 %vm8926_vm0, %v8925_v0  ;;  %v5375_v13 = vmax.f32 %v10596_v9, 0.0 }
0x141d   : > { %v5174_v54 = vsel %vm2021_vm8, %v5173_v43, 0.0  ;;  %v5376_v55 = vpack.c.bf16 %v5375_v13, %v5375_v13 }
0x141e   : > { %v5175_v34 = vrot.slane %v5174_v54, 4 }
0x1420   : > { %v5176_v17 = vadd.f32 %v5175_v34, %v5174_v54 }
0x1422   : > { %v5177_v41 = vrot.slane %v5176_v17, 2 }
0x1424   : > { %v5178_v53 = vadd.f32 %v5177_v41, %v5176_v17 }
0x1426   : > { %v5179_v40 = vrot.slane %v5178_v53, 1 }
0x1428   : > { %v5180_v25 = vadd.f32 %v5179_v40, %v5178_v53 }
0x142a   : > { %v5181_v62 = vmul.f32 %v9947_v51, %v5180_v25 }
0x142c   : > { %v5245_v36 = vmax.f32 %v5181_v62, 0.0 }
0x142e   : > { %v5246_v39 = vpack.c.bf16 %v5245_v36, %v5245_v36 }
0x1430   : > { %7754 = vmatmul.mubr.msk.bf16.vlgmr.msra.gmra.mrb[136].mxu0 %vm2021_vm8, %v5246_v39 }
0x1431   : > { %7766 = vmatpush3.bf16.msra.mxu0 %v8144_v35  ;;  %7769 = vmatprep.mubr.msk.bf16.mxu0 %vm8926_vm0, %v8925_v0 }
0x1432   : > { %7767 = vmatprep.subr.bf16.mxu0 %v8925_v0 }
0x1435   : > { %7768 = vmatpush3.bf16.msra.mxu0 %v8145_v46 }
0x1436   : > { %7779 = vmatprep.subr.bf16.mxu0 %v8925_v0 }
0x1438   : > { %7770 = vmatmul.mubr.msk.bf16.vlgmr.msra.gmra.mrb[140].mxu0 %vm2021_vm8, %v5376_v55 }
0x1439   : > { %7781 = vmatprep.mubr.msk.bf16.mxu0 %vm8926_vm0, %v8925_v0 }
0x14e5   : > { %v5233_v51 = vpop.f32.mrb[128].mxu1 }
0x14e6   : > { %v7747_v22 = vpop.f32.mrb[129].mxu1  ;;  %v5234_v49 = vadd.f32 %v5233_v51, %v5125_v59 }
0x14e7   : > { %v5236_v21 = vpop.f32.mrb[130].mxu1 }
0x14e8   : > { %v7748_v37 = vpop.f32.mrb[131].mxu1  ;;  %v7050_v48 = vmul.f32 -1.442695, %v5234_v49  ;;  %v8367_v49 = vld [vmem:[%s9529_s16] ss:$0 sm:$0xff]  ;;  %s808_s16 = scalar_lea.vmem [#allocation25], %s9505_s1 }
0x14ed   : > { %v5366_v44 = vpop.f32.mrb[132].mxu1 }
0x14ee   : > { %v5367_v3 = vadd.f32 %v7055_v52, %v5366_v44  ;;  %v7763_v2 = vpop.f32.mrb[133].mxu1 }
0x14ef   : > { %v5369_v15 = vpop.f32.mrb[134].mxu1 }
0x14f0   : > { %v5373_v10 = vmul.f32 %v5367_v3, %v9601_v24  ;;  %v5370_v11 = vadd.f32 %v7055_v52, %v5369_v15  ;;  %v7764_v1 = vpop.f32.mrb[135].mxu1 }
0x14f2   : > { %v5374_v18 = vmul.f32 %v5370_v11, %v9605_v38  ;;  %5446 = vrot.lane.b32.xlu1 %v5373_v10, %s8929_s26 }
0x14f4   : > { %v10617_v19 = vpack.c.bf16 %v5374_v18, %v5373_v10  ;;  %5448 = vrot.lane.b32.xlu0 %v5374_v18, %s8929_s26 }
0x1503   : > { %v5296_v42 = vpop.f32.mrb[136].mxu0 }
0x1504   : > { %v5297_v12 = vadd.f32 %v5296_v42, %v5132_v58  ;;  %v7755_v61 = vpop.f32.mrb[137].mxu0 }
0x1505   : > { %v5299_v56 = vpop.f32.mrb[138].mxu0 }
0x1506   : > { %v7054_v16 = vmul.f32 -1.442695, %v5297_v12  ;;  %v7756_v24 = vpop.f32.mrb[139].mxu0 }
0x1508   : > { %8306 = vpow2.f32 %v7054_v16 }
0x1509   : > { %8308 = vpow2.f32 %v7050_v48 }
0x150b   : > { %v5432_v38 = vpop.f32.mrb[140].mxu0 }
0x150c   : > { %v5433_v23 = vadd.f32 %v7059_v63, %v5432_v38  ;;  %v7771_v14 = vpop.f32.mrb[141].mxu0 }
0x150d   : > { %v5435_v50 = vpop.f32.mrb[142].mxu0 }
0x150e   : > { %v10621_v26 = vmul.f32 %v5433_v23, %v9603_v28  ;;  %v7772_v6 = vpop.f32.mrb[143].mxu0 }
0x1510   : > { %5462 = vrot.lane.b32.xlu1 %v10621_v26, %s8929_s26 }
0x1512   : > { %v8307_v4 = vpop.eup %8306 }
0x1513   : > { %v5305_v31 = vadd.f32 1.0, %v8307_v4  ;;  %v8309_v60 = vpop.eup %8308 }
0x1514   : > { %v5242_v8 = vadd.f32 1.0, %v8309_v60 }
0x1515   : > { %8310 = vrcp.f32 %v5305_v31 }
0x1516   : > { %8312 = vrcp.f32 %v5242_v8 }
0x151f   : > { %v8311_v20 = vpop.eup %8310 }
0x1520   : > { %v5439_v7 = vadd.f32 1.0, %v8311_v20  ;;  %v8313_v33 = vpop.eup %8312 }
0x1521   : > { %v5456_v28 = vadd.f32 1.0, %v8313_v33 }
0x1522   : > { %v5443_v32 = vrot.slane %v5439_v7, %v9974_v45 }
0x1523   : > { %v5460_v43 = vrot.slane %v5456_v28, %v9974_v45 }
0x1524   : > { %v5454_v30 = vmul.f32 %v5443_v32, %v5373_v10  ;;  %v5455_v27 = vmul.f32 %v5443_v32, %v5374_v18 }
0x1525   : > { %v5466_v54 = vmul.f32 %v5460_v43, %v10621_v26 }
0x1526   : > { %v5468_v29 = vpack.c.bf16 %v5455_v27, %v5454_v30 }
0x1527   : > { %v5984_v34 = vpack.c.bf16 %v5466_v54, %v5466_v54 }
0x1528   : > { %5592 = vrot.lane.b32.xlu0 %v5468_v29, %s8928_s2  ;;  %v5474_v47 = vsel %vm1034_vm5, %v5468_v29, 0 }
0x1529   : > { %7774 = vmatpush3.bf16.xpose.msra.mxu1 %v5474_v47  ;;  %v5990_v52 = vsel %vm1034_vm5, %v5984_v34, 0 }
0x152a   : > { %7785 = vmatprep.subr.bf16.mxu1 %v8925_v0 }
0x152c   : > { %5713 = vrot.lane.b32.xlu0 %v5468_v29, %s8930_s25 }
0x1530   : > { %5834 = vrot.lane.b32.xlu0 %v5468_v29, %s8932_s28 }
0x1534   : > { %6097 = vrot.lane.b32.xlu0 %v5984_v34, %s8928_s2 }
0x1538   : > { %6207 = vrot.lane.b32.xlu0 %v5984_v34, %s8930_s25 }
0x153c   : > { %6317 = vrot.lane.b32.xlu0 %v5984_v34, %s8932_s28 }
0x1564   : > { %v5447_v17 = vpop.permute.xlu1 %5446 }
0x1565   : > { %v5452_v53 = vmul.f32 %v5447_v17, %v5443_v32 }
0x1566   : > { %v5449_v41 = vpop.permute.xlu0 %5448 }
0x1567   : > { %v5453_v40 = vmul.f32 %v5449_v41, %v5443_v32 }
0x1569   : > { %v5467_v25 = vpack.c.bf16 %v5453_v40, %v5452_v53  ;;  %v8368_v40 = vld [vmem:[%s9532_s4] ss:$0 sm:$0xff]  ;;  %s6590_s4 = sshll.u32 %s808_s16, 4  ;;  %s10875_s4 = int_to_ptr.vmem [resolvable:$true] %s6590_s4 }
0x156b   : > { %7776 = vmatmul.mubr.msk.bf16.vlgmr.msra.gmra.mrb[136].mxu1 %vm1034_vm5, %v5467_v25  ;;  %5589 = vrot.lane.b32.xlu1 %v5467_v25, %s8928_s2 }
0x156c   : > { %7787 = vmatprep.mubr.msk.bf16.mxu1 %vm8926_vm0, %v8925_v0 }
0x156f   : > { %5711 = vrot.lane.b32.xlu1 %v5467_v25, %s8930_s25 }
0x1573   : > { %5832 = vrot.lane.b32.xlu1 %v5467_v25, %s8932_s28 }
0x1582   : > { %v5463_v45 = vpop.permute.xlu1 %5462 }
0x1583   : > { %v5465_v62 = vmul.f32 %v5463_v45, %v5460_v43 }
0x1585   : > { %v5983_v36 = vpack.c.bf16 %v5465_v62, %v5465_v62 }
0x1587   : > { %6094 = vrot.lane.b32.xlu1 %v5983_v36, %s8928_s2  ;;  %s7096_s2 = sshll.u32 %s9046_s24, 8 }
0x158b   : > { %6205 = vrot.lane.b32.xlu1 %v5983_v36, %s8930_s25 }
0x158f   : > { %6315 = vrot.lane.b32.xlu1 %v5983_v36, %s8932_s28  ;;  %s11086_s28 = sld [smem:[#allocation54_spill]] }
0x1595   : > { %s10881_s1 = scalar_lea.hbm %s11086_s28, %s7096_s2 }
0x159a   : > { %v5593_v35 = vpop.permute.xlu0 %5592 }
0x159b   : > { %v5598_v39 = vsel %vm1034_vm5, %v5593_v35, 0 }
0x159c   : > { %7786 = vmatpush3.bf16.xpose.msra.mxu1 %v5598_v39 }
0x159d   : > { %7797 = vmatprep.subr.bf16.mxu1 %v8925_v0 }
0x159e   : > { %v5714_v46 = vpop.permute.xlu0 %5713 }
0x159f   : > { %v5719_v55 = vsel %vm1034_vm5, %v5714_v46, 0 }
0x15a2   : > { %v5835_v51 = vpop.permute.xlu0 %5834 }
0x15a3   : > { %v5840_v21 = vsel %vm1034_vm5, %v5835_v51, 0 }
0x15a6   : > { %v6098_v44 = vpop.permute.xlu0 %6097 }
0x15a7   : > { %v6103_v3 = vsel %vm1034_vm5, %v6098_v44, 0 }
0x15aa   : > { %v6208_v2 = vpop.permute.xlu0 %6207 }
0x15ab   : > { %v6213_v10 = vsel %vm1034_vm5, %v6208_v2, 0 }
0x15ae   : > { %v6318_v11 = vpop.permute.xlu0 %6317 }
0x15af   : > { %v6323_v18 = vsel %vm1034_vm5, %v6318_v11, 0 }
0x15dd   : > { %v5590_v13 = vpop.permute.xlu1 %5589 }
0x15de   : > { %7788 = vmatmul.mubr.msk.bf16.vlgmr.msra.gmra.mrb[140].mxu1 %vm1034_vm5, %v5590_v13 }
0x15df   : > { %7798 = vmatpush3.bf16.xpose.msra.mxu1 %v5719_v55  ;;  %7799 = vmatprep.mubr.msk.bf16.mxu1 %vm8926_vm0, %v8925_v0 }
0x15e0   : > { %7809 = vmatprep.subr.bf16.mxu1 %v8925_v0 }
0x15e1   : > { %v5712_v22 = vpop.permute.xlu1 %5711 }
0x15e5   : > { %v5833_v37 = vpop.permute.xlu1 %5832 }
0x15e6   : > { %7800 = vmatmul.mubr.msk.bf16.vlgmr.msra.gmra.mrb[144].mxu1 %vm1034_vm5, %v5712_v22 }
0x15e7   : > { %7810 = vmatpush3.bf16.xpose.msra.mxu1 %v5840_v21  ;;  %7811 = vmatprep.mubr.msk.bf16.mxu1 %vm8926_vm0, %v8925_v0 }
0x15e8   : > { %7821 = vmatprep.subr.bf16.mxu1 %v8925_v0 }
0x15ee   : > { %7812 = vmatmul.mubr.msk.bf16.vlgmr.msra.gmra.mrb[148].mxu1 %vm1034_vm5, %v5833_v37 }
0x15ef   : > { %7822 = vmatpush3.bf16.xpose.msra.mxu1 %v5990_v52  ;;  %7823 = vmatprep.mubr.msk.bf16.mxu1 %vm8926_vm0, %v8925_v0 }
0x15f0   : > { %7833 = vmatprep.subr.bf16.mxu1 %v8925_v0 }
0x15f6   : > { %7824 = vmatmul.mubr.msk.bf16.vlgmr.msra.gmra.mrb[152].mxu1 %vm1034_vm5, %v5983_v36 }
0x15f7   : > { %7834 = vmatpush3.bf16.xpose.msra.mxu1 %v6103_v3  ;;  %7835 = vmatprep.mubr.msk.bf16.mxu1 %vm8926_vm0, %v8925_v0 }
0x15f8   : > { %7845 = vmatprep.subr.bf16.mxu1 %v8925_v0 }
0x15f9   : > { %v6095_v15 = vpop.permute.xlu1 %6094 }
0x15fd   : > { %v6206_v1 = vpop.permute.xlu1 %6205 }
0x15fe   : > { %7836 = vmatmul.mubr.msk.bf16.vlgmr.msra.gmra.mrb[156].mxu1 %vm1034_vm5, %v6095_v15 }
0x15ff   : > { %7846 = vmatpush3.bf16.xpose.msra.mxu1 %v6213_v10  ;;  %7847 = vmatprep.mubr.msk.bf16.mxu1 %vm8926_vm0, %v8925_v0 }
0x1600   : > { %7857 = vmatprep.subr.bf16.mxu1 %v8925_v0 }
0x1601   : > { %v6316_v59 = vpop.permute.xlu1 %6315 }
0x1606   : > { %7848 = vmatmul.mubr.msk.bf16.vlgmr.msra.gmra.mrb[160].mxu1 %vm1034_vm5, %v6206_v1 }
0x1607   : > { %7858 = vmatpush3.bf16.xpose.msra.mxu1 %v6323_v18  ;;  %7859 = vmatprep.mubr.msk.bf16.mxu1 %vm8926_vm0, %v8925_v0 }
0x1608   : > { %7869 = vmatprep.subr.bf16.mxu1 %v8925_v0 }
0x160e   : > { %7860 = vmatmul.mubr.msk.bf16.vlgmr.msra.gmra.mrb[164].mxu1 %vm1034_vm5, %v6316_v59 }
0x160f   : > { %7873 = vmatprep.mubr.msk.bf16.mxu1 %vm8926_vm0, %v8925_v0 }
0x163e   : > { %v5510_v58 = vpop.f32.mrb[136].mxu1 }
0x163f   : > { %v10681_v42 = vadd.f32 %v8367_v49, %v5510_v58  ;;  %v7777_v12 = vpop.f32.mrb[137].mxu1 }
0x1640   : > { %v5513_v61 = vpop.f32.mrb[138].mxu1 }
0x1641   : > { %v5514_v56 = vadd.f32 %v8367_v49, %v5513_v61  ;;  %v7778_v48 = vpop.f32.mrb[139].mxu1  ;;  %v5517_v16 = vsel %vm1550_vm6, %v10681_v42, -inf }
0x1642   : > { %5518 = vmax.xlane.f32.xlu0 %v5517_v16 }
0x1643   : > { %v5520_v24 = vsel %vm1550_vm6, %v5514_v56, -inf }
0x1644   : > { %5521 = vmax.xlane.f32.xlu1 %v5520_v24 }
0x16b1   : > { %v5634_v63 = vpop.f32.mrb[140].mxu1 }
0x16b2   : > { %v10686_v38 = vadd.f32 %v8367_v49, %v5634_v63  ;;  %v7789_v23 = vpop.f32.mrb[141].mxu1 }
0x16b3   : > { %v5637_v14 = vpop.f32.mrb[142].mxu1 }
0x16b4   : > { %v10688_v50 = vadd.f32 %v8367_v49, %v5637_v14  ;;  %v7790_v6 = vpop.f32.mrb[143].mxu1  ;;  %v5641_v4 = vsel %vm1550_vm6, %v10686_v38, -inf }
0x16b5   : > { %5642 = vmax.xlane.f32.xlu0 %v5641_v4 }
0x16b6   : > { %v5644_v31 = vsel %vm1550_vm6, %v10688_v50, -inf }
0x16b9   : > { %v5755_v60 = vpop.f32.mrb[144].mxu1  ;;  %5645 = vmax.xlane.f32.xlu0 %v5644_v31 }
0x16ba   : > { %v10694_v8 = vadd.f32 %v8367_v49, %v5755_v60  ;;  %v7801_v20 = vpop.f32.mrb[145].mxu1 }
0x16bb   : > { %v5758_v7 = vpop.f32.mrb[146].mxu1 }
0x16bc   : > { %v10696_v32 = vadd.f32 %v8367_v49, %v5758_v7  ;;  %v7802_v30 = vpop.f32.mrb[147].mxu1  ;;  %v5762_v27 = vsel %vm1550_vm6, %v10694_v8, -inf }
0x16bd   : > { %5763 = vmax.xlane.f32.xlu1 %v5762_v27 }
0x16be   : > { %v5765_v33 = vsel %vm1550_vm6, %v10696_v32, -inf }
0x16bf   : > { %5766 = vmax.xlane.f32.xlu0 %v5765_v33 }
0x16c1   : > { %v5876_v29 = vpop.f32.mrb[148].mxu1 }
0x16c2   : > { %v10702_v28 = vadd.f32 %v8367_v49, %v5876_v29  ;;  %v7813_v47 = vpop.f32.mrb[149].mxu1 }
0x16c3   : > { %v5879_v43 = vpop.f32.mrb[150].mxu1 }
0x16c4   : > { %v10704_v54 = vadd.f32 %v8367_v49, %v5879_v43  ;;  %v7814_v34 = vpop.f32.mrb[151].mxu1  ;;  %v5883_v17 = vsel %vm1550_vm6, %v10702_v28, -inf }
0x16c5   : > { %5884 = vmax.xlane.f32.xlu1 %v5883_v17 }
0x16c6   : > { %v5886_v41 = vsel %vm1550_vm6, %v10704_v54, -inf }
0x16c7   : > { %5887 = vmax.xlane.f32.xlu0 %v5886_v41 }
0x16c9   : > { %v6026_v53 = vpop.f32.mrb[152].mxu1 }
0x16ca   : > { %v10711_v25 = vadd.f32 %v8368_v40, %v6026_v53  ;;  %v7825_v45 = vpop.f32.mrb[153].mxu1 }
0x16cb   : > { %v6029_v62 = vpop.f32.mrb[154].mxu1 }
0x16cc   : > { %v7826_v36 = vpop.f32.mrb[155].mxu1  ;;  %v6032_v35 = vsel %vm1034_vm5, %v10711_v25, -inf }
0x16cd   : > { %6033 = vmax.xlane.f32.xlu1 %v6032_v35 }
0x16cf   : > { %v5519_v11 = vpop.xlane.xlu0 %5518 }
0x16d0   : > { %v5523_v18 = vsub.f32 %v10681_v42, %v5519_v11 }
0x16d1   : > { %v6139_v39 = vpop.f32.mrb[156].mxu1  ;;  %v5522_v15 = vpop.xlane.xlu1 %5521 }
0x16d2   : > { %v7837_v46 = vpop.f32.mrb[157].mxu1  ;;  %v5524_v10 = vsub.f32 %v5514_v56, %v5522_v15  ;;  %v5525_v59 = vmul.f32 1.442695, %v5523_v18  ;;  %v10720_v58 = vadd.f32 %v8368_v40, %v6139_v39 }
0x16d3   : > { %v6142_v13 = vpop.f32.mrb[158].mxu1 }
0x16d4   : > { %v7838_v55 = vpop.f32.mrb[159].mxu1  ;;  %v5527_v1 = vmul.f32 1.442695, %v5524_v10  ;;  %v6145_v49 = vsel %vm1034_vm5, %v10720_v58, -inf }
0x16d6   : > { %8314 = vpow2.f32 %v5527_v1 }
0x16d7   : > { %8316 = vpow2.f32 %v5525_v59 }
0x16d9   : > { %v6249_v51 = vpop.f32.mrb[160].mxu1 }
0x16da   : > { %v7849_v22 = vpop.f32.mrb[161].mxu1  ;;  %v10726_v61 = vadd.f32 %v8368_v40, %v6249_v51 }
0x16db   : > { %v6252_v21 = vpop.f32.mrb[162].mxu1 }
0x16dc   : > { %v7850_v37 = vpop.f32.mrb[163].mxu1  ;;  %v6255_v42 = vsel %vm1034_vm5, %v10726_v61, -inf }
0x16dd   : > { %5664 = vrot.lane.b32.xlu0 %v10617_v19, %s8935_s22 }
0x16de   : > { %5541 = vrot.lane.b32.xlu1 %v10617_v19, %s8936_s27 }
0x16e0   : > { %v10724_v12 = vpop.eup %8314 }
0x16e1   : > { %v6359_v52 = vpop.f32.mrb[164].mxu1  ;;  %v5532_v56 = vsel %vm1550_vm6, %v10724_v12, 0.0  ;;  %v10734_v16 = vpop.eup %8316 }
0x16e2   : > { %v7861_v44 = vpop.f32.mrb[165].mxu1  ;;  %v10728_v48 = vadd.f32 %v8368_v40, %v6359_v52  ;;  %v5529_v63 = vsel %vm1550_vm6, %v10734_v16, 0.0 }
0x16e3   : > { %v6362_v3 = vpop.f32.mrb[166].mxu1 }
0x16e4   : > { %v7862_v2 = vpop.f32.mrb[167].mxu1  ;;  %v6365_v24 = vsel %vm1034_vm5, %v10728_v48, -inf }
0x16fc   : > { %6146 = vmax.xlane.f32.xlu0 %v6145_v49 }
0x1700   : > { %5533 = vadd.xlane.f32.xlu0 %v5532_v56 }
0x1702   : > { %6256 = vmax.xlane.f32.xlu1 %v6255_v42 }
0x1704   : > { %6366 = vmax.xlane.f32.xlu0 %v6365_v24 }
0x1706   : > { %5530 = vadd.xlane.f32.xlu1 %v5529_v63 }
0x171a   : > { %5785 = vrot.lane.b32.xlu0 %v10617_v19, %s8937_s0 }
0x1742   : > { %v5643_v23 = vpop.xlane.xlu0 %5642 }
0x1743   : > { %v5647_v14 = vsub.f32 %v10686_v38, %v5643_v23 }
0x1745   : > { %v5649_v6 = vmul.f32 1.442695, %v5647_v14 }
0x1746   : > { %v5646_v4 = vpop.xlane.xlu0 %5645 }
0x1747   : > { %8318 = vpow2.f32 %v5649_v6  ;;  %v5648_v31 = vsub.f32 %v10688_v50, %v5646_v4  ;;  %v5985_v6 = vpack.c.bf16 %v10621_v26, %v10621_v26 }
0x1749   : > { %v5651_v60 = vmul.f32 1.442695, %v5648_v31 }
0x174a   : > { %v5764_v20 = vpop.xlane.xlu1 %5763 }
0x174b   : > { %8320 = vpow2.f32 %v5651_v60  ;;  %v5768_v7 = vsub.f32 %v10694_v8, %v5764_v20 }
0x174c   : > { %v5767_v30 = vpop.xlane.xlu0 %5766 }
0x174d   : > { %v5770_v27 = vmul.f32 1.442695, %v5768_v7  ;;  %v5769_v33 = vsub.f32 %v10696_v32, %v5767_v30 }
0x174f   : > { %8322 = vpow2.f32 %v5770_v27  ;;  %v5772_v29 = vmul.f32 1.442695, %v5769_v33 }
0x1751   : > { %v10746_v47 = vpop.eup %8318  ;;  %8324 = vpow2.f32 %v5772_v29 }
0x1752   : > { %v5885_v38 = vpop.xlane.xlu1 %5884  ;;  %v5653_v43 = vsel %vm1550_vm6, %v10746_v47, 0.0 }
0x1753   : > { %v5889_v50 = vsub.f32 %v10702_v28, %v5885_v38  ;;  %5654 = vadd.xlane.f32.xlu1 %v5653_v43 }
0x1754   : > { %v5888_v34 = vpop.xlane.xlu0 %5887 }
0x1755   : > { %v10751_v17 = vpop.eup %8320  ;;  %v5891_v8 = vmul.f32 1.442695, %v5889_v50  ;;  %v5890_v41 = vsub.f32 %v10704_v54, %v5888_v34 }
0x1756   : > { %v5656_v32 = vsel %vm1550_vm6, %v10751_v17, 0.0 }
0x1757   : > { %8326 = vpow2.f32 %v5891_v8  ;;  %v5893_v53 = vmul.f32 1.442695, %v5890_v41  ;;  %5657 = vadd.xlane.f32.xlu0 %v5656_v32 }
0x1758   : > { %v5665_v21 = vpop.permute.xlu0 %5664 }
0x1759   : > { %v10756_v40 = vpop.eup %8322  ;;  %8328 = vpow2.f32 %v5893_v53 }
0x175a   : > { %v6034_v45 = vpop.xlane.xlu1 %6033  ;;  %v5774_v28 = vsel %vm1550_vm6, %v10756_v40, 0.0 }
0x175b   : > { %v10760_v62 = vpop.eup %8324  ;;  %v6035_v36 = vsub.f32 %v10711_v25, %v6034_v45  ;;  %5775 = vadd.xlane.f32.xlu1 %v5774_v28 }
0x175c   : > { %v5777_v54 = vsel %vm1550_vm6, %v10760_v62, 0.0 }
0x175d   : > { %v6036_v35 = vmul.f32 1.442695, %v6035_v36  ;;  %5778 = vadd.xlane.f32.xlu0 %v5777_v54 }
0x175e   : > { %v5542_v39 = vpop.permute.xlu1 %5541 }
0x175f   : > { %8330 = vpow2.f32 %v6036_v35  ;;  %7780 = vmatpush3.bf16.msra.mxu0 %v5542_v39 }
0x1760   : > { %7791 = vmatprep.subr.bf16.mxu0 %v8925_v0 }
0x1761   : > { %v10766_v46 = vpop.eup %8326 }
0x1762   : > { %v5895_v13 = vsel %vm1550_vm6, %v10766_v46, 0.0 }
0x1763   : > { %v10770_v55 = vpop.eup %8328  ;;  %5896 = vadd.xlane.f32.xlu1 %v5895_v13 }
0x1764   : > { %v5898_v25 = vsel %vm1550_vm6, %v10770_v55, 0.0 }
0x1765   : > { %5899 = vadd.xlane.f32.xlu0 %v5898_v25 }
0x1769   : > { %v10774_v51 = vpop.eup %8330 }
0x176a   : > { %v6038_v22 = vsel %vm1034_vm5, %v10774_v51, 0.0 }
0x176b   : > { %6039 = vadd.xlane.f32.xlu0 %v6038_v22 }
0x1774   : > { %5906 = vrot.lane.b32.xlu1 %v10617_v19, %s8938_s17 }
0x1789   : > { %v6147_v37 = vpop.xlane.xlu0 %6146 }
0x178a   : > { %v6148_v52 = vsub.f32 %v10720_v58, %v6147_v37 }
0x178c   : > { %v6149_v44 = vmul.f32 1.442695, %v6148_v52 }
0x178d   : > { %v5534_v3 = vpop.xlane.xlu0 %5533 }
0x178e   : > { %8332 = vpow2.f32 %v6149_v44 }
0x178f   : > { %v6257_v2 = vpop.xlane.xlu1 %6256  ;;  %8334 = vrcp.f32 %v5534_v3 }
0x1790   : > { %v6258_v15 = vsub.f32 %v10726_v61, %v6257_v2 }
0x1791   : > { %v6367_v10 = vpop.xlane.xlu0 %6366 }
0x1792   : > { %v6259_v11 = vmul.f32 1.442695, %v6258_v15  ;;  %v6368_v1 = vsub.f32 %v10728_v48, %v6367_v10 }
0x1793   : > { %v5531_v18 = vpop.xlane.xlu1 %5530 }
0x1794   : > { %8336 = vpow2.f32 %v6259_v11  ;;  %v6369_v59 = vmul.f32 1.442695, %v6368_v1 }
0x1795   : > { %8338 = vrcp.f32 %v5531_v18 }
0x1796   : > { %8340 = vpow2.f32 %v6369_v59 }
0x1798   : > { %v10783_v19 = vpop.eup %8332 }
0x1799   : > { %v6151_v58 = vsel %vm1034_vm5, %v10783_v19, 0.0  ;;  %v8335_v49 = vpop.eup %8334 }
0x179a   : > { %6152 = vadd.xlane.f32.xlu1 %v6151_v58  ;;  %v5538_v24 = vmul.f32 %v8335_v49, %v10724_v12  ;;  %v5786_v12 = vpop.permute.xlu0 %5785 }
0x179e   : > { %v10787_v56 = vpop.eup %8336 }
0x179f   : > { %v8339_v61 = vpop.eup %8338  ;;  %v6261_v42 = vsel %vm1034_vm5, %v10787_v56, 0.0 }
0x17a0   : > { %v10791_v48 = vpop.eup %8340  ;;  %v5537_v63 = vmul.f32 %v8339_v61, %v10734_v16  ;;  %6262 = vadd.xlane.f32.xlu0 %v6261_v42 }
0x17a1   : > { %v6371_v14 = vsel %vm1034_vm5, %v10791_v48, 0.0 }
0x17a2   : > { %v5539_v23 = vpack.c.bf16 %v5538_v24, %v5537_v63  ;;  %v8146_v63 = vld [vmem:[#allocation19 + $0xc0] sm:$0xff]  }
0x17a3   : > { %7870 = vmatpush3.bf16.msra.mxu1 %v8146_v63 }
0x17a4   : > { %7782 = vmatmul.mubr.msk.bf16.vlgmr.msra.gmra.mrb[144].mxu0 %vm1550_vm6, %v5539_v23  ;;  %6372 = vadd.xlane.f32.xlu0 %v6371_v14  ;;  %v8147_v23 = vld [vmem:[#allocation19 + $0xc8] sm:$0xff]  }
0x17a5   : > { %7792 = vmatpush3.bf16.msra.mxu0 %v5665_v21  ;;  %7793 = vmatprep.mubr.msk.bf16.mxu0 %vm8926_vm0, %v8925_v0 }
0x17a6   : > { %7803 = vmatprep.subr.bf16.mxu0 %v8925_v0  ;;  %7871 = vmatprep.subr.bf16.mxu1 %v8925_v0 }
0x17a7   : > { %7872 = vmatpush3.bf16.msra.mxu1 %v8147_v23 }
0x17ab   : > { %6157 = vrot.lane.b32.xlu1 %v5985_v6, %s8935_s22  ;;  %s8773_s22 = scalar_lea.vmem %s10875_s4, 256 }
0x17ac   : > { %p8774_p10 = scmp.ne.s32.totalorder %s10875_s4, %s8773_s22 }
0x17ae   : > { %p8775_p2 = pnand %p8774_p10, %p11087_p11 }
0x17af   : > { %6267 = vrot.lane.b32.xlu1 %v5985_v6, %s8937_s0 }
0x17b0   : > { %p8776_p1 = pneg %p8775_p2 }
0x17b3   : > { %6377 = vrot.lane.b32.xlu1 %v5985_v6, %s8938_s17 }
0x17ba   : > { %6045 = vrot.lane.b32.xlu0 %v5985_v6, %s8936_s27  ;;  %s8942_s27 = smov [#allocation25]  }
0x17bb   : > { %s8777_s0 = sshll.u32 %s8942_s27, 4  ;;  %s8778_s0 = int_to_ptr.vmem [resolvable:$false] %s8777_s0 }
0x17bc   : > { %s8779_s17 = scalar_lea.vmem %s8778_s0, 512  ;;  %p8780_p8 = scmp.lt.s32.totalorder %s10875_s4, %s8778_s0 }
0x17bd   : > { %p8781_p7 = scmp.lt.s32.totalorder %s8779_s17, %s8773_s22 }
0x17bf   : > { %p8782_p9 = por %p8781_p7, %p8780_p8 }
0x17c1   : > { %p8783_p12 = pnand %p8782_p9, %p8776_p1 }
0x17e0   : > { %v5655_v16 = vpop.xlane.xlu1 %5654 }
0x17e1   : > { %8342 = vrcp.f32 %v5655_v16 }
0x17e4   : > { %v5658_v4 = vpop.xlane.xlu0 %5657 }
0x17e5   : > { %8344 = vrcp.f32 %v5658_v4 }
0x17e8   : > { %v5776_v31 = vpop.xlane.xlu1 %5775 }
0x17e9   : > { %8346 = vrcp.f32 %v5776_v31 }
0x17ea   : > { %v5779_v60 = vpop.xlane.xlu0 %5778 }
0x17eb   : > { %8348 = vrcp.f32 %v5779_v60  ;;  %v8343_v20 = vpop.eup %8342 }
0x17ec   : > { %v5661_v26 = vmul.f32 %v8343_v20, %v10746_v47 }
0x17ef   : > { %v8345_v7 = vpop.eup %8344 }
0x17f0   : > { %v5662_v30 = vmul.f32 %v8345_v7, %v10751_v17  ;;  %v5897_v27 = vpop.xlane.xlu1 %5896 }
0x17f1   : > { %8350 = vrcp.f32 %v5897_v27  ;;  %v8148_v27 = vld [vmem:[#allocation19 + $0xd0] sm:$0xff]  }
0x17f2   : > { %v5900_v33 = vpop.xlane.xlu0 %5899  ;;  %v5663_v29 = vpack.c.bf16 %v5662_v30, %v5661_v26 }
0x17f3   : > { %8352 = vrcp.f32 %v5900_v33  ;;  %v8347_v38 = vpop.eup %8346 }
0x17f4   : > { %7794 = vmatmul.mubr.msk.bf16.vlgmr.msra.gmra.mrb[148].mxu0 %vm1550_vm6, %v5663_v29  ;;  %v5782_v47 = vmul.f32 %v8347_v38, %v10756_v40  ;;  %v5907_v8 = vpop.permute.xlu1 %5906 }
0x17f5   : > { %v8349_v43 = vpop.eup %8348  ;;  %7804 = vmatpush3.bf16.msra.mxu0 %v5786_v12  ;;  %7805 = vmatprep.mubr.msk.bf16.mxu0 %vm8926_vm0, %v8925_v0 }
0x17f6   : > { %v5783_v50 = vmul.f32 %v8349_v43, %v10760_v62  ;;  %7815 = vmatprep.subr.bf16.mxu0 %v8925_v0 }
0x17f8   : > { %v5784_v34 = vpack.c.bf16 %v5783_v50, %v5782_v47  ;;  %v6040_v40 = vpop.xlane.xlu0 %6039  ;;  %v8149_v50 = vld [vmem:[#allocation19 + $0xd8] sm:$0xff]  }
0x17f9   : > { %8354 = vrcp.f32 %v6040_v40 }
0x17fb   : > { %v8351_v17 = vpop.eup %8350 }
0x17fc   : > { %7806 = vmatmul.mubr.msk.bf16.vlgmr.msra.gmra.mrb[152].mxu0 %vm1550_vm6, %v5784_v34  ;;  %v5903_v53 = vmul.f32 %v8351_v17, %v10766_v46 }
0x17fd   : > { %v8353_v41 = vpop.eup %8352  ;;  %7816 = vmatpush3.bf16.msra.mxu0 %v5907_v8  ;;  %7817 = vmatprep.mubr.msk.bf16.mxu0 %vm8926_vm0, %v8925_v0 }
0x17fe   : > { %v5904_v32 = vmul.f32 %v8353_v41, %v10770_v55  ;;  %7827 = vmatprep.subr.bf16.mxu0 %v8925_v0 }
0x1800   : > { %v5905_v45 = vpack.c.bf16 %v5904_v32, %v5903_v53 }
0x1803   : > { %v8355_v36 = vpop.eup %8354 }
0x1804   : > { %7818 = vmatmul.mubr.msk.bf16.vlgmr.msra.gmra.mrb[156].mxu0 %vm1550_vm6, %v5905_v45  ;;  %v6042_v35 = vmul.f32 %v8355_v36, %v10774_v51 }
0x1805   : > { %7829 = vmatprep.mubr.msk.bf16.mxu0 %vm8926_vm0, %v8925_v0 }
0x1806   : > { %v6043_v46 = vpack.c.bf16 %v6042_v35, %v6042_v35 }
0x1827   : > { %v6153_v28 = vpop.xlane.xlu1 %6152 }
0x1828   : > { %8356 = vrcp.f32 %v6153_v28 }
0x182b   : > { %v6158_v55 = vpop.permute.xlu1 %6157 }
0x182c   : > { %v6163_v22 = vsel %vm973_vm1, %v6158_v55, 0 }
0x182d   : > { %v6263_v62 = vpop.xlane.xlu0 %6262 }
0x182e   : > { %8358 = vrcp.f32 %v6263_v62 }
0x182f   : > { %v6268_v21 = vpop.permute.xlu1 %6267 }
0x1830   : > { %v6273_v44 = vsel %vm973_vm1, %v6268_v21, 0 }
0x1831   : > { %v6373_v54 = vpop.xlane.xlu0 %6372 }
0x1832   : > { %v8357_v25 = vpop.eup %8356  ;;  %8360 = vrcp.f32 %v6373_v54 }
0x1833   : > { %v6155_v51 = vmul.f32 %v8357_v25, %v10783_v19  ;;  %v6378_v2 = vpop.permute.xlu1 %6377 }
0x1834   : > { %v6383_v11 = vsel %vm973_vm1, %v6378_v2, 0 }
0x1835   : > { %v6046_v39 = vpop.permute.xlu0 %6045  ;;  %v6156_v37 = vpack.c.bf16 %v6155_v51, %v6155_v51 }
0x1836   : > { %v6051_v13 = vsel %vm973_vm1, %v6046_v39, 0 }
0x1837   : > { %7828 = vmatpush3.bf16.msra.mxu0 %v6051_v13 }
0x1838   : > { %7839 = vmatprep.subr.bf16.mxu0 %v8925_v0  ;;  %v8359_v52 = vpop.eup %8358 }
0x1839   : > { %v6265_v3 = vmul.f32 %v8359_v52, %v10787_v56 }
0x183a   : > { %7830 = vmatmul.mubr.msk.bf16.vlgmr.msra.gmra.mrb[160].mxu0 %vm1034_vm5, %v6043_v46 }
0x183b   : > { %7840 = vmatpush3.bf16.msra.mxu0 %v6163_v22  ;;  %7841 = vmatprep.mubr.msk.bf16.mxu0 %vm8926_vm0, %v8925_v0  ;;  %v6266_v15 = vpack.c.bf16 %v6265_v3, %v6265_v3 }
0x183c   : > { %7851 = vmatprep.subr.bf16.mxu0 %v8925_v0  ;;  %v8361_v10 = vpop.eup %8360 }
0x183d   : > { %v6375_v1 = vmul.f32 %v8361_v10, %v10791_v48 }
0x183f   : > { %v6376_v18 = vpack.c.bf16 %v6375_v1, %v6375_v1 }
0x1842   : > { %7842 = vmatmul.mubr.msk.bf16.vlgmr.msra.gmra.mrb[164].mxu0 %vm1034_vm5, %v6156_v37 }
0x1843   : > { %7852 = vmatpush3.bf16.msra.mxu0 %v6273_v44  ;;  %7853 = vmatprep.mubr.msk.bf16.mxu0 %vm8926_vm0, %v8925_v0 }
0x1844   : > { %7863 = vmatprep.subr.bf16.mxu0 %v8925_v0 }
0x184a   : > { %7854 = vmatmul.mubr.msk.bf16.vlgmr.msra.gmra.mrb[168].mxu0 %vm1034_vm5, %v6266_v15 }
0x184b   : > { %7864 = vmatpush3.bf16.msra.mxu0 %v6383_v11  ;;  %7865 = vmatprep.mubr.msk.bf16.mxu0 %vm8926_vm0, %v8925_v0 }
0x184c   : > { %7877 = vmatprep.subr.bf16.mxu0 %v8925_v0 }
0x1852   : > { %7866 = vmatmul.mubr.msk.bf16.vlgmr.msra.gmra.mrb[172].mxu0 %vm1034_vm5, %v6376_v18 }
0x1853   : > { %7881 = vmatprep.mubr.msk.bf16.mxu0 %vm8926_vm0, %v8925_v0  ;;  %7878 = vmatpush3.bf16.msra.mxu0 %v8148_v27 }
0x1854   : > { %7879 = vmatprep.subr.bf16.mxu0 %v8925_v0 }
0x1857   : > { %7880 = vmatpush3.bf16.msra.mxu0 %v8149_v50 }
0x1877   : > { %v5581_v59 = vpop.f32.mrb[144].mxu0 }
0x1878   : > { %v7783_v19 = vpop.f32.mrb[145].mxu0 }
0x1879   : > { %v5584_v58 = vpop.f32.mrb[146].mxu0 }
0x187a   : > { %v7784_v49 = vpop.f32.mrb[147].mxu0 }
0x18c7   : > { %v5704_v56 = vpop.f32.mrb[148].mxu0 }
0x18c8   : > { %5955 = vrot.lane.b32.xlu1 %v5704_v56, %s8939_s5  ;;  %v7795_v61 = vpop.f32.mrb[149].mxu0 }
0x18c9   : > { %v5707_v42 = vpop.f32.mrb[150].mxu0 }
0x18ca   : > { %v7796_v24 = vpop.f32.mrb[151].mxu0 }
0x18cc   : > { %5957 = vrot.lane.b32.xlu1 %v5707_v42, %s8939_s5 }
0x18cf   : > { %v5825_v48 = vpop.f32.mrb[152].mxu0 }
0x18d0   : > { %5963 = vrot.lane.b32.xlu0 %v5825_v48, %s8940_s15  ;;  %v7807_v14 = vpop.f32.mrb[153].mxu0 }
0x18d1   : > { %v5828_v6 = vpop.f32.mrb[154].mxu0 }
0x18d2   : > { %5965 = vrot.lane.b32.xlu1 %v5828_v6, %s8940_s15  ;;  %v7808_v12 = vpop.f32.mrb[155].mxu0 }
0x18d7   : > { %v5946_v16 = vpop.f32.mrb[156].mxu0 }
0x18d8   : > { %5971 = vrot.lane.b32.xlu0 %v5946_v16, %s11085_s14  ;;  %v7819_v4 = vpop.f32.mrb[157].mxu0 }
0x18d9   : > { %v5949_v31 = vpop.f32.mrb[158].mxu0 }
0x18da   : > { %5973 = vrot.lane.b32.xlu1 %v5949_v31, %s11085_s14  ;;  %v7820_v60 = vpop.f32.mrb[159].mxu0 }
0x190d   : > { %v6087_v20 = vpop.f32.mrb[160].mxu0 }
0x190e   : > { %v7831_v7 = vpop.f32.mrb[161].mxu0 }
0x190f   : > { %v6090_v26 = vpop.f32.mrb[162].mxu0 }
0x1910   : > { %v7832_v30 = vpop.f32.mrb[163].mxu0 }
0x1915   : > { %v6199_v33 = vpop.f32.mrb[164].mxu0 }
0x1916   : > { %6426 = vrot.lane.b32.xlu0 %v6199_v33, %s8939_s5  ;;  %v7843_v29 = vpop.f32.mrb[165].mxu0 }
0x1917   : > { %v6202_v38 = vpop.f32.mrb[166].mxu0 }
0x1918   : > { %v7844_v43 = vpop.f32.mrb[167].mxu0 }
0x191d   : > { %v6309_v47 = vpop.f32.mrb[168].mxu0 }
0x191e   : > { %6430 = vrot.lane.b32.xlu1 %v6309_v47, %s8940_s15  ;;  %v7855_v34 = vpop.f32.mrb[169].mxu0  ;;  %s6572_s15 = scalar_lea.sflag [#allocation4], %s9502_s23 }
0x191f   : > { %v6312_v17 = vpop.f32.mrb[170].mxu0 }
0x1920   : > { %v7856_v8 = vpop.f32.mrb[171].mxu0 }
0x1925   : > { %v6419_v41 = vpop.f32.mrb[172].mxu0 }
0x1926   : > { %6434 = vrot.lane.b32.xlu0 %v6419_v41, %s11085_s14  ;;  %v7867_v32 = vpop.f32.mrb[173].mxu0 }
0x1927   : > { %v6422_v53 = vpop.f32.mrb[174].mxu0 }
0x1928   : > { %v7868_v0 = vpop.f32.mrb[175].mxu0 }
0x193a   : > { %v5956_v45 = vpop.permute.xlu1 %5955 }
0x193b   : > { %v5977_v36 = vsel %vm1034_vm5, %v5581_v59, %v5956_v45 }
0x193e   : > { %v5958_v40 = vpop.permute.xlu1 %5957 }
0x193f   : > { %v5978_v39 = vsel %vm1034_vm5, %v5584_v58, %v5958_v40 }
0x1942   : > { %v5964_v28 = vpop.permute.xlu0 %5963 }
0x1943   : > { %v5979_v54 = vsel %vm1550_vm6, %v5977_v36, %v5964_v28 }
0x1944   : > { %v5966_v62 = vpop.permute.xlu1 %5965 }
0x1945   : > { %v5980_v55 = vsel %vm1550_vm6, %v5978_v39, %v5966_v62 }
0x194a   : > { %v5972_v35 = vpop.permute.xlu0 %5971 }
0x194b   : > { %v5981_v13 = vsel %vm1553_vm7, %v5979_v54, %v5972_v35 }
0x194c   : > { %v5974_v46 = vpop.permute.xlu1 %5973  ;;  %v6440_v22 = vadd.f32 %v5981_v13, %v10577_v57  ;;  %v7079_v57 = vld [vmem:[#allocation20 + $0xa] ss:$0 sm:$0xff] }
0x194d   : > { %v5982_v25 = vsel %vm1553_vm7, %v5980_v55, %v5974_v46 }
0x194e   : > { %v6441_v51 = vadd.f32 %v5982_v25, %v10581_v5 }
0x1950   : > { %v6442_v21 = vpack.c.bf16 %v6441_v51, %v6440_v22 }
0x1952   : > { %7874 = vmatmul.mubr.msk.bf16.vlgmr.msra.gmra.mrb[168].mxu1 %vm2021_vm8, %v6442_v21 }
0x1988   : > { %v6427_v37 = vpop.permute.xlu0 %6426 }
0x1989   : > { %v6437_v44 = vsel %vm1034_vm5, %v6087_v20, %v6427_v37 }
0x1990   : > { %v6431_v52 = vpop.permute.xlu1 %6430 }
0x1991   : > { %v6438_v3 = vsel %vm1550_vm6, %v6437_v44, %v6431_v52 }
0x1998   : > { %v6435_v2 = vpop.permute.xlu0 %6434 }
0x1999   : > { %v6439_v15 = vsel %vm1553_vm7, %v6438_v3, %v6435_v2 }
0x199a   : > { %v6505_v10 = vadd.f32 %v6439_v15, %v10596_v9 }
0x199c   : > { %v6506_v11 = vpack.c.bf16 %v6505_v10, %v6505_v10 }
0x199e   : > { %7882 = vmatmul.mubr.msk.bf16.vlgmr.msra.gmra.mrb[176].mxu0 %vm2021_vm8, %v6506_v11 }
0x1a25   : > { %v6498_v5 = vpop.f32.mrb[168].mxu1 }
0x1a26   : > { %v6499_v1 = vadd.f32 %v7079_v57, %v6498_v5  ;;  %v7875_v18 = vpop.f32.mrb[169].mxu1 }
0x1a27   : > { %v6501_v59 = vpop.f32.mrb[170].mxu1 }
0x1a28   : > { %6568 = vst.msk [vmem:[%s808_s16] sm:$0xff] %vm2021_vm8, %v6499_v1  ;;  %v6502_v9 = vadd.f32 %v7079_v57, %v6501_v59  ;;  %v7876_v19 = vpop.f32.mrb[171].mxu1 }
0x1a2a   : > { %6569 = vst.msk [vmem:[%s808_s16 + $0x8] sm:$0xff] %vm2021_vm8, %v6502_v9 }
0x1a2b   : > { %8786 = shalt.err (!%p8783_p12)
}
0x1a2c   : > { %s8787_s3 = scalar_lea.hbm %s10881_s1, 256  ;;  %s8791_s16 = scalar_lea.hbm %s11086_s28, 512 }
0x1a2d   : > { %p8788_p0 = scmp.ne.s32.totalorder %s10881_s1, %s8787_s3  ;;  %p8792_p4 = scmp.lt.u32.totalorder %s10881_s1, %s11086_s28 }
0x1a2e   : > { %p8793_p13 = scmp.lt.u32.totalorder %s8791_s16, %s8787_s3  ;;  %p8795_p10 = scmp.lt.u32.totalorder %s8787_s3, %s10881_s1 }
0x1a2f   : > { %p8789_p3 = pnand %p8788_p0, %p11087_p11 }
0x1a30   : > { %p8794_p6 = por %p8793_p13, %p8792_p4 }
0x1a31   : > { %p8790_p5 = pneg %p8789_p3 }
0x1a32   : > { %p8796_p2 = por %p8795_p10, %p8794_p6 }
0x1a34   : > { %p8797_p1 = pnand %p8796_p2, %p8790_p5 }
0x1a36   : > { %8800 = shalt.err (!%p8797_p1)
}
0x1a37   : > { %s8943_s25 = smov 128   ;;  %v7083_v58 = vld [vmem:[#allocation20 + $0xb] ss:$0 sm:$0xff]  ;;  %s7091_s22 = sshll.u32 %s9046_s24, 7 }
0x1a38   : > { %7929 = dma.vmem_to_hbm [thread:$0]  (%p11087_p11), %s10875_s4, 256, %s10881_s1, %s6572_s15, %s8943_s25, %s8943_s25, %s8939_s5  }
0x1a39   : > { %s815_s27 = scalar_lea.vmem [#allocation26], %s9515_s7  ;;  %s11088_s20 = sld [smem:[#allocation55_spill]] }
0x1a3a   : > { %s6606_s0 = sshll.u32 %s815_s27, 4  ;;  %s6577_s24 = scalar_lea.sflag [#allocation27], %s9502_s23  ;;  %s10916_s0 = int_to_ptr.vmem [resolvable:$true] %s6606_s0 }
0x1a3b   : > { %s8801_s7 = scalar_lea.vmem %s10916_s0, 128  ;;  %s8944_s5 = smov [#allocation26]  }
0x1a3c   : > { %p8802_p8 = scmp.ne.s32.totalorder %s10916_s0, %s8801_s7  ;;  %s8805_s4 = sshll.u32 %s8944_s5, 4  ;;  %s8806_s4 = int_to_ptr.vmem [resolvable:$false] %s8805_s4 }
0x1a3d   : > { %s8807_s1 = scalar_lea.vmem %s8806_s4, 256  ;;  %p8808_p12 = scmp.lt.s32.totalorder %s10916_s0, %s8806_s4 }
0x1a3e   : > { %p8803_p7 = pnand %p8802_p8, %p11087_p11  ;;  %p8809_p0 = scmp.lt.s32.totalorder %s8807_s1, %s8801_s7 }
0x1a3f   : > { %s11089_s14 = smov %s11088_s20  ;;  %s10914_s16 = scalar_lea.hbm %s11088_s20, %s7091_s22 }
0x1a40   : > { %p8804_p9 = pneg %p8803_p7  ;;  %p8810_p3 = por %p8809_p0, %p8808_p12 }
0x1a42   : > { %p8811_p5 = pnand %p8810_p3, %p8804_p9 }
0x1a71   : > { %v6562_v49 = vpop.f32.mrb[176].mxu0 }
0x1a72   : > { %v6563_v56 = vadd.f32 %v7083_v58, %v6562_v49  ;;  %v7883_v61 = vpop.f32.mrb[177].mxu0 }
0x1a73   : > { %v6565_v42 = vpop.f32.mrb[178].mxu0 }
0x1a74   : > { %v7884_v24 = vpop.f32.mrb[179].mxu0  ;;  %6570 = vst.msk [vmem:[%s815_s27] sm:$0xff] %vm2021_vm8, %v6563_v56 }
0x1a75   : > { %8814 = shalt.err (!%p8811_p5)
}
0x1a76   : > { %s8815_s23 = scalar_lea.hbm %s10914_s16, 128  ;;  %s8819_s26 = scalar_lea.hbm %s11089_s14, 256 }
0x1a77   : > { %p8816_p4 = scmp.ne.s32.totalorder %s10914_s16, %s8815_s23  ;;  %p8820_p10 = scmp.lt.u32.totalorder %s10914_s16, %s11089_s14 }
0x1a78   : > { %p8821_p2 = scmp.lt.u32.totalorder %s8819_s26, %s8815_s23  ;;  %p8823_p8 = scmp.lt.u32.totalorder %s8815_s23, %s10914_s16 }
0x1a79   : > { %p8817_p13 = pnand %p8816_p4, %p11087_p11 }
0x1a7a   : > { %p8822_p1 = por %p8821_p2, %p8820_p10 }
0x1a7b   : > { %p8818_p6 = pneg %p8817_p13 }
0x1a7c   : > { %p8824_p7 = por %p8823_p8, %p8822_p1 }
0x1a7e   : > { %p8825_p9 = pnand %p8824_p7, %p8818_p6 }
0x1a80   : > { %8828 = shalt.err (!%p8825_p9)
}
0x1a81   : > { %7930 = dma.vmem_to_hbm [thread:$0]  (%p11087_p11), %s10916_s0, 128, %s10914_s16, %s6577_s24  }
0x1a82 PF: > { %s11090_s27 = sld [smem:[#allocation43_spill]]  ;;  %s6618_s17 = sand.u32 1, %s8891_s18  }
0x1a83   : > { %p11092_p0 = scmp.ge.s32.totalorder %s8903_s21, 2  ;;  %s6619_s3 = scalar_lea.sflag [#allocation4], %s6618_s17 }
0x1a88   : > { %p11091_p12 = scmp.ne.s32.totalorder %s11090_s27, 0 }
0x1a8a   : > { %p7978_p3 = pnand %p11092_p0, %p11091_p12 }
0x1a8c   : > { %8882 = dma.done.wait (!%p7978_p3), %s6619_s3, 256  }
0x1a8d   : > { %8884 = vsyncadd (!%p7978_p3), %s6619_s3, 4294967040  ;;  %s6628_s20 = scalar_lea.sflag [#allocation27], %s6618_s17 }
0x1a8e   : > { %8886 = dma.done.wait (!%p7978_p3), %s6628_s20, 128  }
0x1a8f   : > { %8888 = vsyncadd (!%p7978_p3), %s6628_s20, 4294967168  ;;  %s11093_s21 = sld [smem:[#allocation41_spill]]  ;;  %s11094_s30 = sld [smem:[#allocation39_spill]] }
0x1a90   : > { %s11095_s20 = sld [smem:[#allocation42_spill]]  ;;  %s11096_s18 = smov %s8895_s19 }
0x1a95   : > { %p45_p11 = scmp.ge.s32.totalorder %s11093_s21, 4   ;;  %s11097_s19 = smov %s11094_s30 }
0x1a97   :  { %47 = sbr.rel (!%p45_p11) target bundleno = 30 (0x1e), region = 267 }
0x1a9e   :  { %6633 = vsyncpa [#allocation3], 1 }
0x1a9f   :  { %6635 = vsyncpa [#allocation3 + $0x1], 1 }
0x1aa0   :  { %6636 = vsyncpa [#allocation6], 1 }
0x1aa1   :  { %6638 = vsyncpa [#allocation6 + $0x1], 1 }
0x1aa2   :  { %6639 = vsyncpa [#allocation9], 1 }
0x1aa3   :  { %6641 = vsyncpa [#allocation9 + $0x1], 1 }
0x1aa4   :  { %6642 = vsyncpa [#allocation12], 1 }
0x1aa5   :  { %6644 = vsyncpa [#allocation12 + $0x1], 1 }
0x1aa6   :  { %6645 = vsyncpa [#allocation15], 1 }
0x1aa7   :  { %6646 = vsyncpa [#allocation18], 1 }
0x1aa8   :  { %6647 = vsyncpa [#allocation21], 1 }
0x1aa9   :  { %6648 = vsyncpa [#allocation24], 1 }
0x1aaa   :  { %6649 = vsyncpa [#allocation4], 1 }
0x1aab   :  { %6651 = vsyncpa [#allocation4 + $0x1], 1 }
0x1aac   :  { %6652 = vsyncpa [#allocation27], 1 }
0x1aad   :  { %6654 = vsyncpa [#allocation27 + $0x1], 1 }

</bundles_post_ra>
